<compile_context>
chip_gen: v7x
topology: tpu7x:2x2x1
jax: 0.10.0
libtpu: 0.0.40
codegen_flags: <defaults>
</compile_context>

<pallas_src>
import functools

import jax
import jax.numpy as jnp
from jax import lax
from jax.experimental import pallas as pl
from jax.experimental.pallas import tpu as pltpu


def _sigmoid(x):
    return 1.0 / (1.0 + jnp.exp(-x))


# ----------------------------------------------------------------------------
# Fused MLP kernel: layer-1 matmul tiled over K, layers 2-4 + sigmoids fused
# into the epilogue of the last reduction step.
# ----------------------------------------------------------------------------
def _fc_rotcenter_kernel(x_ref, w1_ref, b1_ref, w2_ref, b2_ref,
                         w3_ref, b3_ref, w4_ref, b4_ref, o_ref, acc_ref):
    k = pl.program_id(0)

    @pl.when(k == 0)
    def _():
        acc_ref[...] = jnp.zeros_like(acc_ref)

    # Layer-1 partial product for this K tile (bf16 inputs, f32 accumulate).
    acc_ref[...] += jnp.dot(x_ref[...], w1_ref[...],
                            preferred_element_type=jnp.float32)

    @pl.when(k == pl.num_programs(0) - 1)
    def _():
        # Layers 2-4 fused into the last reduction step.  Small dots in bf16
        # (f32 accumulation); bias + sigmoid kept in f32.
        h = _sigmoid(acc_ref[...] + b1_ref[...])                       # (B,512)
        h = _sigmoid(jnp.dot(h.astype(jnp.bfloat16), w2_ref[...],
                             preferred_element_type=jnp.float32) + b2_ref[...])
        h = _sigmoid(jnp.dot(h.astype(jnp.bfloat16), w3_ref[...],
                             preferred_element_type=jnp.float32) + b3_ref[...])
        h = _sigmoid(jnp.dot(h.astype(jnp.bfloat16), w4_ref[...],
                             preferred_element_type=jnp.float32) + b4_ref[...])
        o_ref[...] = h.astype(o_ref.dtype)


# ----------------------------------------------------------------------------
# One-time weight preparation (perf fix #1 from the review).
# ----------------------------------------------------------------------------
def prepare_fc_rotcenter_params(params):
    """Cast weights ONCE.  Do not call this per forward pass.

    Casting the 20736x512 W1 (42.5 MB f32 -> 21.2 MB bf16) on every call
    costs ~3x the kernel's own HBM traffic; keep the bf16 copy around.
    """
    return {
        "w1": params["w1"].astype(jnp.bfloat16),
        "b1": params["b1"].reshape(1, -1).astype(jnp.float32),
        "w2": params["w2"].astype(jnp.bfloat16),
        "b2": params["b2"].reshape(1, -1).astype(jnp.float32),
        "w3": params["w3"].astype(jnp.bfloat16),
        "b3": params["b3"].reshape(1, -1).astype(jnp.float32),
        "w4": params["w4"].astype(jnp.bfloat16),
        "b4": params["b4"].reshape(1, -1).astype(jnp.float32),
    }


def _default_k_tile():
    # K = 20736.  Bigger K tiles amortize the ~0.35us/step pipeline overhead;
    # v6e/v7x have fast HBM + plenty of VMEM -> 2 steps, otherwise 3 steps.
    try:
        kind = jax.devices()[0].device_kind.lower()
    except Exception:
        kind = ""
    if "v6" in kind or "v7" in kind:
        return 10368          # 2 K steps, ~21 MB double-buffered W1
    return 6912               # 3 K steps, ~14 MB double-buffered W1


@functools.partial(jax.jit, static_argnums=(2,))
def _fc_rotcenter_impl(x, p, k_tile):
    B, K = x.shape
    # No-op casts on the prepared path; fallback cast (fused into this jit,
    # not a separate eager HBM pass) if raw f32 params are passed.
    w1 = p["w1"].astype(jnp.bfloat16)
    w2 = p["w2"].astype(jnp.bfloat16)
    w3 = p["w3"].astype(jnp.bfloat16)
    w4 = p["w4"].astype(jnp.bfloat16)
    b1 = p["b1"].reshape(1, -1).astype(jnp.float32)
    b2 = p["b2"].reshape(1, -1).astype(jnp.float32)
    b3 = p["b3"].reshape(1, -1).astype(jnp.float32)
    b4 = p["b4"].reshape(1, -1).astype(jnp.float32)

    H1, H2, H3, C = w1.shape[1], w2.shape[1], w3.shape[1], w4.shape[1]
    assert K % k_tile == 0 and k_tile % 128 == 0, (K, k_tile)
    n_k = K // k_tile

    # Pad batch to a multiple of 8 sublanes (unmasked tiles); sliced off below.
    Bp = max(8, ((B + 7) // 8) * 8)
    xp = jnp.zeros((Bp, K), jnp.bfloat16).at[:B].set(x.astype(jnp.bfloat16))

    # Deeper buffering of the W1 stream only pays with many reduction steps
    # (strictly inferior to simply using bigger tiles, which is the default).
    if n_k >= 4:
        w1_spec = pl.BlockSpec((k_tile, H1), lambda k: (k, 0),
                               pipeline_mode=pl.Buffered(3))
    else:
        w1_spec = pl.BlockSpec((k_tile, H1), lambda k: (k, 0))

    flops = 2 * Bp * (K * H1 + H1 * H2 + H2 * H3 + H3 * C)
    bytes_accessed = (w1.size * 2 + (w2.size + w3.size + w4.size) * 2
                      + xp.size * 2 + Bp * C * 4 + (H1 + H2 + H3 + C) * 4)

    out = pl.pallas_call(
        _fc_rotcenter_kernel,
        out_shape=jax.ShapeDtypeStruct((Bp, C), jnp.float32),
        grid_spec=pltpu.PrefetchScalarGridSpec(
            num_scalar_prefetch=0,
            grid=(n_k,),                                        # K reduction
            in_specs=[
                pl.BlockSpec((Bp, k_tile), lambda k: (0, k)),   # x tile
                w1_spec,                                        # W1 tile
                pl.BlockSpec((1, H1), lambda k: (0, 0)),        # b1 (resident)
                pl.BlockSpec((H1, H2), lambda k: (0, 0)),       # W2 (resident)
                pl.BlockSpec((1, H2), lambda k: (0, 0)),        # b2
                pl.BlockSpec((H2, H3), lambda k: (0, 0)),       # W3
                pl.BlockSpec((1, H3), lambda k: (0, 0)),        # b3
                pl.BlockSpec((H3, C), lambda k: (0, 0)),        # W4
                pl.BlockSpec((1, C), lambda k: (0, 0)),         # b4
            ],
            out_specs=pl.BlockSpec((Bp, C), lambda k: (0, 0)),
            scratch_shapes=[pltpu.VMEM((Bp, H1), jnp.float32)],  # layer-1 acc
        ),
        compiler_params=pltpu.CompilerParams(
            dimension_semantics=("arbitrary",),
            # Double-buffered 6.75-10.1 MiB W1 tiles exceed v5e's 16 MiB
            # default scoped VMEM; 32 MiB is safe on v5e/v6e/v7x.
            vmem_limit_bytes=32 * 1024 * 1024),
        cost_estimate=pl.CostEstimate(
            flops=flops,
            transcendentals=Bp * (H1 + H2 + H3 + C),
            bytes_accessed=bytes_accessed),
    )(xp, w1, b1, w2, b2, w3, b3, w4, b4)
    return out[:B]


def fc_rotcenter(x, params, *, k_tile=None):
    """y = sigmoid(L4(sigmoid(L3(sigmoid(L2(sigmoid(L1(x)))))))).

    `params` should come from prepare_fc_rotcenter_params() (bf16 weights).
    """
    if k_tile is None:
        k_tile = _default_k_tile()
    return _fc_rotcenter_impl(x, params, k_tile)


# ----------------------------------------------------------------------------
# Pure-JAX reference (f32)
# ----------------------------------------------------------------------------
def fc_rotcenter_ref(x, params):
    h = x
    for i in (1, 2, 3, 4):
        h = jnp.dot(h, params[f"w{i}"],
                    precision=lax.Precision.HIGHEST) + params[f"b{i}"]
        h = jax.nn.sigmoid(h)
    return h


if __name__ == "__main__":
    key = jax.random.PRNGKey(0)

    B = 2
    num_classes = 2
    K = 64 * 18 * 18                      # 20736, fixed by the module
    dims = [K, 512, 128, 32, num_classes]

    key, kx = jax.random.split(key)
    x = jax.random.normal(kx, (B, K), jnp.float32)

    params = {}
    for i in range(4):
        fan_in, fan_out = dims[i], dims[i + 1]
        key, kw, kb = jax.random.split(key, 3)
        params[f"w{i+1}"] = (jax.random.normal(kw, (fan_in, fan_out), jnp.float32)
                             / jnp.sqrt(float(fan_in)))
        params[f"b{i+1}"] = 0.1 * jax.random.normal(kb, (fan_out,), jnp.float32)

    # One-time weight prep (bf16 W1 etc.) -- NOT per call.
    prepped = jax.block_until_ready(prepare_fc_rotcenter_params(params))

    y = jax.block_until_ready(fc_rotcenter(x, prepped))
    ref = jax.block_until_ready(fc_rotcenter_ref(x, params))

    assert y.shape == (B, num_classes), (y.shape, (B, num_classes))

    err = float(jnp.max(jnp.abs(y - ref)))
    denom = float(jnp.max(jnp.abs(ref))) + 1.0
    assert err / denom < 1e-2, f"mismatch: max abs err {err}"

    print("KERNEL_OK")
</pallas_src>

<mosaic_0001>
module attributes {stable_mosaic.version = 11 : i64} {
  func.func @_fc_rotcenter_kernel(%arg0: i32, %arg1: memref<8x6912xbf16, #tpu.memory_space<vmem>>, %arg2: memref<6912x512xbf16, #tpu.memory_space<vmem>>, %arg3: memref<1x512xf32, #tpu.memory_space<vmem>>, %arg4: memref<512x128xbf16, #tpu.memory_space<vmem>>, %arg5: memref<1x128xf32, #tpu.memory_space<vmem>>, %arg6: memref<128x32xbf16, #tpu.memory_space<vmem>>, %arg7: memref<1x32xf32, #tpu.memory_space<vmem>>, %arg8: memref<32x2xbf16, #tpu.memory_space<vmem>>, %arg9: memref<1x2xf32, #tpu.memory_space<vmem>>, %arg10: memref<8x2xf32, #tpu.memory_space<vmem>>, %arg11: memref<8x512xf32, #tpu.memory_space<vmem>>) attributes {dimension_semantics = [#tpu.dimension_semantics<arbitrary>], iteration_bounds = array<i64: 3>, scalar_prefetch = 0 : i64, scratch_operands = 1 : i64, tpu.core_type = #tpu.core_type<tc>, window_params = [{transform_indices = @transform_0, window_bounds = array<i64: 8, 6912>}, {transform_indices = @transform_1, window_bounds = array<i64: 6912, 512>}, {pipeline_mode = #tpu.pipeline_mode<synchronous>, transform_indices = @transform_2, window_bounds = array<i64: 1, 512>}, {pipeline_mode = #tpu.pipeline_mode<synchronous>, transform_indices = @transform_3, window_bounds = array<i64: 512, 128>}, {pipeline_mode = #tpu.pipeline_mode<synchronous>, transform_indices = @transform_4, window_bounds = array<i64: 1, 128>}, {pipeline_mode = #tpu.pipeline_mode<synchronous>, transform_indices = @transform_5, window_bounds = array<i64: 128, 32>}, {pipeline_mode = #tpu.pipeline_mode<synchronous>, transform_indices = @transform_6, window_bounds = array<i64: 1, 32>}, {pipeline_mode = #tpu.pipeline_mode<synchronous>, transform_indices = @transform_7, window_bounds = array<i64: 32, 2>}, {pipeline_mode = #tpu.pipeline_mode<synchronous>, transform_indices = @transform_8, window_bounds = array<i64: 1, 2>}, {pipeline_mode = #tpu.pipeline_mode<synchronous>, transform_indices = @transform_9, window_bounds = array<i64: 8, 2>}]} {
    %c0_i32 = arith.constant 0 : i32
    %0 = arith.cmpi eq, %arg0, %c0_i32 : i32
    %1 = arith.extui %0 : i1 to i32
    %c0_i32_0 = arith.constant 0 : i32
    %2 = arith.cmpi ne, %1, %c0_i32_0 : i32
    scf.if %2 {
      %cst_9 = arith.constant 0.000000e+00 : f32
      %12 = vector.broadcast %cst_9 : f32 to vector<8x512xf32>
      %c0_10 = arith.constant 0 : index
      %c0_11 = arith.constant 0 : index
      %13 = vector.load %arg11[%c0_10, %c0_11] : memref<8x512xf32, #tpu.memory_space<vmem>>, vector<8x512xf32>
      tpu.vector_store %arg11[%c0_10, %c0_11], %12 {strides = array<i32>} : memref<8x512xf32, #tpu.memory_space<vmem>>, vector<8x512xf32>,
    } else {
    }
    %c0 = arith.constant 0 : index
    %c0_1 = arith.constant 0 : index
    %3 = vector.load %arg11[%c0, %c0_1] : memref<8x512xf32, #tpu.memory_space<vmem>>, vector<8x512xf32>
    %c0_2 = arith.constant 0 : index
    %c0_3 = arith.constant 0 : index
    %4 = vector.load %arg1[%c0_2, %c0_3] : memref<8x6912xbf16, #tpu.memory_space<vmem>>, vector<8x6912xbf16>
    %c0_4 = arith.constant 0 : index
    %c0_5 = arith.constant 0 : index
    %5 = vector.load %arg2[%c0_4, %c0_5] : memref<6912x512xbf16, #tpu.memory_space<vmem>>, vector<6912x512xbf16>
    %cst = arith.constant dense<0.000000e+00> : vector<8x512xf32>
    %6 = tpu.matmul %4, %5, %cst {dimension_numbers = #tpu.dot_dimension_numbers<[1], [0], [0], [1], [0, 0, 1, 1], [], []>} : vector<8x6912xbf16>, vector<6912x512xbf16>, vector<8x512xf32> -> vector<8x512xf32>
    %7 = arith.addf %3, %6 : vector<8x512xf32>
    %c0_6 = arith.constant 0 : index
    %c0_7 = arith.constant 0 : index
    %8 = vector.load %arg11[%c0_6, %c0_7] : memref<8x512xf32, #tpu.memory_space<vmem>>, vector<8x512xf32>
    tpu.vector_store %arg11[%c0_6, %c0_7], %7 {strides = array<i32>} : memref<8x512xf32, #tpu.memory_space<vmem>>, vector<8x512xf32>,
    %c2_i32 = arith.constant 2 : i32
    %9 = arith.cmpi eq, %arg0, %c2_i32 : i32
    %10 = arith.extui %9 : i1 to i32
    %c0_i32_8 = arith.constant 0 : i32
    %11 = arith.cmpi ne, %10, %c0_i32_8 : i32
    scf.if %11 {
      %c0_9 = arith.constant 0 : index
      %c0_10 = arith.constant 0 : index
      %12 = vector.load %arg11[%c0_9, %c0_10] : memref<8x512xf32, #tpu.memory_space<vmem>>, vector<8x512xf32>
      %c0_11 = arith.constant 0 : index
      %c0_12 = arith.constant 0 : index
      %13 = vector.load %arg3[%c0_11, %c0_12] : memref<1x512xf32, #tpu.memory_space<vmem>>, vector<1x512xf32>
      %14 = vector.broadcast %13 : vector<1x512xf32> to vector<8x512xf32>
      %15 = arith.addf %12, %14 : vector<8x512xf32>
      %cst_13 = arith.constant 0.000000e+00 : f32
      %16 = vector.broadcast %cst_13 : f32 to vector<8x512xf32>
      %17 = arith.subf %16, %15 : vector<8x512xf32>
      %18 = math.exp %17 : vector<8x512xf32>
      %cst_14 = arith.constant 1.000000e+00 : f32
      %19 = vector.broadcast %cst_14 : f32 to vector<8x512xf32>
      %20 = arith.addf %19, %18 : vector<8x512xf32>
      %cst_15 = arith.constant 1.000000e+00 : f32
      %21 = vector.broadcast %cst_15 : f32 to vector<8x512xf32>
      %22 = arith.divf %21, %20 : vector<8x512xf32>
      %23 = arith.truncf %22 : vector<8x512xf32> to vector<8x512xbf16>
      %c0_16 = arith.constant 0 : index
      %c0_17 = arith.constant 0 : index
      %24 = vector.load %arg4[%c0_16, %c0_17] : memref<512x128xbf16, #tpu.memory_space<vmem>>, vector<512x128xbf16>
      %cst_18 = arith.constant dense<0.000000e+00> : vector<8x128xf32>
      %25 = tpu.matmul %23, %24, %cst_18 {dimension_numbers = #tpu.dot_dimension_numbers<[1], [0], [0], [1], [0, 0, 1, 1], [], []>} : vector<8x512xbf16>, vector<512x128xbf16>, vector<8x128xf32> -> vector<8x128xf32>
      %c0_19 = arith.constant 0 : index
      %c0_20 = arith.constant 0 : index
      %26 = vector.load %arg5[%c0_19, %c0_20] : memref<1x128xf32, #tpu.memory_space<vmem>>, vector<1x128xf32>
      %27 = vector.broadcast %26 : vector<1x128xf32> to vector<8x128xf32>
      %28 = arith.addf %25, %27 : vector<8x128xf32>
      %cst_21 = arith.constant 0.000000e+00 : f32
      %29 = vector.broadcast %cst_21 : f32 to vector<8x128xf32>
      %30 = arith.subf %29, %28 : vector<8x128xf32>
      %31 = math.exp %30 : vector<8x128xf32>
      %cst_22 = arith.constant 1.000000e+00 : f32
      %32 = vector.broadcast %cst_22 : f32 to vector<8x128xf32>
      %33 = arith.addf %32, %31 : vector<8x128xf32>
      %cst_23 = arith.constant 1.000000e+00 : f32
      %34 = vector.broadcast %cst_23 : f32 to vector<8x128xf32>
      %35 = arith.divf %34, %33 : vector<8x128xf32>
      %36 = arith.truncf %35 : vector<8x128xf32> to vector<8x128xbf16>
      %c0_24 = arith.constant 0 : index
      %c0_25 = arith.constant 0 : index
      %37 = vector.load %arg6[%c0_24, %c0_25] : memref<128x32xbf16, #tpu.memory_space<vmem>>, vector<128x32xbf16>
      %cst_26 = arith.constant dense<0.000000e+00> : vector<8x32xf32>
      %38 = tpu.matmul %36, %37, %cst_26 {dimension_numbers = #tpu.dot_dimension_numbers<[1], [0], [0], [1], [0, 0, 1, 1], [], []>} : vector<8x128xbf16>, vector<128x32xbf16>, vector<8x32xf32> -> vector<8x32xf32>
      %c0_27 = arith.constant 0 : index
      %c0_28 = arith.constant 0 : index
      %39 = vector.load %arg7[%c0_27, %c0_28] : memref<1x32xf32, #tpu.memory_space<vmem>>, vector<1x32xf32>
      %40 = vector.broadcast %39 : vector<1x32xf32> to vector<8x32xf32>
      %41 = arith.addf %38, %40 : vector<8x32xf32>
      %cst_29 = arith.constant 0.000000e+00 : f32
      %42 = vector.broadcast %cst_29 : f32 to vector<8x32xf32>
      %43 = arith.subf %42, %41 : vector<8x32xf32>
      %44 = math.exp %43 : vector<8x32xf32>
      %cst_30 = arith.constant 1.000000e+00 : f32
      %45 = vector.broadcast %cst_30 : f32 to vector<8x32xf32>
      %46 = arith.addf %45, %44 : vector<8x32xf32>
      %cst_31 = arith.constant 1.000000e+00 : f32
      %47 = vector.broadcast %cst_31 : f32 to vector<8x32xf32>
      %48 = arith.divf %47, %46 : vector<8x32xf32>
      %49 = arith.truncf %48 : vector<8x32xf32> to vector<8x32xbf16>
      %c0_32 = arith.constant 0 : index
      %c0_33 = arith.constant 0 : index
      %50 = vector.load %arg8[%c0_32, %c0_33] : memref<32x2xbf16, #tpu.memory_space<vmem>>, vector<32x2xbf16>
      %cst_34 = arith.constant dense<0.000000e+00> : vector<8x2xf32>
      %51 = tpu.matmul %49, %50, %cst_34 {dimension_numbers = #tpu.dot_dimension_numbers<[1], [0], [0], [1], [0, 0, 1, 1], [], []>} : vector<8x32xbf16>, vector<32x2xbf16>, vector<8x2xf32> -> vector<8x2xf32>
      %c0_35 = arith.constant 0 : index
      %c0_36 = arith.constant 0 : index
      %52 = vector.load %arg9[%c0_35, %c0_36] : memref<1x2xf32, #tpu.memory_space<vmem>>, vector<1x2xf32>
      %53 = vector.broadcast %52 : vector<1x2xf32> to vector<8x2xf32>
      %54 = arith.addf %51, %53 : vector<8x2xf32>
      %cst_37 = arith.constant 0.000000e+00 : f32
      %55 = vector.broadcast %cst_37 : f32 to vector<8x2xf32>
      %56 = arith.subf %55, %54 : vector<8x2xf32>
      %57 = math.exp %56 : vector<8x2xf32>
      %cst_38 = arith.constant 1.000000e+00 : f32
      %58 = vector.broadcast %cst_38 : f32 to vector<8x2xf32>
      %59 = arith.addf %58, %57 : vector<8x2xf32>
      %cst_39 = arith.constant 1.000000e+00 : f32
      %60 = vector.broadcast %cst_39 : f32 to vector<8x2xf32>
      %61 = arith.divf %60, %59 : vector<8x2xf32>
      %c0_40 = arith.constant 0 : index
      %c0_41 = arith.constant 0 : index
      %62 = vector.load %arg10[%c0_40, %c0_41] : memref<8x2xf32, #tpu.memory_space<vmem>>, vector<8x2xf32>
      tpu.vector_store %arg10[%c0_40, %c0_41], %61 {strides = array<i32>} : memref<8x2xf32, #tpu.memory_space<vmem>>, vector<8x2xf32>,
    } else {
    }
    return
  }
  func.func @transform_0(%arg0: i32) -> (i32, i32) {
    %c0_i32 = arith.constant 0 : i32
    %c0_i32_0 = arith.constant 0 : i32
    return %c0_i32, %arg0 : i32, i32
  }
  func.func @transform_1(%arg0: i32) -> (i32, i32) {
    %c0_i32 = arith.constant 0 : i32
    %c0_i32_0 = arith.constant 0 : i32
    return %arg0, %c0_i32 : i32, i32
  }
  func.func @transform_2(%arg0: i32) -> (i32, i32) {
    %c0_i32 = arith.constant 0 : i32
    %c0_i32_0 = arith.constant 0 : i32
    %c0_i32_1 = arith.constant 0 : i32
    return %c0_i32, %c0_i32_0 : i32, i32
  }
  func.func @transform_3(%arg0: i32) -> (i32, i32) {
    %c0_i32 = arith.constant 0 : i32
    %c0_i32_0 = arith.constant 0 : i32
    %c0_i32_1 = arith.constant 0 : i32
    return %c0_i32, %c0_i32_0 : i32, i32
  }
  func.func @transform_4(%arg0: i32) -> (i32, i32) {
    %c0_i32 = arith.constant 0 : i32
    %c0_i32_0 = arith.constant 0 : i32
    %c0_i32_1 = arith.constant 0 : i32
    return %c0_i32, %c0_i32_0 : i32, i32
  }
  func.func @transform_5(%arg0: i32) -> (i32, i32) {
    %c0_i32 = arith.constant 0 : i32
    %c0_i32_0 = arith.constant 0 : i32
    %c0_i32_1 = arith.constant 0 : i32
    return %c0_i32, %c0_i32_0 : i32, i32
  }
  func.func @transform_6(%arg0: i32) -> (i32, i32) {
    %c0_i32 = arith.constant 0 : i32
    %c0_i32_0 = arith.constant 0 : i32
    %c0_i32_1 = arith.constant 0 : i32
    return %c0_i32, %c0_i32_0 : i32, i32
  }
  func.func @transform_7(%arg0: i32) -> (i32, i32) {
    %c0_i32 = arith.constant 0 : i32
    %c0_i32_0 = arith.constant 0 : i32
    %c0_i32_1 = arith.constant 0 : i32
    return %c0_i32, %c0_i32_0 : i32, i32
  }
  func.func @transform_8(%arg0: i32) -> (i32, i32) {
    %c0_i32 = arith.constant 0 : i32
    %c0_i32_0 = arith.constant 0 : i32
    %c0_i32_1 = arith.constant 0 : i32
    return %c0_i32, %c0_i32_0 : i32, i32
  }
  func.func @transform_9(%arg0: i32) -> (i32, i32) {
    %c0_i32 = arith.constant 0 : i32
    %c0_i32_0 = arith.constant 0 : i32
    %c0_i32_1 = arith.constant 0 : i32
    return %c0_i32, %c0_i32_0 : i32, i32
  }
}

</mosaic_0001>

<bundles_post_ra>
// kernel: _fc_rotcenter_impl.1
= control target key start
LH: loop header
LB: loop body
LE: loop exit
PB: predicated region body
PF: predicated region fallthrough
CT: control target
= control target key end

     0   :  { %s21529_s0 = inlined_call_operand.vmem [shape: bf16[8,20736], index: 0, kind: input, shape index: {}]   ;;  %s21530_s1 = inlined_call_operand.hbm [shape: bf16[20736,512], index: 1, kind: input, shape index: {}]   ;;  %s21531_s2 = inlined_call_operand.hbm [shape: f32[1,512], index: 2, kind: input, shape index: {}]   ;;  %s21532_s3 = inlined_call_operand.hbm [shape: bf16[512,128], index: 3, kind: input, shape index: {}]   ;;  %s21533_s4 = inlined_call_operand.hbm [shape: f32[1,128], index: 4, kind: input, shape index: {}]   ;;  %s21534_s5 = inlined_call_operand.vmem [shape: bf16[128,32], index: 5, kind: input, shape index: {}]   ;;  %s21535_s6 = inlined_call_operand.hbm [shape: f32[1,32], index: 6, kind: input, shape index: {}]   ;;  %s21536_s7 = inlined_call_operand.vmem [shape: bf16[32,2], index: 7, kind: input, shape index: {}]   ;;  %s21537_s8 = inlined_call_operand.hbm [shape: f32[1,2], index: 8, kind: input, shape index: {}]   ;;  %s21538_s9 = inlined_call_operand.vmem [shape: f32[8,2], index: 9, kind: output, shape index: {}]  }
   0x1   :  { %21550 = sst [smem:[#allocation26_spill]] %s21531_s2 }
   0x2   :  { %21551 = sst [smem:[#allocation27_spill]] %s21533_s4 }
   0x3   :  { %21552 = sst [smem:[#allocation28_spill]] %s21538_s9 }
   0x4   :  { %14 = vsyncpa [#allocation4], 0 }
   0x5   :  { %16 = vsyncpa [#allocation4 + $0x1], 0 }
   0x6   :  { %17 = vsyncpa [#allocation6], 0 }
   0x7   :  { %18 = vsyncpa [#allocation9], 0 }
   0x8   :  { %19 = vsyncpa [#allocation12], 0  ;;  %s18982_s30 = smov 0   ;;  %s18984_s10 = smov 0  }
   0x9   :  { %s18986_s11 = smov 0   ;;  %s18988_s12 = smov 0  }
   0xa LB: > { %s18919_s13 = smov [#allocation5]   ;;  %s19003_s15 = sadd.s32 4294967295, %s18917_s12   ;;  %s18917_s12 = sphi %s18988_s12, %s21591_s12   ;;  %s18913_s11 = sphi %s18986_s11, %s21590_s11   ;;  %s18909_s10 = sphi %s18984_s10, %s21589_s10   ;;  %s18905_s30 = sphi %s18982_s30, %s21588_s30  }
   0xb   : > { %s263_s14 = sshll.u32 %s18919_s13, 4  ;;  %p13951_p0 = scmp.ge.s32.totalorder %s18917_s12, 1  ;;  %s264_s14 = int_to_ptr.vmem [resolvable:$true] %s263_s14 }
   0xc   : > { %p21539_p1 = scmp.eq.s32.totalorder %s19003_s15, 0  ;;  %p250_p2 = scmp.lt.s32.totalorder %s18917_s12, 4 }
   0xd   : > { %s18920_s17 = smov [#allocation8]   ;;  %s18921_s19 = smov [#allocation7]  }
   0xe   : > { %p19009_p4 = pnand %p13951_p0, %p250_p2  ;;  %s287_s18 = sshll.u32 %s18920_s17, 4  ;;  %s19015_s18 = int_to_ptr.vmem [resolvable:$true] %s287_s18 }
   0xf   : > { %s273_s20 = sshll.u32 %s18921_s19, 4  ;;  %s21555_s2 = sld [smem:[#allocation26_spill]]  ;;  %s19023_s20 = int_to_ptr.vmem [resolvable:$true] %s273_s20 }
  0x10   : > { %s21553_s16 = scalar_select %p19009_p4, 1, 0 }
  0x11   : > { %p15910_p5 = pneg %p19009_p4 }
  0x13   : > { %p19019_p6 = pnand %p15910_p5, %p21539_p1 }
  0x15   : > { %s18701_s24 = scalar_lea.hbm %s21555_s2, 64  ;;  %p19033_p8 = pneg %p19019_p6 }
  0x16   : > { %p18702_p7 = scmp.ne.s32.totalorder %s21555_s2, %s18701_s24  ;;  %p18708_p11 = scmp.lt.u32.totalorder %s18701_s24, %s21555_s2 }
  0x18   : > { %p18704_p9 = pnand %p19033_p8, %p18702_p7 }
  0x1a   : > { %p18705_p10 = pneg %p18704_p9 }
  0x1c   : > { %p18710_p12 = pnand %p18708_p11, %p18705_p10 }
  0x1e   : > { %18713 = shalt.err (!%p18710_p12)
}
  0x1f   : > { %s18714_s13 = scalar_lea.vmem %s264_s14, 64  ;;  %p18722_p5 = scmp.lt.s32.totalorder %s264_s14, %s264_s14 }
  0x20   : > { %p18715_p13 = scmp.ne.s32.totalorder %s264_s14, %s18714_s13  ;;  %p18723_p3 = scmp.lt.s32.totalorder %s18714_s13, %s18714_s13 }
  0x22   : > { %p18717_p0 = pnand %p18715_p13, %p19033_p8  ;;  %p18724_p1 = por %p18723_p3, %p18722_p5 }
  0x24   : > { %p18718_p2 = pneg %p18717_p0 }
  0x26   : > { %p18725_p4 = pnand %p18724_p1, %p18718_p2 }
  0x28   : > { %18728 = shalt.err (!%p18725_p4)
}
  0x29   : > { %15913 = dma.hbm_to_vmem [thread:$0]  (!%p19019_p6), %s21555_s2, 64, %s264_s14, [#allocation6]  }
  0x2a   : > { %s21557_s4 = sld [smem:[#allocation27_spill]] }
  0x30   : > { %s18729_s24 = scalar_lea.hbm %s21557_s4, 16 }
  0x31   : > { %p18730_p7 = scmp.ne.s32.totalorder %s21557_s4, %s18729_s24  ;;  %p18736_p1 = scmp.lt.u32.totalorder %s18729_s24, %s21557_s4 }
  0x33   : > { %p18732_p9 = pnand %p18730_p7, %p19033_p8 }
  0x35   : > { %p18733_p3 = pneg %p18732_p9 }
  0x37   : > { %p18738_p4 = pnand %p18736_p1, %p18733_p3 }
  0x39   : > { %18741 = shalt.err (!%p18738_p4)
}
  0x3a   : > { %s18742_s14 = scalar_lea.vmem %s19015_s18, 16  ;;  %s18749_s13 = scalar_lea.vmem %s19015_s18, 32 }
  0x3b   : > { %p18743_p10 = scmp.ne.s32.totalorder %s19015_s18, %s18742_s14  ;;  %p18750_p13 = scmp.lt.s32.totalorder %s19015_s18, %s19015_s18 }
  0x3c   : > { %p18751_p0 = scmp.lt.s32.totalorder %s18749_s13, %s18742_s14 }
  0x3d   : > { %p18745_p11 = pnand %p18743_p10, %p19033_p8 }
  0x3e   : > { %p18752_p2 = por %p18751_p0, %p18750_p13 }
  0x3f   : > { %p18746_p12 = pneg %p18745_p11 }
  0x41   : > { %p18753_p5 = pnand %p18752_p2, %p18746_p12 }
  0x43   : > { %18756 = shalt.err (!%p18753_p5)
}
  0x44   : > { %15919 = dma.hbm_to_vmem [thread:$0]  (!%p19019_p6), %s21557_s4, 16, %s19015_s18, [#allocation9]  }
  0x45   : > { %s18757_s24 = scalar_lea.hbm %s21532_s3, 4096 }
  0x46   : > { %p18758_p7 = scmp.ne.s32.totalorder %s21532_s3, %s18757_s24  ;;  %p18764_p1 = scmp.lt.u32.totalorder %s18757_s24, %s21532_s3 }
  0x48   : > { %p18760_p9 = pnand %p18758_p7, %p19033_p8 }
  0x4a   : > { %p18761_p3 = pneg %p18760_p9 }
  0x4c   : > { %p18766_p4 = pnand %p18764_p1, %p18761_p3 }
  0x4e   : > { %18769 = shalt.err (!%p18766_p4)
}
  0x4f   : > { %s18770_s18 = scalar_lea.vmem %s19023_s20, 4096  ;;  %p18778_p13 = scmp.lt.s32.totalorder %s19023_s20, %s19023_s20 }
  0x50   : > { %p18771_p10 = scmp.ne.s32.totalorder %s19023_s20, %s18770_s18  ;;  %p18779_p0 = scmp.lt.s32.totalorder %s18770_s18, %s18770_s18 }
  0x52   : > { %p18773_p11 = pnand %p18771_p10, %p19033_p8  ;;  %p18780_p2 = por %p18779_p0, %p18778_p13 }
  0x54   : > { %p18774_p12 = pneg %p18773_p11 }
  0x56   : > { %p18781_p5 = pnand %p18780_p2, %p18774_p12 }
  0x58   : > { %18784 = shalt.err (!%p18781_p5)
}
  0x59   : > { %s18922_s14 = smov 64   ;;  %s18923_s13 = smov 4  }
  0x5a   : > { %15916 = dma.hbm_to_vmem [thread:$0]  (!%p19019_p6), %s21532_s3, 4096, %s19023_s20, [#allocation6], %s18922_s14, %s18922_s14, %s18923_s13  }
  0x5b   : > { %s18924_s22 = smov [#allocation10]   ;;  %s18925_s24 = smov [#allocation11]  }
  0x5c   : > { %s301_s23 = sshll.u32 %s18924_s22, 4  ;;  %s315_s25 = sshll.u32 %s18925_s24, 4  ;;  %s302_s23 = int_to_ptr.vmem [resolvable:$true] %s301_s23  ;;  %s316_s25 = int_to_ptr.vmem [resolvable:$true] %s315_s25 }
  0x5d   : > { %s18785_s29 = scalar_lea.hbm %s21535_s6, 16 }
  0x5e   : > { %p18786_p7 = scmp.ne.s32.totalorder %s21535_s6, %s18785_s29  ;;  %p18792_p1 = scmp.lt.u32.totalorder %s18785_s29, %s21535_s6 }
  0x60   : > { %p18788_p9 = pnand %p18786_p7, %p19033_p8 }
  0x62   : > { %p18789_p3 = pneg %p18788_p9 }
  0x64   : > { %p18794_p4 = pnand %p18792_p1, %p18789_p3 }
  0x66   : > { %18797 = shalt.err (!%p18794_p4)
}
  0x67   : > { %s18798_s20 = scalar_lea.vmem %s302_s23, 16  ;;  %s18805_s14 = scalar_lea.vmem %s302_s23, 32 }
  0x68   : > { %p18799_p10 = scmp.ne.s32.totalorder %s302_s23, %s18798_s20  ;;  %p18806_p13 = scmp.lt.s32.totalorder %s302_s23, %s302_s23 }
  0x69   : > { %p18807_p0 = scmp.lt.s32.totalorder %s18805_s14, %s18798_s20 }
  0x6a   : > { %p18801_p11 = pnand %p18799_p10, %p19033_p8 }
  0x6b   : > { %p18808_p2 = por %p18807_p0, %p18806_p13 }
  0x6c   : > { %p18802_p12 = pneg %p18801_p11 }
  0x6e   : > { %p18809_p5 = pnand %p18808_p2, %p18802_p12 }
  0x70   : > { %18812 = shalt.err (!%p18809_p5)
}
  0x71   : > { %15922 = dma.hbm_to_vmem [thread:$0]  (!%p19019_p6), %s21535_s6, 16, %s302_s23, [#allocation9]  }
  0x72   : > { %s18813_s17 = scalar_lea.hbm %s21537_s8, 16 }
  0x73   : > { %p18814_p7 = scmp.ne.s32.totalorder %s21537_s8, %s18813_s17  ;;  %p18820_p1 = scmp.lt.u32.totalorder %s18813_s17, %s21537_s8 }
  0x75   : > { %p18816_p9 = pnand %p18814_p7, %p19033_p8 }
  0x77   : > { %p18817_p3 = pneg %p18816_p9 }
  0x79   : > { %p18822_p4 = pnand %p18820_p1, %p18817_p3 }
  0x7b   : > { %18825 = shalt.err (!%p18822_p4)
}
  0x7c   : > { %s18826_s28 = scalar_lea.vmem %s316_s25, 16  ;;  %s18833_s23 = scalar_lea.vmem %s316_s25, 32 }
  0x7d   : > { %p18827_p10 = scmp.ne.s32.totalorder %s316_s25, %s18826_s28  ;;  %p18834_p13 = scmp.lt.s32.totalorder %s316_s25, %s316_s25 }
  0x7e   : > { %p18835_p0 = scmp.lt.s32.totalorder %s18833_s23, %s18826_s28 }
  0x7f   : > { %p18829_p11 = pnand %p18827_p10, %p19033_p8 }
  0x80   : > { %p18836_p2 = por %p18835_p0, %p18834_p13 }
  0x81   : > { %p18830_p12 = pneg %p18829_p11 }
  0x83   : > { %p18837_p5 = pnand %p18836_p2, %p18830_p12 }
  0x85   : > { %18840 = shalt.err (!%p18837_p5)
}
  0x86   : > { %15925 = dma.hbm_to_vmem [thread:$0]  (!%p19019_p6), %s21537_s8, 16, %s316_s25, [#allocation12]  }
  0x87   : > { %s19133_s27 = sadd.s32 1, %s18917_s12   ;;  %s58_s20 = sadd.s32 1, %s18913_s11 }
  0x88   : > { %s55_s21 = ssub.s32 %s18917_s12, %s19133_s27  ;;  %p65_p7 = scmp.ne.s32.totalorder %s18913_s11, %s18909_s10 }
  0x89   : > { %p56_p8 = scmp.eq.s32.totalorder %s55_s21, 0  ;;  %p66_p9 = scmp.eq.s32.totalorder %s18917_s12, 0 }
  0x8a   : > { %p71_p3 = scmp.ne.s32.totalorder %s18909_s10, %s18905_s30  ;;  %p21558_p4 = scmp.eq.s32.totalorder %s19003_s15, 0 }
  0x8b   : > { %s19144_s14 = scalar_select %p56_p8, %s18913_s11, %s58_s20  }
  0x8c   : > { %p67_p1 = por %p66_p9, %p65_p7  ;;  %p19148_p10 = por %p21558_p4, %p71_p3 }
  0x8d   : > { %p15935_p11 = scmp.lt.s32.totalorder %s18917_s12, 3  ;;  %s335_s13 = sand.u32 1, %s18913_s11  }
  0x8e   : > { %s15886_s25 = smul.u32 13824, %s335_s13  ;;  %s18846_s29 = scalar_lea.hbm %s21530_s1, 663552 }
  0x8f   : > { %s15801_s4 = smul.u32 221184, %s18917_s12  ;;  %p19155_p6 = pnand %p15935_p11, %p67_p1 }
  0x90   : > { %s339_s22 = scalar_lea.vmem [#allocation3], %s15886_s25  ;;  %s19166_s12 = scalar_lea.sflag [#allocation4], %s335_s13 }
  0x91   : > { %s19162_s30 = scalar_lea.hbm %s21530_s1, %s15801_s4  ;;  %s347_s24 = sshll.u32 %s339_s22, 4  ;;  %s19164_s24 = int_to_ptr.vmem [resolvable:$true] %s347_s24 }
  0x92   : > { %s18841_s26 = scalar_lea.hbm %s19162_s30, 221184  ;;  %p18843_p13 = pneg %p19155_p6 }
  0x93   : > { %p18842_p12 = scmp.ne.s32.totalorder %s19162_s30, %s18841_s26  ;;  %p18847_p5 = scmp.lt.u32.totalorder %s19162_s30, %s21530_s1 }
  0x94   : > { %p18848_p8 = scmp.lt.u32.totalorder %s18846_s29, %s18841_s26  ;;  %p18850_p9 = scmp.lt.u32.totalorder %s18841_s26, %s19162_s30 }
  0x95   : > { %p18844_p0 = pnand %p18843_p13, %p18842_p12 }
  0x96   : > { %p18849_p7 = por %p18848_p8, %p18847_p5 }
  0x97   : > { %p18845_p2 = pneg %p18844_p0 }
  0x98   : > { %p18851_p3 = por %p18850_p9, %p18849_p7 }
  0x9a   : > { %p18852_p1 = pnand %p18851_p3, %p18845_p2 }
  0x9c   : > { %18855 = shalt.err (!%p18852_p1)
}
  0x9d   : > { %s18856_s20 = scalar_lea.vmem %s19164_s24, 221184  ;;  %s18926_s13 = smov [#allocation3]  }
  0x9e   : > { %p18857_p4 = scmp.ne.s32.totalorder %s19164_s24, %s18856_s20  ;;  %s18861_s25 = sshll.u32 %s18926_s13, 4  ;;  %s18862_s25 = int_to_ptr.vmem [resolvable:$false] %s18861_s25 }
  0x9f   : > { %s18863_s4 = scalar_lea.vmem %s18862_s25, 442368  ;;  %p18864_p0 = scmp.lt.s32.totalorder %s19164_s24, %s18862_s25 }
  0xa0   : > { %p18859_p11 = pnand %p18857_p4, %p18843_p13  ;;  %p18865_p5 = scmp.lt.s32.totalorder %s18863_s4, %s18856_s20 }
  0xa2   : > { %p18860_p12 = pneg %p18859_p11  ;;  %p18866_p8 = por %p18865_p5, %p18864_p0 }
  0xa4   : > { %p18867_p7 = pnand %p18866_p8, %p18860_p12 }
  0xa6   : > { %18870 = shalt.err (!%p18867_p7)
}
  0xa7   : > { %s18927_s17 = smov 256   ;;  %s18928_s19 = smov 16  }
  0xa8   : > { %15929 = dma.hbm_to_vmem [thread:$0]  (!%p19155_p6), %s19162_s30, 221184, %s19164_s24, %s19166_s12, %s18927_s17, %s18927_s17, %s18928_s19  }
  0xa9   : > { %p21561_p13 = scmp.ne.s32.totalorder %s21553_s16, 0 }
  0xab   : > { %359 = sbr.rel (%p21561_p13) target bundleno = 2926 (0xb6e), region = 56 }
  0xb2   : > { %s361_s22 = sand.u32 1, %s18909_s10  }
  0xb3   : > { %s15887_s26 = smul.u32 13824, %s361_s22  ;;  %s362_s28 = scalar_lea.sflag [#allocation4], %s361_s22 }
  0xb5   : > { %s19197_s23 = scalar_lea.vmem [#allocation3], %s15887_s26 }
  0xb6   : > { %18888 = dma.done.wait (%p19148_p10), %s362_s28, 221184  }
  0xb7   : > { %18890 = vsyncadd (%p19148_p10), %s362_s28, 4294746112  ;;  %p21562_p2 = scmp.eq.s32.totalorder %s19003_s15, 0 }
  0xb9   : > { %18892 = dma.done.wait (%p21562_p2), [#allocation6], 4160   ;;  %p21563_p6 = pmov %p21562_p2 }
  0xba   : > { %p21564_p9 = pmov %p21562_p2 }
  0xbb   : > { %18894 = vsyncadd (%p21563_p6), [#allocation6], 4294963136 }
  0xbc   : > { %18896 = dma.done.wait (%p21564_p9), [#allocation9], 32   ;;  %p21565_p3 = pmov %p21562_p2 }
  0xbd   : > { %p21566_p1 = pmov %p21562_p2 }
  0xbe   : > { %18898 = vsyncadd (%p21565_p3), [#allocation9], 4294967264 }
  0xbf   : > { %18900 = dma.done.wait (%p21566_p1), [#allocation12], 16   ;;  %p21567_p4 = pmov %p21566_p1 }
  0xc0   : > { %s420_s16 = smul.u32 54, %s19003_s15  ;;  %p21568_p11 = scmp.ne.s32.totalorder %s19003_s15, 0 }
  0xc1   : > { %18902 = vsyncadd (%p21567_p4), [#allocation12], 4294967280  ;;  %v18929_v0 = vmov (!%p21568_p11), 0.0  }
  0xc2   : > { %p421_p10 = scmp.lt.s32.totalorder %s420_s16, 161  ;;  %431 = sbr.rel (%p21568_p11) target bundleno = 201 (0xc9), region = 84  ;;  %432 = vst [vmem:[#allocation2] sm:$0xff] (!%p21568_p11), %v18929_v0  ;;  %433 = vst [vmem:[#allocation2 + $0x8] sm:$0xff] (!%p21568_p11), %v18929_v0 }
  0xc3   : > { %434 = vst [vmem:[#allocation2 + $0x10] sm:$0xff] (!%p21568_p11), %v18929_v0  ;;  %435 = vst [vmem:[#allocation2 + $0x18] sm:$0xff] (!%p21568_p11), %v18929_v0 }
  0xc4   : > { %s21593_s16 = smov (!%p421_p10, %s420_s16), 161 }
  0xc5   : > { %s13966_s2 = sshll.u32 %s21593_s16, 2 }
  0xc6   : > { %s19219_s24 = scalar_lea.vmem %s21529_s0, %s13966_s2 }
  0xc9 PF: > { %v15985_v1 = vld [vmem:[%s19197_s23 + $0x4] ss:$16 sps:$4 sm:$0xff]   ;;  %v15989_v3 = vld [vmem:[%s19197_s23] ss:$16 sps:$4 sm:$0xff]   ;;  %v441_v49 = vld [vmem:[%s19219_s24 + $0x8] sm:$0xff]  ;;  %p15750_p12 = scmp.ne.s32.totalorder %s19003_s15, 2 }
  0xca   : > { %v15987_v2 = vld [vmem:[%s19197_s23 + $0x204] ss:$16 sps:$4 sm:$0xff]   ;;  %11024 = vmatprep.subr.bf16.mxu0 %v15985_v1  ;;  %v15990_v4 = vld [vmem:[%s19197_s23 + $0x200] ss:$16 sps:$4 sm:$0xff]   ;;  %v19275_v52 = vcombine.high %v441_v49, %v441_v49  ;;  %vm18931_vm0 = vmmov (!%p15750_p12), 0   ;;  %vm13799_vm1 = vcmask (!%p15750_p12), 261120  }
  0xcb   : > { %11065 = vmatprep.subr.bf16.mxu1 %v15987_v2  ;;  %v15991_v5 = vld [vmem:[%s19197_s23 + $0x24] ss:$16 sps:$4 sm:$0xff]   ;;  %11025 = vmatpush1.bf16.msra.mxu0 %v15989_v3  ;;  %v15995_v7 = vld [vmem:[%s19197_s23 + $0x20] ss:$16 sps:$4 sm:$0xff]   ;;  %vm13849_vm2 = vcmask (!%p15750_p12), 15360   ;;  %s21587_s29 = sld [smem:[#allocation28_spill]] (!%p15750_p12) }
  0xcc   : > { %11066 = vmatpush1.bf16.msra.mxu1 %v15990_v4  ;;  %v15993_v6 = vld [vmem:[%s19197_s23 + $0x224] ss:$16 sps:$4 sm:$0xff]   ;;  %11026 = vmatprep.subr.bf16.mxu0 %v15991_v5  ;;  %v15996_v8 = vld [vmem:[%s19197_s23 + $0x220] ss:$16 sps:$4 sm:$0xff]  }
  0xcd   : > { %11067 = vmatprep.subr.bf16.mxu1 %v15993_v6  ;;  %v15997_v9 = vld [vmem:[%s19197_s23 + $0x44] ss:$16 sps:$4 sm:$0xff]   ;;  %v16001_v11 = vld [vmem:[%s19197_s23 + $0x40] ss:$16 sps:$4 sm:$0xff]   ;;  %11097 = vmatprep.mubr.bf16.mxu1 %v19275_v52 }
  0xce   : > { %v15999_v10 = vld [vmem:[%s19197_s23 + $0x244] ss:$16 sps:$4 sm:$0xff]   ;;  %v16002_v12 = vld [vmem:[%s19197_s23 + $0x240] ss:$16 sps:$4 sm:$0xff]  }
  0xcf   : > { %11027 = vmatpush1.bf16.msra.mxu0 %v15995_v7  ;;  %v16003_v13 = vld [vmem:[%s19197_s23 + $0x64] ss:$16 sps:$4 sm:$0xff]   ;;  %v16007_v15 = vld [vmem:[%s19197_s23 + $0x60] ss:$16 sps:$4 sm:$0xff]  }
  0xd0   : > { %11068 = vmatpush1.bf16.msra.mxu1 %v15996_v8  ;;  %11028 = vmatprep.subr.bf16.mxu0 %v15997_v9  ;;  %v16005_v14 = vld [vmem:[%s19197_s23 + $0x264] ss:$16 sps:$4 sm:$0xff]   ;;  %v16008_v16 = vld [vmem:[%s19197_s23 + $0x260] ss:$16 sps:$4 sm:$0xff]   ;;  %v19299_v8 = vcombine.low %v441_v49, %v441_v49 }
  0xd1   : > { %11069 = vmatprep.subr.bf16.mxu1 %v15999_v10  ;;  %v16009_v17 = vld [vmem:[%s19197_s23 + $0x84] ss:$16 sps:$4 sm:$0xff]   ;;  %v16013_v19 = vld [vmem:[%s19197_s23 + $0x80] ss:$16 sps:$4 sm:$0xff]  }
  0xd2   : > { %v16011_v18 = vld [vmem:[%s19197_s23 + $0x284] ss:$16 sps:$4 sm:$0xff]   ;;  %v16014_v20 = vld [vmem:[%s19197_s23 + $0x280] ss:$16 sps:$4 sm:$0xff]  }
  0xd3   : > { %11029 = vmatpush1.bf16.msra.mxu0 %v16001_v11  ;;  %v16015_v21 = vld [vmem:[%s19197_s23 + $0xa4] ss:$16 sps:$4 sm:$0xff]   ;;  %v16019_v23 = vld [vmem:[%s19197_s23 + $0xa0] ss:$16 sps:$4 sm:$0xff]  }
  0xd4   : > { %11070 = vmatpush1.bf16.msra.mxu1 %v16002_v12  ;;  %11030 = vmatprep.subr.bf16.mxu0 %v16003_v13  ;;  %v16017_v22 = vld [vmem:[%s19197_s23 + $0x2a4] ss:$16 sps:$4 sm:$0xff]   ;;  %v16020_v24 = vld [vmem:[%s19197_s23 + $0x2a0] ss:$16 sps:$4 sm:$0xff]  }
  0xd5   : > { %11071 = vmatprep.subr.bf16.mxu1 %v16005_v14  ;;  %v16021_v25 = vld [vmem:[%s19197_s23 + $0xc4] ss:$16 sps:$4 sm:$0xff]   ;;  %v16025_v27 = vld [vmem:[%s19197_s23 + $0xc0] ss:$16 sps:$4 sm:$0xff]  }
  0xd6   : > { %v16023_v26 = vld [vmem:[%s19197_s23 + $0x2c4] ss:$16 sps:$4 sm:$0xff]   ;;  %v16026_v28 = vld [vmem:[%s19197_s23 + $0x2c0] ss:$16 sps:$4 sm:$0xff]  }
  0xd7   : > { %11031 = vmatpush1.bf16.msra.mxu0 %v16007_v15  ;;  %v16027_v29 = vld [vmem:[%s19197_s23 + $0xe4] ss:$16 sps:$4 sm:$0xff]   ;;  %v16031_v31 = vld [vmem:[%s19197_s23 + $0xe0] ss:$16 sps:$4 sm:$0xff]  }
  0xd8   : > { %11072 = vmatpush1.bf16.msra.mxu1 %v16008_v16  ;;  %11032 = vmatprep.subr.bf16.mxu0 %v16009_v17  ;;  %v16029_v30 = vld [vmem:[%s19197_s23 + $0x2e4] ss:$16 sps:$4 sm:$0xff]   ;;  %v16032_v32 = vld [vmem:[%s19197_s23 + $0x2e0] ss:$16 sps:$4 sm:$0xff]  }
  0xd9   : > { %11073 = vmatprep.subr.bf16.mxu1 %v16011_v18  ;;  %v16033_v33 = vld [vmem:[%s19197_s23 + $0x104] ss:$16 sps:$4 sm:$0xff]   ;;  %v16037_v35 = vld [vmem:[%s19197_s23 + $0x100] ss:$16 sps:$4 sm:$0xff]  }
  0xda   : > { %v16035_v34 = vld [vmem:[%s19197_s23 + $0x304] ss:$16 sps:$4 sm:$0xff]   ;;  %v16038_v36 = vld [vmem:[%s19197_s23 + $0x300] ss:$16 sps:$4 sm:$0xff]  }
  0xdb   : > { %11033 = vmatpush1.bf16.msra.mxu0 %v16013_v19  ;;  %v16039_v37 = vld [vmem:[%s19197_s23 + $0x124] ss:$16 sps:$4 sm:$0xff]   ;;  %v16043_v39 = vld [vmem:[%s19197_s23 + $0x120] ss:$16 sps:$4 sm:$0xff]  }
  0xdc   : > { %11074 = vmatpush1.bf16.msra.mxu1 %v16014_v20  ;;  %11034 = vmatprep.subr.bf16.mxu0 %v16015_v21  ;;  %v16041_v38 = vld [vmem:[%s19197_s23 + $0x324] ss:$16 sps:$4 sm:$0xff]   ;;  %v16044_v40 = vld [vmem:[%s19197_s23 + $0x320] ss:$16 sps:$4 sm:$0xff]  }
  0xdd   : > { %11075 = vmatprep.subr.bf16.mxu1 %v16017_v22  ;;  %v16045_v41 = vld [vmem:[%s19197_s23 + $0x144] ss:$16 sps:$4 sm:$0xff]   ;;  %v16049_v43 = vld [vmem:[%s19197_s23 + $0x140] ss:$16 sps:$4 sm:$0xff]  }
  0xde   : > { %v16047_v42 = vld [vmem:[%s19197_s23 + $0x344] ss:$16 sps:$4 sm:$0xff]   ;;  %v16050_v44 = vld [vmem:[%s19197_s23 + $0x340] ss:$16 sps:$4 sm:$0xff]  }
  0xdf   : > { %11035 = vmatpush1.bf16.msra.mxu0 %v16019_v23  ;;  %v16051_v45 = vld [vmem:[%s19197_s23 + $0x164] ss:$16 sps:$4 sm:$0xff]   ;;  %v16055_v50 = vld [vmem:[%s19197_s23 + $0x160] ss:$16 sps:$4 sm:$0xff]  }
  0xe0   : > { %11076 = vmatpush1.bf16.msra.mxu1 %v16020_v24  ;;  %11036 = vmatprep.subr.bf16.mxu0 %v16021_v25  ;;  %v16053_v46 = vld [vmem:[%s19197_s23 + $0x364] ss:$16 sps:$4 sm:$0xff]   ;;  %v16056_v51 = vld [vmem:[%s19197_s23 + $0x360] ss:$16 sps:$4 sm:$0xff]  }
  0xe1   : > { %11077 = vmatprep.subr.bf16.mxu1 %v16023_v26  ;;  %v440_v47 = vld [vmem:[%s19219_s24] sm:$0xff] }
  0xe2   : > { %v19270_v48 = vcombine.high %v440_v47, %v440_v47  ;;  %v16057_v53 = vld [vmem:[%s19197_s23 + $0x184] ss:$16 sps:$4 sm:$0xff]   ;;  %v16061_v55 = vld [vmem:[%s19197_s23 + $0x180] ss:$16 sps:$4 sm:$0xff]   ;;  %v19297_v7 = vcombine.low %v440_v47, %v440_v47 }
  0xe3   : > { %11037 = vmatpush1.bf16.msra.mxu0 %v16025_v27  ;;  %v16059_v54 = vld [vmem:[%s19197_s23 + $0x384] ss:$16 sps:$4 sm:$0xff]   ;;  %v16062_v56 = vld [vmem:[%s19197_s23 + $0x380] ss:$16 sps:$4 sm:$0xff]  }
  0xe4   : > { %11078 = vmatpush1.bf16.msra.mxu1 %v16026_v28  ;;  %11038 = vmatprep.subr.bf16.mxu0 %v16027_v29  ;;  %v16063_v57 = vld [vmem:[%s19197_s23 + $0x1a4] ss:$16 sps:$4 sm:$0xff]   ;;  %v16067_v59 = vld [vmem:[%s19197_s23 + $0x1a0] ss:$16 sps:$4 sm:$0xff]  }
  0xe5   : > { %11079 = vmatprep.subr.bf16.mxu1 %v16029_v30  ;;  %11056 = vmatprep.mubr.bf16.mxu0 %v19270_v48  ;;  %v16065_v58 = vld [vmem:[%s19197_s23 + $0x3a4] ss:$16 sps:$4 sm:$0xff]   ;;  %v16068_v60 = vld [vmem:[%s19197_s23 + $0x3a0] ss:$16 sps:$4 sm:$0xff]  }
  0xe6   : > { %v16069_v61 = vld [vmem:[%s19197_s23 + $0x1c4] ss:$16 sps:$4 sm:$0xff]   ;;  %v16073_v63 = vld [vmem:[%s19197_s23 + $0x1c0] ss:$16 sps:$4 sm:$0xff]  }
  0xe7   : > { %11039 = vmatpush1.bf16.msra.mxu0 %v16031_v31  ;;  %v16071_v62 = vld [vmem:[%s19197_s23 + $0x3c4] ss:$16 sps:$4 sm:$0xff]   ;;  %v16074_v0 = vld [vmem:[%s19197_s23 + $0x3c0] ss:$16 sps:$4 sm:$0xff]  }
  0xe8   : > { %11080 = vmatpush1.bf16.msra.mxu1 %v16032_v32  ;;  %11040 = vmatprep.subr.bf16.mxu0 %v16033_v33  ;;  %v16075_v1 = vld [vmem:[%s19197_s23 + $0x1e4] ss:$16 sps:$4 sm:$0xff]   ;;  %v16079_v3 = vld [vmem:[%s19197_s23 + $0x1e0] ss:$16 sps:$4 sm:$0xff]  }
  0xe9   : > { %11081 = vmatprep.subr.bf16.mxu1 %v16035_v34  ;;  %v16077_v2 = vld [vmem:[%s19197_s23 + $0x3e4] ss:$16 sps:$4 sm:$0xff]   ;;  %v16080_v4 = vld [vmem:[%s19197_s23 + $0x3e0] ss:$16 sps:$4 sm:$0xff]   ;;  %v19331_v34 = vld [vmem:[%s19219_s24 + $0x18] sm:$0xff] }
  0xea   : > { %v16087_v5 = vld [vmem:[%s19197_s23 + $0x404] ss:$16 sps:$4 sm:$0xff]   ;;  %v16085_v9 = vld [vmem:[%s19197_s23 + $0x400] ss:$16 sps:$4 sm:$0xff]  }
  0xeb   : > { %11041 = vmatpush1.bf16.msra.mxu0 %v16037_v35  ;;  %v16090_v6 = vld [vmem:[%s19197_s23 + $0x604] ss:$16 sps:$4 sm:$0xff]   ;;  %v16088_v10 = vld [vmem:[%s19197_s23 + $0x600] ss:$16 sps:$4 sm:$0xff]  }
  0xec   : > { %11082 = vmatpush1.bf16.msra.mxu1 %v16038_v36  ;;  %11042 = vmatprep.subr.bf16.mxu0 %v16039_v37  ;;  %v16093_v11 = vld [vmem:[%s19197_s23 + $0x424] ss:$16 sps:$4 sm:$0xff]   ;;  %v16091_v13 = vld [vmem:[%s19197_s23 + $0x420] ss:$16 sps:$4 sm:$0xff]  }
  0xed   : > { %11083 = vmatprep.subr.bf16.mxu1 %v16041_v38  ;;  %v16096_v12 = vld [vmem:[%s19197_s23 + $0x624] ss:$16 sps:$4 sm:$0xff]   ;;  %v16094_v14 = vld [vmem:[%s19197_s23 + $0x620] ss:$16 sps:$4 sm:$0xff]   ;;  %v19341_v38 = vcombine.high %v19331_v34, %v19331_v34 }
  0xee   : > { %v16099_v15 = vld [vmem:[%s19197_s23 + $0x444] ss:$16 sps:$4 sm:$0xff]   ;;  %v16097_v17 = vld [vmem:[%s19197_s23 + $0x440] ss:$16 sps:$4 sm:$0xff]  }
  0xef   : > { %11043 = vmatpush1.bf16.msra.mxu0 %v16043_v39  ;;  %v16102_v16 = vld [vmem:[%s19197_s23 + $0x644] ss:$16 sps:$4 sm:$0xff]   ;;  %v16100_v18 = vld [vmem:[%s19197_s23 + $0x640] ss:$16 sps:$4 sm:$0xff]  }
  0xf0   : > { %11084 = vmatpush1.bf16.msra.mxu1 %v16044_v40  ;;  %11044 = vmatprep.subr.bf16.mxu0 %v16045_v41  ;;  %v16105_v19 = vld [vmem:[%s19197_s23 + $0x464] ss:$16 sps:$4 sm:$0xff]   ;;  %v16103_v21 = vld [vmem:[%s19197_s23 + $0x460] ss:$16 sps:$4 sm:$0xff]  }
  0xf1   : > { %11085 = vmatprep.subr.bf16.mxu1 %v16047_v42  ;;  %v16108_v20 = vld [vmem:[%s19197_s23 + $0x664] ss:$16 sps:$4 sm:$0xff]   ;;  %v16106_v22 = vld [vmem:[%s19197_s23 + $0x660] ss:$16 sps:$4 sm:$0xff]  }
  0xf2   : > { %v16111_v23 = vld [vmem:[%s19197_s23 + $0x484] ss:$16 sps:$4 sm:$0xff]   ;;  %v16109_v25 = vld [vmem:[%s19197_s23 + $0x480] ss:$16 sps:$4 sm:$0xff]  }
  0xf3   : > { %11045 = vmatpush1.bf16.msra.mxu0 %v16049_v43  ;;  %v16114_v24 = vld [vmem:[%s19197_s23 + $0x684] ss:$16 sps:$4 sm:$0xff]   ;;  %v16112_v26 = vld [vmem:[%s19197_s23 + $0x680] ss:$16 sps:$4 sm:$0xff]  }
  0xf4   : > { %11086 = vmatpush1.bf16.msra.mxu1 %v16050_v44  ;;  %11046 = vmatprep.subr.bf16.mxu0 %v16051_v45  ;;  %v16117_v27 = vld [vmem:[%s19197_s23 + $0x4a4] ss:$16 sps:$4 sm:$0xff]   ;;  %v16115_v29 = vld [vmem:[%s19197_s23 + $0x4a0] ss:$16 sps:$4 sm:$0xff]  }
  0xf5   : > { %11087 = vmatprep.subr.bf16.mxu1 %v16053_v46  ;;  %v16120_v28 = vld [vmem:[%s19197_s23 + $0x6a4] ss:$16 sps:$4 sm:$0xff]   ;;  %v16118_v30 = vld [vmem:[%s19197_s23 + $0x6a0] ss:$16 sps:$4 sm:$0xff]  }
  0xf6   : > { %v16123_v31 = vld [vmem:[%s19197_s23 + $0x4c4] ss:$16 sps:$4 sm:$0xff]   ;;  %v16121_v35 = vld [vmem:[%s19197_s23 + $0x4c0] ss:$16 sps:$4 sm:$0xff]  }
  0xf7   : > { %11047 = vmatpush1.bf16.msra.mxu0 %v16055_v50  ;;  %v16126_v32 = vld [vmem:[%s19197_s23 + $0x6c4] ss:$16 sps:$4 sm:$0xff]   ;;  %v16124_v36 = vld [vmem:[%s19197_s23 + $0x6c0] ss:$16 sps:$4 sm:$0xff]  }
  0xf8   : > { %11088 = vmatpush1.bf16.msra.mxu1 %v16056_v51  ;;  %11048 = vmatprep.subr.bf16.mxu0 %v16057_v53  ;;  %v19328_v33 = vld [vmem:[%s19219_s24 + $0x10] sm:$0xff] }
  0xf9   : > { %11089 = vmatprep.subr.bf16.mxu1 %v16059_v54  ;;  %v19337_v37 = vcombine.high %v19328_v33, %v19328_v33  ;;  %v16129_v39 = vld [vmem:[%s19197_s23 + $0x4e4] ss:$16 sps:$4 sm:$0xff]   ;;  %v16127_v41 = vld [vmem:[%s19197_s23 + $0x4e0] ss:$16 sps:$4 sm:$0xff]  }
  0xfa   : > { %v16132_v40 = vld [vmem:[%s19197_s23 + $0x6e4] ss:$16 sps:$4 sm:$0xff]   ;;  %v16130_v42 = vld [vmem:[%s19197_s23 + $0x6e0] ss:$16 sps:$4 sm:$0xff]  }
  0xfb   : > { %11049 = vmatpush1.bf16.msra.mxu0 %v16061_v55  ;;  %v16135_v43 = vld [vmem:[%s19197_s23 + $0x504] ss:$16 sps:$4 sm:$0xff]   ;;  %v16133_v45 = vld [vmem:[%s19197_s23 + $0x500] ss:$16 sps:$4 sm:$0xff]  }
  0xfc   : > { %11090 = vmatpush1.bf16.msra.mxu1 %v16062_v56  ;;  %11050 = vmatprep.subr.bf16.mxu0 %v16063_v57  ;;  %v16138_v44 = vld [vmem:[%s19197_s23 + $0x704] ss:$16 sps:$4 sm:$0xff]   ;;  %v16136_v46 = vld [vmem:[%s19197_s23 + $0x700] ss:$16 sps:$4 sm:$0xff]  }
  0xfd   : > { %11091 = vmatprep.subr.bf16.mxu1 %v16065_v58  ;;  %v16141_v47 = vld [vmem:[%s19197_s23 + $0x524] ss:$16 sps:$4 sm:$0xff]   ;;  %v16139_v50 = vld [vmem:[%s19197_s23 + $0x520] ss:$16 sps:$4 sm:$0xff]  }
  0xfe   : > { %v16144_v49 = vld [vmem:[%s19197_s23 + $0x724] ss:$16 sps:$4 sm:$0xff]   ;;  %v16142_v51 = vld [vmem:[%s19197_s23 + $0x720] ss:$16 sps:$4 sm:$0xff]  }
  0xff   : > { %11051 = vmatpush1.bf16.msra.mxu0 %v16067_v59  ;;  %v16147_v53 = vld [vmem:[%s19197_s23 + $0x544] ss:$16 sps:$4 sm:$0xff]   ;;  %v16145_v55 = vld [vmem:[%s19197_s23 + $0x540] ss:$16 sps:$4 sm:$0xff]  }
 0x100   : > { %11092 = vmatpush1.bf16.msra.mxu1 %v16068_v60  ;;  %11052 = vmatprep.subr.bf16.mxu0 %v16069_v61  ;;  %v16150_v54 = vld [vmem:[%s19197_s23 + $0x744] ss:$16 sps:$4 sm:$0xff]   ;;  %v16148_v56 = vld [vmem:[%s19197_s23 + $0x740] ss:$16 sps:$4 sm:$0xff]  }
 0x101   : > { %11093 = vmatprep.subr.bf16.mxu1 %v16071_v62  ;;  %v16153_v57 = vld [vmem:[%s19197_s23 + $0x564] ss:$16 sps:$4 sm:$0xff]   ;;  %v16151_v59 = vld [vmem:[%s19197_s23 + $0x560] ss:$16 sps:$4 sm:$0xff]  }
 0x102   : > { %v16156_v58 = vld [vmem:[%s19197_s23 + $0x764] ss:$16 sps:$4 sm:$0xff]   ;;  %v16154_v60 = vld [vmem:[%s19197_s23 + $0x760] ss:$16 sps:$4 sm:$0xff]  }
 0x103   : > { %11053 = vmatpush1.bf16.msra.mxu0 %v16073_v63  ;;  %v16159_v61 = vld [vmem:[%s19197_s23 + $0x584] ss:$16 sps:$4 sm:$0xff]   ;;  %v16157_v63 = vld [vmem:[%s19197_s23 + $0x580] ss:$16 sps:$4 sm:$0xff]  }
 0x104   : > { %11094 = vmatpush1.bf16.msra.mxu1 %v16074_v0  ;;  %11054 = vmatprep.subr.bf16.mxu0 %v16075_v1  ;;  %v16162_v62 = vld [vmem:[%s19197_s23 + $0x784] ss:$16 sps:$4 sm:$0xff]   ;;  %v16160_v0 = vld [vmem:[%s19197_s23 + $0x780] ss:$16 sps:$4 sm:$0xff]  }
 0x105   : > { %11095 = vmatprep.subr.bf16.mxu1 %v16077_v2  ;;  %v16165_v1 = vld [vmem:[%s19197_s23 + $0x5a4] ss:$16 sps:$4 sm:$0xff]  }
 0x106   : > { %v16168_v2 = vld [vmem:[%s19197_s23 + $0x7a4] ss:$16 sps:$4 sm:$0xff]  }
 0x107   : > { %11055 = vmatpush1.bf16.msra.mxu0 %v16079_v3  ;;  %v16163_v3 = vld [vmem:[%s19197_s23 + $0x5a0] ss:$16 sps:$4 sm:$0xff]  }
 0x108   : > { %11096 = vmatpush1.bf16.msra.mxu1 %v16080_v4  ;;  %11106 = vmatprep.subr.bf16.mxu0 %v16087_v5  ;;  %v16166_v4 = vld [vmem:[%s19197_s23 + $0x7a0] ss:$16 sps:$4 sm:$0xff]   ;;  %v16171_v5 = vld [vmem:[%s19197_s23 + $0x5c4] ss:$16 sps:$4 sm:$0xff]  }
 0x109   : > { %11147 = vmatprep.subr.bf16.mxu1 %v16090_v6  ;;  %v16174_v6 = vld [vmem:[%s19197_s23 + $0x7c4] ss:$16 sps:$4 sm:$0xff]  }
 0x10a   : > { %11057 = vmatmul.mubr.bf16.vlgmr.msra.gmra.mrb[0].mxu0 %v19297_v7 }
 0x10b   : > { %11098 = vmatmul.mubr.bf16.vlgmr.msra.gmra.mrb[0].mxu1 %v19299_v8  ;;  %11107 = vmatpush1.bf16.msra.mxu0 %v16085_v9  ;;  %v16169_v9 = vld [vmem:[%s19197_s23 + $0x5c0] ss:$16 sps:$4 sm:$0xff]  }
 0x10c   : > { %11148 = vmatpush1.bf16.msra.mxu1 %v16088_v10  ;;  %11108 = vmatprep.subr.bf16.mxu0 %v16093_v11  ;;  %v16172_v10 = vld [vmem:[%s19197_s23 + $0x7c0] ss:$16 sps:$4 sm:$0xff]   ;;  %v16177_v11 = vld [vmem:[%s19197_s23 + $0x5e4] ss:$16 sps:$4 sm:$0xff]  }
 0x10d   : > { %11149 = vmatprep.subr.bf16.mxu1 %v16096_v12  ;;  %11138 = vmatprep.mubr.bf16.mxu0 %v19337_v37  ;;  %v16180_v12 = vld [vmem:[%s19197_s23 + $0x7e4] ss:$16 sps:$4 sm:$0xff]  }
 0x10e   : > { %11179 = vmatprep.mubr.bf16.mxu1 %v19341_v38 }
 0x10f   : > { %11109 = vmatpush1.bf16.msra.mxu0 %v16091_v13  ;;  %v16175_v13 = vld [vmem:[%s19197_s23 + $0x5e0] ss:$16 sps:$4 sm:$0xff]  }
 0x110   : > { %11150 = vmatpush1.bf16.msra.mxu1 %v16094_v14  ;;  %11110 = vmatprep.subr.bf16.mxu0 %v16099_v15  ;;  %v16178_v14 = vld [vmem:[%s19197_s23 + $0x7e0] ss:$16 sps:$4 sm:$0xff]   ;;  %v16187_v15 = vld [vmem:[%s19197_s23 + $0x804] ss:$16 sps:$4 sm:$0xff]  }
 0x111   : > { %11151 = vmatprep.subr.bf16.mxu1 %v16102_v16  ;;  %v16190_v16 = vld [vmem:[%s19197_s23 + $0xa04] ss:$16 sps:$4 sm:$0xff]  }
 0x113   : > { %11111 = vmatpush1.bf16.msra.mxu0 %v16097_v17  ;;  %v19385_v17 = vcombine.low %v19328_v33, %v19328_v33  ;;  %v16205_v33 = vld [vmem:[%s19197_s23 + $0x864] ss:$16 sps:$4 sm:$0xff]  }
 0x114   : > { %11152 = vmatpush1.bf16.msra.mxu1 %v16100_v18  ;;  %11112 = vmatprep.subr.bf16.mxu0 %v16105_v19  ;;  %v19389_v18 = vcombine.low %v19331_v34, %v19331_v34  ;;  %v16185_v19 = vld [vmem:[%s19197_s23 + $0x800] ss:$16 sps:$4 sm:$0xff]   ;;  %v16208_v34 = vld [vmem:[%s19197_s23 + $0xa64] ss:$16 sps:$4 sm:$0xff]  }
 0x115   : > { %11153 = vmatprep.subr.bf16.mxu1 %v16108_v20  ;;  %v16188_v20 = vld [vmem:[%s19197_s23 + $0xa00] ss:$16 sps:$4 sm:$0xff]  }
 0x117   : > { %11113 = vmatpush1.bf16.msra.mxu0 %v16103_v21  ;;  %v16193_v21 = vld [vmem:[%s19197_s23 + $0x824] ss:$16 sps:$4 sm:$0xff]  }
 0x118   : > { %11154 = vmatpush1.bf16.msra.mxu1 %v16106_v22  ;;  %11114 = vmatprep.subr.bf16.mxu0 %v16111_v23  ;;  %v16196_v22 = vld [vmem:[%s19197_s23 + $0xa24] ss:$16 sps:$4 sm:$0xff]  }
 0x119   : > { %11155 = vmatprep.subr.bf16.mxu1 %v16114_v24  ;;  %v19396_v23 = vld [vmem:[%s19219_s24 + $0x20] sm:$0xff]  ;;  %v19399_v24 = vld [vmem:[%s19219_s24 + $0x28] sm:$0xff] }
 0x11b   : > { %11115 = vmatpush1.bf16.msra.mxu0 %v16109_v25  ;;  %v19403_v25 = vcombine.high %v19396_v23, %v19396_v23 }
 0x11c   : > { %11156 = vmatpush1.bf16.msra.mxu1 %v16112_v26  ;;  %11116 = vmatprep.subr.bf16.mxu0 %v16117_v27  ;;  %v19407_v26 = vcombine.high %v19399_v24, %v19399_v24  ;;  %v16191_v27 = vld [vmem:[%s19197_s23 + $0x820] ss:$16 sps:$4 sm:$0xff]  }
 0x11d   : > { %11157 = vmatprep.subr.bf16.mxu1 %v16120_v28  ;;  %v16194_v28 = vld [vmem:[%s19197_s23 + $0xa20] ss:$16 sps:$4 sm:$0xff]  }
 0x11f   : > { %11117 = vmatpush1.bf16.msra.mxu0 %v16115_v29  ;;  %v16199_v29 = vld [vmem:[%s19197_s23 + $0x844] ss:$16 sps:$4 sm:$0xff]  }
 0x120   : > { %11158 = vmatpush1.bf16.msra.mxu1 %v16118_v30  ;;  %11118 = vmatprep.subr.bf16.mxu0 %v16123_v31  ;;  %v16202_v30 = vld [vmem:[%s19197_s23 + $0xa44] ss:$16 sps:$4 sm:$0xff]   ;;  %v16197_v31 = vld [vmem:[%s19197_s23 + $0x840] ss:$16 sps:$4 sm:$0xff]  }
 0x121   : > { %11159 = vmatprep.subr.bf16.mxu1 %v16126_v32  ;;  %v16200_v32 = vld [vmem:[%s19197_s23 + $0xa40] ss:$16 sps:$4 sm:$0xff]  }
 0x123   : > { %11119 = vmatpush1.bf16.msra.mxu0 %v16121_v35  ;;  %v16203_v35 = vld [vmem:[%s19197_s23 + $0x860] ss:$16 sps:$4 sm:$0xff]  }
 0x124   : > { %11160 = vmatpush1.bf16.msra.mxu1 %v16124_v36  ;;  %11120 = vmatprep.subr.bf16.mxu0 %v16129_v39  ;;  %v16206_v36 = vld [vmem:[%s19197_s23 + $0xa60] ss:$16 sps:$4 sm:$0xff]   ;;  %v16211_v39 = vld [vmem:[%s19197_s23 + $0x884] ss:$16 sps:$4 sm:$0xff]  }
 0x125   : > { %11161 = vmatprep.subr.bf16.mxu1 %v16132_v40  ;;  %v16214_v40 = vld [vmem:[%s19197_s23 + $0xa84] ss:$16 sps:$4 sm:$0xff]  }
 0x127   : > { %11121 = vmatpush1.bf16.msra.mxu0 %v16127_v41  ;;  %v16209_v41 = vld [vmem:[%s19197_s23 + $0x880] ss:$16 sps:$4 sm:$0xff]  }
 0x128   : > { %11162 = vmatpush1.bf16.msra.mxu1 %v16130_v42  ;;  %11122 = vmatprep.subr.bf16.mxu0 %v16135_v43  ;;  %v16212_v42 = vld [vmem:[%s19197_s23 + $0xa80] ss:$16 sps:$4 sm:$0xff]   ;;  %v16217_v43 = vld [vmem:[%s19197_s23 + $0x8a4] ss:$16 sps:$4 sm:$0xff]  }
 0x129   : > { %11163 = vmatprep.subr.bf16.mxu1 %v16138_v44  ;;  %v16220_v44 = vld [vmem:[%s19197_s23 + $0xaa4] ss:$16 sps:$4 sm:$0xff]  }
 0x12b   : > { %11123 = vmatpush1.bf16.msra.mxu0 %v16133_v45  ;;  %v16215_v45 = vld [vmem:[%s19197_s23 + $0x8a0] ss:$16 sps:$4 sm:$0xff]  }
 0x12c   : > { %11164 = vmatpush1.bf16.msra.mxu1 %v16136_v46  ;;  %11124 = vmatprep.subr.bf16.mxu0 %v16141_v47  ;;  %v16218_v46 = vld [vmem:[%s19197_s23 + $0xaa0] ss:$16 sps:$4 sm:$0xff]   ;;  %v16223_v47 = vld [vmem:[%s19197_s23 + $0x8c4] ss:$16 sps:$4 sm:$0xff]  }
 0x12d   : > { %11165 = vmatprep.subr.bf16.mxu1 %v16144_v49  ;;  %v16226_v49 = vld [vmem:[%s19197_s23 + $0xac4] ss:$16 sps:$4 sm:$0xff]  }
 0x12f   : > { %11125 = vmatpush1.bf16.msra.mxu0 %v16139_v50  ;;  %v16221_v50 = vld [vmem:[%s19197_s23 + $0x8c0] ss:$16 sps:$4 sm:$0xff]  }
 0x130   : > { %11166 = vmatpush1.bf16.msra.mxu1 %v16142_v51  ;;  %11126 = vmatprep.subr.bf16.mxu0 %v16147_v53  ;;  %v16224_v51 = vld [vmem:[%s19197_s23 + $0xac0] ss:$16 sps:$4 sm:$0xff]   ;;  %v16229_v53 = vld [vmem:[%s19197_s23 + $0x8e4] ss:$16 sps:$4 sm:$0xff]  }
 0x131   : > { %11167 = vmatprep.subr.bf16.mxu1 %v16150_v54  ;;  %v16232_v54 = vld [vmem:[%s19197_s23 + $0xae4] ss:$16 sps:$4 sm:$0xff]  }
 0x133   : > { %11127 = vmatpush1.bf16.msra.mxu0 %v16145_v55  ;;  %v16227_v55 = vld [vmem:[%s19197_s23 + $0x8e0] ss:$16 sps:$4 sm:$0xff]  }
 0x134   : > { %11168 = vmatpush1.bf16.msra.mxu1 %v16148_v56  ;;  %11128 = vmatprep.subr.bf16.mxu0 %v16153_v57  ;;  %v16230_v56 = vld [vmem:[%s19197_s23 + $0xae0] ss:$16 sps:$4 sm:$0xff]   ;;  %v16235_v57 = vld [vmem:[%s19197_s23 + $0x904] ss:$16 sps:$4 sm:$0xff]  }
 0x135   : > { %11169 = vmatprep.subr.bf16.mxu1 %v16156_v58  ;;  %v16238_v58 = vld [vmem:[%s19197_s23 + $0xb04] ss:$16 sps:$4 sm:$0xff]  }
 0x137   : > { %11129 = vmatpush1.bf16.msra.mxu0 %v16151_v59  ;;  %v16233_v59 = vld [vmem:[%s19197_s23 + $0x900] ss:$16 sps:$4 sm:$0xff]  }
 0x138   : > { %11170 = vmatpush1.bf16.msra.mxu1 %v16154_v60  ;;  %11130 = vmatprep.subr.bf16.mxu0 %v16159_v61  ;;  %v16236_v60 = vld [vmem:[%s19197_s23 + $0xb00] ss:$16 sps:$4 sm:$0xff]   ;;  %v16241_v61 = vld [vmem:[%s19197_s23 + $0x924] ss:$16 sps:$4 sm:$0xff]  }
 0x139   : > { %11171 = vmatprep.subr.bf16.mxu1 %v16162_v62  ;;  %v16244_v62 = vld [vmem:[%s19197_s23 + $0xb24] ss:$16 sps:$4 sm:$0xff]  }
 0x13b   : > { %11131 = vmatpush1.bf16.msra.mxu0 %v16157_v63  ;;  %v16239_v63 = vld [vmem:[%s19197_s23 + $0x920] ss:$16 sps:$4 sm:$0xff]  }
 0x13c   : > { %11172 = vmatpush1.bf16.msra.mxu1 %v16160_v0  ;;  %11132 = vmatprep.subr.bf16.mxu0 %v16165_v1  ;;  %v16242_v0 = vld [vmem:[%s19197_s23 + $0xb20] ss:$16 sps:$4 sm:$0xff]   ;;  %v16247_v1 = vld [vmem:[%s19197_s23 + $0x944] ss:$16 sps:$4 sm:$0xff]  }
 0x13d   : > { %11173 = vmatprep.subr.bf16.mxu1 %v16168_v2  ;;  %v16250_v2 = vld [vmem:[%s19197_s23 + $0xb44] ss:$16 sps:$4 sm:$0xff]  }
 0x13f   : > { %11133 = vmatpush1.bf16.msra.mxu0 %v16163_v3  ;;  %v16245_v3 = vld [vmem:[%s19197_s23 + $0x940] ss:$16 sps:$4 sm:$0xff]  }
 0x140   : > { %11174 = vmatpush1.bf16.msra.mxu1 %v16166_v4  ;;  %11134 = vmatprep.subr.bf16.mxu0 %v16171_v5  ;;  %v16248_v4 = vld [vmem:[%s19197_s23 + $0xb40] ss:$16 sps:$4 sm:$0xff]   ;;  %v16253_v5 = vld [vmem:[%s19197_s23 + $0x964] ss:$16 sps:$4 sm:$0xff]  }
 0x141   : > { %11175 = vmatprep.subr.bf16.mxu1 %v16174_v6  ;;  %v16256_v6 = vld [vmem:[%s19197_s23 + $0xb64] ss:$16 sps:$4 sm:$0xff]  }
 0x143   : > { %11135 = vmatpush1.bf16.msra.mxu0 %v16169_v9  ;;  %v16251_v9 = vld [vmem:[%s19197_s23 + $0x960] ss:$16 sps:$4 sm:$0xff]  }
 0x144   : > { %11176 = vmatpush1.bf16.msra.mxu1 %v16172_v10  ;;  %11136 = vmatprep.subr.bf16.mxu0 %v16177_v11  ;;  %v16254_v10 = vld [vmem:[%s19197_s23 + $0xb60] ss:$16 sps:$4 sm:$0xff]   ;;  %v16259_v11 = vld [vmem:[%s19197_s23 + $0x984] ss:$16 sps:$4 sm:$0xff]  }
 0x145   : > { %11177 = vmatprep.subr.bf16.mxu1 %v16180_v12  ;;  %v16262_v12 = vld [vmem:[%s19197_s23 + $0xb84] ss:$16 sps:$4 sm:$0xff]  }
 0x147   : > { %11137 = vmatpush1.bf16.msra.mxu0 %v16175_v13  ;;  %v16257_v13 = vld [vmem:[%s19197_s23 + $0x980] ss:$16 sps:$4 sm:$0xff]  }
 0x148   : > { %11178 = vmatpush1.bf16.msra.mxu1 %v16178_v14  ;;  %11188 = vmatprep.subr.bf16.mxu0 %v16187_v15  ;;  %v16260_v14 = vld [vmem:[%s19197_s23 + $0xb80] ss:$16 sps:$4 sm:$0xff]   ;;  %v16265_v15 = vld [vmem:[%s19197_s23 + $0x9a4] ss:$16 sps:$4 sm:$0xff]  }
 0x149   : > { %11229 = vmatprep.subr.bf16.mxu1 %v16190_v16  ;;  %v16268_v16 = vld [vmem:[%s19197_s23 + $0xba4] ss:$16 sps:$4 sm:$0xff]  }
 0x14a   : > { %11139 = vmatmul.mubr.bf16.vlgmr.msra.gmra.mrb[4].mxu0 %v19385_v17 }
 0x14b   : > { %11180 = vmatmul.mubr.bf16.vlgmr.msra.gmra.mrb[4].mxu1 %v19389_v18  ;;  %11189 = vmatpush1.bf16.msra.mxu0 %v16185_v19  ;;  %v16263_v19 = vld [vmem:[%s19197_s23 + $0x9a0] ss:$16 sps:$4 sm:$0xff]  }
 0x14c   : > { %11230 = vmatpush1.bf16.msra.mxu1 %v16188_v20  ;;  %11190 = vmatprep.subr.bf16.mxu0 %v16193_v21  ;;  %v16266_v20 = vld [vmem:[%s19197_s23 + $0xba0] ss:$16 sps:$4 sm:$0xff]   ;;  %v16271_v21 = vld [vmem:[%s19197_s23 + $0x9c4] ss:$16 sps:$4 sm:$0xff]  }
 0x14d   : > { %11231 = vmatprep.subr.bf16.mxu1 %v16196_v22  ;;  %11220 = vmatprep.mubr.bf16.mxu0 %v19403_v25  ;;  %v16274_v22 = vld [vmem:[%s19197_s23 + $0xbc4] ss:$16 sps:$4 sm:$0xff]  }
 0x14e   : > { %11261 = vmatprep.mubr.bf16.mxu1 %v19407_v26 }
 0x14f   : > { %11191 = vmatpush1.bf16.msra.mxu0 %v16191_v27  ;;  %v16269_v27 = vld [vmem:[%s19197_s23 + $0x9c0] ss:$16 sps:$4 sm:$0xff]  }
 0x150   : > { %11232 = vmatpush1.bf16.msra.mxu1 %v16194_v28  ;;  %11192 = vmatprep.subr.bf16.mxu0 %v16199_v29  ;;  %v16272_v28 = vld [vmem:[%s19197_s23 + $0xbc0] ss:$16 sps:$4 sm:$0xff]   ;;  %v16277_v29 = vld [vmem:[%s19197_s23 + $0x9e4] ss:$16 sps:$4 sm:$0xff]  }
 0x151   : > { %11233 = vmatprep.subr.bf16.mxu1 %v16202_v30  ;;  %v16280_v30 = vld [vmem:[%s19197_s23 + $0xbe4] ss:$16 sps:$4 sm:$0xff]  }
 0x153   : > { %11193 = vmatpush1.bf16.msra.mxu0 %v16197_v31  ;;  %v16275_v31 = vld [vmem:[%s19197_s23 + $0x9e0] ss:$16 sps:$4 sm:$0xff]  }
 0x154   : > { %11234 = vmatpush1.bf16.msra.mxu1 %v16200_v32  ;;  %11194 = vmatprep.subr.bf16.mxu0 %v16205_v33  ;;  %v16278_v32 = vld [vmem:[%s19197_s23 + $0xbe0] ss:$16 sps:$4 sm:$0xff]   ;;  %v16287_v33 = vld [vmem:[%s19197_s23 + $0xc04] ss:$16 sps:$4 sm:$0xff]  }
 0x155   : > { %11235 = vmatprep.subr.bf16.mxu1 %v16208_v34  ;;  %v16290_v34 = vld [vmem:[%s19197_s23 + $0xe04] ss:$16 sps:$4 sm:$0xff]  }
 0x157   : > { %11195 = vmatpush1.bf16.msra.mxu0 %v16203_v35  ;;  %v16285_v35 = vld [vmem:[%s19197_s23 + $0xc00] ss:$16 sps:$4 sm:$0xff]  }
 0x158   : > { %11236 = vmatpush1.bf16.msra.mxu1 %v16206_v36  ;;  %11196 = vmatprep.subr.bf16.mxu0 %v16211_v39  ;;  %v16288_v36 = vld [vmem:[%s19197_s23 + $0xe00] ss:$16 sps:$4 sm:$0xff]   ;;  %v19477_v39 = vcombine.low %v19396_v23, %v19396_v23 }
 0x159   : > { %11237 = vmatprep.subr.bf16.mxu1 %v16214_v40  ;;  %v19481_v40 = vcombine.low %v19399_v24, %v19399_v24 }
 0x15b   : > { %11197 = vmatpush1.bf16.msra.mxu0 %v16209_v41  ;;  %v19484_v41 = vld [vmem:[%s19219_s24 + $0x30] sm:$0xff] }
 0x15c   : > { %11238 = vmatpush1.bf16.msra.mxu1 %v16212_v42  ;;  %11198 = vmatprep.subr.bf16.mxu0 %v16217_v43  ;;  %v19487_v42 = vld [vmem:[%s19219_s24 + $0x38] sm:$0xff]  ;;  %v16293_v43 = vld [vmem:[%s19197_s23 + $0xc24] ss:$16 sps:$4 sm:$0xff]   ;;  %v19493_v23 = vcombine.high %v19484_v41, %v19484_v41 }
 0x15d   : > { %11239 = vmatprep.subr.bf16.mxu1 %v16220_v44  ;;  %v16296_v44 = vld [vmem:[%s19197_s23 + $0xe24] ss:$16 sps:$4 sm:$0xff]   ;;  %v19497_v24 = vcombine.high %v19487_v42, %v19487_v42 }
 0x15f   : > { %11199 = vmatpush1.bf16.msra.mxu0 %v16215_v45  ;;  %v16291_v45 = vld [vmem:[%s19197_s23 + $0xc20] ss:$16 sps:$4 sm:$0xff]  }
 0x160   : > { %11240 = vmatpush1.bf16.msra.mxu1 %v16218_v46  ;;  %11200 = vmatprep.subr.bf16.mxu0 %v16223_v47  ;;  %v16294_v46 = vld [vmem:[%s19197_s23 + $0xe20] ss:$16 sps:$4 sm:$0xff]   ;;  %v16299_v47 = vld [vmem:[%s19197_s23 + $0xc44] ss:$16 sps:$4 sm:$0xff]  }
 0x161   : > { %11241 = vmatprep.subr.bf16.mxu1 %v16226_v49  ;;  %v16302_v49 = vld [vmem:[%s19197_s23 + $0xe44] ss:$16 sps:$4 sm:$0xff]  }
 0x163   : > { %11201 = vmatpush1.bf16.msra.mxu0 %v16221_v50  ;;  %v16297_v50 = vld [vmem:[%s19197_s23 + $0xc40] ss:$16 sps:$4 sm:$0xff]  }
 0x164   : > { %11242 = vmatpush1.bf16.msra.mxu1 %v16224_v51  ;;  %11202 = vmatprep.subr.bf16.mxu0 %v16229_v53  ;;  %v16300_v51 = vld [vmem:[%s19197_s23 + $0xe40] ss:$16 sps:$4 sm:$0xff]   ;;  %v16305_v53 = vld [vmem:[%s19197_s23 + $0xc64] ss:$16 sps:$4 sm:$0xff]  }
 0x165   : > { %11243 = vmatprep.subr.bf16.mxu1 %v16232_v54  ;;  %v16308_v54 = vld [vmem:[%s19197_s23 + $0xe64] ss:$16 sps:$4 sm:$0xff]  }
 0x167   : > { %11203 = vmatpush1.bf16.msra.mxu0 %v16227_v55  ;;  %v16303_v55 = vld [vmem:[%s19197_s23 + $0xc60] ss:$16 sps:$4 sm:$0xff]  }
 0x168   : > { %11244 = vmatpush1.bf16.msra.mxu1 %v16230_v56  ;;  %11204 = vmatprep.subr.bf16.mxu0 %v16235_v57  ;;  %v16306_v56 = vld [vmem:[%s19197_s23 + $0xe60] ss:$16 sps:$4 sm:$0xff]   ;;  %v16311_v57 = vld [vmem:[%s19197_s23 + $0xc84] ss:$16 sps:$4 sm:$0xff]  }
 0x169   : > { %11245 = vmatprep.subr.bf16.mxu1 %v16238_v58  ;;  %v16314_v58 = vld [vmem:[%s19197_s23 + $0xe84] ss:$16 sps:$4 sm:$0xff]  }
 0x16b   : > { %11205 = vmatpush1.bf16.msra.mxu0 %v16233_v59  ;;  %v16309_v59 = vld [vmem:[%s19197_s23 + $0xc80] ss:$16 sps:$4 sm:$0xff]  }
 0x16c   : > { %11246 = vmatpush1.bf16.msra.mxu1 %v16236_v60  ;;  %11206 = vmatprep.subr.bf16.mxu0 %v16241_v61  ;;  %v16312_v60 = vld [vmem:[%s19197_s23 + $0xe80] ss:$16 sps:$4 sm:$0xff]   ;;  %v16317_v61 = vld [vmem:[%s19197_s23 + $0xca4] ss:$16 sps:$4 sm:$0xff]  }
 0x16d   : > { %11247 = vmatprep.subr.bf16.mxu1 %v16244_v62  ;;  %v16320_v62 = vld [vmem:[%s19197_s23 + $0xea4] ss:$16 sps:$4 sm:$0xff]  }
 0x16f   : > { %11207 = vmatpush1.bf16.msra.mxu0 %v16239_v63  ;;  %v16315_v63 = vld [vmem:[%s19197_s23 + $0xca0] ss:$16 sps:$4 sm:$0xff]  }
 0x170   : > { %11248 = vmatpush1.bf16.msra.mxu1 %v16242_v0  ;;  %11208 = vmatprep.subr.bf16.mxu0 %v16247_v1  ;;  %v16318_v0 = vld [vmem:[%s19197_s23 + $0xea0] ss:$16 sps:$4 sm:$0xff]   ;;  %v16323_v1 = vld [vmem:[%s19197_s23 + $0xcc4] ss:$16 sps:$4 sm:$0xff]  }
 0x171   : > { %11249 = vmatprep.subr.bf16.mxu1 %v16250_v2  ;;  %v16326_v2 = vld [vmem:[%s19197_s23 + $0xec4] ss:$16 sps:$4 sm:$0xff]  }
 0x173   : > { %11209 = vmatpush1.bf16.msra.mxu0 %v16245_v3  ;;  %v16321_v3 = vld [vmem:[%s19197_s23 + $0xcc0] ss:$16 sps:$4 sm:$0xff]  }
 0x174   : > { %11250 = vmatpush1.bf16.msra.mxu1 %v16248_v4  ;;  %11210 = vmatprep.subr.bf16.mxu0 %v16253_v5  ;;  %v16324_v4 = vld [vmem:[%s19197_s23 + $0xec0] ss:$16 sps:$4 sm:$0xff]   ;;  %v16329_v5 = vld [vmem:[%s19197_s23 + $0xce4] ss:$16 sps:$4 sm:$0xff]  }
 0x175   : > { %11251 = vmatprep.subr.bf16.mxu1 %v16256_v6  ;;  %v16332_v6 = vld [vmem:[%s19197_s23 + $0xee4] ss:$16 sps:$4 sm:$0xff]  }
 0x177   : > { %11211 = vmatpush1.bf16.msra.mxu0 %v16251_v9  ;;  %v16327_v9 = vld [vmem:[%s19197_s23 + $0xce0] ss:$16 sps:$4 sm:$0xff]  }
 0x178   : > { %11252 = vmatpush1.bf16.msra.mxu1 %v16254_v10  ;;  %11212 = vmatprep.subr.bf16.mxu0 %v16259_v11  ;;  %v16330_v10 = vld [vmem:[%s19197_s23 + $0xee0] ss:$16 sps:$4 sm:$0xff]   ;;  %v16335_v11 = vld [vmem:[%s19197_s23 + $0xd04] ss:$16 sps:$4 sm:$0xff]  }
 0x179   : > { %11253 = vmatprep.subr.bf16.mxu1 %v16262_v12  ;;  %v16338_v12 = vld [vmem:[%s19197_s23 + $0xf04] ss:$16 sps:$4 sm:$0xff]  }
 0x17b   : > { %11213 = vmatpush1.bf16.msra.mxu0 %v16257_v13  ;;  %v16333_v13 = vld [vmem:[%s19197_s23 + $0xd00] ss:$16 sps:$4 sm:$0xff]  }
 0x17c   : > { %11254 = vmatpush1.bf16.msra.mxu1 %v16260_v14  ;;  %11214 = vmatprep.subr.bf16.mxu0 %v16265_v15  ;;  %v16336_v14 = vld [vmem:[%s19197_s23 + $0xf00] ss:$16 sps:$4 sm:$0xff]   ;;  %v16341_v15 = vld [vmem:[%s19197_s23 + $0xd24] ss:$16 sps:$4 sm:$0xff]  }
 0x17d   : > { %11255 = vmatprep.subr.bf16.mxu1 %v16268_v16  ;;  %v16344_v16 = vld [vmem:[%s19197_s23 + $0xf24] ss:$16 sps:$4 sm:$0xff]  }
 0x17f   : > { %11215 = vmatpush1.bf16.msra.mxu0 %v16263_v19  ;;  %v16339_v19 = vld [vmem:[%s19197_s23 + $0xd20] ss:$16 sps:$4 sm:$0xff]  }
 0x180   : > { %11256 = vmatpush1.bf16.msra.mxu1 %v16266_v20  ;;  %11216 = vmatprep.subr.bf16.mxu0 %v16271_v21  ;;  %v16342_v20 = vld [vmem:[%s19197_s23 + $0xf20] ss:$16 sps:$4 sm:$0xff]   ;;  %v16347_v21 = vld [vmem:[%s19197_s23 + $0xd44] ss:$16 sps:$4 sm:$0xff]  }
 0x181   : > { %11257 = vmatprep.subr.bf16.mxu1 %v16274_v22  ;;  %v16350_v22 = vld [vmem:[%s19197_s23 + $0xf44] ss:$16 sps:$4 sm:$0xff]  }
 0x183   : > { %11217 = vmatpush1.bf16.msra.mxu0 %v16269_v27  ;;  %v16345_v27 = vld [vmem:[%s19197_s23 + $0xd40] ss:$16 sps:$4 sm:$0xff]  }
 0x184   : > { %11258 = vmatpush1.bf16.msra.mxu1 %v16272_v28  ;;  %11218 = vmatprep.subr.bf16.mxu0 %v16277_v29  ;;  %v16348_v28 = vld [vmem:[%s19197_s23 + $0xf40] ss:$16 sps:$4 sm:$0xff]   ;;  %v16353_v29 = vld [vmem:[%s19197_s23 + $0xd64] ss:$16 sps:$4 sm:$0xff]  }
 0x185   : > { %11259 = vmatprep.subr.bf16.mxu1 %v16280_v30  ;;  %v16356_v30 = vld [vmem:[%s19197_s23 + $0xf64] ss:$16 sps:$4 sm:$0xff]  }
 0x187   : > { %11219 = vmatpush1.bf16.msra.mxu0 %v16275_v31  ;;  %v16351_v31 = vld [vmem:[%s19197_s23 + $0xd60] ss:$16 sps:$4 sm:$0xff]  }
 0x188   : > { %11260 = vmatpush1.bf16.msra.mxu1 %v16278_v32  ;;  %11270 = vmatprep.subr.bf16.mxu0 %v16287_v33  ;;  %v16354_v32 = vld [vmem:[%s19197_s23 + $0xf60] ss:$16 sps:$4 sm:$0xff]   ;;  %v16359_v33 = vld [vmem:[%s19197_s23 + $0xd84] ss:$16 sps:$4 sm:$0xff]  }
 0x189   : > { %11311 = vmatprep.subr.bf16.mxu1 %v16290_v34  ;;  %v16362_v34 = vld [vmem:[%s19197_s23 + $0xf84] ss:$16 sps:$4 sm:$0xff]  }
 0x18a   : > { %11221 = vmatmul.mubr.bf16.vlgmr.msra.gmra.mrb[8].mxu0 %v19477_v39 }
 0x18b   : > { %11262 = vmatmul.mubr.bf16.vlgmr.msra.gmra.mrb[8].mxu1 %v19481_v40  ;;  %11271 = vmatpush1.bf16.msra.mxu0 %v16285_v35  ;;  %v16357_v35 = vld [vmem:[%s19197_s23 + $0xd80] ss:$16 sps:$4 sm:$0xff]  }
 0x18c   : > { %11312 = vmatpush1.bf16.msra.mxu1 %v16288_v36  ;;  %11272 = vmatprep.subr.bf16.mxu0 %v16293_v43  ;;  %v16360_v36 = vld [vmem:[%s19197_s23 + $0xf80] ss:$16 sps:$4 sm:$0xff]   ;;  %v16365_v43 = vld [vmem:[%s19197_s23 + $0xda4] ss:$16 sps:$4 sm:$0xff]  }
 0x18d   : > { %11313 = vmatprep.subr.bf16.mxu1 %v16296_v44  ;;  %11302 = vmatprep.mubr.bf16.mxu0 %v19493_v23  ;;  %v16368_v44 = vld [vmem:[%s19197_s23 + $0xfa4] ss:$16 sps:$4 sm:$0xff]  }
 0x18e   : > { %11343 = vmatprep.mubr.bf16.mxu1 %v19497_v24 }
 0x18f   : > { %11273 = vmatpush1.bf16.msra.mxu0 %v16291_v45  ;;  %v16363_v45 = vld [vmem:[%s19197_s23 + $0xda0] ss:$16 sps:$4 sm:$0xff]  }
 0x190   : > { %11314 = vmatpush1.bf16.msra.mxu1 %v16294_v46  ;;  %11274 = vmatprep.subr.bf16.mxu0 %v16299_v47  ;;  %v16366_v46 = vld [vmem:[%s19197_s23 + $0xfa0] ss:$16 sps:$4 sm:$0xff]   ;;  %v16371_v47 = vld [vmem:[%s19197_s23 + $0xdc4] ss:$16 sps:$4 sm:$0xff]  }
 0x191   : > { %11315 = vmatprep.subr.bf16.mxu1 %v16302_v49  ;;  %v16374_v49 = vld [vmem:[%s19197_s23 + $0xfc4] ss:$16 sps:$4 sm:$0xff]  }
 0x193   : > { %11275 = vmatpush1.bf16.msra.mxu0 %v16297_v50  ;;  %v16369_v50 = vld [vmem:[%s19197_s23 + $0xdc0] ss:$16 sps:$4 sm:$0xff]  }
 0x194   : > { %11316 = vmatpush1.bf16.msra.mxu1 %v16300_v51  ;;  %11276 = vmatprep.subr.bf16.mxu0 %v16305_v53  ;;  %v16372_v51 = vld [vmem:[%s19197_s23 + $0xfc0] ss:$16 sps:$4 sm:$0xff]   ;;  %v16377_v53 = vld [vmem:[%s19197_s23 + $0xde4] ss:$16 sps:$4 sm:$0xff]  }
 0x195   : > { %11317 = vmatprep.subr.bf16.mxu1 %v16308_v54  ;;  %v16380_v54 = vld [vmem:[%s19197_s23 + $0xfe4] ss:$16 sps:$4 sm:$0xff]  }
 0x197   : > { %11277 = vmatpush1.bf16.msra.mxu0 %v16303_v55  ;;  %v16375_v55 = vld [vmem:[%s19197_s23 + $0xde0] ss:$16 sps:$4 sm:$0xff]  }
 0x198   : > { %11318 = vmatpush1.bf16.msra.mxu1 %v16306_v56  ;;  %11278 = vmatprep.subr.bf16.mxu0 %v16311_v57  ;;  %v16378_v56 = vld [vmem:[%s19197_s23 + $0xfe0] ss:$16 sps:$4 sm:$0xff]   ;;  %v16387_v57 = vld [vmem:[%s19197_s23 + $0x1004] ss:$16 sps:$4 sm:$0xff]  }
 0x199   : > { %11319 = vmatprep.subr.bf16.mxu1 %v16314_v58  ;;  %v16390_v58 = vld [vmem:[%s19197_s23 + $0x1204] ss:$16 sps:$4 sm:$0xff]  }
 0x19b   : > { %11279 = vmatpush1.bf16.msra.mxu0 %v16309_v59  ;;  %v19564_v59 = vld [vmem:[%s19219_s24 + $0x40] sm:$0xff] }
 0x19c   : > { %11320 = vmatpush1.bf16.msra.mxu1 %v16312_v60  ;;  %11280 = vmatprep.subr.bf16.mxu0 %v16317_v61  ;;  %v19568_v60 = vcombine.low %v19484_v41, %v19484_v41  ;;  %v19572_v61 = vcombine.low %v19487_v42, %v19487_v42  ;;  %v19583_v41 = vcombine.high %v19564_v59, %v19564_v59 }
 0x19d   : > { %11321 = vmatprep.subr.bf16.mxu1 %v16320_v62  ;;  %v19575_v62 = vld [vmem:[%s19219_s24 + $0x48] sm:$0xff] }
 0x19e   : > { %v19587_v42 = vcombine.high %v19575_v62, %v19575_v62 }
 0x19f   : > { %11281 = vmatpush1.bf16.msra.mxu0 %v16315_v63  ;;  %v16385_v63 = vld [vmem:[%s19197_s23 + $0x1000] ss:$16 sps:$4 sm:$0xff]  }
 0x1a0   : > { %11322 = vmatpush1.bf16.msra.mxu1 %v16318_v0  ;;  %11282 = vmatprep.subr.bf16.mxu0 %v16323_v1  ;;  %v16388_v0 = vld [vmem:[%s19197_s23 + $0x1200] ss:$16 sps:$4 sm:$0xff]   ;;  %v16393_v1 = vld [vmem:[%s19197_s23 + $0x1024] ss:$16 sps:$4 sm:$0xff]  }
 0x1a1   : > { %11323 = vmatprep.subr.bf16.mxu1 %v16326_v2  ;;  %v16396_v2 = vld [vmem:[%s19197_s23 + $0x1224] ss:$16 sps:$4 sm:$0xff]  }
 0x1a3   : > { %11283 = vmatpush1.bf16.msra.mxu0 %v16321_v3  ;;  %v16391_v3 = vld [vmem:[%s19197_s23 + $0x1020] ss:$16 sps:$4 sm:$0xff]  }
 0x1a4   : > { %11324 = vmatpush1.bf16.msra.mxu1 %v16324_v4  ;;  %11284 = vmatprep.subr.bf16.mxu0 %v16329_v5  ;;  %v16394_v4 = vld [vmem:[%s19197_s23 + $0x1220] ss:$16 sps:$4 sm:$0xff]   ;;  %v16399_v5 = vld [vmem:[%s19197_s23 + $0x1044] ss:$16 sps:$4 sm:$0xff]  }
 0x1a5   : > { %11325 = vmatprep.subr.bf16.mxu1 %v16332_v6  ;;  %v16402_v6 = vld [vmem:[%s19197_s23 + $0x1244] ss:$16 sps:$4 sm:$0xff]  }
 0x1a7   : > { %11285 = vmatpush1.bf16.msra.mxu0 %v16327_v9  ;;  %v16397_v9 = vld [vmem:[%s19197_s23 + $0x1040] ss:$16 sps:$4 sm:$0xff]  }
 0x1a8   : > { %11326 = vmatpush1.bf16.msra.mxu1 %v16330_v10  ;;  %11286 = vmatprep.subr.bf16.mxu0 %v16335_v11  ;;  %v16400_v10 = vld [vmem:[%s19197_s23 + $0x1240] ss:$16 sps:$4 sm:$0xff]   ;;  %v16405_v11 = vld [vmem:[%s19197_s23 + $0x1064] ss:$16 sps:$4 sm:$0xff]  }
 0x1a9   : > { %11327 = vmatprep.subr.bf16.mxu1 %v16338_v12  ;;  %v16408_v12 = vld [vmem:[%s19197_s23 + $0x1264] ss:$16 sps:$4 sm:$0xff]  }
 0x1ab   : > { %11287 = vmatpush1.bf16.msra.mxu0 %v16333_v13  ;;  %v16403_v13 = vld [vmem:[%s19197_s23 + $0x1060] ss:$16 sps:$4 sm:$0xff]  }
 0x1ac   : > { %11328 = vmatpush1.bf16.msra.mxu1 %v16336_v14  ;;  %11288 = vmatprep.subr.bf16.mxu0 %v16341_v15  ;;  %v16406_v14 = vld [vmem:[%s19197_s23 + $0x1260] ss:$16 sps:$4 sm:$0xff]   ;;  %v16411_v15 = vld [vmem:[%s19197_s23 + $0x1084] ss:$16 sps:$4 sm:$0xff]  }
 0x1ad   : > { %11329 = vmatprep.subr.bf16.mxu1 %v16344_v16  ;;  %v16414_v16 = vld [vmem:[%s19197_s23 + $0x1284] ss:$16 sps:$4 sm:$0xff]  }
 0x1af   : > { %11289 = vmatpush1.bf16.msra.mxu0 %v16339_v19  ;;  %v16409_v19 = vld [vmem:[%s19197_s23 + $0x1080] ss:$16 sps:$4 sm:$0xff]  }
 0x1b0   : > { %11330 = vmatpush1.bf16.msra.mxu1 %v16342_v20  ;;  %11290 = vmatprep.subr.bf16.mxu0 %v16347_v21  ;;  %v16412_v20 = vld [vmem:[%s19197_s23 + $0x1280] ss:$16 sps:$4 sm:$0xff]   ;;  %v16417_v21 = vld [vmem:[%s19197_s23 + $0x10a4] ss:$16 sps:$4 sm:$0xff]  }
 0x1b1   : > { %11331 = vmatprep.subr.bf16.mxu1 %v16350_v22  ;;  %v16420_v22 = vld [vmem:[%s19197_s23 + $0x12a4] ss:$16 sps:$4 sm:$0xff]  }
 0x1b3   : > { %11291 = vmatpush1.bf16.msra.mxu0 %v16345_v27  ;;  %v16415_v27 = vld [vmem:[%s19197_s23 + $0x10a0] ss:$16 sps:$4 sm:$0xff]  }
 0x1b4   : > { %11332 = vmatpush1.bf16.msra.mxu1 %v16348_v28  ;;  %11292 = vmatprep.subr.bf16.mxu0 %v16353_v29  ;;  %v16418_v28 = vld [vmem:[%s19197_s23 + $0x12a0] ss:$16 sps:$4 sm:$0xff]   ;;  %v16423_v29 = vld [vmem:[%s19197_s23 + $0x10c4] ss:$16 sps:$4 sm:$0xff]  }
 0x1b5   : > { %11333 = vmatprep.subr.bf16.mxu1 %v16356_v30  ;;  %v16426_v30 = vld [vmem:[%s19197_s23 + $0x12c4] ss:$16 sps:$4 sm:$0xff]  }
 0x1b7   : > { %11293 = vmatpush1.bf16.msra.mxu0 %v16351_v31 }
 0x1b8   : > { %11334 = vmatpush1.bf16.msra.mxu1 %v16354_v32  ;;  %11294 = vmatprep.subr.bf16.mxu0 %v16359_v33  ;;  %v16421_v33 = vld [vmem:[%s19197_s23 + $0x10c0] ss:$16 sps:$4 sm:$0xff]  }
 0x1b9   : > { %11335 = vmatprep.subr.bf16.mxu1 %v16362_v34  ;;  %v16424_v34 = vld [vmem:[%s19197_s23 + $0x12c0] ss:$16 sps:$4 sm:$0xff]  }
 0x1bb   : > { %11295 = vmatpush1.bf16.msra.mxu0 %v16357_v35 }
 0x1bc   : > { %11336 = vmatpush1.bf16.msra.mxu1 %v16360_v36  ;;  %11296 = vmatprep.subr.bf16.mxu0 %v16365_v43 }
 0x1bd   : > { %11337 = vmatprep.subr.bf16.mxu1 %v16368_v44 }
 0x1bf   : > { %11297 = vmatpush1.bf16.msra.mxu0 %v16363_v45 }
 0x1c0   : > { %11338 = vmatpush1.bf16.msra.mxu1 %v16366_v46  ;;  %11298 = vmatprep.subr.bf16.mxu0 %v16371_v47 }
 0x1c1   : > { %11339 = vmatprep.subr.bf16.mxu1 %v16374_v49 }
 0x1c3   : > { %11299 = vmatpush1.bf16.msra.mxu0 %v16369_v50  ;;  %v16429_v50 = vld [vmem:[%s19197_s23 + $0x10e4] ss:$16 sps:$4 sm:$0xff]  }
 0x1c4   : > { %11340 = vmatpush1.bf16.msra.mxu1 %v16372_v51  ;;  %11300 = vmatprep.subr.bf16.mxu0 %v16377_v53  ;;  %v16432_v51 = vld [vmem:[%s19197_s23 + $0x12e4] ss:$16 sps:$4 sm:$0xff]   ;;  %v16427_v53 = vld [vmem:[%s19197_s23 + $0x10e0] ss:$16 sps:$4 sm:$0xff]  }
 0x1c5   : > { %11341 = vmatprep.subr.bf16.mxu1 %v16380_v54  ;;  %v16430_v54 = vld [vmem:[%s19197_s23 + $0x12e0] ss:$16 sps:$4 sm:$0xff]  }
 0x1c7   : > { %11301 = vmatpush1.bf16.msra.mxu0 %v16375_v55  ;;  %v16435_v55 = vld [vmem:[%s19197_s23 + $0x1104] ss:$16 sps:$4 sm:$0xff]  }
 0x1c8   : > { %11342 = vmatpush1.bf16.msra.mxu1 %v16378_v56  ;;  %11352 = vmatprep.subr.bf16.mxu0 %v16387_v57  ;;  %v16438_v56 = vld [vmem:[%s19197_s23 + $0x1304] ss:$16 sps:$4 sm:$0xff]   ;;  %v16433_v57 = vld [vmem:[%s19197_s23 + $0x1100] ss:$16 sps:$4 sm:$0xff]  }
 0x1c9   : > { %11393 = vmatprep.subr.bf16.mxu1 %v16390_v58  ;;  %v16436_v58 = vld [vmem:[%s19197_s23 + $0x1300] ss:$16 sps:$4 sm:$0xff]  }
 0x1ca   : > { %11303 = vmatmul.mubr.bf16.vlgmr.msra.gmra.mrb[12].mxu0 %v19568_v60 }
 0x1cb   : > { %11344 = vmatmul.mubr.bf16.vlgmr.msra.gmra.mrb[12].mxu1 %v19572_v61  ;;  %11353 = vmatpush1.bf16.msra.mxu0 %v16385_v63  ;;  %v16441_v63 = vld [vmem:[%s19197_s23 + $0x1124] ss:$16 sps:$4 sm:$0xff]  }
 0x1cc   : > { %11394 = vmatpush1.bf16.msra.mxu1 %v16388_v0  ;;  %11354 = vmatprep.subr.bf16.mxu0 %v16393_v1  ;;  %v16444_v0 = vld [vmem:[%s19197_s23 + $0x1324] ss:$16 sps:$4 sm:$0xff]   ;;  %v16439_v1 = vld [vmem:[%s19197_s23 + $0x1120] ss:$16 sps:$4 sm:$0xff]  }
 0x1cd   : > { %11395 = vmatprep.subr.bf16.mxu1 %v16396_v2  ;;  %11384 = vmatprep.mubr.bf16.mxu0 %v19583_v41  ;;  %v16442_v2 = vld [vmem:[%s19197_s23 + $0x1320] ss:$16 sps:$4 sm:$0xff]  }
 0x1ce   : > { %11425 = vmatprep.mubr.bf16.mxu1 %v19587_v42 }
 0x1cf   : > { %11355 = vmatpush1.bf16.msra.mxu0 %v16391_v3  ;;  %v16447_v3 = vld [vmem:[%s19197_s23 + $0x1144] ss:$16 sps:$4 sm:$0xff]  }
 0x1d0   : > { %11396 = vmatpush1.bf16.msra.mxu1 %v16394_v4  ;;  %11356 = vmatprep.subr.bf16.mxu0 %v16399_v5  ;;  %v16450_v4 = vld [vmem:[%s19197_s23 + $0x1344] ss:$16 sps:$4 sm:$0xff]   ;;  %v16445_v5 = vld [vmem:[%s19197_s23 + $0x1140] ss:$16 sps:$4 sm:$0xff]  }
 0x1d1   : > { %11397 = vmatprep.subr.bf16.mxu1 %v16402_v6  ;;  %v16448_v6 = vld [vmem:[%s19197_s23 + $0x1340] ss:$16 sps:$4 sm:$0xff]  }
 0x1d3   : > { %11357 = vmatpush1.bf16.msra.mxu0 %v16397_v9  ;;  %v16453_v9 = vld [vmem:[%s19197_s23 + $0x1164] ss:$16 sps:$4 sm:$0xff]  }
 0x1d4   : > { %11398 = vmatpush1.bf16.msra.mxu1 %v16400_v10  ;;  %11358 = vmatprep.subr.bf16.mxu0 %v16405_v11  ;;  %v16456_v10 = vld [vmem:[%s19197_s23 + $0x1364] ss:$16 sps:$4 sm:$0xff]   ;;  %v16451_v11 = vld [vmem:[%s19197_s23 + $0x1160] ss:$16 sps:$4 sm:$0xff]  }
 0x1d5   : > { %11399 = vmatprep.subr.bf16.mxu1 %v16408_v12  ;;  %v16454_v12 = vld [vmem:[%s19197_s23 + $0x1360] ss:$16 sps:$4 sm:$0xff]  }
 0x1d7   : > { %11359 = vmatpush1.bf16.msra.mxu0 %v16403_v13  ;;  %v16459_v13 = vld [vmem:[%s19197_s23 + $0x1184] ss:$16 sps:$4 sm:$0xff]  }
 0x1d8   : > { %11400 = vmatpush1.bf16.msra.mxu1 %v16406_v14  ;;  %11360 = vmatprep.subr.bf16.mxu0 %v16411_v15  ;;  %v16462_v14 = vld [vmem:[%s19197_s23 + $0x1384] ss:$16 sps:$4 sm:$0xff]   ;;  %v16457_v15 = vld [vmem:[%s19197_s23 + $0x1180] ss:$16 sps:$4 sm:$0xff]  }
 0x1d9   : > { %11401 = vmatprep.subr.bf16.mxu1 %v16414_v16  ;;  %v16460_v16 = vld [vmem:[%s19197_s23 + $0x1380] ss:$16 sps:$4 sm:$0xff]  }
 0x1db   : > { %11361 = vmatpush1.bf16.msra.mxu0 %v16409_v19  ;;  %v16465_v19 = vld [vmem:[%s19197_s23 + $0x11a4] ss:$16 sps:$4 sm:$0xff]  }
 0x1dc   : > { %11402 = vmatpush1.bf16.msra.mxu1 %v16412_v20  ;;  %11362 = vmatprep.subr.bf16.mxu0 %v16417_v21  ;;  %v16468_v20 = vld [vmem:[%s19197_s23 + $0x13a4] ss:$16 sps:$4 sm:$0xff]   ;;  %v16463_v21 = vld [vmem:[%s19197_s23 + $0x11a0] ss:$16 sps:$4 sm:$0xff]  }
 0x1dd   : > { %11403 = vmatprep.subr.bf16.mxu1 %v16420_v22  ;;  %v11058_v31 = vpop.f32.mrb[0].mxu0  ;;  %v16466_v22 = vld [vmem:[%s19197_s23 + $0x13a0] ss:$16 sps:$4 sm:$0xff]  }
 0x1de   : > { %v11099_v32 = vpop.f32.mrb[0].mxu1  ;;  %v11060_v36 = vpop.f32.mrb[1].mxu0 }
 0x1df   : > { %v19615_v35 = vadd.f32 %v11099_v32, %v11058_v31  ;;  %v11101_v43 = vpop.f32.mrb[1].mxu1  ;;  %v11062_v45 = vpop.f32.mrb[2].mxu0  ;;  %11363 = vmatpush1.bf16.msra.mxu0 %v16415_v27  ;;  %v16471_v27 = vld [vmem:[%s19197_s23 + $0x11c4] ss:$16 sps:$4 sm:$0xff]  }
 0x1e0   : > { %v19617_v44 = vadd.f32 %v11101_v43, %v11060_v36  ;;  %v11103_v46 = vpop.f32.mrb[2].mxu1  ;;  %11404 = vmatpush1.bf16.msra.mxu1 %v16418_v28  ;;  %v11063_v47 = vpop.f32.mrb[3].mxu0  ;;  %11364 = vmatprep.subr.bf16.mxu0 %v16423_v29  ;;  %v16474_v28 = vld [vmem:[%s19197_s23 + $0x13c4] ss:$16 sps:$4 sm:$0xff]   ;;  %v16469_v29 = vld [vmem:[%s19197_s23 + $0x11c0] ss:$16 sps:$4 sm:$0xff]  }
 0x1e1   : > { %v11104_v49 = vpop.f32.mrb[3].mxu1  ;;  %11405 = vmatprep.subr.bf16.mxu1 %v16426_v30  ;;  %v16472_v30 = vld [vmem:[%s19197_s23 + $0x13c0] ss:$16 sps:$4 sm:$0xff]   ;;  %v16477_v31 = vld [vmem:[%s19197_s23 + $0x11e4] ss:$16 sps:$4 sm:$0xff]   ;;  %v19661_v47 = vcombine.low %v19564_v59, %v19564_v59 }
 0x1e2   : > { %v16480_v32 = vld [vmem:[%s19197_s23 + $0x13e4] ss:$16 sps:$4 sm:$0xff]   ;;  %v16485_v45 = vld [vmem:[%s19197_s23 + $0x1400] ss:$16 sps:$4 sm:$0xff]   ;;  %v19665_v49 = vcombine.low %v19575_v62, %v19575_v62 }
 0x1e3   : > { %11365 = vmatpush1.bf16.msra.mxu0 %v16421_v33  ;;  %v16475_v33 = vld [vmem:[%s19197_s23 + $0x11e0] ss:$16 sps:$4 sm:$0xff]   ;;  %v16487_v36 = vld [vmem:[%s19197_s23 + $0x1404] ss:$16 sps:$4 sm:$0xff]  }
 0x1e4   : > { %11406 = vmatpush1.bf16.msra.mxu1 %v16424_v34  ;;  %11366 = vmatprep.subr.bf16.mxu0 %v16429_v50  ;;  %v16478_v34 = vld [vmem:[%s19197_s23 + $0x13e0] ss:$16 sps:$4 sm:$0xff]   ;;  %v16490_v43 = vld [vmem:[%s19197_s23 + $0x1604] ss:$16 sps:$4 sm:$0xff]  }
 0x1e5   : > { %11407 = vmatprep.subr.bf16.mxu1 %v16432_v51  ;;  %v16488_v46 = vld [vmem:[%s19197_s23 + $0x1600] ss:$16 sps:$4 sm:$0xff]   ;;  %v19671_v51 = vld [vmem:[%s19219_s24 + $0x58] sm:$0xff] }
 0x1e6   : > { %v19668_v50 = vld [vmem:[%s19219_s24 + $0x50] sm:$0xff]  ;;  %v19681_v62 = vcombine.high %v19671_v51, %v19671_v51 }
 0x1e7   : > { %11367 = vmatpush1.bf16.msra.mxu0 %v16427_v53  ;;  %v16493_v53 = vld [vmem:[%s19197_s23 + $0x1424] ss:$16 sps:$4 sm:$0xff]   ;;  %v19677_v59 = vcombine.high %v19668_v50, %v19668_v50 }
 0x1e8   : > { %11408 = vmatpush1.bf16.msra.mxu1 %v16430_v54  ;;  %11368 = vmatprep.subr.bf16.mxu0 %v16435_v55  ;;  %v16496_v54 = vld [vmem:[%s19197_s23 + $0x1624] ss:$16 sps:$4 sm:$0xff]   ;;  %v16491_v55 = vld [vmem:[%s19197_s23 + $0x1420] ss:$16 sps:$4 sm:$0xff]  }
 0x1e9   : > { %11409 = vmatprep.subr.bf16.mxu1 %v16438_v56  ;;  %v16494_v56 = vld [vmem:[%s19197_s23 + $0x1620] ss:$16 sps:$4 sm:$0xff]  }
 0x1eb   : > { %11369 = vmatpush1.bf16.msra.mxu0 %v16433_v57  ;;  %v16499_v57 = vld [vmem:[%s19197_s23 + $0x1444] ss:$16 sps:$4 sm:$0xff]  }
 0x1ec   : > { %11410 = vmatpush1.bf16.msra.mxu1 %v16436_v58  ;;  %11370 = vmatprep.subr.bf16.mxu0 %v16441_v63  ;;  %v16502_v58 = vld [vmem:[%s19197_s23 + $0x1644] ss:$16 sps:$4 sm:$0xff]   ;;  %v16497_v63 = vld [vmem:[%s19197_s23 + $0x1440] ss:$16 sps:$4 sm:$0xff]  }
 0x1ed   : > { %11411 = vmatprep.subr.bf16.mxu1 %v16444_v0  ;;  %v16500_v0 = vld [vmem:[%s19197_s23 + $0x1640] ss:$16 sps:$4 sm:$0xff]  }
 0x1ef   : > { %11371 = vmatpush1.bf16.msra.mxu0 %v16439_v1  ;;  %v16505_v1 = vld [vmem:[%s19197_s23 + $0x1464] ss:$16 sps:$4 sm:$0xff]  }
 0x1f0   : > { %11412 = vmatpush1.bf16.msra.mxu1 %v16442_v2  ;;  %11372 = vmatprep.subr.bf16.mxu0 %v16447_v3  ;;  %v16508_v2 = vld [vmem:[%s19197_s23 + $0x1664] ss:$16 sps:$4 sm:$0xff]   ;;  %v16503_v3 = vld [vmem:[%s19197_s23 + $0x1460] ss:$16 sps:$4 sm:$0xff]  }
 0x1f1   : > { %11413 = vmatprep.subr.bf16.mxu1 %v16450_v4  ;;  %v16506_v4 = vld [vmem:[%s19197_s23 + $0x1660] ss:$16 sps:$4 sm:$0xff]  }
 0x1f3   : > { %11373 = vmatpush1.bf16.msra.mxu0 %v16445_v5  ;;  %v16511_v5 = vld [vmem:[%s19197_s23 + $0x1484] ss:$16 sps:$4 sm:$0xff]  }
 0x1f4   : > { %11414 = vmatpush1.bf16.msra.mxu1 %v16448_v6  ;;  %11374 = vmatprep.subr.bf16.mxu0 %v16453_v9  ;;  %v16514_v6 = vld [vmem:[%s19197_s23 + $0x1684] ss:$16 sps:$4 sm:$0xff]   ;;  %v16509_v9 = vld [vmem:[%s19197_s23 + $0x1480] ss:$16 sps:$4 sm:$0xff]  }
 0x1f5   : > { %11415 = vmatprep.subr.bf16.mxu1 %v16456_v10  ;;  %v16512_v10 = vld [vmem:[%s19197_s23 + $0x1680] ss:$16 sps:$4 sm:$0xff]  }
 0x1f7   : > { %11375 = vmatpush1.bf16.msra.mxu0 %v16451_v11  ;;  %v16517_v11 = vld [vmem:[%s19197_s23 + $0x14a4] ss:$16 sps:$4 sm:$0xff]  }
 0x1f8   : > { %11416 = vmatpush1.bf16.msra.mxu1 %v16454_v12  ;;  %11376 = vmatprep.subr.bf16.mxu0 %v16459_v13  ;;  %v16520_v12 = vld [vmem:[%s19197_s23 + $0x16a4] ss:$16 sps:$4 sm:$0xff]   ;;  %v16515_v13 = vld [vmem:[%s19197_s23 + $0x14a0] ss:$16 sps:$4 sm:$0xff]  }
 0x1f9   : > { %11417 = vmatprep.subr.bf16.mxu1 %v16462_v14  ;;  %v16518_v14 = vld [vmem:[%s19197_s23 + $0x16a0] ss:$16 sps:$4 sm:$0xff]  }
 0x1fb   : > { %11377 = vmatpush1.bf16.msra.mxu0 %v16457_v15  ;;  %v16523_v15 = vld [vmem:[%s19197_s23 + $0x14c4] ss:$16 sps:$4 sm:$0xff]  }
 0x1fc   : > { %11418 = vmatpush1.bf16.msra.mxu1 %v16460_v16  ;;  %11378 = vmatprep.subr.bf16.mxu0 %v16465_v19  ;;  %v16526_v16 = vld [vmem:[%s19197_s23 + $0x16c4] ss:$16 sps:$4 sm:$0xff]  }
 0x1fd   : > { %11419 = vmatprep.subr.bf16.mxu1 %v16468_v20 }
 0x1ff   : > { %11379 = vmatpush1.bf16.msra.mxu0 %v16463_v21  ;;  %v16521_v21 = vld [vmem:[%s19197_s23 + $0x14c0] ss:$16 sps:$4 sm:$0xff]  }
 0x200   : > { %11420 = vmatpush1.bf16.msra.mxu1 %v16466_v22  ;;  %11380 = vmatprep.subr.bf16.mxu0 %v16471_v27  ;;  %v16524_v22 = vld [vmem:[%s19197_s23 + $0x16c0] ss:$16 sps:$4 sm:$0xff]  }
 0x201   : > { %11421 = vmatprep.subr.bf16.mxu1 %v16474_v28 }
 0x203   : > { %11381 = vmatpush1.bf16.msra.mxu0 %v16469_v29 }
 0x204   : > { %11422 = vmatpush1.bf16.msra.mxu1 %v16472_v30  ;;  %11382 = vmatprep.subr.bf16.mxu0 %v16477_v31 }
 0x205   : > { %11423 = vmatprep.subr.bf16.mxu1 %v16480_v32 }
 0x207   : > { %11383 = vmatpush1.bf16.msra.mxu0 %v16475_v33 }
 0x208   : > { %11424 = vmatpush1.bf16.msra.mxu1 %v16478_v34  ;;  %11434 = vmatprep.subr.bf16.mxu0 %v16487_v36 }
 0x209   : > { %11475 = vmatprep.subr.bf16.mxu1 %v16490_v43  ;;  %v16532_v43 = vld [vmem:[%s19197_s23 + $0x16e4] ss:$16 sps:$4 sm:$0xff]  }
 0x20a   : > { %11385 = vmatmul.mubr.bf16.vlgmr.msra.gmra.mrb[16].mxu0 %v19661_v47 }
 0x20b   : > { %11426 = vmatmul.mubr.bf16.vlgmr.msra.gmra.mrb[16].mxu1 %v19665_v49  ;;  %11435 = vmatpush1.bf16.msra.mxu0 %v16485_v45 }
 0x20c   : > { %11476 = vmatpush1.bf16.msra.mxu1 %v16488_v46  ;;  %11436 = vmatprep.subr.bf16.mxu0 %v16493_v53  ;;  %v16530_v46 = vld [vmem:[%s19197_s23 + $0x16e0] ss:$16 sps:$4 sm:$0xff]   ;;  %v16535_v53 = vld [vmem:[%s19197_s23 + $0x1504] ss:$16 sps:$4 sm:$0xff]  }
 0x20d   : > { %11477 = vmatprep.subr.bf16.mxu1 %v16496_v54  ;;  %11466 = vmatprep.mubr.bf16.mxu0 %v19677_v59  ;;  %v16538_v54 = vld [vmem:[%s19197_s23 + $0x1704] ss:$16 sps:$4 sm:$0xff]  }
 0x20e   : > { %11507 = vmatprep.mubr.bf16.mxu1 %v19681_v62 }
 0x20f   : > { %11437 = vmatpush1.bf16.msra.mxu0 %v16491_v55  ;;  %v16533_v55 = vld [vmem:[%s19197_s23 + $0x1500] ss:$16 sps:$4 sm:$0xff]  }
 0x210   : > { %11478 = vmatpush1.bf16.msra.mxu1 %v16494_v56  ;;  %11438 = vmatprep.subr.bf16.mxu0 %v16499_v57  ;;  %v16536_v56 = vld [vmem:[%s19197_s23 + $0x1700] ss:$16 sps:$4 sm:$0xff]   ;;  %v16541_v57 = vld [vmem:[%s19197_s23 + $0x1524] ss:$16 sps:$4 sm:$0xff]  }
 0x211   : > { %11479 = vmatprep.subr.bf16.mxu1 %v16502_v58  ;;  %v16544_v58 = vld [vmem:[%s19197_s23 + $0x1724] ss:$16 sps:$4 sm:$0xff]  }
 0x213   : > { %11439 = vmatpush1.bf16.msra.mxu0 %v16497_v63  ;;  %v16539_v63 = vld [vmem:[%s19197_s23 + $0x1520] ss:$16 sps:$4 sm:$0xff]  }
 0x214   : > { %11480 = vmatpush1.bf16.msra.mxu1 %v16500_v0  ;;  %11440 = vmatprep.subr.bf16.mxu0 %v16505_v1  ;;  %v16542_v0 = vld [vmem:[%s19197_s23 + $0x1720] ss:$16 sps:$4 sm:$0xff]   ;;  %v16547_v1 = vld [vmem:[%s19197_s23 + $0x1544] ss:$16 sps:$4 sm:$0xff]  }
 0x215   : > { %11481 = vmatprep.subr.bf16.mxu1 %v16508_v2  ;;  %v16550_v2 = vld [vmem:[%s19197_s23 + $0x1744] ss:$16 sps:$4 sm:$0xff]  }
 0x217   : > { %11441 = vmatpush1.bf16.msra.mxu0 %v16503_v3  ;;  %v16545_v3 = vld [vmem:[%s19197_s23 + $0x1540] ss:$16 sps:$4 sm:$0xff]  }
 0x218   : > { %11482 = vmatpush1.bf16.msra.mxu1 %v16506_v4  ;;  %11442 = vmatprep.subr.bf16.mxu0 %v16511_v5  ;;  %v16548_v4 = vld [vmem:[%s19197_s23 + $0x1740] ss:$16 sps:$4 sm:$0xff]   ;;  %v16553_v5 = vld [vmem:[%s19197_s23 + $0x1564] ss:$16 sps:$4 sm:$0xff]  }
 0x219   : > { %11483 = vmatprep.subr.bf16.mxu1 %v16514_v6  ;;  %v16556_v6 = vld [vmem:[%s19197_s23 + $0x1764] ss:$16 sps:$4 sm:$0xff]  }
 0x21b   : > { %11443 = vmatpush1.bf16.msra.mxu0 %v16509_v9  ;;  %v16551_v9 = vld [vmem:[%s19197_s23 + $0x1560] ss:$16 sps:$4 sm:$0xff]  }
 0x21c   : > { %11484 = vmatpush1.bf16.msra.mxu1 %v16512_v10  ;;  %11444 = vmatprep.subr.bf16.mxu0 %v16517_v11  ;;  %v16554_v10 = vld [vmem:[%s19197_s23 + $0x1760] ss:$16 sps:$4 sm:$0xff]   ;;  %v16559_v11 = vld [vmem:[%s19197_s23 + $0x1584] ss:$16 sps:$4 sm:$0xff]  }
 0x21d   : > { %11485 = vmatprep.subr.bf16.mxu1 %v16520_v12  ;;  %v11140_v19 = vpop.f32.mrb[4].mxu0  ;;  %v16562_v12 = vld [vmem:[%s19197_s23 + $0x1784] ss:$16 sps:$4 sm:$0xff]  }
 0x21e   : > { %v11181_v20 = vpop.f32.mrb[4].mxu1  ;;  %v11141_v27 = vadd.f32 %v11140_v19, %v19615_v35  ;;  %v11142_v28 = vpop.f32.mrb[5].mxu0  ;;  %v16529_v35 = vld [vmem:[%s19197_s23 + $0x14e4] ss:$16 sps:$4 sm:$0xff]   ;;  %v16563_v19 = vld [vmem:[%s19197_s23 + $0x15a0] ss:$16 sps:$4 sm:$0xff]  }
 0x21f   : > { %v11183_v29 = vpop.f32.mrb[5].mxu1  ;;  %v11143_v30 = vadd.f32 %v11142_v28, %v19617_v44  ;;  %v11144_v31 = vpop.f32.mrb[6].mxu0  ;;  %11445 = vmatpush1.bf16.msra.mxu0 %v16515_v13  ;;  %v16527_v44 = vld [vmem:[%s19197_s23 + $0x14e0] ss:$16 sps:$4 sm:$0xff]  }
 0x220   : > { %v11185_v32 = vpop.f32.mrb[6].mxu1  ;;  %11486 = vmatpush1.bf16.msra.mxu1 %v16518_v14  ;;  %v19711_v33 = vadd.f32 %v11181_v20, %v11141_v27  ;;  %v11145_v34 = vpop.f32.mrb[7].mxu0  ;;  %11446 = vmatprep.subr.bf16.mxu0 %v16523_v15  ;;  %v16557_v13 = vld [vmem:[%s19197_s23 + $0x1580] ss:$16 sps:$4 sm:$0xff]   ;;  %v16565_v15 = vld [vmem:[%s19197_s23 + $0x15a4] ss:$16 sps:$4 sm:$0xff]  }
 0x221   : > { %v11186_v36 = vpop.f32.mrb[7].mxu1  ;;  %11487 = vmatprep.subr.bf16.mxu1 %v16526_v16  ;;  %v19715_v45 = vadd.f32 %v11183_v29, %v11143_v30  ;;  %v16560_v14 = vld [vmem:[%s19197_s23 + $0x1780] ss:$16 sps:$4 sm:$0xff]   ;;  %v16568_v16 = vld [vmem:[%s19197_s23 + $0x17a4] ss:$16 sps:$4 sm:$0xff]  }
 0x222   : > { %v16566_v20 = vld [vmem:[%s19197_s23 + $0x17a0] ss:$16 sps:$4 sm:$0xff]   ;;  %v16577_v29 = vld [vmem:[%s19197_s23 + $0x15e4] ss:$16 sps:$4 sm:$0xff]  }
 0x223   : > { %11447 = vmatpush1.bf16.msra.mxu0 %v16521_v21  ;;  %v16571_v21 = vld [vmem:[%s19197_s23 + $0x15c4] ss:$16 sps:$4 sm:$0xff]   ;;  %v16569_v27 = vld [vmem:[%s19197_s23 + $0x15c0] ss:$16 sps:$4 sm:$0xff]  }
 0x224   : > { %11488 = vmatpush1.bf16.msra.mxu1 %v16524_v22  ;;  %11448 = vmatprep.subr.bf16.mxu0 %v16529_v35  ;;  %v16574_v22 = vld [vmem:[%s19197_s23 + $0x17c4] ss:$16 sps:$4 sm:$0xff]   ;;  %v16572_v28 = vld [vmem:[%s19197_s23 + $0x17c0] ss:$16 sps:$4 sm:$0xff]  }
 0x225   : > { %11489 = vmatprep.subr.bf16.mxu1 %v16532_v43  ;;  %v16580_v30 = vld [vmem:[%s19197_s23 + $0x17e4] ss:$16 sps:$4 sm:$0xff]   ;;  %v16575_v31 = vld [vmem:[%s19197_s23 + $0x15e0] ss:$16 sps:$4 sm:$0xff]  }
 0x226   : > { %v16578_v32 = vld [vmem:[%s19197_s23 + $0x17e0] ss:$16 sps:$4 sm:$0xff]   ;;  %v16587_v34 = vld [vmem:[%s19197_s23 + $0x1804] ss:$16 sps:$4 sm:$0xff]  }
 0x227   : > { %11449 = vmatpush1.bf16.msra.mxu0 %v16527_v44  ;;  %v16590_v36 = vld [vmem:[%s19197_s23 + $0x1a04] ss:$16 sps:$4 sm:$0xff]   ;;  %v16585_v35 = vld [vmem:[%s19197_s23 + $0x1800] ss:$16 sps:$4 sm:$0xff]   ;;  %v19757_v44 = vcombine.low %v19668_v50, %v19668_v50 }
 0x228   : > { %11490 = vmatpush1.bf16.msra.mxu1 %v16530_v46  ;;  %11450 = vmatprep.subr.bf16.mxu0 %v16535_v53  ;;  %v16588_v43 = vld [vmem:[%s19197_s23 + $0x1a00] ss:$16 sps:$4 sm:$0xff]   ;;  %v19761_v46 = vcombine.low %v19671_v51, %v19671_v51 }
 0x229   : > { %11491 = vmatprep.subr.bf16.mxu1 %v16538_v54  ;;  %v19764_v53 = vld [vmem:[%s19219_s24 + $0x60] sm:$0xff]  ;;  %v19767_v54 = vld [vmem:[%s19219_s24 + $0x68] sm:$0xff] }
 0x22a   : > { %v19773_v50 = vcombine.high %v19764_v53, %v19764_v53  ;;  %v19777_v51 = vcombine.high %v19767_v54, %v19767_v54 }
 0x22b   : > { %11451 = vmatpush1.bf16.msra.mxu0 %v16533_v55  ;;  %v16593_v55 = vld [vmem:[%s19197_s23 + $0x1824] ss:$16 sps:$4 sm:$0xff]  }
 0x22c   : > { %11492 = vmatpush1.bf16.msra.mxu1 %v16536_v56  ;;  %11452 = vmatprep.subr.bf16.mxu0 %v16541_v57  ;;  %v16596_v56 = vld [vmem:[%s19197_s23 + $0x1a24] ss:$16 sps:$4 sm:$0xff]   ;;  %v16591_v57 = vld [vmem:[%s19197_s23 + $0x1820] ss:$16 sps:$4 sm:$0xff]  }
 0x22d   : > { %11493 = vmatprep.subr.bf16.mxu1 %v16544_v58  ;;  %v16594_v58 = vld [vmem:[%s19197_s23 + $0x1a20] ss:$16 sps:$4 sm:$0xff]  }
 0x22f   : > { %11453 = vmatpush1.bf16.msra.mxu0 %v16539_v63  ;;  %v16599_v63 = vld [vmem:[%s19197_s23 + $0x1844] ss:$16 sps:$4 sm:$0xff]  }
 0x230   : > { %11494 = vmatpush1.bf16.msra.mxu1 %v16542_v0  ;;  %11454 = vmatprep.subr.bf16.mxu0 %v16547_v1  ;;  %v16602_v0 = vld [vmem:[%s19197_s23 + $0x1a44] ss:$16 sps:$4 sm:$0xff]   ;;  %v16597_v1 = vld [vmem:[%s19197_s23 + $0x1840] ss:$16 sps:$4 sm:$0xff]  }
 0x231   : > { %11495 = vmatprep.subr.bf16.mxu1 %v16550_v2  ;;  %v16600_v2 = vld [vmem:[%s19197_s23 + $0x1a40] ss:$16 sps:$4 sm:$0xff]  }
 0x233   : > { %11455 = vmatpush1.bf16.msra.mxu0 %v16545_v3  ;;  %v16605_v3 = vld [vmem:[%s19197_s23 + $0x1864] ss:$16 sps:$4 sm:$0xff]  }
 0x234   : > { %11496 = vmatpush1.bf16.msra.mxu1 %v16548_v4  ;;  %11456 = vmatprep.subr.bf16.mxu0 %v16553_v5  ;;  %v16608_v4 = vld [vmem:[%s19197_s23 + $0x1a64] ss:$16 sps:$4 sm:$0xff]   ;;  %v16603_v5 = vld [vmem:[%s19197_s23 + $0x1860] ss:$16 sps:$4 sm:$0xff]  }
 0x235   : > { %11497 = vmatprep.subr.bf16.mxu1 %v16556_v6  ;;  %v16606_v6 = vld [vmem:[%s19197_s23 + $0x1a60] ss:$16 sps:$4 sm:$0xff]  }
 0x237   : > { %11457 = vmatpush1.bf16.msra.mxu0 %v16551_v9  ;;  %v16611_v9 = vld [vmem:[%s19197_s23 + $0x1884] ss:$16 sps:$4 sm:$0xff]  }
 0x238   : > { %11498 = vmatpush1.bf16.msra.mxu1 %v16554_v10  ;;  %11458 = vmatprep.subr.bf16.mxu0 %v16559_v11  ;;  %v16614_v10 = vld [vmem:[%s19197_s23 + $0x1a84] ss:$16 sps:$4 sm:$0xff]   ;;  %v16609_v11 = vld [vmem:[%s19197_s23 + $0x1880] ss:$16 sps:$4 sm:$0xff]  }
 0x239   : > { %11499 = vmatprep.subr.bf16.mxu1 %v16562_v12  ;;  %v16612_v12 = vld [vmem:[%s19197_s23 + $0x1a80] ss:$16 sps:$4 sm:$0xff]  }
 0x23b   : > { %11459 = vmatpush1.bf16.msra.mxu0 %v16557_v13  ;;  %v16617_v13 = vld [vmem:[%s19197_s23 + $0x18a4] ss:$16 sps:$4 sm:$0xff]  }
 0x23c   : > { %11500 = vmatpush1.bf16.msra.mxu1 %v16560_v14  ;;  %11460 = vmatprep.subr.bf16.mxu0 %v16565_v15  ;;  %v16620_v14 = vld [vmem:[%s19197_s23 + $0x1aa4] ss:$16 sps:$4 sm:$0xff]   ;;  %v16615_v15 = vld [vmem:[%s19197_s23 + $0x18a0] ss:$16 sps:$4 sm:$0xff]  }
 0x23d   : > { %11501 = vmatprep.subr.bf16.mxu1 %v16568_v16  ;;  %v16618_v16 = vld [vmem:[%s19197_s23 + $0x1aa0] ss:$16 sps:$4 sm:$0xff]  }
 0x23f   : > { %11461 = vmatpush1.bf16.msra.mxu0 %v16563_v19  ;;  %v16623_v19 = vld [vmem:[%s19197_s23 + $0x18c4] ss:$16 sps:$4 sm:$0xff]  }
 0x240   : > { %11502 = vmatpush1.bf16.msra.mxu1 %v16566_v20  ;;  %11462 = vmatprep.subr.bf16.mxu0 %v16571_v21  ;;  %v16626_v20 = vld [vmem:[%s19197_s23 + $0x1ac4] ss:$16 sps:$4 sm:$0xff]  }
 0x241   : > { %11503 = vmatprep.subr.bf16.mxu1 %v16574_v22 }
 0x243   : > { %11463 = vmatpush1.bf16.msra.mxu0 %v16569_v27  ;;  %v16621_v27 = vld [vmem:[%s19197_s23 + $0x18c0] ss:$16 sps:$4 sm:$0xff]  }
 0x244   : > { %11504 = vmatpush1.bf16.msra.mxu1 %v16572_v28  ;;  %11464 = vmatprep.subr.bf16.mxu0 %v16577_v29  ;;  %v16624_v28 = vld [vmem:[%s19197_s23 + $0x1ac0] ss:$16 sps:$4 sm:$0xff]  }
 0x245   : > { %11505 = vmatprep.subr.bf16.mxu1 %v16580_v30 }
 0x247   : > { %11465 = vmatpush1.bf16.msra.mxu0 %v16575_v31 }
 0x248   : > { %11506 = vmatpush1.bf16.msra.mxu1 %v16578_v32  ;;  %11516 = vmatprep.subr.bf16.mxu0 %v16587_v34 }
 0x249   : > { %11557 = vmatprep.subr.bf16.mxu1 %v16590_v36 }
 0x24a   : > { %11467 = vmatmul.mubr.bf16.vlgmr.msra.gmra.mrb[20].mxu0 %v19757_v44 }
 0x24b   : > { %11508 = vmatmul.mubr.bf16.vlgmr.msra.gmra.mrb[20].mxu1 %v19761_v46  ;;  %11517 = vmatpush1.bf16.msra.mxu0 %v16585_v35 }
 0x24c   : > { %11558 = vmatpush1.bf16.msra.mxu1 %v16588_v43  ;;  %11518 = vmatprep.subr.bf16.mxu0 %v16593_v55 }
 0x24d   : > { %11559 = vmatprep.subr.bf16.mxu1 %v16596_v56  ;;  %11548 = vmatprep.mubr.bf16.mxu0 %v19773_v50  ;;  %v16632_v56 = vld [vmem:[%s19197_s23 + $0x1ae4] ss:$16 sps:$4 sm:$0xff]  }
 0x24e   : > { %11589 = vmatprep.mubr.bf16.mxu1 %v19777_v51 }
 0x24f   : > { %11519 = vmatpush1.bf16.msra.mxu0 %v16591_v57 }
 0x250   : > { %11560 = vmatpush1.bf16.msra.mxu1 %v16594_v58  ;;  %11520 = vmatprep.subr.bf16.mxu0 %v16599_v63  ;;  %v16630_v58 = vld [vmem:[%s19197_s23 + $0x1ae0] ss:$16 sps:$4 sm:$0xff]   ;;  %v16635_v63 = vld [vmem:[%s19197_s23 + $0x1904] ss:$16 sps:$4 sm:$0xff]  }
 0x251   : > { %11561 = vmatprep.subr.bf16.mxu1 %v16602_v0  ;;  %v16638_v0 = vld [vmem:[%s19197_s23 + $0x1b04] ss:$16 sps:$4 sm:$0xff]  }
 0x253   : > { %11521 = vmatpush1.bf16.msra.mxu0 %v16597_v1  ;;  %v16633_v1 = vld [vmem:[%s19197_s23 + $0x1900] ss:$16 sps:$4 sm:$0xff]  }
 0x254   : > { %11562 = vmatpush1.bf16.msra.mxu1 %v16600_v2  ;;  %11522 = vmatprep.subr.bf16.mxu0 %v16605_v3  ;;  %v16636_v2 = vld [vmem:[%s19197_s23 + $0x1b00] ss:$16 sps:$4 sm:$0xff]   ;;  %v16641_v3 = vld [vmem:[%s19197_s23 + $0x1924] ss:$16 sps:$4 sm:$0xff]  }
 0x255   : > { %11563 = vmatprep.subr.bf16.mxu1 %v16608_v4  ;;  %v16644_v4 = vld [vmem:[%s19197_s23 + $0x1b24] ss:$16 sps:$4 sm:$0xff]  }
 0x257   : > { %11523 = vmatpush1.bf16.msra.mxu0 %v16603_v5  ;;  %v16639_v5 = vld [vmem:[%s19197_s23 + $0x1920] ss:$16 sps:$4 sm:$0xff]  }
 0x258   : > { %11564 = vmatpush1.bf16.msra.mxu1 %v16606_v6  ;;  %11524 = vmatprep.subr.bf16.mxu0 %v16611_v9  ;;  %v16642_v6 = vld [vmem:[%s19197_s23 + $0x1b20] ss:$16 sps:$4 sm:$0xff]   ;;  %v16647_v9 = vld [vmem:[%s19197_s23 + $0x1944] ss:$16 sps:$4 sm:$0xff]  }
 0x259   : > { %11565 = vmatprep.subr.bf16.mxu1 %v16614_v10  ;;  %v16650_v10 = vld [vmem:[%s19197_s23 + $0x1b44] ss:$16 sps:$4 sm:$0xff]  }
 0x25b   : > { %11525 = vmatpush1.bf16.msra.mxu0 %v16609_v11  ;;  %v16645_v11 = vld [vmem:[%s19197_s23 + $0x1940] ss:$16 sps:$4 sm:$0xff]  }
 0x25c   : > { %11566 = vmatpush1.bf16.msra.mxu1 %v16612_v12  ;;  %11526 = vmatprep.subr.bf16.mxu0 %v16617_v13  ;;  %v16648_v12 = vld [vmem:[%s19197_s23 + $0x1b40] ss:$16 sps:$4 sm:$0xff]   ;;  %v16653_v13 = vld [vmem:[%s19197_s23 + $0x1964] ss:$16 sps:$4 sm:$0xff]  }
 0x25d   : > { %11567 = vmatprep.subr.bf16.mxu1 %v16620_v14  ;;  %v11222_v21 = vpop.f32.mrb[8].mxu0  ;;  %v16656_v14 = vld [vmem:[%s19197_s23 + $0x1b64] ss:$16 sps:$4 sm:$0xff]  }
 0x25e   : > { %v11263_v22 = vpop.f32.mrb[8].mxu1  ;;  %v11223_v29 = vadd.f32 %v11222_v21, %v19711_v33  ;;  %v11224_v30 = vpop.f32.mrb[9].mxu0  ;;  %v16629_v33 = vld [vmem:[%s19197_s23 + $0x18e4] ss:$16 sps:$4 sm:$0xff]   ;;  %v16657_v21 = vld [vmem:[%s19197_s23 + $0x1980] ss:$16 sps:$4 sm:$0xff]  }
 0x25f   : > { %v11265_v31 = vpop.f32.mrb[9].mxu1  ;;  %v11225_v32 = vadd.f32 %v11224_v30, %v19715_v45  ;;  %v11226_v34 = vpop.f32.mrb[10].mxu0  ;;  %11527 = vmatpush1.bf16.msra.mxu0 %v16615_v15  ;;  %v16627_v45 = vld [vmem:[%s19197_s23 + $0x18e0] ss:$16 sps:$4 sm:$0xff]  }
 0x260   : > { %v11267_v36 = vpop.f32.mrb[10].mxu1  ;;  %11568 = vmatpush1.bf16.msra.mxu1 %v16618_v16  ;;  %v19807_v35 = vadd.f32 %v11263_v22, %v11223_v29  ;;  %v11227_v43 = vpop.f32.mrb[11].mxu0  ;;  %11528 = vmatprep.subr.bf16.mxu0 %v16623_v19  ;;  %v16651_v15 = vld [vmem:[%s19197_s23 + $0x1960] ss:$16 sps:$4 sm:$0xff]   ;;  %v16659_v19 = vld [vmem:[%s19197_s23 + $0x1984] ss:$16 sps:$4 sm:$0xff]  }
 0x261   : > { %v11268_v55 = vpop.f32.mrb[11].mxu1  ;;  %11569 = vmatprep.subr.bf16.mxu1 %v16626_v20  ;;  %v19811_v57 = vadd.f32 %v11265_v31, %v11225_v32  ;;  %v16654_v16 = vld [vmem:[%s19197_s23 + $0x1b60] ss:$16 sps:$4 sm:$0xff]   ;;  %v16662_v20 = vld [vmem:[%s19197_s23 + $0x1b84] ss:$16 sps:$4 sm:$0xff]  }
 0x262   : > { %v16660_v22 = vld [vmem:[%s19197_s23 + $0x1b80] ss:$16 sps:$4 sm:$0xff]   ;;  %v16671_v31 = vld [vmem:[%s19197_s23 + $0x19c4] ss:$16 sps:$4 sm:$0xff]  }
 0x263   : > { %11529 = vmatpush1.bf16.msra.mxu0 %v16621_v27  ;;  %v16665_v27 = vld [vmem:[%s19197_s23 + $0x19a4] ss:$16 sps:$4 sm:$0xff]   ;;  %v16663_v29 = vld [vmem:[%s19197_s23 + $0x19a0] ss:$16 sps:$4 sm:$0xff]  }
 0x264   : > { %11570 = vmatpush1.bf16.msra.mxu1 %v16624_v28  ;;  %11530 = vmatprep.subr.bf16.mxu0 %v16629_v33  ;;  %v16668_v28 = vld [vmem:[%s19197_s23 + $0x1ba4] ss:$16 sps:$4 sm:$0xff]   ;;  %v16666_v30 = vld [vmem:[%s19197_s23 + $0x1ba0] ss:$16 sps:$4 sm:$0xff]  }
 0x265   : > { %11571 = vmatprep.subr.bf16.mxu1 %v16632_v56  ;;  %v16674_v32 = vld [vmem:[%s19197_s23 + $0x1bc4] ss:$16 sps:$4 sm:$0xff]   ;;  %v16669_v34 = vld [vmem:[%s19197_s23 + $0x19c0] ss:$16 sps:$4 sm:$0xff]  }
 0x266   : > { %v16672_v36 = vld [vmem:[%s19197_s23 + $0x1bc0] ss:$16 sps:$4 sm:$0xff]   ;;  %v16677_v43 = vld [vmem:[%s19197_s23 + $0x19e4] ss:$16 sps:$4 sm:$0xff]  }
 0x267   : > { %11531 = vmatpush1.bf16.msra.mxu0 %v16627_v45  ;;  %v16680_v55 = vld [vmem:[%s19197_s23 + $0x1be4] ss:$16 sps:$4 sm:$0xff]   ;;  %v16675_v33 = vld [vmem:[%s19197_s23 + $0x19e0] ss:$16 sps:$4 sm:$0xff]  }
 0x268   : > { %11572 = vmatpush1.bf16.msra.mxu1 %v16630_v58  ;;  %11532 = vmatprep.subr.bf16.mxu0 %v16635_v63  ;;  %v16678_v56 = vld [vmem:[%s19197_s23 + $0x1be0] ss:$16 sps:$4 sm:$0xff]   ;;  %v16687_v45 = vld [vmem:[%s19197_s23 + $0x1c04] ss:$16 sps:$4 sm:$0xff]  }
 0x269   : > { %11573 = vmatprep.subr.bf16.mxu1 %v16638_v0  ;;  %v16690_v58 = vld [vmem:[%s19197_s23 + $0x1e04] ss:$16 sps:$4 sm:$0xff]   ;;  %v16685_v63 = vld [vmem:[%s19197_s23 + $0x1c00] ss:$16 sps:$4 sm:$0xff]  }
 0x26a   : > { %v16688_v0 = vld [vmem:[%s19197_s23 + $0x1e00] ss:$16 sps:$4 sm:$0xff]  }
 0x26b   : > { %11533 = vmatpush1.bf16.msra.mxu0 %v16633_v1  ;;  %v19853_v1 = vcombine.low %v19764_v53, %v19764_v53 }
 0x26c   : > { %11574 = vmatpush1.bf16.msra.mxu1 %v16636_v2  ;;  %11534 = vmatprep.subr.bf16.mxu0 %v16641_v3  ;;  %v19857_v2 = vcombine.low %v19767_v54, %v19767_v54  ;;  %v19860_v3 = vld [vmem:[%s19219_s24 + $0x70] sm:$0xff] }
 0x26d   : > { %11575 = vmatprep.subr.bf16.mxu1 %v16644_v4  ;;  %v19863_v4 = vld [vmem:[%s19219_s24 + $0x78] sm:$0xff]  ;;  %v19869_v53 = vcombine.high %v19860_v3, %v19860_v3 }
 0x26e   : > { %v19873_v54 = vcombine.high %v19863_v4, %v19863_v4 }
 0x26f   : > { %11535 = vmatpush1.bf16.msra.mxu0 %v16639_v5  ;;  %v16693_v5 = vld [vmem:[%s19197_s23 + $0x1c24] ss:$16 sps:$4 sm:$0xff]  }
 0x270   : > { %11576 = vmatpush1.bf16.msra.mxu1 %v16642_v6  ;;  %11536 = vmatprep.subr.bf16.mxu0 %v16647_v9  ;;  %v16696_v6 = vld [vmem:[%s19197_s23 + $0x1e24] ss:$16 sps:$4 sm:$0xff]   ;;  %v16691_v9 = vld [vmem:[%s19197_s23 + $0x1c20] ss:$16 sps:$4 sm:$0xff]  }
 0x271   : > { %11577 = vmatprep.subr.bf16.mxu1 %v16650_v10  ;;  %v16694_v10 = vld [vmem:[%s19197_s23 + $0x1e20] ss:$16 sps:$4 sm:$0xff]  }
 0x273   : > { %11537 = vmatpush1.bf16.msra.mxu0 %v16645_v11  ;;  %v16699_v11 = vld [vmem:[%s19197_s23 + $0x1c44] ss:$16 sps:$4 sm:$0xff]  }
 0x274   : > { %11578 = vmatpush1.bf16.msra.mxu1 %v16648_v12  ;;  %11538 = vmatprep.subr.bf16.mxu0 %v16653_v13  ;;  %v16702_v12 = vld [vmem:[%s19197_s23 + $0x1e44] ss:$16 sps:$4 sm:$0xff]   ;;  %v16697_v13 = vld [vmem:[%s19197_s23 + $0x1c40] ss:$16 sps:$4 sm:$0xff]  }
 0x275   : > { %11579 = vmatprep.subr.bf16.mxu1 %v16656_v14  ;;  %v16700_v14 = vld [vmem:[%s19197_s23 + $0x1e40] ss:$16 sps:$4 sm:$0xff]  }
 0x277   : > { %11539 = vmatpush1.bf16.msra.mxu0 %v16651_v15  ;;  %v16705_v15 = vld [vmem:[%s19197_s23 + $0x1c64] ss:$16 sps:$4 sm:$0xff]  }
 0x278   : > { %11580 = vmatpush1.bf16.msra.mxu1 %v16654_v16  ;;  %11540 = vmatprep.subr.bf16.mxu0 %v16659_v19  ;;  %v16708_v16 = vld [vmem:[%s19197_s23 + $0x1e64] ss:$16 sps:$4 sm:$0xff]   ;;  %v16703_v19 = vld [vmem:[%s19197_s23 + $0x1c60] ss:$16 sps:$4 sm:$0xff]  }
 0x279   : > { %11581 = vmatprep.subr.bf16.mxu1 %v16662_v20  ;;  %v16706_v20 = vld [vmem:[%s19197_s23 + $0x1e60] ss:$16 sps:$4 sm:$0xff]  }
 0x27b   : > { %11541 = vmatpush1.bf16.msra.mxu0 %v16657_v21  ;;  %v16711_v21 = vld [vmem:[%s19197_s23 + $0x1c84] ss:$16 sps:$4 sm:$0xff]  }
 0x27c   : > { %11582 = vmatpush1.bf16.msra.mxu1 %v16660_v22  ;;  %11542 = vmatprep.subr.bf16.mxu0 %v16665_v27  ;;  %v16714_v22 = vld [vmem:[%s19197_s23 + $0x1e84] ss:$16 sps:$4 sm:$0xff]   ;;  %v16709_v27 = vld [vmem:[%s19197_s23 + $0x1c80] ss:$16 sps:$4 sm:$0xff]  }
 0x27d   : > { %11583 = vmatprep.subr.bf16.mxu1 %v16668_v28  ;;  %v16712_v28 = vld [vmem:[%s19197_s23 + $0x1e80] ss:$16 sps:$4 sm:$0xff]  }
 0x27f   : > { %11543 = vmatpush1.bf16.msra.mxu0 %v16663_v29  ;;  %v16717_v29 = vld [vmem:[%s19197_s23 + $0x1ca4] ss:$16 sps:$4 sm:$0xff]  }
 0x280   : > { %11584 = vmatpush1.bf16.msra.mxu1 %v16666_v30  ;;  %11544 = vmatprep.subr.bf16.mxu0 %v16671_v31  ;;  %v16720_v30 = vld [vmem:[%s19197_s23 + $0x1ea4] ss:$16 sps:$4 sm:$0xff]   ;;  %v16715_v31 = vld [vmem:[%s19197_s23 + $0x1ca0] ss:$16 sps:$4 sm:$0xff]  }
 0x281   : > { %11585 = vmatprep.subr.bf16.mxu1 %v16674_v32  ;;  %v16718_v32 = vld [vmem:[%s19197_s23 + $0x1ea0] ss:$16 sps:$4 sm:$0xff]  }
 0x283   : > { %11545 = vmatpush1.bf16.msra.mxu0 %v16669_v34  ;;  %v16723_v34 = vld [vmem:[%s19197_s23 + $0x1cc4] ss:$16 sps:$4 sm:$0xff]  }
 0x284   : > { %11586 = vmatpush1.bf16.msra.mxu1 %v16672_v36  ;;  %11546 = vmatprep.subr.bf16.mxu0 %v16677_v43  ;;  %v16726_v36 = vld [vmem:[%s19197_s23 + $0x1ec4] ss:$16 sps:$4 sm:$0xff]  }
 0x285   : > { %11587 = vmatprep.subr.bf16.mxu1 %v16680_v55 }
 0x287   : > { %11547 = vmatpush1.bf16.msra.mxu0 %v16675_v33  ;;  %v16721_v33 = vld [vmem:[%s19197_s23 + $0x1cc0] ss:$16 sps:$4 sm:$0xff]  }
 0x288   : > { %11588 = vmatpush1.bf16.msra.mxu1 %v16678_v56  ;;  %11598 = vmatprep.subr.bf16.mxu0 %v16687_v45  ;;  %v16724_v56 = vld [vmem:[%s19197_s23 + $0x1ec0] ss:$16 sps:$4 sm:$0xff]  }
 0x289   : > { %11639 = vmatprep.subr.bf16.mxu1 %v16690_v58 }
 0x28a   : > { %11549 = vmatmul.mubr.bf16.vlgmr.msra.gmra.mrb[24].mxu0 %v19853_v1 }
 0x28b   : > { %11590 = vmatmul.mubr.bf16.vlgmr.msra.gmra.mrb[24].mxu1 %v19857_v2  ;;  %11599 = vmatpush1.bf16.msra.mxu0 %v16685_v63 }
 0x28c   : > { %11640 = vmatpush1.bf16.msra.mxu1 %v16688_v0  ;;  %11600 = vmatprep.subr.bf16.mxu0 %v16693_v5 }
 0x28d   : > { %11641 = vmatprep.subr.bf16.mxu1 %v16696_v6  ;;  %11630 = vmatprep.mubr.bf16.mxu0 %v19869_v53 }
 0x28e   : > { %11671 = vmatprep.mubr.bf16.mxu1 %v19873_v54 }
 0x28f   : > { %11601 = vmatpush1.bf16.msra.mxu0 %v16691_v9 }
 0x290   : > { %11642 = vmatpush1.bf16.msra.mxu1 %v16694_v10  ;;  %11602 = vmatprep.subr.bf16.mxu0 %v16699_v11 }
 0x291   : > { %11643 = vmatprep.subr.bf16.mxu1 %v16702_v12  ;;  %v16732_v12 = vld [vmem:[%s19197_s23 + $0x1ee4] ss:$16 sps:$4 sm:$0xff]  }
 0x293   : > { %11603 = vmatpush1.bf16.msra.mxu0 %v16697_v13 }
 0x294   : > { %11644 = vmatpush1.bf16.msra.mxu1 %v16700_v14  ;;  %11604 = vmatprep.subr.bf16.mxu0 %v16705_v15  ;;  %v16730_v14 = vld [vmem:[%s19197_s23 + $0x1ee0] ss:$16 sps:$4 sm:$0xff]   ;;  %v16735_v15 = vld [vmem:[%s19197_s23 + $0x1d04] ss:$16 sps:$4 sm:$0xff]  }
 0x295   : > { %11645 = vmatprep.subr.bf16.mxu1 %v16708_v16  ;;  %v16738_v16 = vld [vmem:[%s19197_s23 + $0x1f04] ss:$16 sps:$4 sm:$0xff]  }
 0x297   : > { %11605 = vmatpush1.bf16.msra.mxu0 %v16703_v19  ;;  %v16733_v19 = vld [vmem:[%s19197_s23 + $0x1d00] ss:$16 sps:$4 sm:$0xff]  }
 0x298   : > { %11646 = vmatpush1.bf16.msra.mxu1 %v16706_v20  ;;  %11606 = vmatprep.subr.bf16.mxu0 %v16711_v21  ;;  %v16736_v20 = vld [vmem:[%s19197_s23 + $0x1f00] ss:$16 sps:$4 sm:$0xff]   ;;  %v16741_v21 = vld [vmem:[%s19197_s23 + $0x1d24] ss:$16 sps:$4 sm:$0xff]  }
 0x299   : > { %11647 = vmatprep.subr.bf16.mxu1 %v16714_v22  ;;  %v16744_v22 = vld [vmem:[%s19197_s23 + $0x1f24] ss:$16 sps:$4 sm:$0xff]  }
 0x29b   : > { %11607 = vmatpush1.bf16.msra.mxu0 %v16709_v27  ;;  %v16739_v27 = vld [vmem:[%s19197_s23 + $0x1d20] ss:$16 sps:$4 sm:$0xff]  }
 0x29c   : > { %11648 = vmatpush1.bf16.msra.mxu1 %v16712_v28  ;;  %11608 = vmatprep.subr.bf16.mxu0 %v16717_v29  ;;  %v16742_v28 = vld [vmem:[%s19197_s23 + $0x1f20] ss:$16 sps:$4 sm:$0xff]   ;;  %v16747_v29 = vld [vmem:[%s19197_s23 + $0x1d44] ss:$16 sps:$4 sm:$0xff]  }
 0x29d   : > { %11649 = vmatprep.subr.bf16.mxu1 %v16720_v30  ;;  %v11304_v43 = vpop.f32.mrb[12].mxu0  ;;  %v16750_v30 = vld [vmem:[%s19197_s23 + $0x1f44] ss:$16 sps:$4 sm:$0xff]  }
 0x29e   : > { %v11345_v55 = vpop.f32.mrb[12].mxu1  ;;  %v11305_v45 = vadd.f32 %v11304_v43, %v19807_v35  ;;  %v11306_v58 = vpop.f32.mrb[13].mxu0  ;;  %v16729_v35 = vld [vmem:[%s19197_s23 + $0x1ce4] ss:$16 sps:$4 sm:$0xff]   ;;  %v16751_v43 = vld [vmem:[%s19197_s23 + $0x1d60] ss:$16 sps:$4 sm:$0xff]  }
 0x29f   : > { %v11347_v63 = vpop.f32.mrb[13].mxu1  ;;  %v11307_v0 = vadd.f32 %v11306_v58, %v19811_v57  ;;  %v11308_v5 = vpop.f32.mrb[14].mxu0  ;;  %11609 = vmatpush1.bf16.msra.mxu0 %v16715_v31  ;;  %v16727_v57 = vld [vmem:[%s19197_s23 + $0x1ce0] ss:$16 sps:$4 sm:$0xff]  }
 0x2a0   : > { %v11349_v6 = vpop.f32.mrb[14].mxu1  ;;  %11650 = vmatpush1.bf16.msra.mxu1 %v16718_v32  ;;  %v19903_v9 = vadd.f32 %v11345_v55, %v11305_v45  ;;  %v11309_v10 = vpop.f32.mrb[15].mxu0  ;;  %11610 = vmatprep.subr.bf16.mxu0 %v16723_v34  ;;  %v16745_v31 = vld [vmem:[%s19197_s23 + $0x1d40] ss:$16 sps:$4 sm:$0xff]   ;;  %v16753_v34 = vld [vmem:[%s19197_s23 + $0x1d64] ss:$16 sps:$4 sm:$0xff]  }
 0x2a1   : > { %v11350_v11 = vpop.f32.mrb[15].mxu1  ;;  %11651 = vmatprep.subr.bf16.mxu1 %v16726_v36  ;;  %v19907_v13 = vadd.f32 %v11347_v63, %v11307_v0  ;;  %v16748_v32 = vld [vmem:[%s19197_s23 + $0x1f40] ss:$16 sps:$4 sm:$0xff]   ;;  %v16756_v36 = vld [vmem:[%s19197_s23 + $0x1f64] ss:$16 sps:$4 sm:$0xff]  }
 0x2a2   : > { %v16754_v55 = vld [vmem:[%s19197_s23 + $0x1f60] ss:$16 sps:$4 sm:$0xff]   ;;  %v16765_v63 = vld [vmem:[%s19197_s23 + $0x1da4] ss:$16 sps:$4 sm:$0xff]  }
 0x2a3   : > { %11611 = vmatpush1.bf16.msra.mxu0 %v16721_v33  ;;  %v16759_v33 = vld [vmem:[%s19197_s23 + $0x1d84] ss:$16 sps:$4 sm:$0xff]   ;;  %v16757_v45 = vld [vmem:[%s19197_s23 + $0x1d80] ss:$16 sps:$4 sm:$0xff]  }
 0x2a4   : > { %11652 = vmatpush1.bf16.msra.mxu1 %v16724_v56  ;;  %11612 = vmatprep.subr.bf16.mxu0 %v16729_v35  ;;  %v16762_v56 = vld [vmem:[%s19197_s23 + $0x1f84] ss:$16 sps:$4 sm:$0xff]   ;;  %v16760_v58 = vld [vmem:[%s19197_s23 + $0x1f80] ss:$16 sps:$4 sm:$0xff]  }
 0x2a5   : > { %11653 = vmatprep.subr.bf16.mxu1 %v16732_v12  ;;  %v16768_v0 = vld [vmem:[%s19197_s23 + $0x1fa4] ss:$16 sps:$4 sm:$0xff]   ;;  %v16763_v5 = vld [vmem:[%s19197_s23 + $0x1da0] ss:$16 sps:$4 sm:$0xff]  }
 0x2a6   : > { %v16766_v6 = vld [vmem:[%s19197_s23 + $0x1fa0] ss:$16 sps:$4 sm:$0xff]   ;;  %v16771_v10 = vld [vmem:[%s19197_s23 + $0x1dc4] ss:$16 sps:$4 sm:$0xff]  }
 0x2a7   : > { %11613 = vmatpush1.bf16.msra.mxu0 %v16727_v57  ;;  %v16774_v11 = vld [vmem:[%s19197_s23 + $0x1fc4] ss:$16 sps:$4 sm:$0xff]   ;;  %v16769_v35 = vld [vmem:[%s19197_s23 + $0x1dc0] ss:$16 sps:$4 sm:$0xff]  }
 0x2a8   : > { %11654 = vmatpush1.bf16.msra.mxu1 %v16730_v14  ;;  %11614 = vmatprep.subr.bf16.mxu0 %v16735_v15  ;;  %v16772_v12 = vld [vmem:[%s19197_s23 + $0x1fc0] ss:$16 sps:$4 sm:$0xff]   ;;  %v16777_v57 = vld [vmem:[%s19197_s23 + $0x1de4] ss:$16 sps:$4 sm:$0xff]  }
 0x2a9   : > { %11655 = vmatprep.subr.bf16.mxu1 %v16738_v16  ;;  %v16780_v14 = vld [vmem:[%s19197_s23 + $0x1fe4] ss:$16 sps:$4 sm:$0xff]   ;;  %v16775_v15 = vld [vmem:[%s19197_s23 + $0x1de0] ss:$16 sps:$4 sm:$0xff]  }
 0x2aa   : > { %v16778_v16 = vld [vmem:[%s19197_s23 + $0x1fe0] ss:$16 sps:$4 sm:$0xff]  }
 0x2ab   : > { %11615 = vmatpush1.bf16.msra.mxu0 %v16733_v19  ;;  %v16787_v19 = vld [vmem:[%s19197_s23 + $0x2004] ss:$16 sps:$4 sm:$0xff]  }
 0x2ac   : > { %11656 = vmatpush1.bf16.msra.mxu1 %v16736_v20  ;;  %11616 = vmatprep.subr.bf16.mxu0 %v16741_v21  ;;  %v16790_v20 = vld [vmem:[%s19197_s23 + $0x2204] ss:$16 sps:$4 sm:$0xff]   ;;  %v16785_v21 = vld [vmem:[%s19197_s23 + $0x2000] ss:$16 sps:$4 sm:$0xff]  }
 0x2ad   : > { %11657 = vmatprep.subr.bf16.mxu1 %v16744_v22  ;;  %v16788_v22 = vld [vmem:[%s19197_s23 + $0x2200] ss:$16 sps:$4 sm:$0xff]  }
 0x2af   : > { %11617 = vmatpush1.bf16.msra.mxu0 %v16739_v27  ;;  %v19949_v27 = vcombine.low %v19860_v3, %v19860_v3 }
 0x2b0   : > { %11658 = vmatpush1.bf16.msra.mxu1 %v16742_v28  ;;  %11618 = vmatprep.subr.bf16.mxu0 %v16747_v29  ;;  %v19953_v28 = vcombine.low %v19863_v4, %v19863_v4  ;;  %v19956_v29 = vld [vmem:[%s19219_s24 + $0x80] sm:$0xff] }
 0x2b1   : > { %11659 = vmatprep.subr.bf16.mxu1 %v16750_v30  ;;  %v19959_v30 = vld [vmem:[%s19219_s24 + $0x88] sm:$0xff]  ;;  %v19965_v3 = vcombine.high %v19956_v29, %v19956_v29 }
 0x2b2   : > { %v19969_v4 = vcombine.high %v19959_v30, %v19959_v30 }
 0x2b3   : > { %11619 = vmatpush1.bf16.msra.mxu0 %v16745_v31  ;;  %v16793_v31 = vld [vmem:[%s19197_s23 + $0x2024] ss:$16 sps:$4 sm:$0xff]  }
 0x2b4   : > { %11660 = vmatpush1.bf16.msra.mxu1 %v16748_v32  ;;  %11620 = vmatprep.subr.bf16.mxu0 %v16753_v34  ;;  %v16796_v32 = vld [vmem:[%s19197_s23 + $0x2224] ss:$16 sps:$4 sm:$0xff]   ;;  %v16791_v34 = vld [vmem:[%s19197_s23 + $0x2020] ss:$16 sps:$4 sm:$0xff]  }
 0x2b5   : > { %11661 = vmatprep.subr.bf16.mxu1 %v16756_v36  ;;  %v16794_v36 = vld [vmem:[%s19197_s23 + $0x2220] ss:$16 sps:$4 sm:$0xff]  }
 0x2b7   : > { %11621 = vmatpush1.bf16.msra.mxu0 %v16751_v43  ;;  %v16799_v43 = vld [vmem:[%s19197_s23 + $0x2044] ss:$16 sps:$4 sm:$0xff]  }
 0x2b8   : > { %11662 = vmatpush1.bf16.msra.mxu1 %v16754_v55  ;;  %11622 = vmatprep.subr.bf16.mxu0 %v16759_v33  ;;  %v16802_v55 = vld [vmem:[%s19197_s23 + $0x2244] ss:$16 sps:$4 sm:$0xff]   ;;  %v16797_v33 = vld [vmem:[%s19197_s23 + $0x2040] ss:$16 sps:$4 sm:$0xff]  }
 0x2b9   : > { %11663 = vmatprep.subr.bf16.mxu1 %v16762_v56  ;;  %v16800_v56 = vld [vmem:[%s19197_s23 + $0x2240] ss:$16 sps:$4 sm:$0xff]  }
 0x2bb   : > { %11623 = vmatpush1.bf16.msra.mxu0 %v16757_v45  ;;  %v16805_v45 = vld [vmem:[%s19197_s23 + $0x2064] ss:$16 sps:$4 sm:$0xff]  }
 0x2bc   : > { %11664 = vmatpush1.bf16.msra.mxu1 %v16760_v58  ;;  %11624 = vmatprep.subr.bf16.mxu0 %v16765_v63  ;;  %v16808_v58 = vld [vmem:[%s19197_s23 + $0x2264] ss:$16 sps:$4 sm:$0xff]   ;;  %v16803_v63 = vld [vmem:[%s19197_s23 + $0x2060] ss:$16 sps:$4 sm:$0xff]  }
 0x2bd   : > { %11665 = vmatprep.subr.bf16.mxu1 %v16768_v0  ;;  %v16806_v0 = vld [vmem:[%s19197_s23 + $0x2260] ss:$16 sps:$4 sm:$0xff]  }
 0x2bf   : > { %11625 = vmatpush1.bf16.msra.mxu0 %v16763_v5  ;;  %v16811_v5 = vld [vmem:[%s19197_s23 + $0x2084] ss:$16 sps:$4 sm:$0xff]  }
 0x2c0   : > { %11666 = vmatpush1.bf16.msra.mxu1 %v16766_v6  ;;  %11626 = vmatprep.subr.bf16.mxu0 %v16771_v10  ;;  %v16814_v6 = vld [vmem:[%s19197_s23 + $0x2284] ss:$16 sps:$4 sm:$0xff]   ;;  %v16809_v10 = vld [vmem:[%s19197_s23 + $0x2080] ss:$16 sps:$4 sm:$0xff]  }
 0x2c1   : > { %11667 = vmatprep.subr.bf16.mxu1 %v16774_v11  ;;  %v16812_v11 = vld [vmem:[%s19197_s23 + $0x2280] ss:$16 sps:$4 sm:$0xff]  }
 0x2c3   : > { %11627 = vmatpush1.bf16.msra.mxu0 %v16769_v35  ;;  %v16817_v35 = vld [vmem:[%s19197_s23 + $0x20a4] ss:$16 sps:$4 sm:$0xff]  }
 0x2c4   : > { %11668 = vmatpush1.bf16.msra.mxu1 %v16772_v12  ;;  %11628 = vmatprep.subr.bf16.mxu0 %v16777_v57  ;;  %v16820_v12 = vld [vmem:[%s19197_s23 + $0x22a4] ss:$16 sps:$4 sm:$0xff]   ;;  %v16815_v57 = vld [vmem:[%s19197_s23 + $0x20a0] ss:$16 sps:$4 sm:$0xff]  }
 0x2c5   : > { %11669 = vmatprep.subr.bf16.mxu1 %v16780_v14  ;;  %v16818_v14 = vld [vmem:[%s19197_s23 + $0x22a0] ss:$16 sps:$4 sm:$0xff]  }
 0x2c7   : > { %11629 = vmatpush1.bf16.msra.mxu0 %v16775_v15  ;;  %v16823_v15 = vld [vmem:[%s19197_s23 + $0x20c4] ss:$16 sps:$4 sm:$0xff]  }
 0x2c8   : > { %11670 = vmatpush1.bf16.msra.mxu1 %v16778_v16  ;;  %11680 = vmatprep.subr.bf16.mxu0 %v16787_v19  ;;  %v16826_v16 = vld [vmem:[%s19197_s23 + $0x22c4] ss:$16 sps:$4 sm:$0xff]  }
 0x2c9   : > { %11721 = vmatprep.subr.bf16.mxu1 %v16790_v20 }
 0x2ca   : > { %11631 = vmatmul.mubr.bf16.vlgmr.msra.gmra.mrb[28].mxu0 %v19949_v27 }
 0x2cb   : > { %11672 = vmatmul.mubr.bf16.vlgmr.msra.gmra.mrb[28].mxu1 %v19953_v28  ;;  %11681 = vmatpush1.bf16.msra.mxu0 %v16785_v21  ;;  %v16821_v21 = vld [vmem:[%s19197_s23 + $0x20c0] ss:$16 sps:$4 sm:$0xff]  }
 0x2cc   : > { %11722 = vmatpush1.bf16.msra.mxu1 %v16788_v22  ;;  %11682 = vmatprep.subr.bf16.mxu0 %v16793_v31  ;;  %v16824_v22 = vld [vmem:[%s19197_s23 + $0x22c0] ss:$16 sps:$4 sm:$0xff]  }
 0x2cd   : > { %11723 = vmatprep.subr.bf16.mxu1 %v16796_v32  ;;  %11712 = vmatprep.mubr.bf16.mxu0 %v19965_v3 }
 0x2ce   : > { %11753 = vmatprep.mubr.bf16.mxu1 %v19969_v4 }
 0x2cf   : > { %11683 = vmatpush1.bf16.msra.mxu0 %v16791_v34 }
 0x2d0   : > { %11724 = vmatpush1.bf16.msra.mxu1 %v16794_v36  ;;  %11684 = vmatprep.subr.bf16.mxu0 %v16799_v43 }
 0x2d1   : > { %11725 = vmatprep.subr.bf16.mxu1 %v16802_v55 }
 0x2d3   : > { %11685 = vmatpush1.bf16.msra.mxu0 %v16797_v33 }
 0x2d4   : > { %11726 = vmatpush1.bf16.msra.mxu1 %v16800_v56  ;;  %11686 = vmatprep.subr.bf16.mxu0 %v16805_v45 }
 0x2d5   : > { %11727 = vmatprep.subr.bf16.mxu1 %v16808_v58  ;;  %v16832_v58 = vld [vmem:[%s19197_s23 + $0x22e4] ss:$16 sps:$4 sm:$0xff]  }
 0x2d7   : > { %11687 = vmatpush1.bf16.msra.mxu0 %v16803_v63 }
 0x2d8   : > { %11728 = vmatpush1.bf16.msra.mxu1 %v16806_v0  ;;  %11688 = vmatprep.subr.bf16.mxu0 %v16811_v5  ;;  %v16830_v0 = vld [vmem:[%s19197_s23 + $0x22e0] ss:$16 sps:$4 sm:$0xff]   ;;  %v16835_v5 = vld [vmem:[%s19197_s23 + $0x2104] ss:$16 sps:$4 sm:$0xff]  }
 0x2d9   : > { %11729 = vmatprep.subr.bf16.mxu1 %v16814_v6  ;;  %v16838_v6 = vld [vmem:[%s19197_s23 + $0x2304] ss:$16 sps:$4 sm:$0xff]  }
 0x2db   : > { %11689 = vmatpush1.bf16.msra.mxu0 %v16809_v10  ;;  %v16833_v10 = vld [vmem:[%s19197_s23 + $0x2100] ss:$16 sps:$4 sm:$0xff]  }
 0x2dc   : > { %11730 = vmatpush1.bf16.msra.mxu1 %v16812_v11  ;;  %11690 = vmatprep.subr.bf16.mxu0 %v16817_v35  ;;  %v16836_v11 = vld [vmem:[%s19197_s23 + $0x2300] ss:$16 sps:$4 sm:$0xff]   ;;  %v16841_v35 = vld [vmem:[%s19197_s23 + $0x2124] ss:$16 sps:$4 sm:$0xff]  }
 0x2dd   : > { %11731 = vmatprep.subr.bf16.mxu1 %v16820_v12  ;;  %v11386_v19 = vpop.f32.mrb[16].mxu0  ;;  %v16844_v12 = vld [vmem:[%s19197_s23 + $0x2324] ss:$16 sps:$4 sm:$0xff]  }
 0x2de   : > { %v11427_v20 = vpop.f32.mrb[16].mxu1  ;;  %v11387_v31 = vadd.f32 %v11386_v19, %v19903_v9  ;;  %v11388_v32 = vpop.f32.mrb[17].mxu0  ;;  %v16829_v9 = vld [vmem:[%s19197_s23 + $0x20e4] ss:$16 sps:$4 sm:$0xff]   ;;  %v16845_v19 = vld [vmem:[%s19197_s23 + $0x2140] ss:$16 sps:$4 sm:$0xff]  }
 0x2df   : > { %v11429_v34 = vpop.f32.mrb[17].mxu1  ;;  %v11389_v36 = vadd.f32 %v11388_v32, %v19907_v13  ;;  %v11390_v43 = vpop.f32.mrb[18].mxu0  ;;  %11691 = vmatpush1.bf16.msra.mxu0 %v16815_v57  ;;  %v16827_v13 = vld [vmem:[%s19197_s23 + $0x20e0] ss:$16 sps:$4 sm:$0xff]  }
 0x2e0   : > { %v11431_v55 = vpop.f32.mrb[18].mxu1  ;;  %11732 = vmatpush1.bf16.msra.mxu1 %v16818_v14  ;;  %v19999_v33 = vadd.f32 %v11427_v20, %v11387_v31  ;;  %v11391_v56 = vpop.f32.mrb[19].mxu0  ;;  %11692 = vmatprep.subr.bf16.mxu0 %v16823_v15  ;;  %v16839_v57 = vld [vmem:[%s19197_s23 + $0x2120] ss:$16 sps:$4 sm:$0xff]   ;;  %v16847_v15 = vld [vmem:[%s19197_s23 + $0x2144] ss:$16 sps:$4 sm:$0xff]  }
 0x2e1   : > { %v11432_v45 = vpop.f32.mrb[19].mxu1  ;;  %11733 = vmatprep.subr.bf16.mxu1 %v16826_v16  ;;  %v20003_v63 = vadd.f32 %v11429_v34, %v11389_v36  ;;  %v16842_v14 = vld [vmem:[%s19197_s23 + $0x2320] ss:$16 sps:$4 sm:$0xff]   ;;  %v16850_v16 = vld [vmem:[%s19197_s23 + $0x2344] ss:$16 sps:$4 sm:$0xff]  }
 0x2e2   : > { %v16848_v20 = vld [vmem:[%s19197_s23 + $0x2340] ss:$16 sps:$4 sm:$0xff]   ;;  %v16859_v34 = vld [vmem:[%s19197_s23 + $0x2184] ss:$16 sps:$4 sm:$0xff]  }
 0x2e3   : > { %11693 = vmatpush1.bf16.msra.mxu0 %v16821_v21  ;;  %v16853_v21 = vld [vmem:[%s19197_s23 + $0x2164] ss:$16 sps:$4 sm:$0xff]   ;;  %v16851_v31 = vld [vmem:[%s19197_s23 + $0x2160] ss:$16 sps:$4 sm:$0xff]  }
 0x2e4   : > { %11734 = vmatpush1.bf16.msra.mxu1 %v16824_v22  ;;  %11694 = vmatprep.subr.bf16.mxu0 %v16829_v9  ;;  %v16856_v22 = vld [vmem:[%s19197_s23 + $0x2364] ss:$16 sps:$4 sm:$0xff]   ;;  %v16854_v32 = vld [vmem:[%s19197_s23 + $0x2360] ss:$16 sps:$4 sm:$0xff]  }
 0x2e5   : > { %11735 = vmatprep.subr.bf16.mxu1 %v16832_v58  ;;  %v16862_v36 = vld [vmem:[%s19197_s23 + $0x2384] ss:$16 sps:$4 sm:$0xff]   ;;  %v16857_v43 = vld [vmem:[%s19197_s23 + $0x2180] ss:$16 sps:$4 sm:$0xff]  }
 0x2e6   : > { %v16860_v55 = vld [vmem:[%s19197_s23 + $0x2380] ss:$16 sps:$4 sm:$0xff]   ;;  %v16865_v56 = vld [vmem:[%s19197_s23 + $0x21a4] ss:$16 sps:$4 sm:$0xff]  }
 0x2e7   : > { %11695 = vmatpush1.bf16.msra.mxu0 %v16827_v13  ;;  %v16868_v45 = vld [vmem:[%s19197_s23 + $0x23a4] ss:$16 sps:$4 sm:$0xff]   ;;  %v16863_v9 = vld [vmem:[%s19197_s23 + $0x21a0] ss:$16 sps:$4 sm:$0xff]  }
 0x2e8   : > { %11736 = vmatpush1.bf16.msra.mxu1 %v16830_v0  ;;  %11696 = vmatprep.subr.bf16.mxu0 %v16835_v5  ;;  %v16866_v58 = vld [vmem:[%s19197_s23 + $0x23a0] ss:$16 sps:$4 sm:$0xff]   ;;  %v16871_v13 = vld [vmem:[%s19197_s23 + $0x21c4] ss:$16 sps:$4 sm:$0xff]  }
 0x2e9   : > { %11737 = vmatprep.subr.bf16.mxu1 %v16838_v6  ;;  %v16874_v0 = vld [vmem:[%s19197_s23 + $0x23c4] ss:$16 sps:$4 sm:$0xff]   ;;  %v16869_v5 = vld [vmem:[%s19197_s23 + $0x21c0] ss:$16 sps:$4 sm:$0xff]  }
 0x2ea   : > { %v16872_v6 = vld [vmem:[%s19197_s23 + $0x23c0] ss:$16 sps:$4 sm:$0xff]  }
 0x2eb   : > { %11697 = vmatpush1.bf16.msra.mxu0 %v16833_v10  ;;  %v16877_v10 = vld [vmem:[%s19197_s23 + $0x21e4] ss:$16 sps:$4 sm:$0xff]  }
 0x2ec   : > { %11738 = vmatpush1.bf16.msra.mxu1 %v16836_v11  ;;  %11698 = vmatprep.subr.bf16.mxu0 %v16841_v35  ;;  %v16880_v11 = vld [vmem:[%s19197_s23 + $0x23e4] ss:$16 sps:$4 sm:$0xff]   ;;  %v16875_v35 = vld [vmem:[%s19197_s23 + $0x21e0] ss:$16 sps:$4 sm:$0xff]  }
 0x2ed   : > { %11739 = vmatprep.subr.bf16.mxu1 %v16844_v12  ;;  %v16878_v12 = vld [vmem:[%s19197_s23 + $0x23e0] ss:$16 sps:$4 sm:$0xff]  }
 0x2ef   : > { %11699 = vmatpush1.bf16.msra.mxu0 %v16839_v57  ;;  %v16887_v57 = vld [vmem:[%s19197_s23 + $0x2404] ss:$16 sps:$4 sm:$0xff]  }
 0x2f0   : > { %11740 = vmatpush1.bf16.msra.mxu1 %v16842_v14  ;;  %11700 = vmatprep.subr.bf16.mxu0 %v16847_v15  ;;  %v16890_v14 = vld [vmem:[%s19197_s23 + $0x2604] ss:$16 sps:$4 sm:$0xff]   ;;  %v16885_v15 = vld [vmem:[%s19197_s23 + $0x2400] ss:$16 sps:$4 sm:$0xff]  }
 0x2f1   : > { %11741 = vmatprep.subr.bf16.mxu1 %v16850_v16  ;;  %v16888_v16 = vld [vmem:[%s19197_s23 + $0x2600] ss:$16 sps:$4 sm:$0xff]  }
 0x2f3   : > { %11701 = vmatpush1.bf16.msra.mxu0 %v16845_v19  ;;  %v20045_v19 = vcombine.low %v19956_v29, %v19956_v29 }
 0x2f4   : > { %11742 = vmatpush1.bf16.msra.mxu1 %v16848_v20  ;;  %11702 = vmatprep.subr.bf16.mxu0 %v16853_v21  ;;  %v20049_v20 = vcombine.low %v19959_v30, %v19959_v30  ;;  %v20052_v21 = vld [vmem:[%s19219_s24 + $0x90] sm:$0xff] }
 0x2f5   : > { %11743 = vmatprep.subr.bf16.mxu1 %v16856_v22  ;;  %v20055_v22 = vld [vmem:[%s19219_s24 + $0x98] sm:$0xff]  ;;  %v20061_v29 = vcombine.high %v20052_v21, %v20052_v21 }
 0x2f6   : > { %v20065_v30 = vcombine.high %v20055_v22, %v20055_v22 }
 0x2f7   : > { %11703 = vmatpush1.bf16.msra.mxu0 %v16851_v31  ;;  %v16893_v31 = vld [vmem:[%s19197_s23 + $0x2424] ss:$16 sps:$4 sm:$0xff]  }
 0x2f8   : > { %11744 = vmatpush1.bf16.msra.mxu1 %v16854_v32  ;;  %11704 = vmatprep.subr.bf16.mxu0 %v16859_v34  ;;  %v16896_v32 = vld [vmem:[%s19197_s23 + $0x2624] ss:$16 sps:$4 sm:$0xff]   ;;  %v16891_v34 = vld [vmem:[%s19197_s23 + $0x2420] ss:$16 sps:$4 sm:$0xff]  }
 0x2f9   : > { %11745 = vmatprep.subr.bf16.mxu1 %v16862_v36  ;;  %v16894_v36 = vld [vmem:[%s19197_s23 + $0x2620] ss:$16 sps:$4 sm:$0xff]  }
 0x2fb   : > { %11705 = vmatpush1.bf16.msra.mxu0 %v16857_v43  ;;  %v16899_v43 = vld [vmem:[%s19197_s23 + $0x2444] ss:$16 sps:$4 sm:$0xff]  }
 0x2fc   : > { %11746 = vmatpush1.bf16.msra.mxu1 %v16860_v55  ;;  %11706 = vmatprep.subr.bf16.mxu0 %v16865_v56  ;;  %v16902_v55 = vld [vmem:[%s19197_s23 + $0x2644] ss:$16 sps:$4 sm:$0xff]   ;;  %v16897_v56 = vld [vmem:[%s19197_s23 + $0x2440] ss:$16 sps:$4 sm:$0xff]  }
 0x2fd   : > { %11747 = vmatprep.subr.bf16.mxu1 %v16868_v45  ;;  %v16900_v45 = vld [vmem:[%s19197_s23 + $0x2640] ss:$16 sps:$4 sm:$0xff]  }
 0x2ff   : > { %11707 = vmatpush1.bf16.msra.mxu0 %v16863_v9  ;;  %v16905_v9 = vld [vmem:[%s19197_s23 + $0x2464] ss:$16 sps:$4 sm:$0xff]  }
 0x300   : > { %11748 = vmatpush1.bf16.msra.mxu1 %v16866_v58  ;;  %11708 = vmatprep.subr.bf16.mxu0 %v16871_v13  ;;  %v16908_v58 = vld [vmem:[%s19197_s23 + $0x2664] ss:$16 sps:$4 sm:$0xff]   ;;  %v16903_v13 = vld [vmem:[%s19197_s23 + $0x2460] ss:$16 sps:$4 sm:$0xff]  }
 0x301   : > { %11749 = vmatprep.subr.bf16.mxu1 %v16874_v0  ;;  %v16906_v0 = vld [vmem:[%s19197_s23 + $0x2660] ss:$16 sps:$4 sm:$0xff]  }
 0x303   : > { %11709 = vmatpush1.bf16.msra.mxu0 %v16869_v5  ;;  %v16911_v5 = vld [vmem:[%s19197_s23 + $0x2484] ss:$16 sps:$4 sm:$0xff]  }
 0x304   : > { %11750 = vmatpush1.bf16.msra.mxu1 %v16872_v6  ;;  %11710 = vmatprep.subr.bf16.mxu0 %v16877_v10  ;;  %v16914_v6 = vld [vmem:[%s19197_s23 + $0x2684] ss:$16 sps:$4 sm:$0xff]   ;;  %v16909_v10 = vld [vmem:[%s19197_s23 + $0x2480] ss:$16 sps:$4 sm:$0xff]  }
 0x305   : > { %11751 = vmatprep.subr.bf16.mxu1 %v16880_v11  ;;  %v16912_v11 = vld [vmem:[%s19197_s23 + $0x2680] ss:$16 sps:$4 sm:$0xff]  }
 0x307   : > { %11711 = vmatpush1.bf16.msra.mxu0 %v16875_v35  ;;  %v16917_v35 = vld [vmem:[%s19197_s23 + $0x24a4] ss:$16 sps:$4 sm:$0xff]  }
 0x308   : > { %11752 = vmatpush1.bf16.msra.mxu1 %v16878_v12  ;;  %11762 = vmatprep.subr.bf16.mxu0 %v16887_v57  ;;  %v16920_v12 = vld [vmem:[%s19197_s23 + $0x26a4] ss:$16 sps:$4 sm:$0xff]   ;;  %v16915_v57 = vld [vmem:[%s19197_s23 + $0x24a0] ss:$16 sps:$4 sm:$0xff]  }
 0x309   : > { %11803 = vmatprep.subr.bf16.mxu1 %v16890_v14  ;;  %v16918_v14 = vld [vmem:[%s19197_s23 + $0x26a0] ss:$16 sps:$4 sm:$0xff]  }
 0x30a   : > { %11713 = vmatmul.mubr.bf16.vlgmr.msra.gmra.mrb[32].mxu0 %v20045_v19 }
 0x30b   : > { %11754 = vmatmul.mubr.bf16.vlgmr.msra.gmra.mrb[32].mxu1 %v20049_v20  ;;  %11763 = vmatpush1.bf16.msra.mxu0 %v16885_v15  ;;  %v16923_v15 = vld [vmem:[%s19197_s23 + $0x24c4] ss:$16 sps:$4 sm:$0xff]  }
 0x30c   : > { %11804 = vmatpush1.bf16.msra.mxu1 %v16888_v16  ;;  %11764 = vmatprep.subr.bf16.mxu0 %v16893_v31  ;;  %v16926_v16 = vld [vmem:[%s19197_s23 + $0x26c4] ss:$16 sps:$4 sm:$0xff]  }
 0x30d   : > { %11805 = vmatprep.subr.bf16.mxu1 %v16896_v32  ;;  %11794 = vmatprep.mubr.bf16.mxu0 %v20061_v29 }
 0x30e   : > { %11835 = vmatprep.mubr.bf16.mxu1 %v20065_v30 }
 0x30f   : > { %11765 = vmatpush1.bf16.msra.mxu0 %v16891_v34  ;;  %v16921_v34 = vld [vmem:[%s19197_s23 + $0x24c0] ss:$16 sps:$4 sm:$0xff]  }
 0x310   : > { %11806 = vmatpush1.bf16.msra.mxu1 %v16894_v36  ;;  %11766 = vmatprep.subr.bf16.mxu0 %v16899_v43  ;;  %v16924_v36 = vld [vmem:[%s19197_s23 + $0x26c0] ss:$16 sps:$4 sm:$0xff]  }
 0x311   : > { %11807 = vmatprep.subr.bf16.mxu1 %v16902_v55 }
 0x313   : > { %11767 = vmatpush1.bf16.msra.mxu0 %v16897_v56 }
 0x314   : > { %11808 = vmatpush1.bf16.msra.mxu1 %v16900_v45  ;;  %11768 = vmatprep.subr.bf16.mxu0 %v16905_v9 }
 0x315   : > { %11809 = vmatprep.subr.bf16.mxu1 %v16908_v58 }
 0x317   : > { %11769 = vmatpush1.bf16.msra.mxu0 %v16903_v13 }
 0x318   : > { %11810 = vmatpush1.bf16.msra.mxu1 %v16906_v0  ;;  %11770 = vmatprep.subr.bf16.mxu0 %v16911_v5 }
 0x319   : > { %11811 = vmatprep.subr.bf16.mxu1 %v16914_v6  ;;  %v16932_v6 = vld [vmem:[%s19197_s23 + $0x26e4] ss:$16 sps:$4 sm:$0xff]  }
 0x31b   : > { %11771 = vmatpush1.bf16.msra.mxu0 %v16909_v10 }
 0x31c   : > { %11812 = vmatpush1.bf16.msra.mxu1 %v16912_v11  ;;  %11772 = vmatprep.subr.bf16.mxu0 %v16917_v35  ;;  %v16930_v11 = vld [vmem:[%s19197_s23 + $0x26e0] ss:$16 sps:$4 sm:$0xff]   ;;  %v16935_v35 = vld [vmem:[%s19197_s23 + $0x2504] ss:$16 sps:$4 sm:$0xff]  }
 0x31d   : > { %11813 = vmatprep.subr.bf16.mxu1 %v16920_v12  ;;  %v11468_v31 = vpop.f32.mrb[20].mxu0  ;;  %v16938_v12 = vld [vmem:[%s19197_s23 + $0x2704] ss:$16 sps:$4 sm:$0xff]  }
 0x31e   : > { %v11509_v32 = vpop.f32.mrb[20].mxu1  ;;  %v11469_v43 = vadd.f32 %v11468_v31, %v19999_v33  ;;  %v11470_v55 = vpop.f32.mrb[21].mxu0  ;;  %v16929_v33 = vld [vmem:[%s19197_s23 + $0x24e4] ss:$16 sps:$4 sm:$0xff]   ;;  %v16939_v31 = vld [vmem:[%s19197_s23 + $0x2520] ss:$16 sps:$4 sm:$0xff]  }
 0x31f   : > { %v11511_v56 = vpop.f32.mrb[21].mxu1  ;;  %v11471_v45 = vadd.f32 %v11470_v55, %v20003_v63  ;;  %v11472_v9 = vpop.f32.mrb[22].mxu0  ;;  %11773 = vmatpush1.bf16.msra.mxu0 %v16915_v57  ;;  %v16927_v63 = vld [vmem:[%s19197_s23 + $0x24e0] ss:$16 sps:$4 sm:$0xff]  }
 0x320   : > { %v11513_v58 = vpop.f32.mrb[22].mxu1  ;;  %11814 = vmatpush1.bf16.msra.mxu1 %v16918_v14  ;;  %v20095_v13 = vadd.f32 %v11509_v32, %v11469_v43  ;;  %v11473_v0 = vpop.f32.mrb[23].mxu0  ;;  %11774 = vmatprep.subr.bf16.mxu0 %v16923_v15  ;;  %v16933_v57 = vld [vmem:[%s19197_s23 + $0x2500] ss:$16 sps:$4 sm:$0xff]   ;;  %v16941_v15 = vld [vmem:[%s19197_s23 + $0x2524] ss:$16 sps:$4 sm:$0xff]  }
 0x321   : > { %v11514_v5 = vpop.f32.mrb[23].mxu1  ;;  %11815 = vmatprep.subr.bf16.mxu1 %v16926_v16  ;;  %v20099_v10 = vadd.f32 %v11511_v56, %v11471_v45  ;;  %v16936_v14 = vld [vmem:[%s19197_s23 + $0x2700] ss:$16 sps:$4 sm:$0xff]   ;;  %v16944_v16 = vld [vmem:[%s19197_s23 + $0x2724] ss:$16 sps:$4 sm:$0xff]  }
 0x322   : > { %v16942_v32 = vld [vmem:[%s19197_s23 + $0x2720] ss:$16 sps:$4 sm:$0xff]   ;;  %v16953_v56 = vld [vmem:[%s19197_s23 + $0x2564] ss:$16 sps:$4 sm:$0xff]  }
 0x323   : > { %11775 = vmatpush1.bf16.msra.mxu0 %v16921_v34  ;;  %v16947_v34 = vld [vmem:[%s19197_s23 + $0x2544] ss:$16 sps:$4 sm:$0xff]   ;;  %v16945_v43 = vld [vmem:[%s19197_s23 + $0x2540] ss:$16 sps:$4 sm:$0xff]  }
 0x324   : > { %11816 = vmatpush1.bf16.msra.mxu1 %v16924_v36  ;;  %11776 = vmatprep.subr.bf16.mxu0 %v16929_v33  ;;  %v16950_v36 = vld [vmem:[%s19197_s23 + $0x2744] ss:$16 sps:$4 sm:$0xff]   ;;  %v16948_v55 = vld [vmem:[%s19197_s23 + $0x2740] ss:$16 sps:$4 sm:$0xff]  }
 0x325   : > { %11817 = vmatprep.subr.bf16.mxu1 %v16932_v6  ;;  %v16956_v45 = vld [vmem:[%s19197_s23 + $0x2764] ss:$16 sps:$4 sm:$0xff]   ;;  %v16951_v9 = vld [vmem:[%s19197_s23 + $0x2560] ss:$16 sps:$4 sm:$0xff]  }
 0x326   : > { %v16954_v58 = vld [vmem:[%s19197_s23 + $0x2760] ss:$16 sps:$4 sm:$0xff]   ;;  %v16959_v0 = vld [vmem:[%s19197_s23 + $0x2584] ss:$16 sps:$4 sm:$0xff]  }
 0x327   : > { %11777 = vmatpush1.bf16.msra.mxu0 %v16927_v63  ;;  %v16962_v5 = vld [vmem:[%s19197_s23 + $0x2784] ss:$16 sps:$4 sm:$0xff]   ;;  %v16957_v33 = vld [vmem:[%s19197_s23 + $0x2580] ss:$16 sps:$4 sm:$0xff]  }
 0x328   : > { %11818 = vmatpush1.bf16.msra.mxu1 %v16930_v11  ;;  %11778 = vmatprep.subr.bf16.mxu0 %v16935_v35  ;;  %v16960_v6 = vld [vmem:[%s19197_s23 + $0x2780] ss:$16 sps:$4 sm:$0xff]   ;;  %v16965_v63 = vld [vmem:[%s19197_s23 + $0x25a4] ss:$16 sps:$4 sm:$0xff]  }
 0x329   : > { %11819 = vmatprep.subr.bf16.mxu1 %v16938_v12  ;;  %v16968_v11 = vld [vmem:[%s19197_s23 + $0x27a4] ss:$16 sps:$4 sm:$0xff]   ;;  %v16963_v35 = vld [vmem:[%s19197_s23 + $0x25a0] ss:$16 sps:$4 sm:$0xff]  }
 0x32a   : > { %v16966_v12 = vld [vmem:[%s19197_s23 + $0x27a0] ss:$16 sps:$4 sm:$0xff]  }
 0x32b   : > { %11779 = vmatpush1.bf16.msra.mxu0 %v16933_v57  ;;  %v16971_v57 = vld [vmem:[%s19197_s23 + $0x25c4] ss:$16 sps:$4 sm:$0xff]  }
 0x32c   : > { %11820 = vmatpush1.bf16.msra.mxu1 %v16936_v14  ;;  %11780 = vmatprep.subr.bf16.mxu0 %v16941_v15  ;;  %v16974_v14 = vld [vmem:[%s19197_s23 + $0x27c4] ss:$16 sps:$4 sm:$0xff]   ;;  %v16969_v15 = vld [vmem:[%s19197_s23 + $0x25c0] ss:$16 sps:$4 sm:$0xff]  }
 0x32d   : > { %11821 = vmatprep.subr.bf16.mxu1 %v16944_v16  ;;  %v16972_v16 = vld [vmem:[%s19197_s23 + $0x27c0] ss:$16 sps:$4 sm:$0xff]  }
 0x32f   : > { %11781 = vmatpush1.bf16.msra.mxu0 %v16939_v31  ;;  %v16977_v31 = vld [vmem:[%s19197_s23 + $0x25e4] ss:$16 sps:$4 sm:$0xff]  }
 0x330   : > { %11822 = vmatpush1.bf16.msra.mxu1 %v16942_v32  ;;  %11782 = vmatprep.subr.bf16.mxu0 %v16947_v34  ;;  %v16980_v32 = vld [vmem:[%s19197_s23 + $0x27e4] ss:$16 sps:$4 sm:$0xff]   ;;  %v16975_v34 = vld [vmem:[%s19197_s23 + $0x25e0] ss:$16 sps:$4 sm:$0xff]  }
 0x331   : > { %11823 = vmatprep.subr.bf16.mxu1 %v16950_v36  ;;  %v16978_v36 = vld [vmem:[%s19197_s23 + $0x27e0] ss:$16 sps:$4 sm:$0xff]  }
 0x333   : > { %11783 = vmatpush1.bf16.msra.mxu0 %v16945_v43  ;;  %v16987_v43 = vld [vmem:[%s19197_s23 + $0x2804] ss:$16 sps:$4 sm:$0xff]  }
 0x334   : > { %11824 = vmatpush1.bf16.msra.mxu1 %v16948_v55  ;;  %11784 = vmatprep.subr.bf16.mxu0 %v16953_v56  ;;  %v16990_v55 = vld [vmem:[%s19197_s23 + $0x2a04] ss:$16 sps:$4 sm:$0xff]   ;;  %v16985_v56 = vld [vmem:[%s19197_s23 + $0x2800] ss:$16 sps:$4 sm:$0xff]  }
 0x335   : > { %11825 = vmatprep.subr.bf16.mxu1 %v16956_v45  ;;  %v16988_v45 = vld [vmem:[%s19197_s23 + $0x2a00] ss:$16 sps:$4 sm:$0xff]  }
 0x337   : > { %11785 = vmatpush1.bf16.msra.mxu0 %v16951_v9  ;;  %v20141_v9 = vcombine.low %v20052_v21, %v20052_v21 }
 0x338   : > { %11826 = vmatpush1.bf16.msra.mxu1 %v16954_v58  ;;  %11786 = vmatprep.subr.bf16.mxu0 %v16959_v0  ;;  %v20145_v58 = vcombine.low %v20055_v22, %v20055_v22  ;;  %v20148_v0 = vld [vmem:[%s19219_s24 + $0xa0] sm:$0xff] }
 0x339   : > { %11827 = vmatprep.subr.bf16.mxu1 %v16962_v5  ;;  %v20151_v5 = vld [vmem:[%s19219_s24 + $0xa8] sm:$0xff]  ;;  %v20157_v21 = vcombine.high %v20148_v0, %v20148_v0 }
 0x33a   : > { %v20161_v22 = vcombine.high %v20151_v5, %v20151_v5 }
 0x33b   : > { %11787 = vmatpush1.bf16.msra.mxu0 %v16957_v33  ;;  %v16993_v33 = vld [vmem:[%s19197_s23 + $0x2824] ss:$16 sps:$4 sm:$0xff]  }
 0x33c   : > { %11828 = vmatpush1.bf16.msra.mxu1 %v16960_v6  ;;  %11788 = vmatprep.subr.bf16.mxu0 %v16965_v63  ;;  %v16996_v6 = vld [vmem:[%s19197_s23 + $0x2a24] ss:$16 sps:$4 sm:$0xff]   ;;  %21569 = vst [vmem:[#allocation17_spill] sm:$0xff] %v20161_v22  ;;  %v16991_v63 = vld [vmem:[%s19197_s23 + $0x2820] ss:$16 sps:$4 sm:$0xff]  }
 0x33d   : > { %11829 = vmatprep.subr.bf16.mxu1 %v16968_v11  ;;  %v16994_v11 = vld [vmem:[%s19197_s23 + $0x2a20] ss:$16 sps:$4 sm:$0xff]  }
 0x33f   : > { %11789 = vmatpush1.bf16.msra.mxu0 %v16963_v35  ;;  %v16999_v35 = vld [vmem:[%s19197_s23 + $0x2844] ss:$16 sps:$4 sm:$0xff]  }
 0x340   : > { %11830 = vmatpush1.bf16.msra.mxu1 %v16966_v12  ;;  %11790 = vmatprep.subr.bf16.mxu0 %v16971_v57  ;;  %v17002_v12 = vld [vmem:[%s19197_s23 + $0x2a44] ss:$16 sps:$4 sm:$0xff]   ;;  %v16997_v57 = vld [vmem:[%s19197_s23 + $0x2840] ss:$16 sps:$4 sm:$0xff]  }
 0x341   : > { %11831 = vmatprep.subr.bf16.mxu1 %v16974_v14  ;;  %v17000_v14 = vld [vmem:[%s19197_s23 + $0x2a40] ss:$16 sps:$4 sm:$0xff]  }
 0x343   : > { %11791 = vmatpush1.bf16.msra.mxu0 %v16969_v15  ;;  %v17005_v15 = vld [vmem:[%s19197_s23 + $0x2864] ss:$16 sps:$4 sm:$0xff]  }
 0x344   : > { %11832 = vmatpush1.bf16.msra.mxu1 %v16972_v16  ;;  %11792 = vmatprep.subr.bf16.mxu0 %v16977_v31  ;;  %v17008_v16 = vld [vmem:[%s19197_s23 + $0x2a64] ss:$16 sps:$4 sm:$0xff]   ;;  %v17003_v31 = vld [vmem:[%s19197_s23 + $0x2860] ss:$16 sps:$4 sm:$0xff]  }
 0x345   : > { %11833 = vmatprep.subr.bf16.mxu1 %v16980_v32  ;;  %v17006_v32 = vld [vmem:[%s19197_s23 + $0x2a60] ss:$16 sps:$4 sm:$0xff]  }
 0x347   : > { %11793 = vmatpush1.bf16.msra.mxu0 %v16975_v34  ;;  %v17011_v34 = vld [vmem:[%s19197_s23 + $0x2884] ss:$16 sps:$4 sm:$0xff]  }
 0x348   : > { %11834 = vmatpush1.bf16.msra.mxu1 %v16978_v36  ;;  %11844 = vmatprep.subr.bf16.mxu0 %v16987_v43  ;;  %v17014_v36 = vld [vmem:[%s19197_s23 + $0x2a84] ss:$16 sps:$4 sm:$0xff]   ;;  %v17009_v43 = vld [vmem:[%s19197_s23 + $0x2880] ss:$16 sps:$4 sm:$0xff]  }
 0x349   : > { %11885 = vmatprep.subr.bf16.mxu1 %v16990_v55  ;;  %v17012_v55 = vld [vmem:[%s19197_s23 + $0x2a80] ss:$16 sps:$4 sm:$0xff]  }
 0x34a   : > { %11795 = vmatmul.mubr.bf16.vlgmr.msra.gmra.mrb[36].mxu0 %v20141_v9 }
 0x34b   : > { %11836 = vmatmul.mubr.bf16.vlgmr.msra.gmra.mrb[36].mxu1 %v20145_v58  ;;  %11845 = vmatpush1.bf16.msra.mxu0 %v16985_v56  ;;  %v17017_v56 = vld [vmem:[%s19197_s23 + $0x28a4] ss:$16 sps:$4 sm:$0xff]  }
 0x34c   : > { %11886 = vmatpush1.bf16.msra.mxu1 %v16988_v45  ;;  %11846 = vmatprep.subr.bf16.mxu0 %v16993_v33  ;;  %v17020_v45 = vld [vmem:[%s19197_s23 + $0x2aa4] ss:$16 sps:$4 sm:$0xff]   ;;  %v17015_v33 = vld [vmem:[%s19197_s23 + $0x28a0] ss:$16 sps:$4 sm:$0xff]  }
 0x34d   : > { %11887 = vmatprep.subr.bf16.mxu1 %v16996_v6  ;;  %11876 = vmatprep.mubr.bf16.mxu0 %v20157_v21  ;;  %v17018_v6 = vld [vmem:[%s19197_s23 + $0x2aa0] ss:$16 sps:$4 sm:$0xff]  }
 0x34e   : > { %11917 = vmatprep.mubr.bf16.mxu1 %v20161_v22 }
 0x34f   : > { %11847 = vmatpush1.bf16.msra.mxu0 %v16991_v63  ;;  %v17023_v63 = vld [vmem:[%s19197_s23 + $0x28c4] ss:$16 sps:$4 sm:$0xff]  }
 0x350   : > { %11888 = vmatpush1.bf16.msra.mxu1 %v16994_v11  ;;  %11848 = vmatprep.subr.bf16.mxu0 %v16999_v35  ;;  %v17026_v11 = vld [vmem:[%s19197_s23 + $0x2ac4] ss:$16 sps:$4 sm:$0xff]  }
 0x351   : > { %11889 = vmatprep.subr.bf16.mxu1 %v17002_v12 }
 0x353   : > { %11849 = vmatpush1.bf16.msra.mxu0 %v16997_v57  ;;  %v17021_v57 = vld [vmem:[%s19197_s23 + $0x28c0] ss:$16 sps:$4 sm:$0xff]  }
 0x354   : > { %11890 = vmatpush1.bf16.msra.mxu1 %v17000_v14  ;;  %11850 = vmatprep.subr.bf16.mxu0 %v17005_v15  ;;  %v17024_v14 = vld [vmem:[%s19197_s23 + $0x2ac0] ss:$16 sps:$4 sm:$0xff]  }
 0x355   : > { %11891 = vmatprep.subr.bf16.mxu1 %v17008_v16 }
 0x357   : > { %11851 = vmatpush1.bf16.msra.mxu0 %v17003_v31 }
 0x358   : > { %11892 = vmatpush1.bf16.msra.mxu1 %v17006_v32  ;;  %11852 = vmatprep.subr.bf16.mxu0 %v17011_v34 }
 0x359   : > { %11893 = vmatprep.subr.bf16.mxu1 %v17014_v36 }
 0x35b   : > { %11853 = vmatpush1.bf16.msra.mxu0 %v17009_v43 }
 0x35c   : > { %11894 = vmatpush1.bf16.msra.mxu1 %v17012_v55  ;;  %11854 = vmatprep.subr.bf16.mxu0 %v17017_v56 }
 0x35d   : > { %11895 = vmatprep.subr.bf16.mxu1 %v17020_v45  ;;  %v11550_v35 = vpop.f32.mrb[24].mxu0  ;;  %v17032_v45 = vld [vmem:[%s19197_s23 + $0x2ae4] ss:$16 sps:$4 sm:$0xff]  }
 0x35e   : > { %v11591_v12 = vpop.f32.mrb[24].mxu1  ;;  %v11551_v15 = vadd.f32 %v11550_v35, %v20095_v13  ;;  %v11552_v16 = vpop.f32.mrb[25].mxu0  ;;  %v17029_v13 = vld [vmem:[%s19197_s23 + $0x28e4] ss:$16 sps:$4 sm:$0xff]  }
 0x35f   : > { %v11593_v31 = vpop.f32.mrb[25].mxu1  ;;  %v11553_v32 = vadd.f32 %v11552_v16, %v20099_v10  ;;  %v11554_v34 = vpop.f32.mrb[26].mxu0  ;;  %11855 = vmatpush1.bf16.msra.mxu0 %v17015_v33  ;;  %v17027_v10 = vld [vmem:[%s19197_s23 + $0x28e0] ss:$16 sps:$4 sm:$0xff]  }
 0x360   : > { %v11595_v36 = vpop.f32.mrb[26].mxu1  ;;  %11896 = vmatpush1.bf16.msra.mxu1 %v17018_v6  ;;  %v20191_v43 = vadd.f32 %v11591_v12, %v11551_v15  ;;  %v11555_v55 = vpop.f32.mrb[27].mxu0  ;;  %11856 = vmatprep.subr.bf16.mxu0 %v17023_v63  ;;  %v17030_v33 = vld [vmem:[%s19197_s23 + $0x2ae0] ss:$16 sps:$4 sm:$0xff]   ;;  %v17035_v6 = vld [vmem:[%s19197_s23 + $0x2904] ss:$16 sps:$4 sm:$0xff]  }
 0x361   : > { %v11596_v56 = vpop.f32.mrb[27].mxu1  ;;  %11897 = vmatprep.subr.bf16.mxu1 %v17026_v11  ;;  %v20195_v35 = vadd.f32 %v11593_v31, %v11553_v32  ;;  %v17038_v12 = vld [vmem:[%s19197_s23 + $0x2b04] ss:$16 sps:$4 sm:$0xff]   ;;  %v17033_v63 = vld [vmem:[%s19197_s23 + $0x2900] ss:$16 sps:$4 sm:$0xff]  }
 0x362   : > { %v17036_v11 = vld [vmem:[%s19197_s23 + $0x2b00] ss:$16 sps:$4 sm:$0xff]   ;;  %v17047_v31 = vld [vmem:[%s19197_s23 + $0x2944] ss:$16 sps:$4 sm:$0xff]  }
 0x363   : > { %11857 = vmatpush1.bf16.msra.mxu0 %v17021_v57  ;;  %v17041_v57 = vld [vmem:[%s19197_s23 + $0x2924] ss:$16 sps:$4 sm:$0xff]   ;;  %v17039_v15 = vld [vmem:[%s19197_s23 + $0x2920] ss:$16 sps:$4 sm:$0xff]  }
 0x364   : > { %11898 = vmatpush1.bf16.msra.mxu1 %v17024_v14  ;;  %11858 = vmatprep.subr.bf16.mxu0 %v17029_v13  ;;  %v17044_v14 = vld [vmem:[%s19197_s23 + $0x2b24] ss:$16 sps:$4 sm:$0xff]   ;;  %v17042_v16 = vld [vmem:[%s19197_s23 + $0x2b20] ss:$16 sps:$4 sm:$0xff]  }
 0x365   : > { %11899 = vmatprep.subr.bf16.mxu1 %v17032_v45  ;;  %v17050_v32 = vld [vmem:[%s19197_s23 + $0x2b44] ss:$16 sps:$4 sm:$0xff]   ;;  %v17045_v34 = vld [vmem:[%s19197_s23 + $0x2940] ss:$16 sps:$4 sm:$0xff]  }
 0x366   : > { %v17048_v36 = vld [vmem:[%s19197_s23 + $0x2b40] ss:$16 sps:$4 sm:$0xff]   ;;  %v17053_v55 = vld [vmem:[%s19197_s23 + $0x2964] ss:$16 sps:$4 sm:$0xff]  }
 0x367   : > { %11859 = vmatpush1.bf16.msra.mxu0 %v17027_v10  ;;  %v17056_v56 = vld [vmem:[%s19197_s23 + $0x2b64] ss:$16 sps:$4 sm:$0xff]   ;;  %v17051_v13 = vld [vmem:[%s19197_s23 + $0x2960] ss:$16 sps:$4 sm:$0xff]  }
 0x368   : > { %11900 = vmatpush1.bf16.msra.mxu1 %v17030_v33  ;;  %11860 = vmatprep.subr.bf16.mxu0 %v17035_v6  ;;  %v17054_v45 = vld [vmem:[%s19197_s23 + $0x2b60] ss:$16 sps:$4 sm:$0xff]   ;;  %v17059_v10 = vld [vmem:[%s19197_s23 + $0x2984] ss:$16 sps:$4 sm:$0xff]  }
 0x369   : > { %11901 = vmatprep.subr.bf16.mxu1 %v17038_v12  ;;  %v17062_v33 = vld [vmem:[%s19197_s23 + $0x2b84] ss:$16 sps:$4 sm:$0xff]   ;;  %v17057_v6 = vld [vmem:[%s19197_s23 + $0x2980] ss:$16 sps:$4 sm:$0xff]  }
 0x36a   : > { %v17060_v12 = vld [vmem:[%s19197_s23 + $0x2b80] ss:$16 sps:$4 sm:$0xff]  }
 0x36b   : > { %11861 = vmatpush1.bf16.msra.mxu0 %v17033_v63  ;;  %v17065_v63 = vld [vmem:[%s19197_s23 + $0x29a4] ss:$16 sps:$4 sm:$0xff]  }
 0x36c   : > { %11902 = vmatpush1.bf16.msra.mxu1 %v17036_v11  ;;  %11862 = vmatprep.subr.bf16.mxu0 %v17041_v57  ;;  %v17068_v11 = vld [vmem:[%s19197_s23 + $0x2ba4] ss:$16 sps:$4 sm:$0xff]   ;;  %v17063_v57 = vld [vmem:[%s19197_s23 + $0x29a0] ss:$16 sps:$4 sm:$0xff]  }
 0x36d   : > { %11903 = vmatprep.subr.bf16.mxu1 %v17044_v14  ;;  %v17066_v14 = vld [vmem:[%s19197_s23 + $0x2ba0] ss:$16 sps:$4 sm:$0xff]  }
 0x36f   : > { %11863 = vmatpush1.bf16.msra.mxu0 %v17039_v15  ;;  %v17071_v15 = vld [vmem:[%s19197_s23 + $0x29c4] ss:$16 sps:$4 sm:$0xff]  }
 0x370   : > { %11904 = vmatpush1.bf16.msra.mxu1 %v17042_v16  ;;  %11864 = vmatprep.subr.bf16.mxu0 %v17047_v31  ;;  %v17074_v16 = vld [vmem:[%s19197_s23 + $0x2bc4] ss:$16 sps:$4 sm:$0xff]   ;;  %v17069_v31 = vld [vmem:[%s19197_s23 + $0x29c0] ss:$16 sps:$4 sm:$0xff]  }
 0x371   : > { %11905 = vmatprep.subr.bf16.mxu1 %v17050_v32  ;;  %v17072_v32 = vld [vmem:[%s19197_s23 + $0x2bc0] ss:$16 sps:$4 sm:$0xff]  }
 0x373   : > { %11865 = vmatpush1.bf16.msra.mxu0 %v17045_v34  ;;  %v17077_v34 = vld [vmem:[%s19197_s23 + $0x29e4] ss:$16 sps:$4 sm:$0xff]  }
 0x374   : > { %11906 = vmatpush1.bf16.msra.mxu1 %v17048_v36  ;;  %11866 = vmatprep.subr.bf16.mxu0 %v17053_v55  ;;  %v17080_v36 = vld [vmem:[%s19197_s23 + $0x2be4] ss:$16 sps:$4 sm:$0xff]   ;;  %v17075_v55 = vld [vmem:[%s19197_s23 + $0x29e0] ss:$16 sps:$4 sm:$0xff]  }
 0x375   : > { %11907 = vmatprep.subr.bf16.mxu1 %v17056_v56  ;;  %v17078_v56 = vld [vmem:[%s19197_s23 + $0x2be0] ss:$16 sps:$4 sm:$0xff]  }
 0x377   : > { %11867 = vmatpush1.bf16.msra.mxu0 %v17051_v13  ;;  %v17087_v13 = vld [vmem:[%s19197_s23 + $0x2c04] ss:$16 sps:$4 sm:$0xff]  }
 0x378   : > { %11908 = vmatpush1.bf16.msra.mxu1 %v17054_v45  ;;  %11868 = vmatprep.subr.bf16.mxu0 %v17059_v10  ;;  %v17090_v45 = vld [vmem:[%s19197_s23 + $0x2e04] ss:$16 sps:$4 sm:$0xff]   ;;  %v17085_v10 = vld [vmem:[%s19197_s23 + $0x2c00] ss:$16 sps:$4 sm:$0xff]  }
 0x379   : > { %11909 = vmatprep.subr.bf16.mxu1 %v17062_v33  ;;  %v17088_v33 = vld [vmem:[%s19197_s23 + $0x2e00] ss:$16 sps:$4 sm:$0xff]  }
 0x37b   : > { %11869 = vmatpush1.bf16.msra.mxu0 %v17057_v6  ;;  %v20237_v6 = vcombine.low %v20148_v0, %v20148_v0 }
 0x37c   : > { %11910 = vmatpush1.bf16.msra.mxu1 %v17060_v12  ;;  %11870 = vmatprep.subr.bf16.mxu0 %v17065_v63  ;;  %v20241_v12 = vcombine.low %v20151_v5, %v20151_v5  ;;  %v20244_v63 = vld [vmem:[%s19219_s24 + $0xb0] sm:$0xff] }
 0x37d   : > { %11911 = vmatprep.subr.bf16.mxu1 %v17068_v11  ;;  %v20247_v11 = vld [vmem:[%s19219_s24 + $0xb8] sm:$0xff]  ;;  %v20253_v0 = vcombine.high %v20244_v63, %v20244_v63 }
 0x37e   : > { %21570 = vst [vmem:[#allocation18_spill] sm:$0xff] %v20241_v12  ;;  %v20257_v5 = vcombine.high %v20247_v11, %v20247_v11 }
 0x37f   : > { %11871 = vmatpush1.bf16.msra.mxu0 %v17063_v57  ;;  %v17093_v57 = vld [vmem:[%s19197_s23 + $0x2c24] ss:$16 sps:$4 sm:$0xff]   ;;  %21571 = vst [vmem:[#allocation19_spill] sm:$0xff] %v20253_v0 }
 0x380   : > { %11912 = vmatpush1.bf16.msra.mxu1 %v17066_v14  ;;  %11872 = vmatprep.subr.bf16.mxu0 %v17071_v15  ;;  %v17096_v14 = vld [vmem:[%s19197_s23 + $0x2e24] ss:$16 sps:$4 sm:$0xff]   ;;  %21572 = vst [vmem:[#allocation20_spill] sm:$0xff] %v20257_v5  ;;  %v17091_v15 = vld [vmem:[%s19197_s23 + $0x2c20] ss:$16 sps:$4 sm:$0xff]  }
 0x381   : > { %11913 = vmatprep.subr.bf16.mxu1 %v17074_v16  ;;  %v17094_v16 = vld [vmem:[%s19197_s23 + $0x2e20] ss:$16 sps:$4 sm:$0xff]  }
 0x383   : > { %11873 = vmatpush1.bf16.msra.mxu0 %v17069_v31  ;;  %v17099_v31 = vld [vmem:[%s19197_s23 + $0x2c44] ss:$16 sps:$4 sm:$0xff]  }
 0x384   : > { %11914 = vmatpush1.bf16.msra.mxu1 %v17072_v32  ;;  %11874 = vmatprep.subr.bf16.mxu0 %v17077_v34  ;;  %v17102_v32 = vld [vmem:[%s19197_s23 + $0x2e44] ss:$16 sps:$4 sm:$0xff]   ;;  %v17097_v34 = vld [vmem:[%s19197_s23 + $0x2c40] ss:$16 sps:$4 sm:$0xff]  }
 0x385   : > { %11915 = vmatprep.subr.bf16.mxu1 %v17080_v36  ;;  %v17100_v36 = vld [vmem:[%s19197_s23 + $0x2e40] ss:$16 sps:$4 sm:$0xff]  }
 0x387   : > { %11875 = vmatpush1.bf16.msra.mxu0 %v17075_v55  ;;  %v17105_v55 = vld [vmem:[%s19197_s23 + $0x2c64] ss:$16 sps:$4 sm:$0xff]  }
 0x388   : > { %11916 = vmatpush1.bf16.msra.mxu1 %v17078_v56  ;;  %11926 = vmatprep.subr.bf16.mxu0 %v17087_v13  ;;  %v17108_v56 = vld [vmem:[%s19197_s23 + $0x2e64] ss:$16 sps:$4 sm:$0xff]   ;;  %v17103_v13 = vld [vmem:[%s19197_s23 + $0x2c60] ss:$16 sps:$4 sm:$0xff]  }
 0x389   : > { %11967 = vmatprep.subr.bf16.mxu1 %v17090_v45  ;;  %v17106_v45 = vld [vmem:[%s19197_s23 + $0x2e60] ss:$16 sps:$4 sm:$0xff]  }
 0x38a   : > { %11877 = vmatmul.mubr.bf16.vlgmr.msra.gmra.mrb[40].mxu0 %v20237_v6 }
 0x38b   : > { %11918 = vmatmul.mubr.bf16.vlgmr.msra.gmra.mrb[40].mxu1 %v20241_v12  ;;  %11927 = vmatpush1.bf16.msra.mxu0 %v17085_v10  ;;  %v17111_v10 = vld [vmem:[%s19197_s23 + $0x2c84] ss:$16 sps:$4 sm:$0xff]  }
 0x38c   : > { %11968 = vmatpush1.bf16.msra.mxu1 %v17088_v33  ;;  %11928 = vmatprep.subr.bf16.mxu0 %v17093_v57  ;;  %v17114_v33 = vld [vmem:[%s19197_s23 + $0x2e84] ss:$16 sps:$4 sm:$0xff]   ;;  %v17109_v57 = vld [vmem:[%s19197_s23 + $0x2c80] ss:$16 sps:$4 sm:$0xff]  }
 0x38d   : > { %11969 = vmatprep.subr.bf16.mxu1 %v17096_v14  ;;  %11958 = vmatprep.mubr.bf16.mxu0 %v20253_v0  ;;  %v17112_v14 = vld [vmem:[%s19197_s23 + $0x2e80] ss:$16 sps:$4 sm:$0xff]  }
 0x38e   : > { %11999 = vmatprep.mubr.bf16.mxu1 %v20257_v5 }
 0x38f   : > { %11929 = vmatpush1.bf16.msra.mxu0 %v17091_v15  ;;  %v17117_v15 = vld [vmem:[%s19197_s23 + $0x2ca4] ss:$16 sps:$4 sm:$0xff]  }
 0x390   : > { %11970 = vmatpush1.bf16.msra.mxu1 %v17094_v16  ;;  %11930 = vmatprep.subr.bf16.mxu0 %v17099_v31  ;;  %v17120_v16 = vld [vmem:[%s19197_s23 + $0x2ea4] ss:$16 sps:$4 sm:$0xff]   ;;  %v17115_v31 = vld [vmem:[%s19197_s23 + $0x2ca0] ss:$16 sps:$4 sm:$0xff]  }
 0x391   : > { %11971 = vmatprep.subr.bf16.mxu1 %v17102_v32  ;;  %v17118_v32 = vld [vmem:[%s19197_s23 + $0x2ea0] ss:$16 sps:$4 sm:$0xff]  }
 0x393   : > { %11931 = vmatpush1.bf16.msra.mxu0 %v17097_v34  ;;  %v17123_v34 = vld [vmem:[%s19197_s23 + $0x2cc4] ss:$16 sps:$4 sm:$0xff]  }
 0x394   : > { %11972 = vmatpush1.bf16.msra.mxu1 %v17100_v36  ;;  %11932 = vmatprep.subr.bf16.mxu0 %v17105_v55  ;;  %v17126_v36 = vld [vmem:[%s19197_s23 + $0x2ec4] ss:$16 sps:$4 sm:$0xff]  }
 0x395   : > { %11973 = vmatprep.subr.bf16.mxu1 %v17108_v56 }
 0x397   : > { %11933 = vmatpush1.bf16.msra.mxu0 %v17103_v13  ;;  %v17121_v13 = vld [vmem:[%s19197_s23 + $0x2cc0] ss:$16 sps:$4 sm:$0xff]  }
 0x398   : > { %11974 = vmatpush1.bf16.msra.mxu1 %v17106_v45  ;;  %11934 = vmatprep.subr.bf16.mxu0 %v17111_v10  ;;  %v17124_v45 = vld [vmem:[%s19197_s23 + $0x2ec0] ss:$16 sps:$4 sm:$0xff]  }
 0x399   : > { %11975 = vmatprep.subr.bf16.mxu1 %v17114_v33 }
 0x39b   : > { %11935 = vmatpush1.bf16.msra.mxu0 %v17109_v57 }
 0x39c   : > { %11976 = vmatpush1.bf16.msra.mxu1 %v17112_v14  ;;  %11936 = vmatprep.subr.bf16.mxu0 %v17117_v15 }
 0x39d   : > { %11977 = vmatprep.subr.bf16.mxu1 %v17120_v16  ;;  %v11632_v55 = vpop.f32.mrb[28].mxu0 }
 0x39e   : > { %v11673_v56 = vpop.f32.mrb[28].mxu1  ;;  %v11633_v5 = vadd.f32 %v11632_v55, %v20191_v43  ;;  %v11634_v10 = vpop.f32.mrb[29].mxu0  ;;  %v17129_v43 = vld [vmem:[%s19197_s23 + $0x2ce4] ss:$16 sps:$4 sm:$0xff]  }
 0x39f   : > { %v11675_v33 = vpop.f32.mrb[29].mxu1  ;;  %v11635_v12 = vadd.f32 %v11634_v10, %v20195_v35  ;;  %v11636_v57 = vpop.f32.mrb[30].mxu0  ;;  %11937 = vmatpush1.bf16.msra.mxu0 %v17115_v31  ;;  %v17132_v55 = vld [vmem:[%s19197_s23 + $0x2ee4] ss:$16 sps:$4 sm:$0xff]   ;;  %v17127_v35 = vld [vmem:[%s19197_s23 + $0x2ce0] ss:$16 sps:$4 sm:$0xff]  }
 0x3a0   : > { %v11677_v14 = vpop.f32.mrb[30].mxu1  ;;  %11978 = vmatpush1.bf16.msra.mxu1 %v17118_v32  ;;  %v20287_v15 = vadd.f32 %v11673_v56, %v11633_v5  ;;  %v11637_v16 = vpop.f32.mrb[31].mxu0  ;;  %11938 = vmatprep.subr.bf16.mxu0 %v17123_v34  ;;  %v17130_v31 = vld [vmem:[%s19197_s23 + $0x2ee0] ss:$16 sps:$4 sm:$0xff]   ;;  %v17135_v5 = vld [vmem:[%s19197_s23 + $0x2d04] ss:$16 sps:$4 sm:$0xff]  }
 0x3a1   : > { %v11678_v0 = vpop.f32.mrb[31].mxu1  ;;  %11979 = vmatprep.subr.bf16.mxu1 %v17126_v36  ;;  %v20291_v22 = vadd.f32 %v11675_v33, %v11635_v12  ;;  %v17133_v32 = vld [vmem:[%s19197_s23 + $0x2d00] ss:$16 sps:$4 sm:$0xff]   ;;  %v17141_v12 = vld [vmem:[%s19197_s23 + $0x2d24] ss:$16 sps:$4 sm:$0xff]  }
 0x3a2   : > { %v17138_v0 = vld [vmem:[%s19197_s23 + $0x2f04] ss:$16 sps:$4 sm:$0xff]   ;;  %v17136_v34 = vld [vmem:[%s19197_s23 + $0x2f00] ss:$16 sps:$4 sm:$0xff]  }
 0x3a3   : > { %11939 = vmatpush1.bf16.msra.mxu0 %v17121_v13  ;;  %v17144_v36 = vld [vmem:[%s19197_s23 + $0x2f24] ss:$16 sps:$4 sm:$0xff]   ;;  %v17139_v56 = vld [vmem:[%s19197_s23 + $0x2d20] ss:$16 sps:$4 sm:$0xff]  }
 0x3a4   : > { %11980 = vmatpush1.bf16.msra.mxu1 %v17124_v45  ;;  %11940 = vmatprep.subr.bf16.mxu0 %v17129_v43  ;;  %v17142_v13 = vld [vmem:[%s19197_s23 + $0x2f20] ss:$16 sps:$4 sm:$0xff]   ;;  %v17147_v45 = vld [vmem:[%s19197_s23 + $0x2d44] ss:$16 sps:$4 sm:$0xff]  }
 0x3a5   : > { %11981 = vmatprep.subr.bf16.mxu1 %v17132_v55  ;;  %v17150_v10 = vld [vmem:[%s19197_s23 + $0x2f44] ss:$16 sps:$4 sm:$0xff]   ;;  %v17145_v33 = vld [vmem:[%s19197_s23 + $0x2d40] ss:$16 sps:$4 sm:$0xff]  }
 0x3a6   : > { %v17148_v57 = vld [vmem:[%s19197_s23 + $0x2f40] ss:$16 sps:$4 sm:$0xff]   ;;  %v17153_v14 = vld [vmem:[%s19197_s23 + $0x2d64] ss:$16 sps:$4 sm:$0xff]  }
 0x3a7   : > { %11941 = vmatpush1.bf16.msra.mxu0 %v17127_v35  ;;  %v17156_v16 = vld [vmem:[%s19197_s23 + $0x2f64] ss:$16 sps:$4 sm:$0xff]   ;;  %v17151_v43 = vld [vmem:[%s19197_s23 + $0x2d60] ss:$16 sps:$4 sm:$0xff]  }
 0x3a8   : > { %11982 = vmatpush1.bf16.msra.mxu1 %v17130_v31  ;;  %11942 = vmatprep.subr.bf16.mxu0 %v17135_v5  ;;  %v17154_v55 = vld [vmem:[%s19197_s23 + $0x2f60] ss:$16 sps:$4 sm:$0xff]   ;;  %v17159_v35 = vld [vmem:[%s19197_s23 + $0x2d84] ss:$16 sps:$4 sm:$0xff]  }
 0x3a9   : > { %11983 = vmatprep.subr.bf16.mxu1 %v17138_v0  ;;  %v17162_v31 = vld [vmem:[%s19197_s23 + $0x2f84] ss:$16 sps:$4 sm:$0xff]   ;;  %v17157_v5 = vld [vmem:[%s19197_s23 + $0x2d80] ss:$16 sps:$4 sm:$0xff]  }
 0x3aa   : > { %v17160_v0 = vld [vmem:[%s19197_s23 + $0x2f80] ss:$16 sps:$4 sm:$0xff]  }
 0x3ab   : > { %11943 = vmatpush1.bf16.msra.mxu0 %v17133_v32  ;;  %v17165_v32 = vld [vmem:[%s19197_s23 + $0x2da4] ss:$16 sps:$4 sm:$0xff]  }
 0x3ac   : > { %11984 = vmatpush1.bf16.msra.mxu1 %v17136_v34  ;;  %11944 = vmatprep.subr.bf16.mxu0 %v17141_v12  ;;  %v17168_v34 = vld [vmem:[%s19197_s23 + $0x2fa4] ss:$16 sps:$4 sm:$0xff]   ;;  %v17163_v12 = vld [vmem:[%s19197_s23 + $0x2da0] ss:$16 sps:$4 sm:$0xff]  }
 0x3ad   : > { %11985 = vmatprep.subr.bf16.mxu1 %v17144_v36  ;;  %v17166_v36 = vld [vmem:[%s19197_s23 + $0x2fa0] ss:$16 sps:$4 sm:$0xff]  }
 0x3af   : > { %11945 = vmatpush1.bf16.msra.mxu0 %v17139_v56  ;;  %v17171_v56 = vld [vmem:[%s19197_s23 + $0x2dc4] ss:$16 sps:$4 sm:$0xff]  }
 0x3b0   : > { %11986 = vmatpush1.bf16.msra.mxu1 %v17142_v13  ;;  %11946 = vmatprep.subr.bf16.mxu0 %v17147_v45  ;;  %v17174_v13 = vld [vmem:[%s19197_s23 + $0x2fc4] ss:$16 sps:$4 sm:$0xff]   ;;  %v17169_v45 = vld [vmem:[%s19197_s23 + $0x2dc0] ss:$16 sps:$4 sm:$0xff]  }
 0x3b1   : > { %11987 = vmatprep.subr.bf16.mxu1 %v17150_v10  ;;  %v17172_v10 = vld [vmem:[%s19197_s23 + $0x2fc0] ss:$16 sps:$4 sm:$0xff]  }
 0x3b3   : > { %11947 = vmatpush1.bf16.msra.mxu0 %v17145_v33  ;;  %v17177_v33 = vld [vmem:[%s19197_s23 + $0x2de4] ss:$16 sps:$4 sm:$0xff]  }
 0x3b4   : > { %11988 = vmatpush1.bf16.msra.mxu1 %v17148_v57  ;;  %11948 = vmatprep.subr.bf16.mxu0 %v17153_v14  ;;  %v17180_v57 = vld [vmem:[%s19197_s23 + $0x2fe4] ss:$16 sps:$4 sm:$0xff]   ;;  %v17175_v14 = vld [vmem:[%s19197_s23 + $0x2de0] ss:$16 sps:$4 sm:$0xff]  }
 0x3b5   : > { %11989 = vmatprep.subr.bf16.mxu1 %v17156_v16  ;;  %v17178_v16 = vld [vmem:[%s19197_s23 + $0x2fe0] ss:$16 sps:$4 sm:$0xff]  }
 0x3b7   : > { %11949 = vmatpush1.bf16.msra.mxu0 %v17151_v43  ;;  %v17187_v43 = vld [vmem:[%s19197_s23 + $0x3004] ss:$16 sps:$4 sm:$0xff]  }
 0x3b8   : > { %11990 = vmatpush1.bf16.msra.mxu1 %v17154_v55  ;;  %11950 = vmatprep.subr.bf16.mxu0 %v17159_v35  ;;  %v17190_v55 = vld [vmem:[%s19197_s23 + $0x3204] ss:$16 sps:$4 sm:$0xff]  }
 0x3b9   : > { %11991 = vmatprep.subr.bf16.mxu1 %v17162_v31  ;;  %v20330_v35 = vld [vmem:[%s19219_s24 + $0xc0] sm:$0xff] }
 0x3ba   : > { %v17185_v31 = vld [vmem:[%s19197_s23 + $0x3000] ss:$16 sps:$4 sm:$0xff]  }
 0x3bb   : > { %11951 = vmatpush1.bf16.msra.mxu0 %v17157_v5  ;;  %v17188_v5 = vld [vmem:[%s19197_s23 + $0x3200] ss:$16 sps:$4 sm:$0xff]  }
 0x3bc   : > { %11992 = vmatpush1.bf16.msra.mxu1 %v17160_v0  ;;  %11952 = vmatprep.subr.bf16.mxu0 %v17165_v32  ;;  %v20336_v0 = vcombine.low %v20244_v63, %v20244_v63  ;;  %v20340_v32 = vcombine.low %v20247_v11, %v20247_v11  ;;  %v17191_v11 = vld [vmem:[%s19197_s23 + $0x3020] ss:$16 sps:$4 sm:$0xff]  }
 0x3bd   : > { %11993 = vmatprep.subr.bf16.mxu1 %v17168_v34  ;;  %v20343_v34 = vld [vmem:[%s19219_s24 + $0xc8] sm:$0xff] }
 0x3be   : > { %21573 = vst [vmem:[#allocation21_spill] sm:$0xff] %v20336_v0  ;;  %21574 = vst [vmem:[#allocation22_spill] sm:$0xff] %v20340_v32  ;;  %v20353_v63 = vcombine.high %v20343_v34, %v20343_v34 }
 0x3bf   : > { %11953 = vmatpush1.bf16.msra.mxu0 %v17163_v12  ;;  %v17193_v12 = vld [vmem:[%s19197_s23 + $0x3024] ss:$16 sps:$4 sm:$0xff]  }
 0x3c0   : > { %11994 = vmatpush1.bf16.msra.mxu1 %v17166_v36  ;;  %11954 = vmatprep.subr.bf16.mxu0 %v17171_v56  ;;  %v17196_v36 = vld [vmem:[%s19197_s23 + $0x3224] ss:$16 sps:$4 sm:$0xff]   ;;  %v20349_v56 = vcombine.high %v20330_v35, %v20330_v35  ;;  %21576 = vst [vmem:[#allocation24_spill] sm:$0xff] %v20353_v63 }
 0x3c1   : > { %11995 = vmatprep.subr.bf16.mxu1 %v17174_v13  ;;  %v17194_v13 = vld [vmem:[%s19197_s23 + $0x3220] ss:$16 sps:$4 sm:$0xff]  }
 0x3c2   : > { %21575 = vst [vmem:[#allocation23_spill] sm:$0xff] %v20349_v56 }
 0x3c3   : > { %11955 = vmatpush1.bf16.msra.mxu0 %v17169_v45  ;;  %v17199_v45 = vld [vmem:[%s19197_s23 + $0x3044] ss:$16 sps:$4 sm:$0xff]  }
 0x3c4   : > { %11996 = vmatpush1.bf16.msra.mxu1 %v17172_v10  ;;  %11956 = vmatprep.subr.bf16.mxu0 %v17177_v33  ;;  %v17202_v10 = vld [vmem:[%s19197_s23 + $0x3244] ss:$16 sps:$4 sm:$0xff]   ;;  %v17197_v33 = vld [vmem:[%s19197_s23 + $0x3040] ss:$16 sps:$4 sm:$0xff]  }
 0x3c5   : > { %11997 = vmatprep.subr.bf16.mxu1 %v17180_v57  ;;  %v17200_v57 = vld [vmem:[%s19197_s23 + $0x3240] ss:$16 sps:$4 sm:$0xff]  }
 0x3c7   : > { %11957 = vmatpush1.bf16.msra.mxu0 %v17175_v14  ;;  %v17205_v14 = vld [vmem:[%s19197_s23 + $0x3064] ss:$16 sps:$4 sm:$0xff]  }
 0x3c8   : > { %11998 = vmatpush1.bf16.msra.mxu1 %v17178_v16  ;;  %12008 = vmatprep.subr.bf16.mxu0 %v17187_v43  ;;  %v17208_v16 = vld [vmem:[%s19197_s23 + $0x3264] ss:$16 sps:$4 sm:$0xff]   ;;  %v17203_v43 = vld [vmem:[%s19197_s23 + $0x3060] ss:$16 sps:$4 sm:$0xff]  }
 0x3c9   : > { %12049 = vmatprep.subr.bf16.mxu1 %v17190_v55  ;;  %v17206_v55 = vld [vmem:[%s19197_s23 + $0x3260] ss:$16 sps:$4 sm:$0xff]  }
 0x3ca   : > { %11959 = vmatmul.mubr.bf16.vlgmr.msra.gmra.mrb[44].mxu0 %v20336_v0 }
 0x3cb   : > { %12000 = vmatmul.mubr.bf16.vlgmr.msra.gmra.mrb[44].mxu1 %v20340_v32  ;;  %12009 = vmatpush1.bf16.msra.mxu0 %v17185_v31  ;;  %v17211_v31 = vld [vmem:[%s19197_s23 + $0x3084] ss:$16 sps:$4 sm:$0xff]  }
 0x3cc   : > { %12050 = vmatpush1.bf16.msra.mxu1 %v17188_v5  ;;  %12010 = vmatprep.subr.bf16.mxu0 %v17193_v12  ;;  %v17214_v5 = vld [vmem:[%s19197_s23 + $0x3284] ss:$16 sps:$4 sm:$0xff]   ;;  %v17209_v12 = vld [vmem:[%s19197_s23 + $0x3080] ss:$16 sps:$4 sm:$0xff]  }
 0x3cd   : > { %12051 = vmatprep.subr.bf16.mxu1 %v17196_v36  ;;  %12040 = vmatprep.mubr.bf16.mxu0 %v20349_v56  ;;  %v17212_v36 = vld [vmem:[%s19197_s23 + $0x3280] ss:$16 sps:$4 sm:$0xff]  }
 0x3ce   : > { %12081 = vmatprep.mubr.bf16.mxu1 %v20353_v63 }
 0x3cf   : > { %12011 = vmatpush1.bf16.msra.mxu0 %v17191_v11  ;;  %v17217_v11 = vld [vmem:[%s19197_s23 + $0x30a4] ss:$16 sps:$4 sm:$0xff]  }
 0x3d0   : > { %12052 = vmatpush1.bf16.msra.mxu1 %v17194_v13  ;;  %12012 = vmatprep.subr.bf16.mxu0 %v17199_v45  ;;  %v17220_v13 = vld [vmem:[%s19197_s23 + $0x32a4] ss:$16 sps:$4 sm:$0xff]   ;;  %v17215_v45 = vld [vmem:[%s19197_s23 + $0x30a0] ss:$16 sps:$4 sm:$0xff]  }
 0x3d1   : > { %12053 = vmatprep.subr.bf16.mxu1 %v17202_v10  ;;  %v17218_v10 = vld [vmem:[%s19197_s23 + $0x32a0] ss:$16 sps:$4 sm:$0xff]  }
 0x3d3   : > { %12013 = vmatpush1.bf16.msra.mxu0 %v17197_v33  ;;  %v17223_v33 = vld [vmem:[%s19197_s23 + $0x30c4] ss:$16 sps:$4 sm:$0xff]  }
 0x3d4   : > { %12054 = vmatpush1.bf16.msra.mxu1 %v17200_v57  ;;  %12014 = vmatprep.subr.bf16.mxu0 %v17205_v14  ;;  %v17226_v57 = vld [vmem:[%s19197_s23 + $0x32c4] ss:$16 sps:$4 sm:$0xff]  }
 0x3d5   : > { %12055 = vmatprep.subr.bf16.mxu1 %v17208_v16 }
 0x3d7   : > { %12015 = vmatpush1.bf16.msra.mxu0 %v17203_v43  ;;  %v17221_v43 = vld [vmem:[%s19197_s23 + $0x30c0] ss:$16 sps:$4 sm:$0xff]  }
 0x3d8   : > { %12056 = vmatpush1.bf16.msra.mxu1 %v17206_v55  ;;  %12016 = vmatprep.subr.bf16.mxu0 %v17211_v31  ;;  %v17224_v55 = vld [vmem:[%s19197_s23 + $0x32c0] ss:$16 sps:$4 sm:$0xff]  }
 0x3d9   : > { %12057 = vmatprep.subr.bf16.mxu1 %v17214_v5 }
 0x3db   : > { %12017 = vmatpush1.bf16.msra.mxu0 %v17209_v12 }
 0x3dc   : > { %12058 = vmatpush1.bf16.msra.mxu1 %v17212_v36  ;;  %12018 = vmatprep.subr.bf16.mxu0 %v17217_v11 }
 0x3dd   : > { %12059 = vmatprep.subr.bf16.mxu1 %v17220_v13  ;;  %v11714_v14 = vpop.f32.mrb[32].mxu0 }
 0x3de   : > { %v11755_v16 = vpop.f32.mrb[32].mxu1  ;;  %v11715_v63 = vadd.f32 %v11714_v14, %v20287_v15  ;;  %v11716_v31 = vpop.f32.mrb[33].mxu0  ;;  %v17229_v15 = vld [vmem:[%s19197_s23 + $0x30e4] ss:$16 sps:$4 sm:$0xff]  }
 0x3df   : > { %v11757_v5 = vpop.f32.mrb[33].mxu1  ;;  %v11717_v32 = vadd.f32 %v11716_v31, %v20291_v22  ;;  %v11718_v12 = vpop.f32.mrb[34].mxu0  ;;  %12019 = vmatpush1.bf16.msra.mxu0 %v17215_v45  ;;  %v17232_v14 = vld [vmem:[%s19197_s23 + $0x32e4] ss:$16 sps:$4 sm:$0xff]   ;;  %v17227_v22 = vld [vmem:[%s19197_s23 + $0x30e0] ss:$16 sps:$4 sm:$0xff]  }
 0x3e0   : > { %v11759_v36 = vpop.f32.mrb[34].mxu1  ;;  %12060 = vmatpush1.bf16.msra.mxu1 %v17218_v10  ;;  %v20383_v11 = vadd.f32 %v11755_v16, %v11715_v63  ;;  %v11719_v13 = vpop.f32.mrb[35].mxu0  ;;  %12020 = vmatprep.subr.bf16.mxu0 %v17223_v33  ;;  %v17230_v45 = vld [vmem:[%s19197_s23 + $0x32e0] ss:$16 sps:$4 sm:$0xff]   ;;  %v17235_v63 = vld [vmem:[%s19197_s23 + $0x3104] ss:$16 sps:$4 sm:$0xff]  }
 0x3e1   : > { %v11760_v56 = vpop.f32.mrb[35].mxu1  ;;  %12061 = vmatprep.subr.bf16.mxu1 %v17226_v57  ;;  %v20387_v0 = vadd.f32 %v11757_v5, %v11717_v32  ;;  %v17233_v10 = vld [vmem:[%s19197_s23 + $0x3100] ss:$16 sps:$4 sm:$0xff]   ;;  %v17241_v32 = vld [vmem:[%s19197_s23 + $0x3124] ss:$16 sps:$4 sm:$0xff]  }
 0x3e2   : > { %v17238_v56 = vld [vmem:[%s19197_s23 + $0x3304] ss:$16 sps:$4 sm:$0xff]   ;;  %v17236_v33 = vld [vmem:[%s19197_s23 + $0x3300] ss:$16 sps:$4 sm:$0xff]  }
 0x3e3   : > { %12021 = vmatpush1.bf16.msra.mxu0 %v17221_v43  ;;  %v17244_v57 = vld [vmem:[%s19197_s23 + $0x3324] ss:$16 sps:$4 sm:$0xff]   ;;  %v17239_v16 = vld [vmem:[%s19197_s23 + $0x3120] ss:$16 sps:$4 sm:$0xff]  }
 0x3e4   : > { %12062 = vmatpush1.bf16.msra.mxu1 %v17224_v55  ;;  %12022 = vmatprep.subr.bf16.mxu0 %v17229_v15  ;;  %v17242_v43 = vld [vmem:[%s19197_s23 + $0x3320] ss:$16 sps:$4 sm:$0xff]   ;;  %v17247_v55 = vld [vmem:[%s19197_s23 + $0x3144] ss:$16 sps:$4 sm:$0xff]  }
 0x3e5   : > { %12063 = vmatprep.subr.bf16.mxu1 %v17232_v14  ;;  %v17250_v31 = vld [vmem:[%s19197_s23 + $0x3344] ss:$16 sps:$4 sm:$0xff]   ;;  %v17245_v5 = vld [vmem:[%s19197_s23 + $0x3140] ss:$16 sps:$4 sm:$0xff]  }
 0x3e6   : > { %v17248_v12 = vld [vmem:[%s19197_s23 + $0x3340] ss:$16 sps:$4 sm:$0xff]   ;;  %v17253_v36 = vld [vmem:[%s19197_s23 + $0x3164] ss:$16 sps:$4 sm:$0xff]  }
 0x3e7   : > { %12023 = vmatpush1.bf16.msra.mxu0 %v17227_v22  ;;  %v17256_v13 = vld [vmem:[%s19197_s23 + $0x3364] ss:$16 sps:$4 sm:$0xff]   ;;  %v17251_v15 = vld [vmem:[%s19197_s23 + $0x3160] ss:$16 sps:$4 sm:$0xff]  }
 0x3e8   : > { %12064 = vmatpush1.bf16.msra.mxu1 %v17230_v45  ;;  %12024 = vmatprep.subr.bf16.mxu0 %v17235_v63  ;;  %v17254_v14 = vld [vmem:[%s19197_s23 + $0x3360] ss:$16 sps:$4 sm:$0xff]   ;;  %v17259_v22 = vld [vmem:[%s19197_s23 + $0x3184] ss:$16 sps:$4 sm:$0xff]  }
 0x3e9   : > { %12065 = vmatprep.subr.bf16.mxu1 %v17238_v56  ;;  %v17262_v45 = vld [vmem:[%s19197_s23 + $0x3384] ss:$16 sps:$4 sm:$0xff]   ;;  %v17257_v63 = vld [vmem:[%s19197_s23 + $0x3180] ss:$16 sps:$4 sm:$0xff]  }
 0x3ea   : > { %v17260_v56 = vld [vmem:[%s19197_s23 + $0x3380] ss:$16 sps:$4 sm:$0xff]  }
 0x3eb   : > { %12025 = vmatpush1.bf16.msra.mxu0 %v17233_v10  ;;  %v17265_v10 = vld [vmem:[%s19197_s23 + $0x31a4] ss:$16 sps:$4 sm:$0xff]  }
 0x3ec   : > { %12066 = vmatpush1.bf16.msra.mxu1 %v17236_v33  ;;  %12026 = vmatprep.subr.bf16.mxu0 %v17241_v32  ;;  %v17268_v33 = vld [vmem:[%s19197_s23 + $0x33a4] ss:$16 sps:$4 sm:$0xff]   ;;  %v17263_v32 = vld [vmem:[%s19197_s23 + $0x31a0] ss:$16 sps:$4 sm:$0xff]  }
 0x3ed   : > { %12067 = vmatprep.subr.bf16.mxu1 %v17244_v57  ;;  %v17266_v57 = vld [vmem:[%s19197_s23 + $0x33a0] ss:$16 sps:$4 sm:$0xff]  }
 0x3ef   : > { %12027 = vmatpush1.bf16.msra.mxu0 %v17239_v16  ;;  %v17271_v16 = vld [vmem:[%s19197_s23 + $0x31c4] ss:$16 sps:$4 sm:$0xff]  }
 0x3f0   : > { %12068 = vmatpush1.bf16.msra.mxu1 %v17242_v43  ;;  %12028 = vmatprep.subr.bf16.mxu0 %v17247_v55  ;;  %v17274_v43 = vld [vmem:[%s19197_s23 + $0x33c4] ss:$16 sps:$4 sm:$0xff]   ;;  %v17269_v55 = vld [vmem:[%s19197_s23 + $0x31c0] ss:$16 sps:$4 sm:$0xff]  }
 0x3f1   : > { %12069 = vmatprep.subr.bf16.mxu1 %v17250_v31  ;;  %v17272_v31 = vld [vmem:[%s19197_s23 + $0x33c0] ss:$16 sps:$4 sm:$0xff]  }
 0x3f3   : > { %12029 = vmatpush1.bf16.msra.mxu0 %v17245_v5  ;;  %v17277_v5 = vld [vmem:[%s19197_s23 + $0x31e4] ss:$16 sps:$4 sm:$0xff]  }
 0x3f4   : > { %12070 = vmatpush1.bf16.msra.mxu1 %v17248_v12  ;;  %12030 = vmatprep.subr.bf16.mxu0 %v17253_v36  ;;  %v17280_v12 = vld [vmem:[%s19197_s23 + $0x33e4] ss:$16 sps:$4 sm:$0xff]   ;;  %v17275_v36 = vld [vmem:[%s19197_s23 + $0x31e0] ss:$16 sps:$4 sm:$0xff]  }
 0x3f5   : > { %12071 = vmatprep.subr.bf16.mxu1 %v17256_v13  ;;  %v17278_v13 = vld [vmem:[%s19197_s23 + $0x33e0] ss:$16 sps:$4 sm:$0xff]  }
 0x3f7   : > { %12031 = vmatpush1.bf16.msra.mxu0 %v17251_v15  ;;  %v17287_v15 = vld [vmem:[%s19197_s23 + $0x3404] ss:$16 sps:$4 sm:$0xff]  }
 0x3f8   : > { %12072 = vmatpush1.bf16.msra.mxu1 %v17254_v14  ;;  %12032 = vmatprep.subr.bf16.mxu0 %v17259_v22  ;;  %v17290_v14 = vld [vmem:[%s19197_s23 + $0xc] ss:$16 sps:$4 sm:$0xff]   ;;  %v20426_v22 = vld [vmem:[%s19219_s24 + $0xd0] sm:$0xff] }
 0x3f9   : > { %12073 = vmatprep.subr.bf16.mxu1 %v17262_v45  ;;  %v17285_v45 = vld [vmem:[%s19197_s23 + $0x3400] ss:$16 sps:$4 sm:$0xff]  }
 0x3fb   : > { %12033 = vmatpush1.bf16.msra.mxu0 %v17257_v63  ;;  %v17288_v63 = vld [vmem:[%s19197_s23 + $0x8] ss:$16 sps:$4 sm:$0xff]  }
 0x3fc   : > { %12074 = vmatpush1.bf16.msra.mxu1 %v17260_v56  ;;  %12034 = vmatprep.subr.bf16.mxu0 %v17265_v10  ;;  %v20432_v56 = vcombine.low %v20330_v35, %v20330_v35  ;;  %v20436_v10 = vcombine.low %v20343_v34, %v20343_v34  ;;  %v17291_v35 = vld [vmem:[%s19197_s23 + $0x3420] ss:$16 sps:$4 sm:$0xff]   ;;  %v17294_v34 = vld [vmem:[%s19197_s23 + $0x28] ss:$16 sps:$4 sm:$0xff]  }
 0x3fd   : > { %12075 = vmatprep.subr.bf16.mxu1 %v17268_v33  ;;  %v17293_v33 = vld [vmem:[%s19197_s23 + $0x3424] ss:$16 sps:$4 sm:$0xff]  }
 0x3fe   : > { %21577 = vst [vmem:[#allocation25_spill] sm:$0xff] %v20436_v10 }
 0x3ff   : > { %12035 = vmatpush1.bf16.msra.mxu0 %v17263_v32  ;;  %v17296_v32 = vld [vmem:[%s19197_s23 + $0x2c] ss:$16 sps:$4 sm:$0xff]  }
 0x400   : > { %12076 = vmatpush1.bf16.msra.mxu1 %v17266_v57  ;;  %12036 = vmatprep.subr.bf16.mxu0 %v17271_v16  ;;  %v20442_v57 = vcombine.high %v20426_v22, %v20426_v22  ;;  %v17299_v16 = vld [vmem:[%s19197_s23 + $0x3444] ss:$16 sps:$4 sm:$0xff]  }
 0x401   : > { %12077 = vmatprep.subr.bf16.mxu1 %v17274_v43  ;;  %v17302_v43 = vld [vmem:[%s19197_s23 + $0x4c] ss:$16 sps:$4 sm:$0xff]  }
 0x403   : > { %12037 = vmatpush1.bf16.msra.mxu0 %v17269_v55  ;;  %v17297_v55 = vld [vmem:[%s19197_s23 + $0x3440] ss:$16 sps:$4 sm:$0xff]  }
 0x404   : > { %12078 = vmatpush1.bf16.msra.mxu1 %v17272_v31  ;;  %12038 = vmatprep.subr.bf16.mxu0 %v17277_v5  ;;  %v17300_v31 = vld [vmem:[%s19197_s23 + $0x48] ss:$16 sps:$4 sm:$0xff]   ;;  %v17305_v5 = vld [vmem:[%s19197_s23 + $0x3464] ss:$16 sps:$4 sm:$0xff]  }
 0x405   : > { %12079 = vmatprep.subr.bf16.mxu1 %v17280_v12  ;;  %v17308_v12 = vld [vmem:[%s19197_s23 + $0x6c] ss:$16 sps:$4 sm:$0xff]  }
 0x407   : > { %12039 = vmatpush1.bf16.msra.mxu0 %v17275_v36  ;;  %v17303_v36 = vld [vmem:[%s19197_s23 + $0x3460] ss:$16 sps:$4 sm:$0xff]  }
 0x408   : > { %12080 = vmatpush1.bf16.msra.mxu1 %v17278_v13  ;;  %12090 = vmatprep.subr.bf16.mxu0 %v17287_v15  ;;  %v17306_v13 = vld [vmem:[%s19197_s23 + $0x68] ss:$16 sps:$4 sm:$0xff]   ;;  %v17314_v15 = vld [vmem:[%s19197_s23 + $0x8c] ss:$16 sps:$4 sm:$0xff]  }
 0x409   : > { %12131 = vmatprep.subr.bf16.mxu1 %v17290_v14  ;;  %v17309_v14 = vld [vmem:[%s19197_s23 + $0x3480] ss:$16 sps:$4 sm:$0xff]  }
 0x40a   : > { %12041 = vmatmul.mubr.bf16.vlgmr.msra.gmra.mrb[48].mxu0 %v20432_v56 }
 0x40b   : > { %12082 = vmatmul.mubr.bf16.vlgmr.msra.gmra.mrb[48].mxu1 %v20436_v10  ;;  %12091 = vmatpush1.bf16.msra.mxu0 %v17285_v45  ;;  %v17312_v45 = vld [vmem:[%s19197_s23 + $0x88] ss:$16 sps:$4 sm:$0xff]  }
 0x40c   : > { %12132 = vmatpush1.bf16.msra.mxu1 %v17288_v63  ;;  %12092 = vmatprep.subr.bf16.mxu0 %v17293_v33  ;;  %v17317_v63 = vld [vmem:[%s19197_s23 + $0x34a4] ss:$16 sps:$4 sm:$0xff]   ;;  %v17320_v33 = vld [vmem:[%s19197_s23 + $0xac] ss:$16 sps:$4 sm:$0xff]  }
 0x40d   : > { %12133 = vmatprep.subr.bf16.mxu1 %v17296_v32  ;;  %12122 = vmatprep.mubr.bf16.mxu0 %v20442_v57  ;;  %v17315_v32 = vld [vmem:[%s19197_s23 + $0x34a0] ss:$16 sps:$4 sm:$0xff]  }
 0x40e   : > { %12163 = vmatprep.mubr.bf16.mxu1 %v19270_v48  ;;  %v17311_v48 = vld [vmem:[%s19197_s23 + $0x3484] ss:$16 sps:$4 sm:$0xff]  }
 0x40f   : > { %12093 = vmatpush1.bf16.msra.mxu0 %v17291_v35  ;;  %v17318_v35 = vld [vmem:[%s19197_s23 + $0xa8] ss:$16 sps:$4 sm:$0xff]  }
 0x410   : > { %12134 = vmatpush1.bf16.msra.mxu1 %v17294_v34  ;;  %12094 = vmatprep.subr.bf16.mxu0 %v17299_v16  ;;  %v17323_v34 = vld [vmem:[%s19197_s23 + $0x34c4] ss:$16 sps:$4 sm:$0xff]   ;;  %v17326_v16 = vld [vmem:[%s19197_s23 + $0xcc] ss:$16 sps:$4 sm:$0xff]  }
 0x411   : > { %12135 = vmatprep.subr.bf16.mxu1 %v17302_v43 }
 0x413   : > { %12095 = vmatpush1.bf16.msra.mxu0 %v17297_v55 }
 0x414   : > { %12136 = vmatpush1.bf16.msra.mxu1 %v17300_v31  ;;  %12096 = vmatprep.subr.bf16.mxu0 %v17305_v5  ;;  %v17321_v31 = vld [vmem:[%s19197_s23 + $0x34c0] ss:$16 sps:$4 sm:$0xff]   ;;  %v17324_v5 = vld [vmem:[%s19197_s23 + $0xc8] ss:$16 sps:$4 sm:$0xff]  }
 0x415   : > { %12137 = vmatprep.subr.bf16.mxu1 %v17308_v12 }
 0x417   : > { %12097 = vmatpush1.bf16.msra.mxu0 %v17303_v36 }
 0x418   : > { %12138 = vmatpush1.bf16.msra.mxu1 %v17306_v13  ;;  %12098 = vmatprep.subr.bf16.mxu0 %v17311_v48 }
 0x419   : > { %12139 = vmatprep.subr.bf16.mxu1 %v17314_v15 }
 0x41b   : > { %12099 = vmatpush1.bf16.msra.mxu0 %v17309_v14 }
 0x41c   : > { %12140 = vmatpush1.bf16.msra.mxu1 %v17312_v45  ;;  %12100 = vmatprep.subr.bf16.mxu0 %v17317_v63 }
 0x41d   : > { %12141 = vmatprep.subr.bf16.mxu1 %v17320_v33  ;;  %v11796_v43 = vpop.f32.mrb[36].mxu0 }
 0x41e   : > { %v11837_v55 = vpop.f32.mrb[36].mxu1  ;;  %v11797_v12 = vadd.f32 %v11796_v43, %v20383_v11  ;;  %v11798_v36 = vpop.f32.mrb[37].mxu0  ;;  %v17329_v11 = vld [vmem:[%s19197_s23 + $0x34e4] ss:$16 sps:$4 sm:$0xff]   ;;  %v17332_v43 = vld [vmem:[%s19197_s23 + $0xec] ss:$16 sps:$4 sm:$0xff]  }
 0x41f   : > { %v11839_v13 = vpop.f32.mrb[37].mxu1  ;;  %v11799_v48 = vadd.f32 %v11798_v36, %v20387_v0  ;;  %v11800_v15 = vpop.f32.mrb[38].mxu0  ;;  %12101 = vmatpush1.bf16.msra.mxu0 %v17315_v32  ;;  %v17327_v0 = vld [vmem:[%s19197_s23 + $0x34e0] ss:$16 sps:$4 sm:$0xff]   ;;  %v17330_v32 = vld [vmem:[%s19197_s23 + $0xe8] ss:$16 sps:$4 sm:$0xff]  }
 0x420   : > { %v11841_v14 = vpop.f32.mrb[38].mxu1  ;;  %12142 = vmatpush1.bf16.msra.mxu1 %v17318_v35  ;;  %v20472_v45 = vadd.f32 %v11837_v55, %v11797_v12  ;;  %v11801_v63 = vpop.f32.mrb[39].mxu0  ;;  %12102 = vmatprep.subr.bf16.mxu0 %v17323_v34  ;;  %v17335_v35 = vld [vmem:[%s19197_s23 + $0x3504] ss:$16 sps:$4 sm:$0xff]   ;;  %v17338_v55 = vld [vmem:[%s19197_s23 + $0x10c] ss:$16 sps:$4 sm:$0xff]  }
 0x421   : > { %v11842_v33 = vpop.f32.mrb[39].mxu1  ;;  %12143 = vmatprep.subr.bf16.mxu1 %v17326_v16  ;;  %v20476_v10 = vadd.f32 %v11839_v13, %v11799_v48  ;;  %v17333_v34 = vld [vmem:[%s19197_s23 + $0x3500] ss:$16 sps:$4 sm:$0xff]   ;;  %v17336_v16 = vld [vmem:[%s19197_s23 + $0x108] ss:$16 sps:$4 sm:$0xff]  }
 0x422   : > { %v17339_v12 = vld [vmem:[%s19197_s23 + $0x3520] ss:$16 sps:$4 sm:$0xff]   ;;  %v17342_v36 = vld [vmem:[%s19197_s23 + $0x128] ss:$16 sps:$4 sm:$0xff]   ;;  %v17347_v13 = vld [vmem:[%s19197_s23 + $0x3544] ss:$16 sps:$4 sm:$0xff]  }
 0x423   : > { %12103 = vmatpush1.bf16.msra.mxu0 %v17321_v31  ;;  %v17341_v31 = vld [vmem:[%s19197_s23 + $0x3524] ss:$16 sps:$4 sm:$0xff]   ;;  %v17350_v48 = vld [vmem:[%s19197_s23 + $0x14c] ss:$16 sps:$4 sm:$0xff]   ;;  %v17345_v15 = vld [vmem:[%s19197_s23 + $0x3540] ss:$16 sps:$4 sm:$0xff]  }
 0x424   : > { %12144 = vmatpush1.bf16.msra.mxu1 %v17324_v5  ;;  %12104 = vmatprep.subr.bf16.mxu0 %v17329_v11  ;;  %v17344_v5 = vld [vmem:[%s19197_s23 + $0x12c] ss:$16 sps:$4 sm:$0xff]   ;;  %v17348_v14 = vld [vmem:[%s19197_s23 + $0x148] ss:$16 sps:$4 sm:$0xff]   ;;  %v17353_v63 = vld [vmem:[%s19197_s23 + $0x3564] ss:$16 sps:$4 sm:$0xff]  }
 0x425   : > { %12145 = vmatprep.subr.bf16.mxu1 %v17332_v43  ;;  %v17356_v33 = vld [vmem:[%s19197_s23 + $0x16c] ss:$16 sps:$4 sm:$0xff]   ;;  %v17351_v11 = vld [vmem:[%s19197_s23 + $0x3560] ss:$16 sps:$4 sm:$0xff]   ;;  %v17354_v43 = vld [vmem:[%s19197_s23 + $0x168] ss:$16 sps:$4 sm:$0xff]  }
 0x427   : > { %12105 = vmatpush1.bf16.msra.mxu0 %v17327_v0  ;;  %v17359_v0 = vld [vmem:[%s19197_s23 + $0x3584] ss:$16 sps:$4 sm:$0xff]  }
 0x428   : > { %12146 = vmatpush1.bf16.msra.mxu1 %v17330_v32  ;;  %12106 = vmatprep.subr.bf16.mxu0 %v17335_v35  ;;  %v17362_v32 = vld [vmem:[%s19197_s23 + $0x18c] ss:$16 sps:$4 sm:$0xff]   ;;  %v17357_v35 = vld [vmem:[%s19197_s23 + $0x3580] ss:$16 sps:$4 sm:$0xff]  }
 0x429   : > { %12147 = vmatprep.subr.bf16.mxu1 %v17338_v55  ;;  %v17360_v55 = vld [vmem:[%s19197_s23 + $0x188] ss:$16 sps:$4 sm:$0xff]  }
 0x42b   : > { %12107 = vmatpush1.bf16.msra.mxu0 %v17333_v34  ;;  %v17365_v34 = vld [vmem:[%s19197_s23 + $0x35a4] ss:$16 sps:$4 sm:$0xff]  }
 0x42c   : > { %12148 = vmatpush1.bf16.msra.mxu1 %v17336_v16  ;;  %12108 = vmatprep.subr.bf16.mxu0 %v17341_v31  ;;  %v17368_v16 = vld [vmem:[%s19197_s23 + $0x1ac] ss:$16 sps:$4 sm:$0xff]   ;;  %v17363_v31 = vld [vmem:[%s19197_s23 + $0x35a0] ss:$16 sps:$4 sm:$0xff]  }
 0x42d   : > { %12149 = vmatprep.subr.bf16.mxu1 %v17344_v5  ;;  %v17366_v5 = vld [vmem:[%s19197_s23 + $0x1a8] ss:$16 sps:$4 sm:$0xff]  }
 0x42f   : > { %12109 = vmatpush1.bf16.msra.mxu0 %v17339_v12  ;;  %v17371_v12 = vld [vmem:[%s19197_s23 + $0x35c4] ss:$16 sps:$4 sm:$0xff]  }
 0x430   : > { %12150 = vmatpush1.bf16.msra.mxu1 %v17342_v36  ;;  %12110 = vmatprep.subr.bf16.mxu0 %v17347_v13  ;;  %v17374_v36 = vld [vmem:[%s19197_s23 + $0x1cc] ss:$16 sps:$4 sm:$0xff]   ;;  %v17369_v13 = vld [vmem:[%s19197_s23 + $0x35c0] ss:$16 sps:$4 sm:$0xff]  }
 0x431   : > { %12151 = vmatprep.subr.bf16.mxu1 %v17350_v48  ;;  %v17372_v48 = vld [vmem:[%s19197_s23 + $0x1c8] ss:$16 sps:$4 sm:$0xff]  }
 0x433   : > { %12111 = vmatpush1.bf16.msra.mxu0 %v17345_v15  ;;  %v17377_v15 = vld [vmem:[%s19197_s23 + $0x35e4] ss:$16 sps:$4 sm:$0xff]  }
 0x434   : > { %12152 = vmatpush1.bf16.msra.mxu1 %v17348_v14  ;;  %12112 = vmatprep.subr.bf16.mxu0 %v17353_v63  ;;  %v17380_v14 = vld [vmem:[%s19197_s23 + $0x1ec] ss:$16 sps:$4 sm:$0xff]   ;;  %v17375_v63 = vld [vmem:[%s19197_s23 + $0x35e0] ss:$16 sps:$4 sm:$0xff]  }
 0x435   : > { %12153 = vmatprep.subr.bf16.mxu1 %v17356_v33  ;;  %v17378_v33 = vld [vmem:[%s19197_s23 + $0x1e8] ss:$16 sps:$4 sm:$0xff]  }
 0x437   : > { %12113 = vmatpush1.bf16.msra.mxu0 %v17351_v11  ;;  %v17385_v11 = vld [vmem:[%s19197_s23 + $0x20c] ss:$16 sps:$4 sm:$0xff]  }
 0x438   : > { %12154 = vmatpush1.bf16.msra.mxu1 %v17354_v43  ;;  %12114 = vmatprep.subr.bf16.mxu0 %v17359_v0  ;;  %v17388_v43 = vld [vmem:[%s19197_s23 + $0x40c] ss:$16 sps:$4 sm:$0xff]   ;;  %v17383_v0 = vld [vmem:[%s19197_s23 + $0x208] ss:$16 sps:$4 sm:$0xff]  }
 0x439   : > { %12155 = vmatprep.subr.bf16.mxu1 %v17362_v32  ;;  %v17386_v32 = vld [vmem:[%s19197_s23 + $0x408] ss:$16 sps:$4 sm:$0xff]  }
 0x43b   : > { %12115 = vmatpush1.bf16.msra.mxu0 %v17357_v35  ;;  %v20518_v35 = vcombine.low %v20426_v22, %v20426_v22  ;;  %v17392_v22 = vld [vmem:[%s19197_s23 + $0x428] ss:$16 sps:$4 sm:$0xff]  }
 0x43c   : > { %12156 = vmatpush1.bf16.msra.mxu1 %v17360_v55  ;;  %12116 = vmatprep.subr.bf16.mxu0 %v17365_v34  ;;  %v17391_v55 = vld [vmem:[%s19197_s23 + $0x22c] ss:$16 sps:$4 sm:$0xff]  }
 0x43d   : > { %12157 = vmatprep.subr.bf16.mxu1 %v17368_v16  ;;  %v17394_v34 = vld [vmem:[%s19197_s23 + $0x42c] ss:$16 sps:$4 sm:$0xff]   ;;  %v17389_v16 = vld [vmem:[%s19197_s23 + $0x228] ss:$16 sps:$4 sm:$0xff]  }
 0x43f   : > { %12117 = vmatpush1.bf16.msra.mxu0 %v17363_v31  ;;  %v17397_v31 = vld [vmem:[%s19197_s23 + $0x24c] ss:$16 sps:$4 sm:$0xff]  }
 0x440   : > { %12158 = vmatpush1.bf16.msra.mxu1 %v17366_v5  ;;  %12118 = vmatprep.subr.bf16.mxu0 %v17371_v12  ;;  %v17400_v5 = vld [vmem:[%s19197_s23 + $0x44c] ss:$16 sps:$4 sm:$0xff]   ;;  %v17398_v12 = vld [vmem:[%s19197_s23 + $0x448] ss:$16 sps:$4 sm:$0xff]  }
 0x441   : > { %12159 = vmatprep.subr.bf16.mxu1 %v17374_v36  ;;  %v17403_v36 = vld [vmem:[%s19197_s23 + $0x26c] ss:$16 sps:$4 sm:$0xff]  }
 0x443   : > { %12119 = vmatpush1.bf16.msra.mxu0 %v17369_v13  ;;  %v17406_v13 = vld [vmem:[%s19197_s23 + $0x46c] ss:$16 sps:$4 sm:$0xff]  }
 0x444   : > { %12160 = vmatpush1.bf16.msra.mxu1 %v17372_v48  ;;  %12120 = vmatprep.subr.bf16.mxu0 %v17377_v15  ;;  %v17404_v48 = vld [vmem:[%s19197_s23 + $0x468] ss:$16 sps:$4 sm:$0xff]   ;;  %v17412_v15 = vld [vmem:[%s19197_s23 + $0x48c] ss:$16 sps:$4 sm:$0xff]  }
 0x445   : > { %12161 = vmatprep.subr.bf16.mxu1 %v17380_v14  ;;  %v17407_v14 = vld [vmem:[%s19197_s23 + $0x288] ss:$16 sps:$4 sm:$0xff]  }
 0x447   : > { %12121 = vmatpush1.bf16.msra.mxu0 %v17375_v63  ;;  %v17410_v63 = vld [vmem:[%s19197_s23 + $0x488] ss:$16 sps:$4 sm:$0xff]  }
 0x448   : > { %12162 = vmatpush1.bf16.msra.mxu1 %v17378_v33  ;;  %12172 = vmatprep.subr.bf16.mxu0 %v17385_v11  ;;  %v17415_v33 = vld [vmem:[%s19197_s23 + $0x2ac] ss:$16 sps:$4 sm:$0xff]  }
 0x449   : > { %12213 = vmatprep.subr.bf16.mxu1 %v17388_v43  ;;  %v17418_v11 = vld [vmem:[%s19197_s23 + $0x4ac] ss:$16 sps:$4 sm:$0xff]   ;;  %v17413_v43 = vld [vmem:[%s19197_s23 + $0x2a8] ss:$16 sps:$4 sm:$0xff]  }
 0x44a   : > { %12123 = vmatmul.mubr.bf16.vlgmr.msra.gmra.mrb[52].mxu0 %v20518_v35 }
 0x44b   : > { %12164 = vmatmul.mubr.bf16.vlgmr.msra.gmra.mrb[52].mxu1 %v19297_v7  ;;  %12173 = vmatpush1.bf16.msra.mxu0 %v17383_v0  ;;  %v17395_v7 = vld [vmem:[%s19197_s23 + $0x248] ss:$16 sps:$4 sm:$0xff]  }
 0x44c   : > { %12214 = vmatpush1.bf16.msra.mxu1 %v17386_v32  ;;  %12174 = vmatprep.subr.bf16.mxu0 %v17391_v55  ;;  %v17416_v0 = vld [vmem:[%s19197_s23 + $0x4a8] ss:$16 sps:$4 sm:$0xff]   ;;  %v17421_v32 = vld [vmem:[%s19197_s23 + $0x2cc] ss:$16 sps:$4 sm:$0xff]  }
 0x44d   : > { %12215 = vmatprep.subr.bf16.mxu1 %v17394_v34  ;;  %12204 = vmatprep.mubr.bf16.mxu0 %v19275_v52  ;;  %v17401_v52 = vld [vmem:[%s19197_s23 + $0x268] ss:$16 sps:$4 sm:$0xff]   ;;  %v17424_v55 = vld [vmem:[%s19197_s23 + $0x4cc] ss:$16 sps:$4 sm:$0xff]  }
 0x44e   : > { %12245 = vmatprep.mubr.bf16.mxu1 %v19337_v37  ;;  %v17409_v37 = vld [vmem:[%s19197_s23 + $0x28c] ss:$16 sps:$4 sm:$0xff]  }
 0x44f   : > { %12175 = vmatpush1.bf16.msra.mxu0 %v17389_v16 }
 0x450   : > { %12216 = vmatpush1.bf16.msra.mxu1 %v17392_v22  ;;  %12176 = vmatprep.subr.bf16.mxu0 %v17397_v31  ;;  %v17419_v22 = vld [vmem:[%s19197_s23 + $0x2c8] ss:$16 sps:$4 sm:$0xff]  }
 0x451   : > { %12217 = vmatprep.subr.bf16.mxu1 %v17400_v5  ;;  %v17422_v31 = vld [vmem:[%s19197_s23 + $0x4c8] ss:$16 sps:$4 sm:$0xff]  }
 0x453   : > { %12177 = vmatpush1.bf16.msra.mxu0 %v17395_v7 }
 0x454   : > { %12218 = vmatpush1.bf16.msra.mxu1 %v17398_v12  ;;  %12178 = vmatprep.subr.bf16.mxu0 %v17403_v36 }
 0x455   : > { %12219 = vmatprep.subr.bf16.mxu1 %v17406_v13 }
 0x457   : > { %12179 = vmatpush1.bf16.msra.mxu0 %v17401_v52 }
 0x458   : > { %12220 = vmatpush1.bf16.msra.mxu1 %v17404_v48  ;;  %12180 = vmatprep.subr.bf16.mxu0 %v17409_v37 }
 0x459   : > { %12221 = vmatprep.subr.bf16.mxu1 %v17412_v15 }
 0x45b   : > { %12181 = vmatpush1.bf16.msra.mxu0 %v17407_v14  ;;  %v17430_v14 = vld [vmem:[%s19197_s23 + $0x4ec] ss:$16 sps:$4 sm:$0xff]  }
 0x45c   : > { %12222 = vmatpush1.bf16.msra.mxu1 %v17410_v63  ;;  %12182 = vmatprep.subr.bf16.mxu0 %v17415_v33  ;;  %v17428_v33 = vld [vmem:[%s19197_s23 + $0x4e8] ss:$16 sps:$4 sm:$0xff]  }
 0x45d   : > { %12223 = vmatprep.subr.bf16.mxu1 %v17418_v11  ;;  %v11878_v34 = vpop.f32.mrb[40].mxu0  ;;  %v17433_v11 = vld [vmem:[%s19197_s23 + $0x30c] ss:$16 sps:$4 sm:$0xff]  }
 0x45e   : > { %v11919_v16 = vpop.f32.mrb[40].mxu1  ;;  %v11879_v5 = vadd.f32 %v11878_v34, %v20472_v45  ;;  %v11880_v7 = vpop.f32.mrb[41].mxu0  ;;  %v17427_v45 = vld [vmem:[%s19197_s23 + $0x2ec] ss:$16 sps:$4 sm:$0xff]  }
 0x45f   : > { %v11921_v12 = vpop.f32.mrb[41].mxu1  ;;  %v11881_v36 = vadd.f32 %v11880_v7, %v20476_v10  ;;  %v11882_v13 = vpop.f32.mrb[42].mxu0  ;;  %12183 = vmatpush1.bf16.msra.mxu0 %v17413_v43  ;;  %v17425_v10 = vld [vmem:[%s19197_s23 + $0x2e8] ss:$16 sps:$4 sm:$0xff]   ;;  %v17436_v43 = vld [vmem:[%s19197_s23 + $0x50c] ss:$16 sps:$4 sm:$0xff]  }
 0x460   : > { %v11923_v52 = vpop.f32.mrb[42].mxu1  ;;  %12224 = vmatpush1.bf16.msra.mxu1 %v17416_v0  ;;  %v20550_v48 = vadd.f32 %v11919_v16, %v11879_v5  ;;  %v11883_v37 = vpop.f32.mrb[43].mxu0  ;;  %12184 = vmatprep.subr.bf16.mxu0 %v17421_v32  ;;  %v17431_v0 = vld [vmem:[%s19197_s23 + $0x308] ss:$16 sps:$4 sm:$0xff]   ;;  %v17442_v34 = vld [vmem:[%s19197_s23 + $0x52c] ss:$16 sps:$4 sm:$0xff]  }
 0x461   : > { %v11924_v15 = vpop.f32.mrb[43].mxu1  ;;  %12225 = vmatprep.subr.bf16.mxu1 %v17424_v55  ;;  %v20554_v63 = vadd.f32 %v11921_v12, %v11881_v36  ;;  %v17434_v32 = vld [vmem:[%s19197_s23 + $0x508] ss:$16 sps:$4 sm:$0xff]   ;;  %v17439_v55 = vld [vmem:[%s19197_s23 + $0x32c] ss:$16 sps:$4 sm:$0xff]  }
 0x462   : > { %v17437_v16 = vld [vmem:[%s19197_s23 + $0x328] ss:$16 sps:$4 sm:$0xff]   ;;  %v17448_v5 = vld [vmem:[%s19197_s23 + $0x54c] ss:$16 sps:$4 sm:$0xff]  }
 0x463   : > { %12185 = vmatpush1.bf16.msra.mxu0 %v17419_v22  ;;  %v17440_v22 = vld [vmem:[%s19197_s23 + $0x528] ss:$16 sps:$4 sm:$0xff]   ;;  %v17451_v36 = vld [vmem:[%s19197_s23 + $0x36c] ss:$16 sps:$4 sm:$0xff]  }
 0x464   : > { %12226 = vmatpush1.bf16.msra.mxu1 %v17422_v31  ;;  %12186 = vmatprep.subr.bf16.mxu0 %v17427_v45  ;;  %v17445_v31 = vld [vmem:[%s19197_s23 + $0x34c] ss:$16 sps:$4 sm:$0xff]   ;;  %v17443_v7 = vld [vmem:[%s19197_s23 + $0x348] ss:$16 sps:$4 sm:$0xff]  }
 0x465   : > { %12227 = vmatprep.subr.bf16.mxu1 %v17430_v14  ;;  %v17446_v12 = vld [vmem:[%s19197_s23 + $0x548] ss:$16 sps:$4 sm:$0xff]   ;;  %v17454_v13 = vld [vmem:[%s19197_s23 + $0x56c] ss:$16 sps:$4 sm:$0xff]  }
 0x466   : > { %v17449_v52 = vld [vmem:[%s19197_s23 + $0x368] ss:$16 sps:$4 sm:$0xff]   ;;  %v17457_v15 = vld [vmem:[%s19197_s23 + $0x38c] ss:$16 sps:$4 sm:$0xff]  }
 0x467   : > { %12187 = vmatpush1.bf16.msra.mxu0 %v17425_v10  ;;  %v17452_v37 = vld [vmem:[%s19197_s23 + $0x568] ss:$16 sps:$4 sm:$0xff]   ;;  %v17460_v45 = vld [vmem:[%s19197_s23 + $0x58c] ss:$16 sps:$4 sm:$0xff]  }
 0x468   : > { %12228 = vmatpush1.bf16.msra.mxu1 %v17428_v33  ;;  %12188 = vmatprep.subr.bf16.mxu0 %v17433_v11  ;;  %v17455_v14 = vld [vmem:[%s19197_s23 + $0x388] ss:$16 sps:$4 sm:$0xff]   ;;  %v17463_v33 = vld [vmem:[%s19197_s23 + $0x3ac] ss:$16 sps:$4 sm:$0xff]  }
 0x469   : > { %12229 = vmatprep.subr.bf16.mxu1 %v17436_v43  ;;  %v17458_v10 = vld [vmem:[%s19197_s23 + $0x588] ss:$16 sps:$4 sm:$0xff]   ;;  %v17466_v11 = vld [vmem:[%s19197_s23 + $0x5ac] ss:$16 sps:$4 sm:$0xff]  }
 0x46a   : > { %v17461_v43 = vld [vmem:[%s19197_s23 + $0x3a8] ss:$16 sps:$4 sm:$0xff]  }
 0x46b   : > { %12189 = vmatpush1.bf16.msra.mxu0 %v17431_v0  ;;  %v17464_v0 = vld [vmem:[%s19197_s23 + $0x5a8] ss:$16 sps:$4 sm:$0xff]  }
 0x46c   : > { %12230 = vmatpush1.bf16.msra.mxu1 %v17434_v32  ;;  %12190 = vmatprep.subr.bf16.mxu0 %v17439_v55  ;;  %v17469_v32 = vld [vmem:[%s19197_s23 + $0x3cc] ss:$16 sps:$4 sm:$0xff]  }
 0x46d   : > { %12231 = vmatprep.subr.bf16.mxu1 %v17442_v34  ;;  %v17472_v55 = vld [vmem:[%s19197_s23 + $0x5cc] ss:$16 sps:$4 sm:$0xff]   ;;  %v17467_v34 = vld [vmem:[%s19197_s23 + $0x3c8] ss:$16 sps:$4 sm:$0xff]  }
 0x46f   : > { %12191 = vmatpush1.bf16.msra.mxu0 %v17437_v16  ;;  %v17470_v16 = vld [vmem:[%s19197_s23 + $0x5c8] ss:$16 sps:$4 sm:$0xff]  }
 0x470   : > { %12232 = vmatpush1.bf16.msra.mxu1 %v17440_v22  ;;  %12192 = vmatprep.subr.bf16.mxu0 %v17445_v31  ;;  %v17475_v22 = vld [vmem:[%s19197_s23 + $0x3ec] ss:$16 sps:$4 sm:$0xff]  }
 0x471   : > { %12233 = vmatprep.subr.bf16.mxu1 %v17448_v5  ;;  %v17478_v31 = vld [vmem:[%s19197_s23 + $0x5ec] ss:$16 sps:$4 sm:$0xff]   ;;  %v17473_v5 = vld [vmem:[%s19197_s23 + $0x3e8] ss:$16 sps:$4 sm:$0xff]  }
 0x473   : > { %12193 = vmatpush1.bf16.msra.mxu0 %v17443_v7  ;;  %v17476_v7 = vld [vmem:[%s19197_s23 + $0x5e8] ss:$16 sps:$4 sm:$0xff]  }
 0x474   : > { %12234 = vmatpush1.bf16.msra.mxu1 %v17446_v12  ;;  %12194 = vmatprep.subr.bf16.mxu0 %v17451_v36  ;;  %v17481_v12 = vld [vmem:[%s19197_s23 + $0x60c] ss:$16 sps:$4 sm:$0xff]  }
 0x475   : > { %12235 = vmatprep.subr.bf16.mxu1 %v17454_v13  ;;  %v17484_v36 = vld [vmem:[%s19197_s23 + $0x80c] ss:$16 sps:$4 sm:$0xff]   ;;  %v17479_v13 = vld [vmem:[%s19197_s23 + $0x608] ss:$16 sps:$4 sm:$0xff]  }
 0x477   : > { %12195 = vmatpush1.bf16.msra.mxu0 %v17449_v52  ;;  %v17482_v52 = vld [vmem:[%s19197_s23 + $0x808] ss:$16 sps:$4 sm:$0xff]  }
 0x478   : > { %12236 = vmatpush1.bf16.msra.mxu1 %v17452_v37  ;;  %12196 = vmatprep.subr.bf16.mxu0 %v17457_v15  ;;  %v17487_v37 = vld [vmem:[%s19197_s23 + $0x62c] ss:$16 sps:$4 sm:$0xff]  }
 0x479   : > { %12237 = vmatprep.subr.bf16.mxu1 %v17460_v45  ;;  %v17490_v15 = vld [vmem:[%s19197_s23 + $0x82c] ss:$16 sps:$4 sm:$0xff]   ;;  %v17485_v45 = vld [vmem:[%s19197_s23 + $0x628] ss:$16 sps:$4 sm:$0xff]  }
 0x47b   : > { %12197 = vmatpush1.bf16.msra.mxu0 %v17455_v14  ;;  %v17488_v14 = vld [vmem:[%s19197_s23 + $0x828] ss:$16 sps:$4 sm:$0xff]  }
 0x47c   : > { %12238 = vmatpush1.bf16.msra.mxu1 %v17458_v10  ;;  %12198 = vmatprep.subr.bf16.mxu0 %v17463_v33  ;;  %v17493_v10 = vld [vmem:[%s19197_s23 + $0x64c] ss:$16 sps:$4 sm:$0xff]  }
 0x47d   : > { %12239 = vmatprep.subr.bf16.mxu1 %v17466_v11  ;;  %v17496_v33 = vld [vmem:[%s19197_s23 + $0x84c] ss:$16 sps:$4 sm:$0xff]  }
 0x47e   : > { %v17499_v11 = vld [vmem:[%s19197_s23 + $0x66c] ss:$16 sps:$4 sm:$0xff]  }
 0x47f   : > { %12199 = vmatpush1.bf16.msra.mxu0 %v17461_v43  ;;  %v17502_v43 = vld [vmem:[%s19197_s23 + $0x86c] ss:$16 sps:$4 sm:$0xff]  }
 0x480   : > { %12240 = vmatpush1.bf16.msra.mxu1 %v17464_v0  ;;  %12200 = vmatprep.subr.bf16.mxu0 %v17469_v32  ;;  %v17497_v0 = vld [vmem:[%s19197_s23 + $0x668] ss:$16 sps:$4 sm:$0xff]   ;;  %v17508_v32 = vld [vmem:[%s19197_s23 + $0x88c] ss:$16 sps:$4 sm:$0xff]  }
 0x481   : > { %12241 = vmatprep.subr.bf16.mxu1 %v17472_v55  ;;  %v17503_v55 = vld [vmem:[%s19197_s23 + $0x688] ss:$16 sps:$4 sm:$0xff]  }
 0x483   : > { %12201 = vmatpush1.bf16.msra.mxu0 %v17467_v34  ;;  %v17506_v34 = vld [vmem:[%s19197_s23 + $0x888] ss:$16 sps:$4 sm:$0xff]  }
 0x484   : > { %12242 = vmatpush1.bf16.msra.mxu1 %v17470_v16  ;;  %12202 = vmatprep.subr.bf16.mxu0 %v17475_v22  ;;  %v17511_v16 = vld [vmem:[%s19197_s23 + $0x6ac] ss:$16 sps:$4 sm:$0xff]  }
 0x485   : > { %12243 = vmatprep.subr.bf16.mxu1 %v17478_v31  ;;  %v17514_v22 = vld [vmem:[%s19197_s23 + $0x8ac] ss:$16 sps:$4 sm:$0xff]   ;;  %v17509_v31 = vld [vmem:[%s19197_s23 + $0x6a8] ss:$16 sps:$4 sm:$0xff]  }
 0x487   : > { %12203 = vmatpush1.bf16.msra.mxu0 %v17473_v5  ;;  %v17512_v5 = vld [vmem:[%s19197_s23 + $0x8a8] ss:$16 sps:$4 sm:$0xff]  }
 0x488   : > { %12244 = vmatpush1.bf16.msra.mxu1 %v17476_v7  ;;  %12254 = vmatprep.subr.bf16.mxu0 %v17481_v12  ;;  %v17517_v7 = vld [vmem:[%s19197_s23 + $0x6cc] ss:$16 sps:$4 sm:$0xff]  }
 0x489   : > { %12295 = vmatprep.subr.bf16.mxu1 %v17484_v36  ;;  %v17520_v12 = vld [vmem:[%s19197_s23 + $0x8cc] ss:$16 sps:$4 sm:$0xff]  }
 0x48a   : > { %12205 = vmatmul.mubr.bf16.vlgmr.msra.gmra.mrb[56].mxu0 %v19299_v8  ;;  %v17491_v8 = vld [vmem:[%s19197_s23 + $0x648] ss:$16 sps:$4 sm:$0xff]  }
 0x48b   : > { %12246 = vmatmul.mubr.bf16.vlgmr.msra.gmra.mrb[56].mxu1 %v19385_v17  ;;  %12255 = vmatpush1.bf16.msra.mxu0 %v17479_v13  ;;  %v17494_v17 = vld [vmem:[%s19197_s23 + $0x848] ss:$16 sps:$4 sm:$0xff]  }
 0x48c   : > { %12296 = vmatpush1.bf16.msra.mxu1 %v17482_v52  ;;  %12256 = vmatprep.subr.bf16.mxu0 %v17487_v37 }
 0x48d   : > { %12297 = vmatprep.subr.bf16.mxu1 %v17490_v15  ;;  %12286 = vmatprep.mubr.bf16.mxu0 %v19341_v38  ;;  %v17500_v38 = vld [vmem:[%s19197_s23 + $0x868] ss:$16 sps:$4 sm:$0xff]  }
 0x48e   : > { %12327 = vmatprep.mubr.bf16.mxu1 %v19403_v25  ;;  %v17505_v25 = vld [vmem:[%s19197_s23 + $0x68c] ss:$16 sps:$4 sm:$0xff]  }
 0x48f   : > { %12257 = vmatpush1.bf16.msra.mxu0 %v17485_v45 }
 0x490   : > { %12298 = vmatpush1.bf16.msra.mxu1 %v17488_v14  ;;  %12258 = vmatprep.subr.bf16.mxu0 %v17493_v10 }
 0x491   : > { %12299 = vmatprep.subr.bf16.mxu1 %v17496_v33  ;;  %v17515_v33 = vld [vmem:[%s19197_s23 + $0x6c8] ss:$16 sps:$4 sm:$0xff]  }
 0x493   : > { %12259 = vmatpush1.bf16.msra.mxu0 %v17491_v8  ;;  %v17518_v8 = vld [vmem:[%s19197_s23 + $0x8c8] ss:$16 sps:$4 sm:$0xff]  }
 0x494   : > { %12300 = vmatpush1.bf16.msra.mxu1 %v17494_v17  ;;  %12260 = vmatprep.subr.bf16.mxu0 %v17499_v11 }
 0x495   : > { %12301 = vmatprep.subr.bf16.mxu1 %v17502_v43 }
 0x497   : > { %12261 = vmatpush1.bf16.msra.mxu0 %v17497_v0 }
 0x498   : > { %12302 = vmatpush1.bf16.msra.mxu1 %v17500_v38  ;;  %12262 = vmatprep.subr.bf16.mxu0 %v17505_v25  ;;  %v17521_v38 = vld [vmem:[%s19197_s23 + $0x6e8] ss:$16 sps:$4 sm:$0xff]  }
 0x499   : > { %12303 = vmatprep.subr.bf16.mxu1 %v17508_v32  ;;  %v17524_v25 = vld [vmem:[%s19197_s23 + $0x8e8] ss:$16 sps:$4 sm:$0xff]   ;;  %v17529_v32 = vld [vmem:[%s19197_s23 + $0x70c] ss:$16 sps:$4 sm:$0xff]  }
 0x49b   : > { %12263 = vmatpush1.bf16.msra.mxu0 %v17503_v55  ;;  %v17532_v55 = vld [vmem:[%s19197_s23 + $0x90c] ss:$16 sps:$4 sm:$0xff]  }
 0x49c   : > { %12304 = vmatpush1.bf16.msra.mxu1 %v17506_v34  ;;  %12264 = vmatprep.subr.bf16.mxu0 %v17511_v16  ;;  %v17527_v34 = vld [vmem:[%s19197_s23 + $0x708] ss:$16 sps:$4 sm:$0xff]  }
 0x49d   : > { %12305 = vmatprep.subr.bf16.mxu1 %v17514_v22  ;;  %v11960_v36 = vpop.f32.mrb[44].mxu0  ;;  %v17530_v16 = vld [vmem:[%s19197_s23 + $0x908] ss:$16 sps:$4 sm:$0xff]   ;;  %v17535_v22 = vld [vmem:[%s19197_s23 + $0x72c] ss:$16 sps:$4 sm:$0xff]  }
 0x49e   : > { %v12001_v13 = vpop.f32.mrb[44].mxu1  ;;  %v11961_v52 = vadd.f32 %v11960_v36, %v20550_v48  ;;  %v11962_v37 = vpop.f32.mrb[45].mxu0  ;;  %v17523_v48 = vld [vmem:[%s19197_s23 + $0x6ec] ss:$16 sps:$4 sm:$0xff]  }
 0x49f   : > { %v12003_v15 = vpop.f32.mrb[45].mxu1  ;;  %v11963_v45 = vadd.f32 %v11962_v37, %v20554_v63  ;;  %v11964_v14 = vpop.f32.mrb[46].mxu0  ;;  %12265 = vmatpush1.bf16.msra.mxu0 %v17509_v31  ;;  %v17526_v63 = vld [vmem:[%s19197_s23 + $0x8ec] ss:$16 sps:$4 sm:$0xff]  }
 0x4a0   : > { %v12005_v10 = vpop.f32.mrb[46].mxu1  ;;  %12306 = vmatpush1.bf16.msra.mxu1 %v17512_v5  ;;  %v20624_v17 = vadd.f32 %v12001_v13, %v11961_v52  ;;  %v11965_v11 = vpop.f32.mrb[47].mxu0  ;;  %12266 = vmatprep.subr.bf16.mxu0 %v17517_v7  ;;  %v17538_v31 = vld [vmem:[%s19197_s23 + $0x92c] ss:$16 sps:$4 sm:$0xff]   ;;  %v17533_v5 = vld [vmem:[%s19197_s23 + $0x728] ss:$16 sps:$4 sm:$0xff]  }
 0x4a1   : > { %v12006_v43 = vpop.f32.mrb[47].mxu1  ;;  %12307 = vmatprep.subr.bf16.mxu1 %v17520_v12  ;;  %v20628_v0 = vadd.f32 %v12003_v15, %v11963_v45  ;;  %v17536_v7 = vld [vmem:[%s19197_s23 + $0x928] ss:$16 sps:$4 sm:$0xff]   ;;  %v17541_v12 = vld [vmem:[%s19197_s23 + $0x74c] ss:$16 sps:$4 sm:$0xff]  }
 0x4a2   : > { %v17544_v36 = vld [vmem:[%s19197_s23 + $0x94c] ss:$16 sps:$4 sm:$0xff]   ;;  %v17539_v13 = vld [vmem:[%s19197_s23 + $0x748] ss:$16 sps:$4 sm:$0xff]  }
 0x4a3   : > { %12267 = vmatpush1.bf16.msra.mxu0 %v17515_v33  ;;  %v17542_v52 = vld [vmem:[%s19197_s23 + $0x948] ss:$16 sps:$4 sm:$0xff]   ;;  %v17547_v37 = vld [vmem:[%s19197_s23 + $0x76c] ss:$16 sps:$4 sm:$0xff]  }
 0x4a4   : > { %12308 = vmatpush1.bf16.msra.mxu1 %v17518_v8  ;;  %12268 = vmatprep.subr.bf16.mxu0 %v17523_v48  ;;  %v17550_v15 = vld [vmem:[%s19197_s23 + $0x96c] ss:$16 sps:$4 sm:$0xff]   ;;  %v17545_v45 = vld [vmem:[%s19197_s23 + $0x768] ss:$16 sps:$4 sm:$0xff]  }
 0x4a5   : > { %12309 = vmatprep.subr.bf16.mxu1 %v17526_v63  ;;  %v17548_v14 = vld [vmem:[%s19197_s23 + $0x968] ss:$16 sps:$4 sm:$0xff]   ;;  %v17553_v10 = vld [vmem:[%s19197_s23 + $0x78c] ss:$16 sps:$4 sm:$0xff]  }
 0x4a6   : > { %v17556_v33 = vld [vmem:[%s19197_s23 + $0x98c] ss:$16 sps:$4 sm:$0xff]   ;;  %v17551_v8 = vld [vmem:[%s19197_s23 + $0x788] ss:$16 sps:$4 sm:$0xff]  }
 0x4a7   : > { %12269 = vmatpush1.bf16.msra.mxu0 %v17521_v38  ;;  %v17554_v11 = vld [vmem:[%s19197_s23 + $0x988] ss:$16 sps:$4 sm:$0xff]   ;;  %v17559_v43 = vld [vmem:[%s19197_s23 + $0x7ac] ss:$16 sps:$4 sm:$0xff]  }
 0x4a8   : > { %12310 = vmatpush1.bf16.msra.mxu1 %v17524_v25  ;;  %12270 = vmatprep.subr.bf16.mxu0 %v17529_v32  ;;  %v17562_v48 = vld [vmem:[%s19197_s23 + $0x9ac] ss:$16 sps:$4 sm:$0xff]   ;;  %v17557_v63 = vld [vmem:[%s19197_s23 + $0x7a8] ss:$16 sps:$4 sm:$0xff]  }
 0x4a9   : > { %12311 = vmatprep.subr.bf16.mxu1 %v17532_v55  ;;  %v17560_v38 = vld [vmem:[%s19197_s23 + $0x9a8] ss:$16 sps:$4 sm:$0xff]   ;;  %v17565_v25 = vld [vmem:[%s19197_s23 + $0x7cc] ss:$16 sps:$4 sm:$0xff]  }
 0x4aa   : > { %v17568_v32 = vld [vmem:[%s19197_s23 + $0x9cc] ss:$16 sps:$4 sm:$0xff]   ;;  %v17563_v55 = vld [vmem:[%s19197_s23 + $0x7c8] ss:$16 sps:$4 sm:$0xff]  }
 0x4ab   : > { %12271 = vmatpush1.bf16.msra.mxu0 %v17527_v34  ;;  %v17566_v34 = vld [vmem:[%s19197_s23 + $0x9c8] ss:$16 sps:$4 sm:$0xff]  }
 0x4ac   : > { %12312 = vmatpush1.bf16.msra.mxu1 %v17530_v16  ;;  %12272 = vmatprep.subr.bf16.mxu0 %v17535_v22  ;;  %v17571_v16 = vld [vmem:[%s19197_s23 + $0x7ec] ss:$16 sps:$4 sm:$0xff]  }
 0x4ad   : > { %12313 = vmatprep.subr.bf16.mxu1 %v17538_v31  ;;  %v17574_v22 = vld [vmem:[%s19197_s23 + $0x9ec] ss:$16 sps:$4 sm:$0xff]   ;;  %v17569_v31 = vld [vmem:[%s19197_s23 + $0x7e8] ss:$16 sps:$4 sm:$0xff]  }
 0x4af   : > { %12273 = vmatpush1.bf16.msra.mxu0 %v17533_v5  ;;  %v17572_v5 = vld [vmem:[%s19197_s23 + $0x9e8] ss:$16 sps:$4 sm:$0xff]  }
 0x4b0   : > { %12314 = vmatpush1.bf16.msra.mxu1 %v17536_v7  ;;  %12274 = vmatprep.subr.bf16.mxu0 %v17541_v12  ;;  %v17577_v7 = vld [vmem:[%s19197_s23 + $0xa0c] ss:$16 sps:$4 sm:$0xff]  }
 0x4b1   : > { %12315 = vmatprep.subr.bf16.mxu1 %v17544_v36  ;;  %v17580_v12 = vld [vmem:[%s19197_s23 + $0xc0c] ss:$16 sps:$4 sm:$0xff]   ;;  %v17575_v36 = vld [vmem:[%s19197_s23 + $0xa08] ss:$16 sps:$4 sm:$0xff]  }
 0x4b3   : > { %12275 = vmatpush1.bf16.msra.mxu0 %v17539_v13  ;;  %v17578_v13 = vld [vmem:[%s19197_s23 + $0xc08] ss:$16 sps:$4 sm:$0xff]  }
 0x4b4   : > { %12316 = vmatpush1.bf16.msra.mxu1 %v17542_v52  ;;  %12276 = vmatprep.subr.bf16.mxu0 %v17547_v37  ;;  %v17583_v52 = vld [vmem:[%s19197_s23 + $0xa2c] ss:$16 sps:$4 sm:$0xff]  }
 0x4b5   : > { %12317 = vmatprep.subr.bf16.mxu1 %v17550_v15  ;;  %v17586_v37 = vld [vmem:[%s19197_s23 + $0xc2c] ss:$16 sps:$4 sm:$0xff]   ;;  %v17581_v15 = vld [vmem:[%s19197_s23 + $0xa28] ss:$16 sps:$4 sm:$0xff]  }
 0x4b7   : > { %12277 = vmatpush1.bf16.msra.mxu0 %v17545_v45  ;;  %v17584_v45 = vld [vmem:[%s19197_s23 + $0xc28] ss:$16 sps:$4 sm:$0xff]  }
 0x4b8   : > { %12318 = vmatpush1.bf16.msra.mxu1 %v17548_v14  ;;  %12278 = vmatprep.subr.bf16.mxu0 %v17553_v10  ;;  %v17589_v14 = vld [vmem:[%s19197_s23 + $0xa4c] ss:$16 sps:$4 sm:$0xff]  }
 0x4b9   : > { %12319 = vmatprep.subr.bf16.mxu1 %v17556_v33  ;;  %v17592_v10 = vld [vmem:[%s19197_s23 + $0xc4c] ss:$16 sps:$4 sm:$0xff]  }
 0x4ba   : > { %v17595_v33 = vld [vmem:[%s19197_s23 + $0xa6c] ss:$16 sps:$4 sm:$0xff]  }
 0x4bb   : > { %12279 = vmatpush1.bf16.msra.mxu0 %v17551_v8  ;;  %v17598_v8 = vld [vmem:[%s19197_s23 + $0xc6c] ss:$16 sps:$4 sm:$0xff]  }
 0x4bc   : > { %12320 = vmatpush1.bf16.msra.mxu1 %v17554_v11  ;;  %12280 = vmatprep.subr.bf16.mxu0 %v17559_v43  ;;  %v17593_v11 = vld [vmem:[%s19197_s23 + $0xa68] ss:$16 sps:$4 sm:$0xff]   ;;  %v17604_v43 = vld [vmem:[%s19197_s23 + $0xc8c] ss:$16 sps:$4 sm:$0xff]  }
 0x4bd   : > { %12321 = vmatprep.subr.bf16.mxu1 %v17562_v48  ;;  %v17599_v48 = vld [vmem:[%s19197_s23 + $0xa88] ss:$16 sps:$4 sm:$0xff]  }
 0x4bf   : > { %12281 = vmatpush1.bf16.msra.mxu0 %v17557_v63  ;;  %v17602_v63 = vld [vmem:[%s19197_s23 + $0xc88] ss:$16 sps:$4 sm:$0xff]  }
 0x4c0   : > { %12322 = vmatpush1.bf16.msra.mxu1 %v17560_v38  ;;  %12282 = vmatprep.subr.bf16.mxu0 %v17565_v25  ;;  %v17607_v38 = vld [vmem:[%s19197_s23 + $0xaac] ss:$16 sps:$4 sm:$0xff]  }
 0x4c1   : > { %12323 = vmatprep.subr.bf16.mxu1 %v17568_v32  ;;  %v17610_v25 = vld [vmem:[%s19197_s23 + $0xcac] ss:$16 sps:$4 sm:$0xff]   ;;  %v17605_v32 = vld [vmem:[%s19197_s23 + $0xaa8] ss:$16 sps:$4 sm:$0xff]  }
 0x4c3   : > { %12283 = vmatpush1.bf16.msra.mxu0 %v17563_v55  ;;  %v17608_v55 = vld [vmem:[%s19197_s23 + $0xca8] ss:$16 sps:$4 sm:$0xff]  }
 0x4c4   : > { %12324 = vmatpush1.bf16.msra.mxu1 %v17566_v34  ;;  %12284 = vmatprep.subr.bf16.mxu0 %v17571_v16  ;;  %v17613_v34 = vld [vmem:[%s19197_s23 + $0xacc] ss:$16 sps:$4 sm:$0xff]  }
 0x4c5   : > { %12325 = vmatprep.subr.bf16.mxu1 %v17574_v22  ;;  %v17616_v16 = vld [vmem:[%s19197_s23 + $0xccc] ss:$16 sps:$4 sm:$0xff]  }
 0x4c7   : > { %12285 = vmatpush1.bf16.msra.mxu0 %v17569_v31 }
 0x4c8   : > { %12326 = vmatpush1.bf16.msra.mxu1 %v17572_v5  ;;  %12336 = vmatprep.subr.bf16.mxu0 %v17577_v7 }
 0x4c9   : > { %12377 = vmatprep.subr.bf16.mxu1 %v17580_v12 }
 0x4ca   : > { %12287 = vmatmul.mubr.bf16.vlgmr.msra.gmra.mrb[60].mxu0 %v19389_v18  ;;  %v17587_v18 = vld [vmem:[%s19197_s23 + $0xa48] ss:$16 sps:$4 sm:$0xff]  }
 0x4cb   : > { %12328 = vmatmul.mubr.bf16.vlgmr.msra.gmra.mrb[60].mxu1 %v19477_v39  ;;  %12337 = vmatpush1.bf16.msra.mxu0 %v17575_v36  ;;  %v17590_v39 = vld [vmem:[%s19197_s23 + $0xc48] ss:$16 sps:$4 sm:$0xff]  }
 0x4cc   : > { %12378 = vmatpush1.bf16.msra.mxu1 %v17578_v13  ;;  %12338 = vmatprep.subr.bf16.mxu0 %v17583_v52 }
 0x4cd   : > { %12379 = vmatprep.subr.bf16.mxu1 %v17586_v37  ;;  %12368 = vmatprep.mubr.bf16.mxu0 %v19407_v26  ;;  %v17596_v26 = vld [vmem:[%s19197_s23 + $0xc68] ss:$16 sps:$4 sm:$0xff]  }
 0x4ce   : > { %12409 = vmatprep.mubr.bf16.mxu1 %v19493_v23  ;;  %v17601_v23 = vld [vmem:[%s19197_s23 + $0xa8c] ss:$16 sps:$4 sm:$0xff]   ;;  %v17611_v37 = vld [vmem:[%s19197_s23 + $0xac8] ss:$16 sps:$4 sm:$0xff]  }
 0x4cf   : > { %12339 = vmatpush1.bf16.msra.mxu0 %v17581_v15  ;;  %v17614_v15 = vld [vmem:[%s19197_s23 + $0xcc8] ss:$16 sps:$4 sm:$0xff]  }
 0x4d0   : > { %12380 = vmatpush1.bf16.msra.mxu1 %v17584_v45  ;;  %12340 = vmatprep.subr.bf16.mxu0 %v17589_v14 }
 0x4d1   : > { %12381 = vmatprep.subr.bf16.mxu1 %v17592_v10 }
 0x4d3   : > { %12341 = vmatpush1.bf16.msra.mxu0 %v17587_v18 }
 0x4d4   : > { %12382 = vmatpush1.bf16.msra.mxu1 %v17590_v39  ;;  %12342 = vmatprep.subr.bf16.mxu0 %v17595_v33  ;;  %v17617_v39 = vld [vmem:[%s19197_s23 + $0xae8] ss:$16 sps:$4 sm:$0xff]  }
 0x4d5   : > { %12383 = vmatprep.subr.bf16.mxu1 %v17598_v8  ;;  %v17620_v33 = vld [vmem:[%s19197_s23 + $0xce8] ss:$16 sps:$4 sm:$0xff]   ;;  %v17625_v8 = vld [vmem:[%s19197_s23 + $0xb0c] ss:$16 sps:$4 sm:$0xff]  }
 0x4d7   : > { %12343 = vmatpush1.bf16.msra.mxu0 %v17593_v11  ;;  %v17628_v11 = vld [vmem:[%s19197_s23 + $0xd0c] ss:$16 sps:$4 sm:$0xff]  }
 0x4d8   : > { %12384 = vmatpush1.bf16.msra.mxu1 %v17596_v26  ;;  %12344 = vmatprep.subr.bf16.mxu0 %v17601_v23  ;;  %v17623_v26 = vld [vmem:[%s19197_s23 + $0xb08] ss:$16 sps:$4 sm:$0xff]  }
 0x4d9   : > { %12385 = vmatprep.subr.bf16.mxu1 %v17604_v43  ;;  %v17626_v23 = vld [vmem:[%s19197_s23 + $0xd08] ss:$16 sps:$4 sm:$0xff]   ;;  %v17631_v43 = vld [vmem:[%s19197_s23 + $0xb2c] ss:$16 sps:$4 sm:$0xff]  }
 0x4db   : > { %12345 = vmatpush1.bf16.msra.mxu0 %v17599_v48  ;;  %v17634_v48 = vld [vmem:[%s19197_s23 + $0xd2c] ss:$16 sps:$4 sm:$0xff]  }
 0x4dc   : > { %12386 = vmatpush1.bf16.msra.mxu1 %v17602_v63  ;;  %12346 = vmatprep.subr.bf16.mxu0 %v17607_v38  ;;  %v17629_v63 = vld [vmem:[%s19197_s23 + $0xb28] ss:$16 sps:$4 sm:$0xff]  }
 0x4dd   : > { %12387 = vmatprep.subr.bf16.mxu1 %v17610_v25  ;;  %v12042_v22 = vpop.f32.mrb[48].mxu0  ;;  %v17632_v38 = vld [vmem:[%s19197_s23 + $0xd28] ss:$16 sps:$4 sm:$0xff]   ;;  %v17637_v25 = vld [vmem:[%s19197_s23 + $0xb4c] ss:$16 sps:$4 sm:$0xff]  }
 0x4de   : > { %v12083_v31 = vpop.f32.mrb[48].mxu1  ;;  %v12043_v5 = vadd.f32 %v12042_v22, %v20624_v17  ;;  %v12044_v7 = vpop.f32.mrb[49].mxu0  ;;  %v17619_v17 = vld [vmem:[%s19197_s23 + $0xaec] ss:$16 sps:$4 sm:$0xff]  }
 0x4df   : > { %v12085_v12 = vpop.f32.mrb[49].mxu1  ;;  %v12045_v36 = vadd.f32 %v12044_v7, %v20628_v0  ;;  %v12046_v13 = vpop.f32.mrb[50].mxu0  ;;  %12347 = vmatpush1.bf16.msra.mxu0 %v17605_v32  ;;  %v17622_v0 = vld [vmem:[%s19197_s23 + $0xcec] ss:$16 sps:$4 sm:$0xff]  }
 0x4e0   : > { %v12087_v52 = vpop.f32.mrb[50].mxu1  ;;  %12388 = vmatpush1.bf16.msra.mxu1 %v17608_v55  ;;  %v20698_v45 = vadd.f32 %v12083_v31, %v12043_v5  ;;  %v12047_v14 = vpop.f32.mrb[51].mxu0  ;;  %12348 = vmatprep.subr.bf16.mxu0 %v17613_v34  ;;  %v17640_v32 = vld [vmem:[%s19197_s23 + $0xd4c] ss:$16 sps:$4 sm:$0xff]   ;;  %v17635_v55 = vld [vmem:[%s19197_s23 + $0xb48] ss:$16 sps:$4 sm:$0xff]  }
 0x4e1   : > { %v12088_v10 = vpop.f32.mrb[51].mxu1  ;;  %12389 = vmatprep.subr.bf16.mxu1 %v17616_v16  ;;  %v20702_v18 = vadd.f32 %v12085_v12, %v12045_v36  ;;  %v17638_v34 = vld [vmem:[%s19197_s23 + $0xd48] ss:$16 sps:$4 sm:$0xff]   ;;  %v17643_v16 = vld [vmem:[%s19197_s23 + $0xb6c] ss:$16 sps:$4 sm:$0xff]  }
 0x4e2   : > { %v17646_v22 = vld [vmem:[%s19197_s23 + $0xd6c] ss:$16 sps:$4 sm:$0xff]   ;;  %v17641_v31 = vld [vmem:[%s19197_s23 + $0xb68] ss:$16 sps:$4 sm:$0xff]  }
 0x4e3   : > { %12349 = vmatpush1.bf16.msra.mxu0 %v17611_v37  ;;  %v17644_v5 = vld [vmem:[%s19197_s23 + $0xd68] ss:$16 sps:$4 sm:$0xff]   ;;  %v17649_v7 = vld [vmem:[%s19197_s23 + $0xb8c] ss:$16 sps:$4 sm:$0xff]  }
 0x4e4   : > { %12390 = vmatpush1.bf16.msra.mxu1 %v17614_v15  ;;  %12350 = vmatprep.subr.bf16.mxu0 %v17619_v17  ;;  %v17652_v12 = vld [vmem:[%s19197_s23 + $0xd8c] ss:$16 sps:$4 sm:$0xff]   ;;  %v17647_v36 = vld [vmem:[%s19197_s23 + $0xb88] ss:$16 sps:$4 sm:$0xff]  }
 0x4e5   : > { %12391 = vmatprep.subr.bf16.mxu1 %v17622_v0  ;;  %v17650_v13 = vld [vmem:[%s19197_s23 + $0xd88] ss:$16 sps:$4 sm:$0xff]   ;;  %v17655_v52 = vld [vmem:[%s19197_s23 + $0xbac] ss:$16 sps:$4 sm:$0xff]  }
 0x4e6   : > { %v17658_v37 = vld [vmem:[%s19197_s23 + $0xdac] ss:$16 sps:$4 sm:$0xff]   ;;  %v17653_v15 = vld [vmem:[%s19197_s23 + $0xba8] ss:$16 sps:$4 sm:$0xff]  }
 0x4e7   : > { %12351 = vmatpush1.bf16.msra.mxu0 %v17617_v39  ;;  %v17656_v14 = vld [vmem:[%s19197_s23 + $0xda8] ss:$16 sps:$4 sm:$0xff]   ;;  %v17661_v10 = vld [vmem:[%s19197_s23 + $0xbcc] ss:$16 sps:$4 sm:$0xff]  }
 0x4e8   : > { %12392 = vmatpush1.bf16.msra.mxu1 %v17620_v33  ;;  %12352 = vmatprep.subr.bf16.mxu0 %v17625_v8  ;;  %v17664_v17 = vld [vmem:[%s19197_s23 + $0xdcc] ss:$16 sps:$4 sm:$0xff]   ;;  %v17659_v0 = vld [vmem:[%s19197_s23 + $0xbc8] ss:$16 sps:$4 sm:$0xff]  }
 0x4e9   : > { %12393 = vmatprep.subr.bf16.mxu1 %v17628_v11  ;;  %v17662_v39 = vld [vmem:[%s19197_s23 + $0xdc8] ss:$16 sps:$4 sm:$0xff]   ;;  %v17667_v33 = vld [vmem:[%s19197_s23 + $0xbec] ss:$16 sps:$4 sm:$0xff]  }
 0x4ea   : > { %v17670_v8 = vld [vmem:[%s19197_s23 + $0xdec] ss:$16 sps:$4 sm:$0xff]   ;;  %v17665_v11 = vld [vmem:[%s19197_s23 + $0xbe8] ss:$16 sps:$4 sm:$0xff]  }
 0x4eb   : > { %12353 = vmatpush1.bf16.msra.mxu0 %v17623_v26  ;;  %v17668_v26 = vld [vmem:[%s19197_s23 + $0xde8] ss:$16 sps:$4 sm:$0xff]  }
 0x4ec   : > { %12394 = vmatpush1.bf16.msra.mxu1 %v17626_v23  ;;  %12354 = vmatprep.subr.bf16.mxu0 %v17631_v43  ;;  %v17673_v23 = vld [vmem:[%s19197_s23 + $0xe0c] ss:$16 sps:$4 sm:$0xff]  }
 0x4ed   : > { %12395 = vmatprep.subr.bf16.mxu1 %v17634_v48  ;;  %v17676_v43 = vld [vmem:[%s19197_s23 + $0x100c] ss:$16 sps:$4 sm:$0xff]   ;;  %v17671_v48 = vld [vmem:[%s19197_s23 + $0xe08] ss:$16 sps:$4 sm:$0xff]  }
 0x4ef   : > { %12355 = vmatpush1.bf16.msra.mxu0 %v17629_v63  ;;  %v17674_v63 = vld [vmem:[%s19197_s23 + $0x1008] ss:$16 sps:$4 sm:$0xff]  }
 0x4f0   : > { %12396 = vmatpush1.bf16.msra.mxu1 %v17632_v38  ;;  %12356 = vmatprep.subr.bf16.mxu0 %v17637_v25  ;;  %v17679_v38 = vld [vmem:[%s19197_s23 + $0xe2c] ss:$16 sps:$4 sm:$0xff]  }
 0x4f1   : > { %12397 = vmatprep.subr.bf16.mxu1 %v17640_v32  ;;  %v17682_v25 = vld [vmem:[%s19197_s23 + $0x102c] ss:$16 sps:$4 sm:$0xff]   ;;  %v17677_v32 = vld [vmem:[%s19197_s23 + $0xe28] ss:$16 sps:$4 sm:$0xff]  }
 0x4f3   : > { %12357 = vmatpush1.bf16.msra.mxu0 %v17635_v55  ;;  %v17680_v55 = vld [vmem:[%s19197_s23 + $0x1028] ss:$16 sps:$4 sm:$0xff]  }
 0x4f4   : > { %12398 = vmatpush1.bf16.msra.mxu1 %v17638_v34  ;;  %12358 = vmatprep.subr.bf16.mxu0 %v17643_v16  ;;  %v17685_v34 = vld [vmem:[%s19197_s23 + $0xe4c] ss:$16 sps:$4 sm:$0xff]  }
 0x4f5   : > { %12399 = vmatprep.subr.bf16.mxu1 %v17646_v22  ;;  %v17688_v16 = vld [vmem:[%s19197_s23 + $0x104c] ss:$16 sps:$4 sm:$0xff]  }
 0x4f6   : > { %v17691_v22 = vld [vmem:[%s19197_s23 + $0xe6c] ss:$16 sps:$4 sm:$0xff]  }
 0x4f7   : > { %12359 = vmatpush1.bf16.msra.mxu0 %v17641_v31  ;;  %v17694_v31 = vld [vmem:[%s19197_s23 + $0x106c] ss:$16 sps:$4 sm:$0xff]  }
 0x4f8   : > { %12400 = vmatpush1.bf16.msra.mxu1 %v17644_v5  ;;  %12360 = vmatprep.subr.bf16.mxu0 %v17649_v7  ;;  %v17689_v5 = vld [vmem:[%s19197_s23 + $0xe68] ss:$16 sps:$4 sm:$0xff]   ;;  %v17700_v7 = vld [vmem:[%s19197_s23 + $0x108c] ss:$16 sps:$4 sm:$0xff]  }
 0x4f9   : > { %12401 = vmatprep.subr.bf16.mxu1 %v17652_v12  ;;  %v17695_v12 = vld [vmem:[%s19197_s23 + $0xe88] ss:$16 sps:$4 sm:$0xff]  }
 0x4fb   : > { %12361 = vmatpush1.bf16.msra.mxu0 %v17647_v36  ;;  %v17698_v36 = vld [vmem:[%s19197_s23 + $0x1088] ss:$16 sps:$4 sm:$0xff]  }
 0x4fc   : > { %12402 = vmatpush1.bf16.msra.mxu1 %v17650_v13  ;;  %12362 = vmatprep.subr.bf16.mxu0 %v17655_v52  ;;  %v17703_v13 = vld [vmem:[%s19197_s23 + $0xeac] ss:$16 sps:$4 sm:$0xff]  }
 0x4fd   : > { %12403 = vmatprep.subr.bf16.mxu1 %v17658_v37  ;;  %v17706_v52 = vld [vmem:[%s19197_s23 + $0x10ac] ss:$16 sps:$4 sm:$0xff]   ;;  %v17701_v37 = vld [vmem:[%s19197_s23 + $0xea8] ss:$16 sps:$4 sm:$0xff]  }
 0x4ff   : > { %12363 = vmatpush1.bf16.msra.mxu0 %v17653_v15  ;;  %v17704_v15 = vld [vmem:[%s19197_s23 + $0x10a8] ss:$16 sps:$4 sm:$0xff]  }
 0x500   : > { %12404 = vmatpush1.bf16.msra.mxu1 %v17656_v14  ;;  %12364 = vmatprep.subr.bf16.mxu0 %v17661_v10  ;;  %v17709_v14 = vld [vmem:[%s19197_s23 + $0xecc] ss:$16 sps:$4 sm:$0xff]  }
 0x501   : > { %12405 = vmatprep.subr.bf16.mxu1 %v17664_v17  ;;  %v17712_v10 = vld [vmem:[%s19197_s23 + $0x10cc] ss:$16 sps:$4 sm:$0xff]   ;;  %v436_v17 = vld [vmem:[#allocation2] sm:$0xff] }
 0x503   : > { %12365 = vmatpush1.bf16.msra.mxu0 %v17659_v0 }
 0x504   : > { %12406 = vmatpush1.bf16.msra.mxu1 %v17662_v39  ;;  %12366 = vmatprep.subr.bf16.mxu0 %v17667_v33 }
 0x505   : > { %12407 = vmatprep.subr.bf16.mxu1 %v17670_v8  ;;  %v437_v8 = vld [vmem:[#allocation2 + $0x8] sm:$0xff] }
 0x507   : > { %12367 = vmatpush1.bf16.msra.mxu0 %v17665_v11 }
 0x508   : > { %12408 = vmatpush1.bf16.msra.mxu1 %v17668_v26  ;;  %12418 = vmatprep.subr.bf16.mxu0 %v17673_v23 }
 0x509   : > { %12459 = vmatprep.subr.bf16.mxu1 %v17676_v43 }
 0x50a   : > { %12369 = vmatmul.mubr.bf16.vlgmr.msra.gmra.mrb[64].mxu0 %v19481_v40  ;;  %v17683_v40 = vld [vmem:[%s19197_s23 + $0xe48] ss:$16 sps:$4 sm:$0xff]  }
 0x50b   : > { %12410 = vmatmul.mubr.bf16.vlgmr.msra.gmra.mrb[64].mxu1 %v19568_v60  ;;  %12419 = vmatpush1.bf16.msra.mxu0 %v17671_v48  ;;  %v17686_v60 = vld [vmem:[%s19197_s23 + $0x1048] ss:$16 sps:$4 sm:$0xff]  }
 0x50c   : > { %12460 = vmatpush1.bf16.msra.mxu1 %v17674_v63  ;;  %12420 = vmatprep.subr.bf16.mxu0 %v17679_v38  ;;  %v17707_v63 = vld [vmem:[%s19197_s23 + $0xec8] ss:$16 sps:$4 sm:$0xff]  }
 0x50d   : > { %12461 = vmatprep.subr.bf16.mxu1 %v17682_v25  ;;  %12450 = vmatprep.mubr.bf16.mxu0 %v19497_v24  ;;  %v17692_v24 = vld [vmem:[%s19197_s23 + $0x1068] ss:$16 sps:$4 sm:$0xff]  }
 0x50e   : > { %12491 = vmatprep.mubr.bf16.mxu1 %v19583_v41  ;;  %v17697_v41 = vld [vmem:[%s19197_s23 + $0xe8c] ss:$16 sps:$4 sm:$0xff]   ;;  %v17710_v38 = vld [vmem:[%s19197_s23 + $0x10c8] ss:$16 sps:$4 sm:$0xff]  }
 0x50f   : > { %12421 = vmatpush1.bf16.msra.mxu0 %v17677_v32 }
 0x510   : > { %12462 = vmatpush1.bf16.msra.mxu1 %v17680_v55  ;;  %12422 = vmatprep.subr.bf16.mxu0 %v17685_v34  ;;  %v17715_v55 = vld [vmem:[%s19197_s23 + $0xeec] ss:$16 sps:$4 sm:$0xff]  }
 0x511   : > { %12463 = vmatprep.subr.bf16.mxu1 %v17688_v16  ;;  %v17718_v34 = vld [vmem:[%s19197_s23 + $0x10ec] ss:$16 sps:$4 sm:$0xff]   ;;  %v17713_v16 = vld [vmem:[%s19197_s23 + $0xee8] ss:$16 sps:$4 sm:$0xff]  }
 0x513   : > { %12423 = vmatpush1.bf16.msra.mxu0 %v17683_v40  ;;  %v17716_v40 = vld [vmem:[%s19197_s23 + $0x10e8] ss:$16 sps:$4 sm:$0xff]  }
 0x514   : > { %12464 = vmatpush1.bf16.msra.mxu1 %v17686_v60  ;;  %12424 = vmatprep.subr.bf16.mxu0 %v17691_v22  ;;  %v17721_v60 = vld [vmem:[%s19197_s23 + $0xf0c] ss:$16 sps:$4 sm:$0xff]  }
 0x515   : > { %12465 = vmatprep.subr.bf16.mxu1 %v17694_v31  ;;  %v17724_v22 = vld [vmem:[%s19197_s23 + $0x110c] ss:$16 sps:$4 sm:$0xff]   ;;  %v17719_v31 = vld [vmem:[%s19197_s23 + $0xf08] ss:$16 sps:$4 sm:$0xff]  }
 0x517   : > { %12425 = vmatpush1.bf16.msra.mxu0 %v17689_v5  ;;  %v17722_v5 = vld [vmem:[%s19197_s23 + $0x1108] ss:$16 sps:$4 sm:$0xff]  }
 0x518   : > { %12466 = vmatpush1.bf16.msra.mxu1 %v17692_v24  ;;  %12426 = vmatprep.subr.bf16.mxu0 %v17697_v41  ;;  %v17727_v24 = vld [vmem:[%s19197_s23 + $0xf2c] ss:$16 sps:$4 sm:$0xff]  }
 0x519   : > { %12467 = vmatprep.subr.bf16.mxu1 %v17700_v7  ;;  %v17730_v41 = vld [vmem:[%s19197_s23 + $0x112c] ss:$16 sps:$4 sm:$0xff]   ;;  %v17725_v7 = vld [vmem:[%s19197_s23 + $0xf28] ss:$16 sps:$4 sm:$0xff]  }
 0x51b   : > { %12427 = vmatpush1.bf16.msra.mxu0 %v17695_v12  ;;  %v17728_v12 = vld [vmem:[%s19197_s23 + $0x1128] ss:$16 sps:$4 sm:$0xff]  }
 0x51c   : > { %12468 = vmatpush1.bf16.msra.mxu1 %v17698_v36  ;;  %12428 = vmatprep.subr.bf16.mxu0 %v17703_v13  ;;  %v17733_v36 = vld [vmem:[%s19197_s23 + $0xf4c] ss:$16 sps:$4 sm:$0xff]  }
 0x51d   : > { %12469 = vmatprep.subr.bf16.mxu1 %v17706_v52  ;;  %v12124_v0 = vpop.f32.mrb[52].mxu0  ;;  %v17736_v13 = vld [vmem:[%s19197_s23 + $0x114c] ss:$16 sps:$4 sm:$0xff]   ;;  %v17731_v52 = vld [vmem:[%s19197_s23 + $0xf48] ss:$16 sps:$4 sm:$0xff]  }
 0x51e   : > { %v20768_v39 = vpop.f32.mrb[52].mxu1  ;;  %v12125_v33 = vadd.f32 %v12124_v0, %v20698_v45  ;;  %v12126_v11 = vpop.f32.mrb[53].mxu0  ;;  %v17745_v0 = vld [vmem:[%s19197_s23 + $0xf8c] ss:$16 sps:$4 sm:$0xff]  }
 0x51f   : > { %v20771_v26 = vpop.f32.mrb[53].mxu1  ;;  %v12127_v23 = vadd.f32 %v12126_v11, %v20702_v18  ;;  %v12128_v43 = vpop.f32.mrb[54].mxu0  ;;  %12429 = vmatpush1.bf16.msra.mxu0 %v17701_v37  ;;  %v17734_v37 = vld [vmem:[%s19197_s23 + $0x1148] ss:$16 sps:$4 sm:$0xff]  }
 0x520   : > { %v12169_v48 = vpop.f32.mrb[54].mxu1  ;;  %12470 = vmatpush1.bf16.msra.mxu1 %v17704_v15  ;;  %v13238_v25 = vadd.f32 %v12125_v33, %v436_v17  ;;  %v12129_v32 = vpop.f32.mrb[55].mxu0  ;;  %12430 = vmatprep.subr.bf16.mxu0 %v17709_v14  ;;  %v17739_v15 = vld [vmem:[%s19197_s23 + $0xf6c] ss:$16 sps:$4 sm:$0xff]   ;;  %v17740_v17 = vld [vmem:[%s19197_s23 + $0x1168] ss:$16 sps:$4 sm:$0xff]  }
 0x521   : > { %v12170_v45 = vpop.f32.mrb[55].mxu1  ;;  %12471 = vmatprep.subr.bf16.mxu1 %v17712_v10  ;;  %v13239_v18 = vadd.f32 %v12127_v23, %v437_v8  ;;  %v17742_v14 = vld [vmem:[%s19197_s23 + $0x116c] ss:$16 sps:$4 sm:$0xff]   ;;  %v17737_v10 = vld [vmem:[%s19197_s23 + $0xf68] ss:$16 sps:$4 sm:$0xff]  }
 0x522   : > { %13242 = vst [vmem:[#allocation2] sm:$0xff] %v13238_v25  ;;  %v17748_v33 = vld [vmem:[%s19197_s23 + $0x118c] ss:$16 sps:$4 sm:$0xff]   ;;  %v17743_v8 = vld [vmem:[%s19197_s23 + $0xf88] ss:$16 sps:$4 sm:$0xff]  }
 0x523   : > { %13243 = vst [vmem:[#allocation2 + $0x8] sm:$0xff] %v13239_v18  ;;  %12431 = vmatpush1.bf16.msra.mxu0 %v17707_v63  ;;  %v17746_v11 = vld [vmem:[%s19197_s23 + $0x1188] ss:$16 sps:$4 sm:$0xff]   ;;  %v17751_v23 = vld [vmem:[%s19197_s23 + $0xfac] ss:$16 sps:$4 sm:$0xff]  }
 0x524   : > { %12472 = vmatpush1.bf16.msra.mxu1 %v17710_v38  ;;  %12432 = vmatprep.subr.bf16.mxu0 %v17715_v55  ;;  %v17754_v43 = vld [vmem:[%s19197_s23 + $0x11ac] ss:$16 sps:$4 sm:$0xff]   ;;  %v17749_v48 = vld [vmem:[%s19197_s23 + $0xfa8] ss:$16 sps:$4 sm:$0xff]  }
 0x525   : > { %12473 = vmatprep.subr.bf16.mxu1 %v17718_v34  ;;  %v17752_v63 = vld [vmem:[%s19197_s23 + $0x11a8] ss:$16 sps:$4 sm:$0xff]   ;;  %v17757_v38 = vld [vmem:[%s19197_s23 + $0xfcc] ss:$16 sps:$4 sm:$0xff]  }
 0x526   : > { %v17760_v25 = vld [vmem:[%s19197_s23 + $0x11cc] ss:$16 sps:$4 sm:$0xff]   ;;  %v17755_v32 = vld [vmem:[%s19197_s23 + $0xfc8] ss:$16 sps:$4 sm:$0xff]  }
 0x527   : > { %12433 = vmatpush1.bf16.msra.mxu0 %v17713_v16  ;;  %v17758_v45 = vld [vmem:[%s19197_s23 + $0x11c8] ss:$16 sps:$4 sm:$0xff]   ;;  %v17763_v55 = vld [vmem:[%s19197_s23 + $0xfec] ss:$16 sps:$4 sm:$0xff]  }
 0x528   : > { %12474 = vmatpush1.bf16.msra.mxu1 %v17716_v40  ;;  %12434 = vmatprep.subr.bf16.mxu0 %v17721_v60  ;;  %v17766_v34 = vld [vmem:[%s19197_s23 + $0x11ec] ss:$16 sps:$4 sm:$0xff]   ;;  %v17761_v18 = vld [vmem:[%s19197_s23 + $0xfe8] ss:$16 sps:$4 sm:$0xff]  }
 0x529   : > { %12475 = vmatprep.subr.bf16.mxu1 %v17724_v22  ;;  %v17764_v16 = vld [vmem:[%s19197_s23 + $0x11e8] ss:$16 sps:$4 sm:$0xff]   ;;  %v17769_v40 = vld [vmem:[%s19197_s23 + $0x120c] ss:$16 sps:$4 sm:$0xff]  }
 0x52a   : > { %v17772_v60 = vld [vmem:[%s19197_s23 + $0x140c] ss:$16 sps:$4 sm:$0xff]   ;;  %v17767_v22 = vld [vmem:[%s19197_s23 + $0x1208] ss:$16 sps:$4 sm:$0xff]  }
 0x52b   : > { %12435 = vmatpush1.bf16.msra.mxu0 %v17719_v31  ;;  %v17770_v31 = vld [vmem:[%s19197_s23 + $0x1408] ss:$16 sps:$4 sm:$0xff]  }
 0x52c   : > { %12476 = vmatpush1.bf16.msra.mxu1 %v17722_v5  ;;  %12436 = vmatprep.subr.bf16.mxu0 %v17727_v24  ;;  %v17775_v5 = vld [vmem:[%s19197_s23 + $0x122c] ss:$16 sps:$4 sm:$0xff]  }
 0x52d   : > { %12477 = vmatprep.subr.bf16.mxu1 %v17730_v41  ;;  %v17778_v24 = vld [vmem:[%s19197_s23 + $0x142c] ss:$16 sps:$4 sm:$0xff]   ;;  %v17773_v41 = vld [vmem:[%s19197_s23 + $0x1228] ss:$16 sps:$4 sm:$0xff]  }
 0x52f   : > { %12437 = vmatpush1.bf16.msra.mxu0 %v17725_v7  ;;  %v17776_v7 = vld [vmem:[%s19197_s23 + $0x1428] ss:$16 sps:$4 sm:$0xff]  }
 0x530   : > { %12478 = vmatpush1.bf16.msra.mxu1 %v17728_v12  ;;  %12438 = vmatprep.subr.bf16.mxu0 %v17733_v36  ;;  %v17781_v12 = vld [vmem:[%s19197_s23 + $0x124c] ss:$16 sps:$4 sm:$0xff]  }
 0x531   : > { %12479 = vmatprep.subr.bf16.mxu1 %v17736_v13  ;;  %v17784_v36 = vld [vmem:[%s19197_s23 + $0x144c] ss:$16 sps:$4 sm:$0xff]  }
 0x532   : > { %v17787_v13 = vld [vmem:[%s19197_s23 + $0x126c] ss:$16 sps:$4 sm:$0xff]  }
 0x533   : > { %12439 = vmatpush1.bf16.msra.mxu0 %v17731_v52  ;;  %v17790_v52 = vld [vmem:[%s19197_s23 + $0x146c] ss:$16 sps:$4 sm:$0xff]  }
 0x534   : > { %12480 = vmatpush1.bf16.msra.mxu1 %v17734_v37  ;;  %12440 = vmatprep.subr.bf16.mxu0 %v17739_v15  ;;  %v17785_v37 = vld [vmem:[%s19197_s23 + $0x1268] ss:$16 sps:$4 sm:$0xff]   ;;  %v17796_v15 = vld [vmem:[%s19197_s23 + $0x148c] ss:$16 sps:$4 sm:$0xff]  }
 0x535   : > { %12481 = vmatprep.subr.bf16.mxu1 %v17742_v14  ;;  %v17791_v14 = vld [vmem:[%s19197_s23 + $0x1288] ss:$16 sps:$4 sm:$0xff]  }
 0x537   : > { %12441 = vmatpush1.bf16.msra.mxu0 %v17737_v10  ;;  %v17794_v10 = vld [vmem:[%s19197_s23 + $0x1488] ss:$16 sps:$4 sm:$0xff]  }
 0x538   : > { %12482 = vmatpush1.bf16.msra.mxu1 %v17740_v17  ;;  %12442 = vmatprep.subr.bf16.mxu0 %v17745_v0  ;;  %v17799_v17 = vld [vmem:[%s19197_s23 + $0x12ac] ss:$16 sps:$4 sm:$0xff]  }
 0x539   : > { %12483 = vmatprep.subr.bf16.mxu1 %v17748_v33  ;;  %v17802_v0 = vld [vmem:[%s19197_s23 + $0x14ac] ss:$16 sps:$4 sm:$0xff]   ;;  %v17797_v33 = vld [vmem:[%s19197_s23 + $0x12a8] ss:$16 sps:$4 sm:$0xff]  }
 0x53b   : > { %12443 = vmatpush1.bf16.msra.mxu0 %v17743_v8  ;;  %v17800_v8 = vld [vmem:[%s19197_s23 + $0x14a8] ss:$16 sps:$4 sm:$0xff]  }
 0x53c   : > { %12484 = vmatpush1.bf16.msra.mxu1 %v17746_v11  ;;  %12444 = vmatprep.subr.bf16.mxu0 %v17751_v23  ;;  %v17805_v11 = vld [vmem:[%s19197_s23 + $0x12cc] ss:$16 sps:$4 sm:$0xff]  }
 0x53d   : > { %12485 = vmatprep.subr.bf16.mxu1 %v17754_v43  ;;  %v17808_v23 = vld [vmem:[%s19197_s23 + $0x14cc] ss:$16 sps:$4 sm:$0xff]  }
 0x53f   : > { %12445 = vmatpush1.bf16.msra.mxu0 %v17749_v48 }
 0x540   : > { %12486 = vmatpush1.bf16.msra.mxu1 %v17752_v63  ;;  %12446 = vmatprep.subr.bf16.mxu0 %v17757_v38 }
 0x541   : > { %12487 = vmatprep.subr.bf16.mxu1 %v17760_v25 }
 0x543   : > { %12447 = vmatpush1.bf16.msra.mxu0 %v17755_v32 }
 0x544   : > { %12488 = vmatpush1.bf16.msra.mxu1 %v17758_v45  ;;  %12448 = vmatprep.subr.bf16.mxu0 %v17763_v55 }
 0x545   : > { %12489 = vmatprep.subr.bf16.mxu1 %v17766_v34  ;;  %v17803_v34 = vld [vmem:[%s19197_s23 + $0x12c8] ss:$16 sps:$4 sm:$0xff]  }
 0x547   : > { %12449 = vmatpush1.bf16.msra.mxu0 %v17761_v18  ;;  %v17806_v18 = vld [vmem:[%s19197_s23 + $0x14c8] ss:$16 sps:$4 sm:$0xff]  }
 0x548   : > { %12490 = vmatpush1.bf16.msra.mxu1 %v17764_v16  ;;  %12500 = vmatprep.subr.bf16.mxu0 %v17769_v40 }
 0x549   : > { %12541 = vmatprep.subr.bf16.mxu1 %v17772_v60 }
 0x54a   : > { %12451 = vmatmul.mubr.bf16.vlgmr.msra.gmra.mrb[68].mxu0 %v19572_v61  ;;  %v17779_v61 = vld [vmem:[%s19197_s23 + $0x1248] ss:$16 sps:$4 sm:$0xff]  }
 0x54b   : > { %12492 = vmatmul.mubr.bf16.vlgmr.msra.gmra.mrb[68].mxu1 %v19661_v47  ;;  %12501 = vmatpush1.bf16.msra.mxu0 %v17767_v22  ;;  %v17782_v47 = vld [vmem:[%s19197_s23 + $0x1448] ss:$16 sps:$4 sm:$0xff]  }
 0x54c   : > { %12542 = vmatpush1.bf16.msra.mxu1 %v17770_v31  ;;  %12502 = vmatprep.subr.bf16.mxu0 %v17775_v5  ;;  %v17809_v31 = vld [vmem:[%s19197_s23 + $0x12e8] ss:$16 sps:$4 sm:$0xff]  }
 0x54d   : > { %12543 = vmatprep.subr.bf16.mxu1 %v17778_v24  ;;  %12532 = vmatprep.mubr.bf16.mxu0 %v19587_v42  ;;  %v17788_v42 = vld [vmem:[%s19197_s23 + $0x1468] ss:$16 sps:$4 sm:$0xff]   ;;  %v17817_v24 = vld [vmem:[%s19197_s23 + $0x130c] ss:$16 sps:$4 sm:$0xff]  }
 0x54e   : > { %12573 = vmatprep.mubr.bf16.mxu1 %v19677_v59  ;;  %v17793_v59 = vld [vmem:[%s19197_s23 + $0x128c] ss:$16 sps:$4 sm:$0xff]   ;;  %v17812_v5 = vld [vmem:[%s19197_s23 + $0x14e8] ss:$16 sps:$4 sm:$0xff]  }
 0x54f   : > { %12503 = vmatpush1.bf16.msra.mxu0 %v17773_v41  ;;  %v17820_v41 = vld [vmem:[%s19197_s23 + $0x150c] ss:$16 sps:$4 sm:$0xff]  }
 0x550   : > { %12544 = vmatpush1.bf16.msra.mxu1 %v17776_v7  ;;  %12504 = vmatprep.subr.bf16.mxu0 %v17781_v12  ;;  %v17815_v7 = vld [vmem:[%s19197_s23 + $0x1308] ss:$16 sps:$4 sm:$0xff]  }
 0x551   : > { %12545 = vmatprep.subr.bf16.mxu1 %v17784_v36  ;;  %v17818_v12 = vld [vmem:[%s19197_s23 + $0x1508] ss:$16 sps:$4 sm:$0xff]   ;;  %v17823_v36 = vld [vmem:[%s19197_s23 + $0x132c] ss:$16 sps:$4 sm:$0xff]  }
 0x553   : > { %12505 = vmatpush1.bf16.msra.mxu0 %v17779_v61  ;;  %v17826_v61 = vld [vmem:[%s19197_s23 + $0x152c] ss:$16 sps:$4 sm:$0xff]  }
 0x554   : > { %12546 = vmatpush1.bf16.msra.mxu1 %v17782_v47  ;;  %12506 = vmatprep.subr.bf16.mxu0 %v17787_v13  ;;  %v17821_v47 = vld [vmem:[%s19197_s23 + $0x1328] ss:$16 sps:$4 sm:$0xff]  }
 0x555   : > { %12547 = vmatprep.subr.bf16.mxu1 %v17790_v52  ;;  %v17824_v13 = vld [vmem:[%s19197_s23 + $0x1528] ss:$16 sps:$4 sm:$0xff]   ;;  %v17829_v52 = vld [vmem:[%s19197_s23 + $0x134c] ss:$16 sps:$4 sm:$0xff]  }
 0x557   : > { %12507 = vmatpush1.bf16.msra.mxu0 %v17785_v37  ;;  %v17832_v37 = vld [vmem:[%s19197_s23 + $0x154c] ss:$16 sps:$4 sm:$0xff]  }
 0x558   : > { %12548 = vmatpush1.bf16.msra.mxu1 %v17788_v42  ;;  %12508 = vmatprep.subr.bf16.mxu0 %v17793_v59  ;;  %v17827_v42 = vld [vmem:[%s19197_s23 + $0x1348] ss:$16 sps:$4 sm:$0xff]  }
 0x559   : > { %12549 = vmatprep.subr.bf16.mxu1 %v17796_v15  ;;  %v17830_v59 = vld [vmem:[%s19197_s23 + $0x1548] ss:$16 sps:$4 sm:$0xff]   ;;  %v17835_v15 = vld [vmem:[%s19197_s23 + $0x136c] ss:$16 sps:$4 sm:$0xff]  }
 0x55b   : > { %12509 = vmatpush1.bf16.msra.mxu0 %v17791_v14  ;;  %v17838_v14 = vld [vmem:[%s19197_s23 + $0x156c] ss:$16 sps:$4 sm:$0xff]  }
 0x55c   : > { %12550 = vmatpush1.bf16.msra.mxu1 %v17794_v10  ;;  %12510 = vmatprep.subr.bf16.mxu0 %v17799_v17  ;;  %v17833_v10 = vld [vmem:[%s19197_s23 + $0x1368] ss:$16 sps:$4 sm:$0xff]  }
 0x55d   : > { %12551 = vmatprep.subr.bf16.mxu1 %v17802_v0  ;;  %v12206_v43 = vpop.f32.mrb[56].mxu0  ;;  %v17836_v17 = vld [vmem:[%s19197_s23 + $0x1568] ss:$16 sps:$4 sm:$0xff]   ;;  %v17841_v0 = vld [vmem:[%s19197_s23 + $0x138c] ss:$16 sps:$4 sm:$0xff]  }
 0x55e   : > { %v12247_v48 = vpop.f32.mrb[56].mxu1  ;;  %v12207_v63 = vadd.f32 %v12206_v43, %v20768_v39  ;;  %v12208_v38 = vpop.f32.mrb[57].mxu0  ;;  %v17811_v39 = vld [vmem:[%s19197_s23 + $0x12ec] ss:$16 sps:$4 sm:$0xff]  }
 0x55f   : > { %v12249_v25 = vpop.f32.mrb[57].mxu1  ;;  %v12209_v32 = vadd.f32 %v12208_v38, %v20771_v26  ;;  %v12210_v45 = vpop.f32.mrb[58].mxu0  ;;  %12511 = vmatpush1.bf16.msra.mxu0 %v17797_v33  ;;  %v17814_v26 = vld [vmem:[%s19197_s23 + $0x14ec] ss:$16 sps:$4 sm:$0xff]  }
 0x560   : > { %v12251_v55 = vpop.f32.mrb[58].mxu1  ;;  %12552 = vmatpush1.bf16.msra.mxu1 %v17800_v8  ;;  %v20846_v16 = vadd.f32 %v12247_v48, %v12207_v63  ;;  %v12211_v40 = vpop.f32.mrb[59].mxu0  ;;  %12512 = vmatprep.subr.bf16.mxu0 %v17805_v11  ;;  %v17844_v33 = vld [vmem:[%s19197_s23 + $0x158c] ss:$16 sps:$4 sm:$0xff]   ;;  %v17839_v8 = vld [vmem:[%s19197_s23 + $0x1388] ss:$16 sps:$4 sm:$0xff]  }
 0x561   : > { %v12252_v60 = vpop.f32.mrb[59].mxu1  ;;  %12553 = vmatprep.subr.bf16.mxu1 %v17808_v23  ;;  %v20850_v22 = vadd.f32 %v12249_v25, %v12209_v32  ;;  %v17842_v11 = vld [vmem:[%s19197_s23 + $0x1588] ss:$16 sps:$4 sm:$0xff]   ;;  %v17847_v23 = vld [vmem:[%s19197_s23 + $0x13ac] ss:$16 sps:$4 sm:$0xff]  }
 0x562   : > { %v17850_v43 = vld [vmem:[%s19197_s23 + $0x15ac] ss:$16 sps:$4 sm:$0xff]   ;;  %v17845_v48 = vld [vmem:[%s19197_s23 + $0x13a8] ss:$16 sps:$4 sm:$0xff]  }
 0x563   : > { %12513 = vmatpush1.bf16.msra.mxu0 %v17803_v34  ;;  %v17848_v63 = vld [vmem:[%s19197_s23 + $0x15a8] ss:$16 sps:$4 sm:$0xff]   ;;  %v17853_v38 = vld [vmem:[%s19197_s23 + $0x13cc] ss:$16 sps:$4 sm:$0xff]  }
 0x564   : > { %12554 = vmatpush1.bf16.msra.mxu1 %v17806_v18  ;;  %12514 = vmatprep.subr.bf16.mxu0 %v17811_v39  ;;  %v17856_v25 = vld [vmem:[%s19197_s23 + $0x15cc] ss:$16 sps:$4 sm:$0xff]   ;;  %v17851_v32 = vld [vmem:[%s19197_s23 + $0x13c8] ss:$16 sps:$4 sm:$0xff]  }
 0x565   : > { %12555 = vmatprep.subr.bf16.mxu1 %v17814_v26  ;;  %v17854_v45 = vld [vmem:[%s19197_s23 + $0x15c8] ss:$16 sps:$4 sm:$0xff]   ;;  %v17859_v55 = vld [vmem:[%s19197_s23 + $0x13ec] ss:$16 sps:$4 sm:$0xff]  }
 0x566   : > { %v17862_v34 = vld [vmem:[%s19197_s23 + $0x15ec] ss:$16 sps:$4 sm:$0xff]   ;;  %v17857_v18 = vld [vmem:[%s19197_s23 + $0x13e8] ss:$16 sps:$4 sm:$0xff]  }
 0x567   : > { %12515 = vmatpush1.bf16.msra.mxu0 %v17809_v31  ;;  %v17860_v40 = vld [vmem:[%s19197_s23 + $0x15e8] ss:$16 sps:$4 sm:$0xff]   ;;  %v17865_v60 = vld [vmem:[%s19197_s23 + $0x160c] ss:$16 sps:$4 sm:$0xff]  }
 0x568   : > { %12556 = vmatpush1.bf16.msra.mxu1 %v17812_v5  ;;  %12516 = vmatprep.subr.bf16.mxu0 %v17817_v24  ;;  %v17868_v39 = vld [vmem:[%s19197_s23 + $0x180c] ss:$16 sps:$4 sm:$0xff]   ;;  %v17863_v26 = vld [vmem:[%s19197_s23 + $0x1608] ss:$16 sps:$4 sm:$0xff]  }
 0x569   : > { %12557 = vmatprep.subr.bf16.mxu1 %v17820_v41  ;;  %v17866_v31 = vld [vmem:[%s19197_s23 + $0x1808] ss:$16 sps:$4 sm:$0xff]   ;;  %v17871_v5 = vld [vmem:[%s19197_s23 + $0x162c] ss:$16 sps:$4 sm:$0xff]  }
 0x56a   : > { %v17874_v24 = vld [vmem:[%s19197_s23 + $0x182c] ss:$16 sps:$4 sm:$0xff]   ;;  %v17869_v41 = vld [vmem:[%s19197_s23 + $0x1628] ss:$16 sps:$4 sm:$0xff]  }
 0x56b   : > { %12517 = vmatpush1.bf16.msra.mxu0 %v17815_v7  ;;  %v17872_v7 = vld [vmem:[%s19197_s23 + $0x1828] ss:$16 sps:$4 sm:$0xff]  }
 0x56c   : > { %12558 = vmatpush1.bf16.msra.mxu1 %v17818_v12  ;;  %12518 = vmatprep.subr.bf16.mxu0 %v17823_v36  ;;  %v17877_v12 = vld [vmem:[%s19197_s23 + $0x164c] ss:$16 sps:$4 sm:$0xff]  }
 0x56d   : > { %12559 = vmatprep.subr.bf16.mxu1 %v17826_v61  ;;  %v17880_v36 = vld [vmem:[%s19197_s23 + $0x184c] ss:$16 sps:$4 sm:$0xff]  }
 0x56e   : > { %v17883_v61 = vld [vmem:[%s19197_s23 + $0x166c] ss:$16 sps:$4 sm:$0xff]  }
 0x56f   : > { %12519 = vmatpush1.bf16.msra.mxu0 %v17821_v47  ;;  %v17886_v47 = vld [vmem:[%s19197_s23 + $0x186c] ss:$16 sps:$4 sm:$0xff]  }
 0x570   : > { %12560 = vmatpush1.bf16.msra.mxu1 %v17824_v13  ;;  %12520 = vmatprep.subr.bf16.mxu0 %v17829_v52  ;;  %v17881_v13 = vld [vmem:[%s19197_s23 + $0x1668] ss:$16 sps:$4 sm:$0xff]   ;;  %v17892_v52 = vld [vmem:[%s19197_s23 + $0x188c] ss:$16 sps:$4 sm:$0xff]  }
 0x571   : > { %12561 = vmatprep.subr.bf16.mxu1 %v17832_v37  ;;  %v17887_v37 = vld [vmem:[%s19197_s23 + $0x1688] ss:$16 sps:$4 sm:$0xff]  }
 0x573   : > { %12521 = vmatpush1.bf16.msra.mxu0 %v17827_v42  ;;  %v17890_v42 = vld [vmem:[%s19197_s23 + $0x1888] ss:$16 sps:$4 sm:$0xff]  }
 0x574   : > { %12562 = vmatpush1.bf16.msra.mxu1 %v17830_v59  ;;  %12522 = vmatprep.subr.bf16.mxu0 %v17835_v15  ;;  %v17895_v59 = vld [vmem:[%s19197_s23 + $0x16ac] ss:$16 sps:$4 sm:$0xff]  }
 0x575   : > { %12563 = vmatprep.subr.bf16.mxu1 %v17838_v14  ;;  %v17898_v15 = vld [vmem:[%s19197_s23 + $0x18ac] ss:$16 sps:$4 sm:$0xff]   ;;  %v17893_v14 = vld [vmem:[%s19197_s23 + $0x16a8] ss:$16 sps:$4 sm:$0xff]  }
 0x577   : > { %12523 = vmatpush1.bf16.msra.mxu0 %v17833_v10  ;;  %v17896_v10 = vld [vmem:[%s19197_s23 + $0x18a8] ss:$16 sps:$4 sm:$0xff]  }
 0x578   : > { %12564 = vmatpush1.bf16.msra.mxu1 %v17836_v17  ;;  %12524 = vmatprep.subr.bf16.mxu0 %v17841_v0  ;;  %v17901_v17 = vld [vmem:[%s19197_s23 + $0x16cc] ss:$16 sps:$4 sm:$0xff]  }
 0x579   : > { %12565 = vmatprep.subr.bf16.mxu1 %v17844_v33  ;;  %v17904_v0 = vld [vmem:[%s19197_s23 + $0x18cc] ss:$16 sps:$4 sm:$0xff]  }
 0x57b   : > { %12525 = vmatpush1.bf16.msra.mxu0 %v17839_v8 }
 0x57c   : > { %12566 = vmatpush1.bf16.msra.mxu1 %v17842_v11  ;;  %12526 = vmatprep.subr.bf16.mxu0 %v17847_v23 }
 0x57d   : > { %12567 = vmatprep.subr.bf16.mxu1 %v17850_v43 }
 0x57f   : > { %12527 = vmatpush1.bf16.msra.mxu0 %v17845_v48 }
 0x580   : > { %12568 = vmatpush1.bf16.msra.mxu1 %v17848_v63  ;;  %12528 = vmatprep.subr.bf16.mxu0 %v17853_v38 }
 0x581   : > { %12569 = vmatprep.subr.bf16.mxu1 %v17856_v25  ;;  %v17899_v25 = vld [vmem:[%s19197_s23 + $0x16c8] ss:$16 sps:$4 sm:$0xff]  }
 0x583   : > { %12529 = vmatpush1.bf16.msra.mxu0 %v17851_v32  ;;  %v17902_v32 = vld [vmem:[%s19197_s23 + $0x18c8] ss:$16 sps:$4 sm:$0xff]  }
 0x584   : > { %12570 = vmatpush1.bf16.msra.mxu1 %v17854_v45  ;;  %12530 = vmatprep.subr.bf16.mxu0 %v17859_v55 }
 0x585   : > { %12571 = vmatprep.subr.bf16.mxu1 %v17862_v34 }
 0x587   : > { %12531 = vmatpush1.bf16.msra.mxu0 %v17857_v18 }
 0x588   : > { %12572 = vmatpush1.bf16.msra.mxu1 %v17860_v40  ;;  %12582 = vmatprep.subr.bf16.mxu0 %v17865_v60  ;;  %v17905_v40 = vld [vmem:[%s19197_s23 + $0x16e8] ss:$16 sps:$4 sm:$0xff]  }
 0x589   : > { %12623 = vmatprep.subr.bf16.mxu1 %v17868_v39  ;;  %v17908_v60 = vld [vmem:[%s19197_s23 + $0x18e8] ss:$16 sps:$4 sm:$0xff]   ;;  %v17913_v39 = vld [vmem:[%s19197_s23 + $0x170c] ss:$16 sps:$4 sm:$0xff]  }
 0x58a   : > { %12533 = vmatmul.mubr.bf16.vlgmr.msra.gmra.mrb[72].mxu0 %v19665_v49  ;;  %v17875_v49 = vld [vmem:[%s19197_s23 + $0x1648] ss:$16 sps:$4 sm:$0xff]  }
 0x58b   : > { %12574 = vmatmul.mubr.bf16.vlgmr.msra.gmra.mrb[72].mxu1 %v19757_v44  ;;  %12583 = vmatpush1.bf16.msra.mxu0 %v17863_v26  ;;  %v17878_v44 = vld [vmem:[%s19197_s23 + $0x1848] ss:$16 sps:$4 sm:$0xff]   ;;  %v17916_v26 = vld [vmem:[%s19197_s23 + $0x190c] ss:$16 sps:$4 sm:$0xff]  }
 0x58c   : > { %12624 = vmatpush1.bf16.msra.mxu1 %v17866_v31  ;;  %12584 = vmatprep.subr.bf16.mxu0 %v17871_v5  ;;  %v17911_v31 = vld [vmem:[%s19197_s23 + $0x1708] ss:$16 sps:$4 sm:$0xff]  }
 0x58d   : > { %12625 = vmatprep.subr.bf16.mxu1 %v17874_v24  ;;  %12614 = vmatprep.mubr.bf16.mxu0 %v19681_v62  ;;  %v17884_v62 = vld [vmem:[%s19197_s23 + $0x1868] ss:$16 sps:$4 sm:$0xff]   ;;  %v17919_v24 = vld [vmem:[%s19197_s23 + $0x172c] ss:$16 sps:$4 sm:$0xff]  }
 0x58e   : > { %12655 = vmatprep.mubr.bf16.mxu1 %v19773_v50  ;;  %v17889_v50 = vld [vmem:[%s19197_s23 + $0x168c] ss:$16 sps:$4 sm:$0xff]   ;;  %v17914_v5 = vld [vmem:[%s19197_s23 + $0x1908] ss:$16 sps:$4 sm:$0xff]  }
 0x58f   : > { %12585 = vmatpush1.bf16.msra.mxu0 %v17869_v41  ;;  %v17922_v41 = vld [vmem:[%s19197_s23 + $0x192c] ss:$16 sps:$4 sm:$0xff]  }
 0x590   : > { %12626 = vmatpush1.bf16.msra.mxu1 %v17872_v7  ;;  %12586 = vmatprep.subr.bf16.mxu0 %v17877_v12  ;;  %v17917_v7 = vld [vmem:[%s19197_s23 + $0x1728] ss:$16 sps:$4 sm:$0xff]  }
 0x591   : > { %12627 = vmatprep.subr.bf16.mxu1 %v17880_v36  ;;  %v17920_v12 = vld [vmem:[%s19197_s23 + $0x1928] ss:$16 sps:$4 sm:$0xff]   ;;  %v17925_v36 = vld [vmem:[%s19197_s23 + $0x174c] ss:$16 sps:$4 sm:$0xff]  }
 0x593   : > { %12587 = vmatpush1.bf16.msra.mxu0 %v17875_v49  ;;  %v17928_v49 = vld [vmem:[%s19197_s23 + $0x194c] ss:$16 sps:$4 sm:$0xff]  }
 0x594   : > { %12628 = vmatpush1.bf16.msra.mxu1 %v17878_v44  ;;  %12588 = vmatprep.subr.bf16.mxu0 %v17883_v61  ;;  %v17923_v44 = vld [vmem:[%s19197_s23 + $0x1748] ss:$16 sps:$4 sm:$0xff]  }
 0x595   : > { %12629 = vmatprep.subr.bf16.mxu1 %v17886_v47  ;;  %v17926_v61 = vld [vmem:[%s19197_s23 + $0x1948] ss:$16 sps:$4 sm:$0xff]   ;;  %v17931_v47 = vld [vmem:[%s19197_s23 + $0x176c] ss:$16 sps:$4 sm:$0xff]  }
 0x597   : > { %12589 = vmatpush1.bf16.msra.mxu0 %v17881_v13  ;;  %v17934_v13 = vld [vmem:[%s19197_s23 + $0x196c] ss:$16 sps:$4 sm:$0xff]  }
 0x598   : > { %12630 = vmatpush1.bf16.msra.mxu1 %v17884_v62  ;;  %12590 = vmatprep.subr.bf16.mxu0 %v17889_v50  ;;  %v17929_v62 = vld [vmem:[%s19197_s23 + $0x1768] ss:$16 sps:$4 sm:$0xff]  }
 0x599   : > { %12631 = vmatprep.subr.bf16.mxu1 %v17892_v52  ;;  %v17932_v50 = vld [vmem:[%s19197_s23 + $0x1968] ss:$16 sps:$4 sm:$0xff]   ;;  %v17937_v52 = vld [vmem:[%s19197_s23 + $0x178c] ss:$16 sps:$4 sm:$0xff]  }
 0x59b   : > { %12591 = vmatpush1.bf16.msra.mxu0 %v17887_v37  ;;  %v17940_v37 = vld [vmem:[%s19197_s23 + $0x198c] ss:$16 sps:$4 sm:$0xff]  }
 0x59c   : > { %12632 = vmatpush1.bf16.msra.mxu1 %v17890_v42  ;;  %12592 = vmatprep.subr.bf16.mxu0 %v17895_v59  ;;  %v17935_v42 = vld [vmem:[%s19197_s23 + $0x1788] ss:$16 sps:$4 sm:$0xff]  }
 0x59d   : > { %12633 = vmatprep.subr.bf16.mxu1 %v17898_v15  ;;  %v12288_v33 = vpop.f32.mrb[60].mxu0  ;;  %v17938_v59 = vld [vmem:[%s19197_s23 + $0x1988] ss:$16 sps:$4 sm:$0xff]   ;;  %v17943_v15 = vld [vmem:[%s19197_s23 + $0x17ac] ss:$16 sps:$4 sm:$0xff]  }
 0x59e   : > { %v12329_v8 = vpop.f32.mrb[60].mxu1  ;;  %v12289_v11 = vadd.f32 %v12288_v33, %v20846_v16  ;;  %v12290_v23 = vpop.f32.mrb[61].mxu0  ;;  %v17907_v16 = vld [vmem:[%s19197_s23 + $0x16ec] ss:$16 sps:$4 sm:$0xff]  }
 0x59f   : > { %v12331_v43 = vpop.f32.mrb[61].mxu1  ;;  %v12291_v48 = vadd.f32 %v12290_v23, %v20850_v22  ;;  %v12292_v63 = vpop.f32.mrb[62].mxu0  ;;  %12593 = vmatpush1.bf16.msra.mxu0 %v17893_v14  ;;  %v17910_v22 = vld [vmem:[%s19197_s23 + $0x18ec] ss:$16 sps:$4 sm:$0xff]  }
 0x5a0   : > { %v12333_v38 = vpop.f32.mrb[62].mxu1  ;;  %12634 = vmatpush1.bf16.msra.mxu1 %v17896_v10  ;;  %v20920_v45 = vadd.f32 %v12329_v8, %v12289_v11  ;;  %v12293_v55 = vpop.f32.mrb[63].mxu0  ;;  %12594 = vmatprep.subr.bf16.mxu0 %v17901_v17  ;;  %v17946_v14 = vld [vmem:[%s19197_s23 + $0x19ac] ss:$16 sps:$4 sm:$0xff]   ;;  %v17941_v10 = vld [vmem:[%s19197_s23 + $0x17a8] ss:$16 sps:$4 sm:$0xff]  }
 0x5a1   : > { %v12334_v34 = vpop.f32.mrb[63].mxu1  ;;  %12635 = vmatprep.subr.bf16.mxu1 %v17904_v0  ;;  %v20924_v18 = vadd.f32 %v12331_v43, %v12291_v48  ;;  %v17944_v17 = vld [vmem:[%s19197_s23 + $0x19a8] ss:$16 sps:$4 sm:$0xff]   ;;  %v17949_v0 = vld [vmem:[%s19197_s23 + $0x17cc] ss:$16 sps:$4 sm:$0xff]  }
 0x5a2   : > { %v17952_v33 = vld [vmem:[%s19197_s23 + $0x19cc] ss:$16 sps:$4 sm:$0xff]   ;;  %v17947_v8 = vld [vmem:[%s19197_s23 + $0x17c8] ss:$16 sps:$4 sm:$0xff]  }
 0x5a3   : > { %12595 = vmatpush1.bf16.msra.mxu0 %v17899_v25  ;;  %v17950_v11 = vld [vmem:[%s19197_s23 + $0x19c8] ss:$16 sps:$4 sm:$0xff]   ;;  %v17955_v23 = vld [vmem:[%s19197_s23 + $0x17ec] ss:$16 sps:$4 sm:$0xff]  }
 0x5a4   : > { %12636 = vmatpush1.bf16.msra.mxu1 %v17902_v32  ;;  %12596 = vmatprep.subr.bf16.mxu0 %v17907_v16  ;;  %v17958_v43 = vld [vmem:[%s19197_s23 + $0x19ec] ss:$16 sps:$4 sm:$0xff]   ;;  %v17953_v48 = vld [vmem:[%s19197_s23 + $0x17e8] ss:$16 sps:$4 sm:$0xff]  }
 0x5a5   : > { %12637 = vmatprep.subr.bf16.mxu1 %v17910_v22  ;;  %v17956_v63 = vld [vmem:[%s19197_s23 + $0x19e8] ss:$16 sps:$4 sm:$0xff]   ;;  %v17961_v38 = vld [vmem:[%s19197_s23 + $0x1a0c] ss:$16 sps:$4 sm:$0xff]  }
 0x5a6   : > { %v17964_v25 = vld [vmem:[%s19197_s23 + $0x1c0c] ss:$16 sps:$4 sm:$0xff]   ;;  %v17959_v32 = vld [vmem:[%s19197_s23 + $0x1a08] ss:$16 sps:$4 sm:$0xff]  }
 0x5a7   : > { %12597 = vmatpush1.bf16.msra.mxu0 %v17905_v40  ;;  %v17962_v55 = vld [vmem:[%s19197_s23 + $0x1c08] ss:$16 sps:$4 sm:$0xff]   ;;  %v17967_v34 = vld [vmem:[%s19197_s23 + $0x1a2c] ss:$16 sps:$4 sm:$0xff]  }
 0x5a8   : > { %12638 = vmatpush1.bf16.msra.mxu1 %v17908_v60  ;;  %12598 = vmatprep.subr.bf16.mxu0 %v17913_v39  ;;  %v17970_v16 = vld [vmem:[%s19197_s23 + $0x1c2c] ss:$16 sps:$4 sm:$0xff]   ;;  %v17965_v22 = vld [vmem:[%s19197_s23 + $0x1a28] ss:$16 sps:$4 sm:$0xff]  }
 0x5a9   : > { %12639 = vmatprep.subr.bf16.mxu1 %v17916_v26  ;;  %v17968_v40 = vld [vmem:[%s19197_s23 + $0x1c28] ss:$16 sps:$4 sm:$0xff]   ;;  %v17973_v60 = vld [vmem:[%s19197_s23 + $0x1a4c] ss:$16 sps:$4 sm:$0xff]  }
 0x5aa   : > { %v17976_v39 = vld [vmem:[%s19197_s23 + $0x1c4c] ss:$16 sps:$4 sm:$0xff]  }
 0x5ab   : > { %12599 = vmatpush1.bf16.msra.mxu0 %v17911_v31  ;;  %v17979_v26 = vld [vmem:[%s19197_s23 + $0x1a6c] ss:$16 sps:$4 sm:$0xff]  }
 0x5ac   : > { %12640 = vmatpush1.bf16.msra.mxu1 %v17914_v5  ;;  %12600 = vmatprep.subr.bf16.mxu0 %v17919_v24  ;;  %v17982_v31 = vld [vmem:[%s19197_s23 + $0x1c6c] ss:$16 sps:$4 sm:$0xff]   ;;  %v17977_v5 = vld [vmem:[%s19197_s23 + $0x1a68] ss:$16 sps:$4 sm:$0xff]  }
 0x5ad   : > { %12641 = vmatprep.subr.bf16.mxu1 %v17922_v41  ;;  %v17988_v24 = vld [vmem:[%s19197_s23 + $0x1c8c] ss:$16 sps:$4 sm:$0xff]   ;;  %v17983_v41 = vld [vmem:[%s19197_s23 + $0x1a88] ss:$16 sps:$4 sm:$0xff]  }
 0x5af   : > { %12601 = vmatpush1.bf16.msra.mxu0 %v17917_v7  ;;  %v17986_v7 = vld [vmem:[%s19197_s23 + $0x1c88] ss:$16 sps:$4 sm:$0xff]  }
 0x5b0   : > { %12642 = vmatpush1.bf16.msra.mxu1 %v17920_v12  ;;  %12602 = vmatprep.subr.bf16.mxu0 %v17925_v36  ;;  %v17991_v12 = vld [vmem:[%s19197_s23 + $0x1aac] ss:$16 sps:$4 sm:$0xff]  }
 0x5b1   : > { %12643 = vmatprep.subr.bf16.mxu1 %v17928_v49  ;;  %v17994_v36 = vld [vmem:[%s19197_s23 + $0x1cac] ss:$16 sps:$4 sm:$0xff]   ;;  %v17989_v49 = vld [vmem:[%s19197_s23 + $0x1aa8] ss:$16 sps:$4 sm:$0xff]  }
 0x5b3   : > { %12603 = vmatpush1.bf16.msra.mxu0 %v17923_v44  ;;  %v17992_v44 = vld [vmem:[%s19197_s23 + $0x1ca8] ss:$16 sps:$4 sm:$0xff]  }
 0x5b4   : > { %12644 = vmatpush1.bf16.msra.mxu1 %v17926_v61  ;;  %12604 = vmatprep.subr.bf16.mxu0 %v17931_v47  ;;  %v17997_v61 = vld [vmem:[%s19197_s23 + $0x1acc] ss:$16 sps:$4 sm:$0xff]  }
 0x5b5   : > { %12645 = vmatprep.subr.bf16.mxu1 %v17934_v13  ;;  %v18000_v47 = vld [vmem:[%s19197_s23 + $0x1ccc] ss:$16 sps:$4 sm:$0xff]  }
 0x5b7   : > { %12605 = vmatpush1.bf16.msra.mxu0 %v17929_v62 }
 0x5b8   : > { %12646 = vmatpush1.bf16.msra.mxu1 %v17932_v50  ;;  %12606 = vmatprep.subr.bf16.mxu0 %v17937_v52 }
 0x5b9   : > { %12647 = vmatprep.subr.bf16.mxu1 %v17940_v37 }
 0x5bb   : > { %12607 = vmatpush1.bf16.msra.mxu0 %v17935_v42 }
 0x5bc   : > { %12648 = vmatpush1.bf16.msra.mxu1 %v17938_v59  ;;  %12608 = vmatprep.subr.bf16.mxu0 %v17943_v15 }
 0x5bd   : > { %12649 = vmatprep.subr.bf16.mxu1 %v17946_v14  ;;  %v17995_v14 = vld [vmem:[%s19197_s23 + $0x1ac8] ss:$16 sps:$4 sm:$0xff]  }
 0x5bf   : > { %12609 = vmatpush1.bf16.msra.mxu0 %v17941_v10  ;;  %v17998_v10 = vld [vmem:[%s19197_s23 + $0x1cc8] ss:$16 sps:$4 sm:$0xff]  }
 0x5c0   : > { %12650 = vmatpush1.bf16.msra.mxu1 %v17944_v17  ;;  %12610 = vmatprep.subr.bf16.mxu0 %v17949_v0 }
 0x5c1   : > { %12651 = vmatprep.subr.bf16.mxu1 %v17952_v33 }
 0x5c3   : > { %12611 = vmatpush1.bf16.msra.mxu0 %v17947_v8 }
 0x5c4   : > { %12652 = vmatpush1.bf16.msra.mxu1 %v17950_v11  ;;  %12612 = vmatprep.subr.bf16.mxu0 %v17955_v23  ;;  %v18001_v11 = vld [vmem:[%s19197_s23 + $0x1ae8] ss:$16 sps:$4 sm:$0xff]  }
 0x5c5   : > { %12653 = vmatprep.subr.bf16.mxu1 %v17958_v43  ;;  %v18004_v23 = vld [vmem:[%s19197_s23 + $0x1ce8] ss:$16 sps:$4 sm:$0xff]   ;;  %v18009_v43 = vld [vmem:[%s19197_s23 + $0x1b0c] ss:$16 sps:$4 sm:$0xff]  }
 0x5c7   : > { %12613 = vmatpush1.bf16.msra.mxu0 %v17953_v48  ;;  %v18012_v48 = vld [vmem:[%s19197_s23 + $0x1d0c] ss:$16 sps:$4 sm:$0xff]  }
 0x5c8   : > { %12654 = vmatpush1.bf16.msra.mxu1 %v17956_v63  ;;  %12664 = vmatprep.subr.bf16.mxu0 %v17961_v38  ;;  %v18007_v63 = vld [vmem:[%s19197_s23 + $0x1b08] ss:$16 sps:$4 sm:$0xff]  }
 0x5c9   : > { %12705 = vmatprep.subr.bf16.mxu1 %v17964_v25  ;;  %v18010_v38 = vld [vmem:[%s19197_s23 + $0x1d08] ss:$16 sps:$4 sm:$0xff]   ;;  %v18015_v25 = vld [vmem:[%s19197_s23 + $0x1b2c] ss:$16 sps:$4 sm:$0xff]  }
 0x5ca   : > { %12615 = vmatmul.mubr.bf16.vlgmr.msra.gmra.mrb[76].mxu0 %v19761_v46  ;;  %v17971_v46 = vld [vmem:[%s19197_s23 + $0x1a48] ss:$16 sps:$4 sm:$0xff]  }
 0x5cb   : > { %12656 = vmatmul.mubr.bf16.vlgmr.msra.gmra.mrb[76].mxu1 %v19853_v1  ;;  %12665 = vmatpush1.bf16.msra.mxu0 %v17959_v32  ;;  %v17974_v1 = vld [vmem:[%s19197_s23 + $0x1c48] ss:$16 sps:$4 sm:$0xff]   ;;  %v18018_v32 = vld [vmem:[%s19197_s23 + $0x1d2c] ss:$16 sps:$4 sm:$0xff]  }
 0x5cc   : > { %12706 = vmatpush1.bf16.msra.mxu1 %v17962_v55  ;;  %12666 = vmatprep.subr.bf16.mxu0 %v17967_v34  ;;  %v18013_v55 = vld [vmem:[%s19197_s23 + $0x1b28] ss:$16 sps:$4 sm:$0xff]  }
 0x5cd   : > { %12707 = vmatprep.subr.bf16.mxu1 %v17970_v16  ;;  %12696 = vmatprep.mubr.bf16.mxu0 %v19777_v51  ;;  %v17980_v51 = vld [vmem:[%s19197_s23 + $0x1c68] ss:$16 sps:$4 sm:$0xff]   ;;  %v18021_v16 = vld [vmem:[%s19197_s23 + $0x1b4c] ss:$16 sps:$4 sm:$0xff]  }
 0x5ce   : > { %12737 = vmatprep.mubr.bf16.mxu1 %v19869_v53  ;;  %v17985_v53 = vld [vmem:[%s19197_s23 + $0x1a8c] ss:$16 sps:$4 sm:$0xff]   ;;  %v18016_v34 = vld [vmem:[%s19197_s23 + $0x1d28] ss:$16 sps:$4 sm:$0xff]  }
 0x5cf   : > { %12667 = vmatpush1.bf16.msra.mxu0 %v17965_v22  ;;  %v18024_v22 = vld [vmem:[%s19197_s23 + $0x1d4c] ss:$16 sps:$4 sm:$0xff]  }
 0x5d0   : > { %12708 = vmatpush1.bf16.msra.mxu1 %v17968_v40  ;;  %12668 = vmatprep.subr.bf16.mxu0 %v17973_v60  ;;  %v18019_v40 = vld [vmem:[%s19197_s23 + $0x1b48] ss:$16 sps:$4 sm:$0xff]  }
 0x5d1   : > { %12709 = vmatprep.subr.bf16.mxu1 %v17976_v39  ;;  %v18022_v60 = vld [vmem:[%s19197_s23 + $0x1d48] ss:$16 sps:$4 sm:$0xff]   ;;  %v18027_v39 = vld [vmem:[%s19197_s23 + $0x1b6c] ss:$16 sps:$4 sm:$0xff]  }
 0x5d3   : > { %12669 = vmatpush1.bf16.msra.mxu0 %v17971_v46  ;;  %v18030_v46 = vld [vmem:[%s19197_s23 + $0x1d6c] ss:$16 sps:$4 sm:$0xff]  }
 0x5d4   : > { %12710 = vmatpush1.bf16.msra.mxu1 %v17974_v1  ;;  %12670 = vmatprep.subr.bf16.mxu0 %v17979_v26  ;;  %v18025_v1 = vld [vmem:[%s19197_s23 + $0x1b68] ss:$16 sps:$4 sm:$0xff]  }
 0x5d5   : > { %12711 = vmatprep.subr.bf16.mxu1 %v17982_v31  ;;  %v18028_v26 = vld [vmem:[%s19197_s23 + $0x1d68] ss:$16 sps:$4 sm:$0xff]   ;;  %v18033_v31 = vld [vmem:[%s19197_s23 + $0x1b8c] ss:$16 sps:$4 sm:$0xff]  }
 0x5d7   : > { %12671 = vmatpush1.bf16.msra.mxu0 %v17977_v5  ;;  %v18036_v5 = vld [vmem:[%s19197_s23 + $0x1d8c] ss:$16 sps:$4 sm:$0xff]  }
 0x5d8   : > { %12712 = vmatpush1.bf16.msra.mxu1 %v17980_v51  ;;  %12672 = vmatprep.subr.bf16.mxu0 %v17985_v53  ;;  %v18031_v51 = vld [vmem:[%s19197_s23 + $0x1b88] ss:$16 sps:$4 sm:$0xff]  }
 0x5d9   : > { %12713 = vmatprep.subr.bf16.mxu1 %v17988_v24  ;;  %v18034_v53 = vld [vmem:[%s19197_s23 + $0x1d88] ss:$16 sps:$4 sm:$0xff]   ;;  %v18039_v24 = vld [vmem:[%s19197_s23 + $0x1bac] ss:$16 sps:$4 sm:$0xff]  }
 0x5db   : > { %12673 = vmatpush1.bf16.msra.mxu0 %v17983_v41  ;;  %v18042_v41 = vld [vmem:[%s19197_s23 + $0x1dac] ss:$16 sps:$4 sm:$0xff]  }
 0x5dc   : > { %12714 = vmatpush1.bf16.msra.mxu1 %v17986_v7  ;;  %12674 = vmatprep.subr.bf16.mxu0 %v17991_v12  ;;  %v18037_v7 = vld [vmem:[%s19197_s23 + $0x1ba8] ss:$16 sps:$4 sm:$0xff]  }
 0x5dd   : > { %12715 = vmatprep.subr.bf16.mxu1 %v17994_v36  ;;  %v12370_v13 = vpop.f32.mrb[64].mxu0  ;;  %v18040_v12 = vld [vmem:[%s19197_s23 + $0x1da8] ss:$16 sps:$4 sm:$0xff]   ;;  %v18045_v36 = vld [vmem:[%s19197_s23 + $0x1bcc] ss:$16 sps:$4 sm:$0xff]  }
 0x5de   : > { %v12411_v62 = vpop.f32.mrb[64].mxu1  ;;  %v12371_v50 = vadd.f32 %v12370_v13, %v20920_v45  ;;  %v12372_v52 = vpop.f32.mrb[65].mxu0  ;;  %v18003_v45 = vld [vmem:[%s19197_s23 + $0x1aec] ss:$16 sps:$4 sm:$0xff]  }
 0x5df   : > { %v12413_v37 = vpop.f32.mrb[65].mxu1  ;;  %v12373_v42 = vadd.f32 %v12372_v52, %v20924_v18  ;;  %v12374_v59 = vpop.f32.mrb[66].mxu0  ;;  %12675 = vmatpush1.bf16.msra.mxu0 %v17989_v49  ;;  %v18006_v18 = vld [vmem:[%s19197_s23 + $0x1cec] ss:$16 sps:$4 sm:$0xff]  }
 0x5e0   : > { %v12415_v15 = vpop.f32.mrb[66].mxu1  ;;  %12716 = vmatpush1.bf16.msra.mxu1 %v17992_v44  ;;  %v20994_v17 = vadd.f32 %v12411_v62, %v12371_v50  ;;  %v12375_v0 = vpop.f32.mrb[67].mxu0  ;;  %12676 = vmatprep.subr.bf16.mxu0 %v17997_v61  ;;  %v18048_v49 = vld [vmem:[%s19197_s23 + $0x1dcc] ss:$16 sps:$4 sm:$0xff]   ;;  %v18043_v44 = vld [vmem:[%s19197_s23 + $0x1bc8] ss:$16 sps:$4 sm:$0xff]  }
 0x5e1   : > { %v12416_v33 = vpop.f32.mrb[67].mxu1  ;;  %12717 = vmatprep.subr.bf16.mxu1 %v18000_v47  ;;  %v20998_v8 = vadd.f32 %v12413_v37, %v12373_v42  ;;  %v18046_v61 = vld [vmem:[%s19197_s23 + $0x1dc8] ss:$16 sps:$4 sm:$0xff]   ;;  %v18051_v47 = vld [vmem:[%s19197_s23 + $0x1bec] ss:$16 sps:$4 sm:$0xff]  }
 0x5e2   : > { %v18054_v13 = vld [vmem:[%s19197_s23 + $0x1dec] ss:$16 sps:$4 sm:$0xff]   ;;  %v18049_v62 = vld [vmem:[%s19197_s23 + $0x1be8] ss:$16 sps:$4 sm:$0xff]  }
 0x5e3   : > { %12677 = vmatpush1.bf16.msra.mxu0 %v17995_v14  ;;  %v18052_v50 = vld [vmem:[%s19197_s23 + $0x1de8] ss:$16 sps:$4 sm:$0xff]   ;;  %v18057_v52 = vld [vmem:[%s19197_s23 + $0x1e0c] ss:$16 sps:$4 sm:$0xff]  }
 0x5e4   : > { %12718 = vmatpush1.bf16.msra.mxu1 %v17998_v10  ;;  %12678 = vmatprep.subr.bf16.mxu0 %v18003_v45  ;;  %v18060_v37 = vld [vmem:[%s19197_s23 + $0x200c] ss:$16 sps:$4 sm:$0xff]   ;;  %v18055_v42 = vld [vmem:[%s19197_s23 + $0x1e08] ss:$16 sps:$4 sm:$0xff]  }
 0x5e5   : > { %12719 = vmatprep.subr.bf16.mxu1 %v18006_v18  ;;  %v18058_v59 = vld [vmem:[%s19197_s23 + $0x2008] ss:$16 sps:$4 sm:$0xff]   ;;  %v18063_v15 = vld [vmem:[%s19197_s23 + $0x1e2c] ss:$16 sps:$4 sm:$0xff]  }
 0x5e6   : > { %v18066_v14 = vld [vmem:[%s19197_s23 + $0x202c] ss:$16 sps:$4 sm:$0xff]   ;;  %v18061_v10 = vld [vmem:[%s19197_s23 + $0x1e28] ss:$16 sps:$4 sm:$0xff]  }
 0x5e7   : > { %12679 = vmatpush1.bf16.msra.mxu0 %v18001_v11  ;;  %v18064_v0 = vld [vmem:[%s19197_s23 + $0x2028] ss:$16 sps:$4 sm:$0xff]   ;;  %v18069_v33 = vld [vmem:[%s19197_s23 + $0x1e4c] ss:$16 sps:$4 sm:$0xff]  }
 0x5e8   : > { %12720 = vmatpush1.bf16.msra.mxu1 %v18004_v23  ;;  %12680 = vmatprep.subr.bf16.mxu0 %v18009_v43  ;;  %v18072_v45 = vld [vmem:[%s19197_s23 + $0x204c] ss:$16 sps:$4 sm:$0xff]   ;;  %v18073_v23 = vld [vmem:[%s19197_s23 + $0x1e68] ss:$16 sps:$4 sm:$0xff]  }
 0x5e9   : > { %12721 = vmatprep.subr.bf16.mxu1 %v18012_v48  ;;  %v18075_v18 = vld [vmem:[%s19197_s23 + $0x1e6c] ss:$16 sps:$4 sm:$0xff]   ;;  %v18079_v48 = vld [vmem:[%s19197_s23 + $0x1e88] ss:$16 sps:$4 sm:$0xff]  }
 0x5ea   : > { %v18078_v11 = vld [vmem:[%s19197_s23 + $0x206c] ss:$16 sps:$4 sm:$0xff]  }
 0x5eb   : > { %12681 = vmatpush1.bf16.msra.mxu0 %v18007_v63  ;;  %v18084_v43 = vld [vmem:[%s19197_s23 + $0x208c] ss:$16 sps:$4 sm:$0xff]   ;;  %v18082_v63 = vld [vmem:[%s19197_s23 + $0x2088] ss:$16 sps:$4 sm:$0xff]  }
 0x5ec   : > { %12722 = vmatpush1.bf16.msra.mxu1 %v18010_v38  ;;  %12682 = vmatprep.subr.bf16.mxu0 %v18015_v25  ;;  %v18087_v38 = vld [vmem:[%s19197_s23 + $0x1eac] ss:$16 sps:$4 sm:$0xff]  }
 0x5ed   : > { %12723 = vmatprep.subr.bf16.mxu1 %v18018_v32  ;;  %v18090_v25 = vld [vmem:[%s19197_s23 + $0x20ac] ss:$16 sps:$4 sm:$0xff]   ;;  %v18085_v32 = vld [vmem:[%s19197_s23 + $0x1ea8] ss:$16 sps:$4 sm:$0xff]  }
 0x5ef   : > { %12683 = vmatpush1.bf16.msra.mxu0 %v18013_v55  ;;  %v18088_v55 = vld [vmem:[%s19197_s23 + $0x20a8] ss:$16 sps:$4 sm:$0xff]  }
 0x5f0   : > { %12724 = vmatpush1.bf16.msra.mxu1 %v18016_v34  ;;  %12684 = vmatprep.subr.bf16.mxu0 %v18021_v16  ;;  %v18093_v34 = vld [vmem:[%s19197_s23 + $0x1ecc] ss:$16 sps:$4 sm:$0xff]  }
 0x5f1   : > { %12725 = vmatprep.subr.bf16.mxu1 %v18024_v22  ;;  %v18096_v16 = vld [vmem:[%s19197_s23 + $0x20cc] ss:$16 sps:$4 sm:$0xff]  }
 0x5f3   : > { %12685 = vmatpush1.bf16.msra.mxu0 %v18019_v40 }
 0x5f4   : > { %12726 = vmatpush1.bf16.msra.mxu1 %v18022_v60  ;;  %12686 = vmatprep.subr.bf16.mxu0 %v18027_v39 }
 0x5f5   : > { %12727 = vmatprep.subr.bf16.mxu1 %v18030_v46 }
 0x5f7   : > { %12687 = vmatpush1.bf16.msra.mxu0 %v18025_v1 }
 0x5f8   : > { %12728 = vmatpush1.bf16.msra.mxu1 %v18028_v26  ;;  %12688 = vmatprep.subr.bf16.mxu0 %v18033_v31 }
 0x5f9   : > { %12729 = vmatprep.subr.bf16.mxu1 %v18036_v5  ;;  %v18091_v5 = vld [vmem:[%s19197_s23 + $0x1ec8] ss:$16 sps:$4 sm:$0xff]  }
 0x5fb   : > { %12689 = vmatpush1.bf16.msra.mxu0 %v18031_v51  ;;  %v18094_v51 = vld [vmem:[%s19197_s23 + $0x20c8] ss:$16 sps:$4 sm:$0xff]  }
 0x5fc   : > { %12730 = vmatpush1.bf16.msra.mxu1 %v18034_v53  ;;  %12690 = vmatprep.subr.bf16.mxu0 %v18039_v24 }
 0x5fd   : > { %12731 = vmatprep.subr.bf16.mxu1 %v18042_v41 }
 0x5ff   : > { %12691 = vmatpush1.bf16.msra.mxu0 %v18037_v7 }
 0x600   : > { %12732 = vmatpush1.bf16.msra.mxu1 %v18040_v12  ;;  %12692 = vmatprep.subr.bf16.mxu0 %v18045_v36  ;;  %v18097_v12 = vld [vmem:[%s19197_s23 + $0x1ee8] ss:$16 sps:$4 sm:$0xff]  }
 0x601   : > { %12733 = vmatprep.subr.bf16.mxu1 %v18048_v49  ;;  %v18100_v36 = vld [vmem:[%s19197_s23 + $0x20e8] ss:$16 sps:$4 sm:$0xff]   ;;  %v18105_v49 = vld [vmem:[%s19197_s23 + $0x1f0c] ss:$16 sps:$4 sm:$0xff]  }
 0x603   : > { %12693 = vmatpush1.bf16.msra.mxu0 %v18043_v44  ;;  %v18108_v44 = vld [vmem:[%s19197_s23 + $0x210c] ss:$16 sps:$4 sm:$0xff]  }
 0x604   : > { %12734 = vmatpush1.bf16.msra.mxu1 %v18046_v61  ;;  %12694 = vmatprep.subr.bf16.mxu0 %v18051_v47  ;;  %v18103_v61 = vld [vmem:[%s19197_s23 + $0x1f08] ss:$16 sps:$4 sm:$0xff]  }
 0x605   : > { %12735 = vmatprep.subr.bf16.mxu1 %v18054_v13  ;;  %v18106_v47 = vld [vmem:[%s19197_s23 + $0x2108] ss:$16 sps:$4 sm:$0xff]   ;;  %v18111_v13 = vld [vmem:[%s19197_s23 + $0x1f2c] ss:$16 sps:$4 sm:$0xff]  }
 0x607   : > { %12695 = vmatpush1.bf16.msra.mxu0 %v18049_v62  ;;  %v18114_v62 = vld [vmem:[%s19197_s23 + $0x212c] ss:$16 sps:$4 sm:$0xff]  }
 0x608   : > { %12736 = vmatpush1.bf16.msra.mxu1 %v18052_v50  ;;  %12746 = vmatprep.subr.bf16.mxu0 %v18057_v52  ;;  %v18109_v50 = vld [vmem:[%s19197_s23 + $0x1f28] ss:$16 sps:$4 sm:$0xff]  }
 0x609   : > { %12787 = vmatprep.subr.bf16.mxu1 %v18060_v37  ;;  %v18112_v52 = vld [vmem:[%s19197_s23 + $0x2128] ss:$16 sps:$4 sm:$0xff]   ;;  %v18117_v37 = vld [vmem:[%s19197_s23 + $0x1f4c] ss:$16 sps:$4 sm:$0xff]  }
 0x60a   : > { %12697 = vmatmul.mubr.bf16.vlgmr.msra.gmra.mrb[80].mxu0 %v19857_v2  ;;  %v18067_v2 = vld [vmem:[%s19197_s23 + $0x1e48] ss:$16 sps:$4 sm:$0xff]  }
 0x60b   : > { %12738 = vmatmul.mubr.bf16.vlgmr.msra.gmra.mrb[80].mxu1 %v19949_v27  ;;  %12747 = vmatpush1.bf16.msra.mxu0 %v18055_v42  ;;  %v18070_v27 = vld [vmem:[%s19197_s23 + $0x2048] ss:$16 sps:$4 sm:$0xff]   ;;  %v18120_v42 = vld [vmem:[%s19197_s23 + $0x214c] ss:$16 sps:$4 sm:$0xff]  }
 0x60c   : > { %12788 = vmatpush1.bf16.msra.mxu1 %v18058_v59  ;;  %12748 = vmatprep.subr.bf16.mxu0 %v18063_v15  ;;  %v18115_v59 = vld [vmem:[%s19197_s23 + $0x1f48] ss:$16 sps:$4 sm:$0xff]  }
 0x60d   : > { %12789 = vmatprep.subr.bf16.mxu1 %v18066_v14  ;;  %12778 = vmatprep.mubr.bf16.mxu0 %v19873_v54  ;;  %v18076_v54 = vld [vmem:[%s19197_s23 + $0x2068] ss:$16 sps:$4 sm:$0xff]   ;;  %v18123_v14 = vld [vmem:[%s19197_s23 + $0x1f6c] ss:$16 sps:$4 sm:$0xff]  }
 0x60e   : > { %12819 = vmatprep.mubr.bf16.mxu1 %v19965_v3  ;;  %v18081_v3 = vld [vmem:[%s19197_s23 + $0x1e8c] ss:$16 sps:$4 sm:$0xff]   ;;  %v18118_v15 = vld [vmem:[%s19197_s23 + $0x2148] ss:$16 sps:$4 sm:$0xff]  }
 0x60f   : > { %12749 = vmatpush1.bf16.msra.mxu0 %v18061_v10  ;;  %v18126_v10 = vld [vmem:[%s19197_s23 + $0x216c] ss:$16 sps:$4 sm:$0xff]  }
 0x610   : > { %12790 = vmatpush1.bf16.msra.mxu1 %v18064_v0  ;;  %12750 = vmatprep.subr.bf16.mxu0 %v18069_v33  ;;  %v18121_v0 = vld [vmem:[%s19197_s23 + $0x1f68] ss:$16 sps:$4 sm:$0xff]  }
 0x611   : > { %12791 = vmatprep.subr.bf16.mxu1 %v18072_v45  ;;  %v18124_v33 = vld [vmem:[%s19197_s23 + $0x2168] ss:$16 sps:$4 sm:$0xff]   ;;  %v18129_v45 = vld [vmem:[%s19197_s23 + $0x1f8c] ss:$16 sps:$4 sm:$0xff]  }
 0x613   : > { %12751 = vmatpush1.bf16.msra.mxu0 %v18067_v2  ;;  %v18132_v2 = vld [vmem:[%s19197_s23 + $0x218c] ss:$16 sps:$4 sm:$0xff]  }
 0x614   : > { %12792 = vmatpush1.bf16.msra.mxu1 %v18070_v27  ;;  %12752 = vmatprep.subr.bf16.mxu0 %v18075_v18  ;;  %v18127_v27 = vld [vmem:[%s19197_s23 + $0x1f88] ss:$16 sps:$4 sm:$0xff]  }
 0x615   : > { %12793 = vmatprep.subr.bf16.mxu1 %v18078_v11  ;;  %v18130_v18 = vld [vmem:[%s19197_s23 + $0x2188] ss:$16 sps:$4 sm:$0xff]   ;;  %v18135_v11 = vld [vmem:[%s19197_s23 + $0x1fac] ss:$16 sps:$4 sm:$0xff]  }
 0x617   : > { %12753 = vmatpush1.bf16.msra.mxu0 %v18073_v23  ;;  %v18138_v23 = vld [vmem:[%s19197_s23 + $0x21ac] ss:$16 sps:$4 sm:$0xff]  }
 0x618   : > { %12794 = vmatpush1.bf16.msra.mxu1 %v18076_v54  ;;  %12754 = vmatprep.subr.bf16.mxu0 %v18081_v3  ;;  %v18133_v54 = vld [vmem:[%s19197_s23 + $0x1fa8] ss:$16 sps:$4 sm:$0xff]  }
 0x619   : > { %12795 = vmatprep.subr.bf16.mxu1 %v18084_v43  ;;  %v18136_v3 = vld [vmem:[%s19197_s23 + $0x21a8] ss:$16 sps:$4 sm:$0xff]   ;;  %v18141_v43 = vld [vmem:[%s19197_s23 + $0x1fcc] ss:$16 sps:$4 sm:$0xff]  }
 0x61b   : > { %12755 = vmatpush1.bf16.msra.mxu0 %v18079_v48  ;;  %v18144_v48 = vld [vmem:[%s19197_s23 + $0x21cc] ss:$16 sps:$4 sm:$0xff]  }
 0x61c   : > { %12796 = vmatpush1.bf16.msra.mxu1 %v18082_v63  ;;  %12756 = vmatprep.subr.bf16.mxu0 %v18087_v38  ;;  %v18139_v63 = vld [vmem:[%s19197_s23 + $0x1fc8] ss:$16 sps:$4 sm:$0xff]  }
 0x61d   : > { %12797 = vmatprep.subr.bf16.mxu1 %v18090_v25  ;;  %v12452_v22 = vpop.f32.mrb[68].mxu0  ;;  %v18142_v38 = vld [vmem:[%s19197_s23 + $0x21c8] ss:$16 sps:$4 sm:$0xff]   ;;  %v18147_v25 = vld [vmem:[%s19197_s23 + $0x1fec] ss:$16 sps:$4 sm:$0xff]  }
 0x61e   : > { %v12493_v40 = vpop.f32.mrb[68].mxu1  ;;  %v12453_v60 = vadd.f32 %v12452_v22, %v20994_v17  ;;  %v12454_v39 = vpop.f32.mrb[69].mxu0  ;;  %v18099_v17 = vld [vmem:[%s19197_s23 + $0x1eec] ss:$16 sps:$4 sm:$0xff]  }
 0x61f   : > { %v12495_v46 = vpop.f32.mrb[69].mxu1  ;;  %v12455_v1 = vadd.f32 %v12454_v39, %v20998_v8  ;;  %v12456_v26 = vpop.f32.mrb[70].mxu0  ;;  %12757 = vmatpush1.bf16.msra.mxu0 %v18085_v32  ;;  %v18102_v8 = vld [vmem:[%s19197_s23 + $0x20ec] ss:$16 sps:$4 sm:$0xff]  }
 0x620   : > { %v12497_v31 = vpop.f32.mrb[70].mxu1  ;;  %12798 = vmatpush1.bf16.msra.mxu1 %v18088_v55  ;;  %v21068_v53 = vadd.f32 %v12493_v40, %v12453_v60  ;;  %v12457_v24 = vpop.f32.mrb[71].mxu0  ;;  %12758 = vmatprep.subr.bf16.mxu0 %v18093_v34  ;;  %v18150_v32 = vld [vmem:[%s19197_s23 + $0x21ec] ss:$16 sps:$4 sm:$0xff]   ;;  %v18145_v55 = vld [vmem:[%s19197_s23 + $0x1fe8] ss:$16 sps:$4 sm:$0xff]  }
 0x621   : > { %v12498_v41 = vpop.f32.mrb[71].mxu1  ;;  %12799 = vmatprep.subr.bf16.mxu1 %v18096_v16  ;;  %v21072_v7 = vadd.f32 %v12495_v46, %v12455_v1  ;;  %v18148_v34 = vld [vmem:[%s19197_s23 + $0x21e8] ss:$16 sps:$4 sm:$0xff]   ;;  %v18153_v16 = vld [vmem:[%s19197_s23 + $0x220c] ss:$16 sps:$4 sm:$0xff]  }
 0x622   : > { %v18156_v22 = vld [vmem:[%s19197_s23 + $0x240c] ss:$16 sps:$4 sm:$0xff]   ;;  %v18151_v40 = vld [vmem:[%s19197_s23 + $0x2208] ss:$16 sps:$4 sm:$0xff]  }
 0x623   : > { %12759 = vmatpush1.bf16.msra.mxu0 %v18091_v5  ;;  %v18154_v60 = vld [vmem:[%s19197_s23 + $0x2408] ss:$16 sps:$4 sm:$0xff]   ;;  %v18159_v39 = vld [vmem:[%s19197_s23 + $0x222c] ss:$16 sps:$4 sm:$0xff]  }
 0x624   : > { %12800 = vmatpush1.bf16.msra.mxu1 %v18094_v51  ;;  %12760 = vmatprep.subr.bf16.mxu0 %v18099_v17  ;;  %v18162_v46 = vld [vmem:[%s19197_s23 + $0x242c] ss:$16 sps:$4 sm:$0xff]   ;;  %v18157_v1 = vld [vmem:[%s19197_s23 + $0x2228] ss:$16 sps:$4 sm:$0xff]  }
 0x625   : > { %12801 = vmatprep.subr.bf16.mxu1 %v18102_v8  ;;  %v18160_v26 = vld [vmem:[%s19197_s23 + $0x2428] ss:$16 sps:$4 sm:$0xff]   ;;  %v18165_v31 = vld [vmem:[%s19197_s23 + $0x224c] ss:$16 sps:$4 sm:$0xff]  }
 0x626   : > { %v18168_v5 = vld [vmem:[%s19197_s23 + $0x244c] ss:$16 sps:$4 sm:$0xff]   ;;  %v18169_v41 = vld [vmem:[%s19197_s23 + $0x2268] ss:$16 sps:$4 sm:$0xff]  }
 0x627   : > { %12761 = vmatpush1.bf16.msra.mxu0 %v18097_v12  ;;  %v18171_v51 = vld [vmem:[%s19197_s23 + $0x226c] ss:$16 sps:$4 sm:$0xff]   ;;  %v18175_v8 = vld [vmem:[%s19197_s23 + $0x2288] ss:$16 sps:$4 sm:$0xff]  }
 0x628   : > { %12802 = vmatpush1.bf16.msra.mxu1 %v18100_v36  ;;  %12762 = vmatprep.subr.bf16.mxu0 %v18105_v49  ;;  %v18174_v24 = vld [vmem:[%s19197_s23 + $0x246c] ss:$16 sps:$4 sm:$0xff]   ;;  %v18178_v12 = vld [vmem:[%s19197_s23 + $0x2488] ss:$16 sps:$4 sm:$0xff]  }
 0x629   : > { %12803 = vmatprep.subr.bf16.mxu1 %v18108_v44  ;;  %v18180_v17 = vld [vmem:[%s19197_s23 + $0x248c] ss:$16 sps:$4 sm:$0xff]   ;;  %v18181_v44 = vld [vmem:[%s19197_s23 + $0x22a8] ss:$16 sps:$4 sm:$0xff]  }
 0x62a   : > { %v18183_v36 = vld [vmem:[%s19197_s23 + $0x22ac] ss:$16 sps:$4 sm:$0xff]  }
 0x62b   : > { %12763 = vmatpush1.bf16.msra.mxu0 %v18103_v61  ;;  %v18186_v49 = vld [vmem:[%s19197_s23 + $0x24ac] ss:$16 sps:$4 sm:$0xff]   ;;  %v18184_v61 = vld [vmem:[%s19197_s23 + $0x24a8] ss:$16 sps:$4 sm:$0xff]  }
 0x62c   : > { %12804 = vmatpush1.bf16.msra.mxu1 %v18106_v47  ;;  %12764 = vmatprep.subr.bf16.mxu0 %v18111_v13  ;;  %v18189_v47 = vld [vmem:[%s19197_s23 + $0x22cc] ss:$16 sps:$4 sm:$0xff]  }
 0x62d   : > { %12805 = vmatprep.subr.bf16.mxu1 %v18114_v62  ;;  %v18192_v13 = vld [vmem:[%s19197_s23 + $0x24cc] ss:$16 sps:$4 sm:$0xff]  }
 0x62f   : > { %12765 = vmatpush1.bf16.msra.mxu0 %v18109_v50 }
 0x630   : > { %12806 = vmatpush1.bf16.msra.mxu1 %v18112_v52  ;;  %12766 = vmatprep.subr.bf16.mxu0 %v18117_v37 }
 0x631   : > { %12807 = vmatprep.subr.bf16.mxu1 %v18120_v42 }
 0x633   : > { %12767 = vmatpush1.bf16.msra.mxu0 %v18115_v59 }
 0x634   : > { %12808 = vmatpush1.bf16.msra.mxu1 %v18118_v15  ;;  %12768 = vmatprep.subr.bf16.mxu0 %v18123_v14 }
 0x635   : > { %12809 = vmatprep.subr.bf16.mxu1 %v18126_v10  ;;  %v18187_v10 = vld [vmem:[%s19197_s23 + $0x22c8] ss:$16 sps:$4 sm:$0xff]  }
 0x637   : > { %12769 = vmatpush1.bf16.msra.mxu0 %v18121_v0  ;;  %v18190_v0 = vld [vmem:[%s19197_s23 + $0x24c8] ss:$16 sps:$4 sm:$0xff]  }
 0x638   : > { %12810 = vmatpush1.bf16.msra.mxu1 %v18124_v33  ;;  %12770 = vmatprep.subr.bf16.mxu0 %v18129_v45 }
 0x639   : > { %12811 = vmatprep.subr.bf16.mxu1 %v18132_v2 }
 0x63b   : > { %12771 = vmatpush1.bf16.msra.mxu0 %v18127_v27 }
 0x63c   : > { %12812 = vmatpush1.bf16.msra.mxu1 %v18130_v18  ;;  %12772 = vmatprep.subr.bf16.mxu0 %v18135_v11  ;;  %v18193_v18 = vld [vmem:[%s19197_s23 + $0x22e8] ss:$16 sps:$4 sm:$0xff]  }
 0x63d   : > { %12813 = vmatprep.subr.bf16.mxu1 %v18138_v23  ;;  %v18196_v11 = vld [vmem:[%s19197_s23 + $0x24e8] ss:$16 sps:$4 sm:$0xff]   ;;  %v18201_v23 = vld [vmem:[%s19197_s23 + $0x230c] ss:$16 sps:$4 sm:$0xff]  }
 0x63f   : > { %12773 = vmatpush1.bf16.msra.mxu0 %v18133_v54  ;;  %v18204_v54 = vld [vmem:[%s19197_s23 + $0x250c] ss:$16 sps:$4 sm:$0xff]  }
 0x640   : > { %12814 = vmatpush1.bf16.msra.mxu1 %v18136_v3  ;;  %12774 = vmatprep.subr.bf16.mxu0 %v18141_v43  ;;  %v18199_v3 = vld [vmem:[%s19197_s23 + $0x2308] ss:$16 sps:$4 sm:$0xff]  }
 0x641   : > { %12815 = vmatprep.subr.bf16.mxu1 %v18144_v48  ;;  %v18202_v43 = vld [vmem:[%s19197_s23 + $0x2508] ss:$16 sps:$4 sm:$0xff]   ;;  %v18207_v48 = vld [vmem:[%s19197_s23 + $0x232c] ss:$16 sps:$4 sm:$0xff]  }
 0x643   : > { %12775 = vmatpush1.bf16.msra.mxu0 %v18139_v63  ;;  %v18210_v63 = vld [vmem:[%s19197_s23 + $0x252c] ss:$16 sps:$4 sm:$0xff]  }
 0x644   : > { %12816 = vmatpush1.bf16.msra.mxu1 %v18142_v38  ;;  %12776 = vmatprep.subr.bf16.mxu0 %v18147_v25  ;;  %v18205_v38 = vld [vmem:[%s19197_s23 + $0x2328] ss:$16 sps:$4 sm:$0xff]  }
 0x645   : > { %12817 = vmatprep.subr.bf16.mxu1 %v18150_v32  ;;  %v18208_v25 = vld [vmem:[%s19197_s23 + $0x2528] ss:$16 sps:$4 sm:$0xff]   ;;  %v18213_v32 = vld [vmem:[%s19197_s23 + $0x234c] ss:$16 sps:$4 sm:$0xff]  }
 0x647   : > { %12777 = vmatpush1.bf16.msra.mxu0 %v18145_v55  ;;  %v18216_v55 = vld [vmem:[%s19197_s23 + $0x254c] ss:$16 sps:$4 sm:$0xff]  }
 0x648   : > { %12818 = vmatpush1.bf16.msra.mxu1 %v18148_v34  ;;  %12828 = vmatprep.subr.bf16.mxu0 %v18153_v16  ;;  %v18211_v34 = vld [vmem:[%s19197_s23 + $0x2348] ss:$16 sps:$4 sm:$0xff]  }
 0x649   : > { %12869 = vmatprep.subr.bf16.mxu1 %v18156_v22  ;;  %v18214_v16 = vld [vmem:[%s19197_s23 + $0x2548] ss:$16 sps:$4 sm:$0xff]   ;;  %v18219_v22 = vld [vmem:[%s19197_s23 + $0x236c] ss:$16 sps:$4 sm:$0xff]  }
 0x64a   : > { %12779 = vmatmul.mubr.bf16.vlgmr.msra.gmra.mrb[84].mxu0 %v19953_v28  ;;  %v18163_v28 = vld [vmem:[%s19197_s23 + $0x2248] ss:$16 sps:$4 sm:$0xff]  }
 0x64b   : > { %12820 = vmatmul.mubr.bf16.vlgmr.msra.gmra.mrb[84].mxu1 %v20045_v19  ;;  %12829 = vmatpush1.bf16.msra.mxu0 %v18151_v40  ;;  %v18166_v19 = vld [vmem:[%s19197_s23 + $0x2448] ss:$16 sps:$4 sm:$0xff]   ;;  %v18222_v40 = vld [vmem:[%s19197_s23 + $0x256c] ss:$16 sps:$4 sm:$0xff]  }
 0x64c   : > { %12870 = vmatpush1.bf16.msra.mxu1 %v18154_v60  ;;  %12830 = vmatprep.subr.bf16.mxu0 %v18159_v39  ;;  %v18217_v60 = vld [vmem:[%s19197_s23 + $0x2368] ss:$16 sps:$4 sm:$0xff]  }
 0x64d   : > { %12871 = vmatprep.subr.bf16.mxu1 %v18162_v46  ;;  %12860 = vmatprep.mubr.bf16.mxu0 %v19969_v4  ;;  %v18172_v4 = vld [vmem:[%s19197_s23 + $0x2468] ss:$16 sps:$4 sm:$0xff]   ;;  %v18225_v46 = vld [vmem:[%s19197_s23 + $0x238c] ss:$16 sps:$4 sm:$0xff]  }
 0x64e   : > { %12901 = vmatprep.mubr.bf16.mxu1 %v20061_v29  ;;  %v18177_v29 = vld [vmem:[%s19197_s23 + $0x228c] ss:$16 sps:$4 sm:$0xff]   ;;  %v18220_v39 = vld [vmem:[%s19197_s23 + $0x2568] ss:$16 sps:$4 sm:$0xff]  }
 0x64f   : > { %12831 = vmatpush1.bf16.msra.mxu0 %v18157_v1  ;;  %v18228_v1 = vld [vmem:[%s19197_s23 + $0x258c] ss:$16 sps:$4 sm:$0xff]  }
 0x650   : > { %12872 = vmatpush1.bf16.msra.mxu1 %v18160_v26  ;;  %12832 = vmatprep.subr.bf16.mxu0 %v18165_v31  ;;  %v18223_v26 = vld [vmem:[%s19197_s23 + $0x2388] ss:$16 sps:$4 sm:$0xff]  }
 0x651   : > { %12873 = vmatprep.subr.bf16.mxu1 %v18168_v5  ;;  %v18226_v31 = vld [vmem:[%s19197_s23 + $0x2588] ss:$16 sps:$4 sm:$0xff]   ;;  %v18231_v5 = vld [vmem:[%s19197_s23 + $0x23ac] ss:$16 sps:$4 sm:$0xff]  }
 0x653   : > { %12833 = vmatpush1.bf16.msra.mxu0 %v18163_v28  ;;  %v18234_v28 = vld [vmem:[%s19197_s23 + $0x25ac] ss:$16 sps:$4 sm:$0xff]  }
 0x654   : > { %12874 = vmatpush1.bf16.msra.mxu1 %v18166_v19  ;;  %12834 = vmatprep.subr.bf16.mxu0 %v18171_v51  ;;  %v18229_v19 = vld [vmem:[%s19197_s23 + $0x23a8] ss:$16 sps:$4 sm:$0xff]  }
 0x655   : > { %12875 = vmatprep.subr.bf16.mxu1 %v18174_v24  ;;  %v18232_v51 = vld [vmem:[%s19197_s23 + $0x25a8] ss:$16 sps:$4 sm:$0xff]   ;;  %v18237_v24 = vld [vmem:[%s19197_s23 + $0x23cc] ss:$16 sps:$4 sm:$0xff]  }
 0x657   : > { %12835 = vmatpush1.bf16.msra.mxu0 %v18169_v41  ;;  %v18240_v41 = vld [vmem:[%s19197_s23 + $0x25cc] ss:$16 sps:$4 sm:$0xff]  }
 0x658   : > { %12876 = vmatpush1.bf16.msra.mxu1 %v18172_v4  ;;  %12836 = vmatprep.subr.bf16.mxu0 %v18177_v29  ;;  %v18235_v4 = vld [vmem:[%s19197_s23 + $0x23c8] ss:$16 sps:$4 sm:$0xff]  }
 0x659   : > { %12877 = vmatprep.subr.bf16.mxu1 %v18180_v17  ;;  %v18238_v29 = vld [vmem:[%s19197_s23 + $0x25c8] ss:$16 sps:$4 sm:$0xff]   ;;  %v18243_v17 = vld [vmem:[%s19197_s23 + $0x23ec] ss:$16 sps:$4 sm:$0xff]  }
 0x65b   : > { %12837 = vmatpush1.bf16.msra.mxu0 %v18175_v8  ;;  %v18246_v8 = vld [vmem:[%s19197_s23 + $0x25ec] ss:$16 sps:$4 sm:$0xff]  }
 0x65c   : > { %12878 = vmatpush1.bf16.msra.mxu1 %v18178_v12  ;;  %12838 = vmatprep.subr.bf16.mxu0 %v18183_v36  ;;  %v18241_v12 = vld [vmem:[%s19197_s23 + $0x23e8] ss:$16 sps:$4 sm:$0xff]  }
 0x65d   : > { %12879 = vmatprep.subr.bf16.mxu1 %v18186_v49  ;;  %v12534_v62 = vpop.f32.mrb[72].mxu0  ;;  %v18244_v36 = vld [vmem:[%s19197_s23 + $0x25e8] ss:$16 sps:$4 sm:$0xff]   ;;  %v18249_v49 = vld [vmem:[%s19197_s23 + $0x260c] ss:$16 sps:$4 sm:$0xff]  }
 0x65e   : > { %v12575_v50 = vpop.f32.mrb[72].mxu1  ;;  %v12535_v52 = vadd.f32 %v12534_v62, %v21068_v53  ;;  %v12536_v37 = vpop.f32.mrb[73].mxu0  ;;  %v18195_v53 = vld [vmem:[%s19197_s23 + $0x22ec] ss:$16 sps:$4 sm:$0xff]  }
 0x65f   : > { %v12577_v42 = vpop.f32.mrb[73].mxu1  ;;  %v12537_v59 = vadd.f32 %v12536_v37, %v21072_v7  ;;  %v12538_v15 = vpop.f32.mrb[74].mxu0  ;;  %12839 = vmatpush1.bf16.msra.mxu0 %v18181_v44  ;;  %v18198_v7 = vld [vmem:[%s19197_s23 + $0x24ec] ss:$16 sps:$4 sm:$0xff]  }
 0x660   : > { %v12579_v14 = vpop.f32.mrb[74].mxu1  ;;  %12880 = vmatpush1.bf16.msra.mxu1 %v18184_v61  ;;  %v21142_v33 = vadd.f32 %v12575_v50, %v12535_v52  ;;  %v12539_v45 = vpop.f32.mrb[75].mxu0  ;;  %12840 = vmatprep.subr.bf16.mxu0 %v18189_v47  ;;  %v18252_v44 = vld [vmem:[%s19197_s23 + $0x280c] ss:$16 sps:$4 sm:$0xff]   ;;  %v18247_v61 = vld [vmem:[%s19197_s23 + $0x2608] ss:$16 sps:$4 sm:$0xff]  }
 0x661   : > { %v12580_v2 = vpop.f32.mrb[75].mxu1  ;;  %12881 = vmatprep.subr.bf16.mxu1 %v18192_v13  ;;  %v21146_v27 = vadd.f32 %v12577_v42, %v12537_v59  ;;  %v18250_v47 = vld [vmem:[%s19197_s23 + $0x2808] ss:$16 sps:$4 sm:$0xff]   ;;  %v18255_v13 = vld [vmem:[%s19197_s23 + $0x262c] ss:$16 sps:$4 sm:$0xff]  }
 0x662   : > { %v18258_v62 = vld [vmem:[%s19197_s23 + $0x282c] ss:$16 sps:$4 sm:$0xff]   ;;  %v18253_v50 = vld [vmem:[%s19197_s23 + $0x2628] ss:$16 sps:$4 sm:$0xff]  }
 0x663   : > { %12841 = vmatpush1.bf16.msra.mxu0 %v18187_v10  ;;  %v18256_v52 = vld [vmem:[%s19197_s23 + $0x2828] ss:$16 sps:$4 sm:$0xff]   ;;  %v18261_v37 = vld [vmem:[%s19197_s23 + $0x264c] ss:$16 sps:$4 sm:$0xff]  }
 0x664   : > { %12882 = vmatpush1.bf16.msra.mxu1 %v18190_v0  ;;  %12842 = vmatprep.subr.bf16.mxu0 %v18195_v53  ;;  %v18264_v42 = vld [vmem:[%s19197_s23 + $0x284c] ss:$16 sps:$4 sm:$0xff]   ;;  %v18265_v14 = vld [vmem:[%s19197_s23 + $0x2668] ss:$16 sps:$4 sm:$0xff]  }
 0x665   : > { %12883 = vmatprep.subr.bf16.mxu1 %v18198_v7  ;;  %v18267_v59 = vld [vmem:[%s19197_s23 + $0x266c] ss:$16 sps:$4 sm:$0xff]   ;;  %v18271_v0 = vld [vmem:[%s19197_s23 + $0x2688] ss:$16 sps:$4 sm:$0xff]  }
 0x666   : > { %v18270_v15 = vld [vmem:[%s19197_s23 + $0x286c] ss:$16 sps:$4 sm:$0xff]   ;;  %v18274_v45 = vld [vmem:[%s19197_s23 + $0x2888] ss:$16 sps:$4 sm:$0xff]  }
 0x667   : > { %12843 = vmatpush1.bf16.msra.mxu0 %v18193_v18  ;;  %v18276_v10 = vld [vmem:[%s19197_s23 + $0x288c] ss:$16 sps:$4 sm:$0xff]   ;;  %v18277_v7 = vld [vmem:[%s19197_s23 + $0x26a8] ss:$16 sps:$4 sm:$0xff]  }
 0x668   : > { %12884 = vmatpush1.bf16.msra.mxu1 %v18196_v11  ;;  %12844 = vmatprep.subr.bf16.mxu0 %v18201_v23  ;;  %v18279_v2 = vld [vmem:[%s19197_s23 + $0x26ac] ss:$16 sps:$4 sm:$0xff]   ;;  %v18280_v18 = vld [vmem:[%s19197_s23 + $0x28a8] ss:$16 sps:$4 sm:$0xff]  }
 0x669   : > { %12885 = vmatprep.subr.bf16.mxu1 %v18204_v54  ;;  %v18282_v53 = vld [vmem:[%s19197_s23 + $0x28ac] ss:$16 sps:$4 sm:$0xff]  }
 0x66a   : > { %v18285_v11 = vld [vmem:[%s19197_s23 + $0x26cc] ss:$16 sps:$4 sm:$0xff]  }
 0x66b   : > { %12845 = vmatpush1.bf16.msra.mxu0 %v18199_v3  ;;  %v18288_v23 = vld [vmem:[%s19197_s23 + $0x28cc] ss:$16 sps:$4 sm:$0xff]  }
 0x66c   : > { %12886 = vmatpush1.bf16.msra.mxu1 %v18202_v43  ;;  %12846 = vmatprep.subr.bf16.mxu0 %v18207_v48 }
 0x66d   : > { %12887 = vmatprep.subr.bf16.mxu1 %v18210_v63 }
 0x66f   : > { %12847 = vmatpush1.bf16.msra.mxu0 %v18205_v38 }
 0x670   : > { %12888 = vmatpush1.bf16.msra.mxu1 %v18208_v25  ;;  %12848 = vmatprep.subr.bf16.mxu0 %v18213_v32 }
 0x671   : > { %12889 = vmatprep.subr.bf16.mxu1 %v18216_v55  ;;  %v18283_v55 = vld [vmem:[%s19197_s23 + $0x26c8] ss:$16 sps:$4 sm:$0xff]  }
 0x673   : > { %12849 = vmatpush1.bf16.msra.mxu0 %v18211_v34  ;;  %v18286_v34 = vld [vmem:[%s19197_s23 + $0x28c8] ss:$16 sps:$4 sm:$0xff]  }
 0x674   : > { %12890 = vmatpush1.bf16.msra.mxu1 %v18214_v16  ;;  %12850 = vmatprep.subr.bf16.mxu0 %v18219_v22 }
 0x675   : > { %12891 = vmatprep.subr.bf16.mxu1 %v18222_v40 }
 0x677   : > { %12851 = vmatpush1.bf16.msra.mxu0 %v18217_v60 }
 0x678   : > { %12892 = vmatpush1.bf16.msra.mxu1 %v18220_v39  ;;  %12852 = vmatprep.subr.bf16.mxu0 %v18225_v46  ;;  %v18289_v39 = vld [vmem:[%s19197_s23 + $0x26e8] ss:$16 sps:$4 sm:$0xff]  }
 0x679   : > { %12893 = vmatprep.subr.bf16.mxu1 %v18228_v1  ;;  %v18292_v46 = vld [vmem:[%s19197_s23 + $0x28e8] ss:$16 sps:$4 sm:$0xff]   ;;  %v18297_v1 = vld [vmem:[%s19197_s23 + $0x270c] ss:$16 sps:$4 sm:$0xff]  }
 0x67b   : > { %12853 = vmatpush1.bf16.msra.mxu0 %v18223_v26  ;;  %v18300_v26 = vld [vmem:[%s19197_s23 + $0x290c] ss:$16 sps:$4 sm:$0xff]  }
 0x67c   : > { %12894 = vmatpush1.bf16.msra.mxu1 %v18226_v31  ;;  %12854 = vmatprep.subr.bf16.mxu0 %v18231_v5  ;;  %v18295_v31 = vld [vmem:[%s19197_s23 + $0x2708] ss:$16 sps:$4 sm:$0xff]  }
 0x67d   : > { %12895 = vmatprep.subr.bf16.mxu1 %v18234_v28  ;;  %v18298_v5 = vld [vmem:[%s19197_s23 + $0x2908] ss:$16 sps:$4 sm:$0xff]   ;;  %v18303_v28 = vld [vmem:[%s19197_s23 + $0x272c] ss:$16 sps:$4 sm:$0xff]  }
 0x67f   : > { %12855 = vmatpush1.bf16.msra.mxu0 %v18229_v19  ;;  %v18306_v19 = vld [vmem:[%s19197_s23 + $0x292c] ss:$16 sps:$4 sm:$0xff]  }
 0x680   : > { %12896 = vmatpush1.bf16.msra.mxu1 %v18232_v51  ;;  %12856 = vmatprep.subr.bf16.mxu0 %v18237_v24  ;;  %v18301_v51 = vld [vmem:[%s19197_s23 + $0x2728] ss:$16 sps:$4 sm:$0xff]  }
 0x681   : > { %12897 = vmatprep.subr.bf16.mxu1 %v18240_v41  ;;  %v18304_v24 = vld [vmem:[%s19197_s23 + $0x2928] ss:$16 sps:$4 sm:$0xff]   ;;  %v18309_v41 = vld [vmem:[%s19197_s23 + $0x274c] ss:$16 sps:$4 sm:$0xff]  }
 0x683   : > { %12857 = vmatpush1.bf16.msra.mxu0 %v18235_v4  ;;  %v18312_v4 = vld [vmem:[%s19197_s23 + $0x294c] ss:$16 sps:$4 sm:$0xff]  }
 0x684   : > { %12898 = vmatpush1.bf16.msra.mxu1 %v18238_v29  ;;  %12858 = vmatprep.subr.bf16.mxu0 %v18243_v17  ;;  %v18307_v29 = vld [vmem:[%s19197_s23 + $0x2748] ss:$16 sps:$4 sm:$0xff]  }
 0x685   : > { %12899 = vmatprep.subr.bf16.mxu1 %v18246_v8  ;;  %v18310_v17 = vld [vmem:[%s19197_s23 + $0x2948] ss:$16 sps:$4 sm:$0xff]   ;;  %v18315_v8 = vld [vmem:[%s19197_s23 + $0x276c] ss:$16 sps:$4 sm:$0xff]  }
 0x687   : > { %12859 = vmatpush1.bf16.msra.mxu0 %v18241_v12  ;;  %v18318_v12 = vld [vmem:[%s19197_s23 + $0x296c] ss:$16 sps:$4 sm:$0xff]  }
 0x688   : > { %12900 = vmatpush1.bf16.msra.mxu1 %v18244_v36  ;;  %12910 = vmatprep.subr.bf16.mxu0 %v18249_v49  ;;  %v18313_v36 = vld [vmem:[%s19197_s23 + $0x2768] ss:$16 sps:$4 sm:$0xff]  }
 0x689   : > { %12951 = vmatprep.subr.bf16.mxu1 %v18252_v44  ;;  %v18316_v49 = vld [vmem:[%s19197_s23 + $0x2968] ss:$16 sps:$4 sm:$0xff]   ;;  %v18321_v44 = vld [vmem:[%s19197_s23 + $0x278c] ss:$16 sps:$4 sm:$0xff]  }
 0x68a   : > { %12861 = vmatmul.mubr.bf16.vlgmr.msra.gmra.mrb[88].mxu0 %v20049_v20  ;;  %v18259_v20 = vld [vmem:[%s19197_s23 + $0x2648] ss:$16 sps:$4 sm:$0xff]  }
 0x68b   : > { %12902 = vmatmul.mubr.bf16.vlgmr.msra.gmra.mrb[88].mxu1 %v20141_v9  ;;  %12911 = vmatpush1.bf16.msra.mxu0 %v18247_v61  ;;  %v18262_v9 = vld [vmem:[%s19197_s23 + $0x2848] ss:$16 sps:$4 sm:$0xff]   ;;  %v18324_v61 = vld [vmem:[%s19197_s23 + $0x298c] ss:$16 sps:$4 sm:$0xff]  }
 0x68c   : > { %12952 = vmatpush1.bf16.msra.mxu1 %v18250_v47  ;;  %12912 = vmatprep.subr.bf16.mxu0 %v18255_v13  ;;  %v18319_v47 = vld [vmem:[%s19197_s23 + $0x2788] ss:$16 sps:$4 sm:$0xff]  }
 0x68d   : > { %12953 = vmatprep.subr.bf16.mxu1 %v18258_v62  ;;  %12942 = vmatprep.mubr.bf16.mxu0 %v20065_v30  ;;  %v18268_v30 = vld [vmem:[%s19197_s23 + $0x2868] ss:$16 sps:$4 sm:$0xff]   ;;  %v18327_v62 = vld [vmem:[%s19197_s23 + $0x27ac] ss:$16 sps:$4 sm:$0xff]  }
 0x68e   : > { %12983 = vmatprep.mubr.bf16.mxu1 %v20157_v21  ;;  %v18273_v21 = vld [vmem:[%s19197_s23 + $0x268c] ss:$16 sps:$4 sm:$0xff]   ;;  %v18322_v13 = vld [vmem:[%s19197_s23 + $0x2988] ss:$16 sps:$4 sm:$0xff]  }
 0x68f   : > { %12913 = vmatpush1.bf16.msra.mxu0 %v18253_v50  ;;  %v18330_v50 = vld [vmem:[%s19197_s23 + $0x29ac] ss:$16 sps:$4 sm:$0xff]  }
 0x690   : > { %12954 = vmatpush1.bf16.msra.mxu1 %v18256_v52  ;;  %12914 = vmatprep.subr.bf16.mxu0 %v18261_v37  ;;  %v18325_v52 = vld [vmem:[%s19197_s23 + $0x27a8] ss:$16 sps:$4 sm:$0xff]  }
 0x691   : > { %12955 = vmatprep.subr.bf16.mxu1 %v18264_v42  ;;  %v18328_v37 = vld [vmem:[%s19197_s23 + $0x29a8] ss:$16 sps:$4 sm:$0xff]   ;;  %v18333_v42 = vld [vmem:[%s19197_s23 + $0x27cc] ss:$16 sps:$4 sm:$0xff]  }
 0x693   : > { %12915 = vmatpush1.bf16.msra.mxu0 %v18259_v20  ;;  %v18336_v20 = vld [vmem:[%s19197_s23 + $0x29cc] ss:$16 sps:$4 sm:$0xff]  }
 0x694   : > { %12956 = vmatpush1.bf16.msra.mxu1 %v18262_v9  ;;  %12916 = vmatprep.subr.bf16.mxu0 %v18267_v59  ;;  %v18331_v9 = vld [vmem:[%s19197_s23 + $0x27c8] ss:$16 sps:$4 sm:$0xff]  }
 0x695   : > { %12957 = vmatprep.subr.bf16.mxu1 %v18270_v15  ;;  %v18334_v59 = vld [vmem:[%s19197_s23 + $0x29c8] ss:$16 sps:$4 sm:$0xff]   ;;  %v18339_v15 = vld [vmem:[%s19197_s23 + $0x27ec] ss:$16 sps:$4 sm:$0xff]  }
 0x697   : > { %12917 = vmatpush1.bf16.msra.mxu0 %v18265_v14  ;;  %v18342_v14 = vld [vmem:[%s19197_s23 + $0x29ec] ss:$16 sps:$4 sm:$0xff]  }
 0x698   : > { %12958 = vmatpush1.bf16.msra.mxu1 %v18268_v30  ;;  %12918 = vmatprep.subr.bf16.mxu0 %v18273_v21  ;;  %v18337_v30 = vld [vmem:[%s19197_s23 + $0x27e8] ss:$16 sps:$4 sm:$0xff]  }
 0x699   : > { %12959 = vmatprep.subr.bf16.mxu1 %v18276_v10  ;;  %v18340_v21 = vld [vmem:[%s19197_s23 + $0x29e8] ss:$16 sps:$4 sm:$0xff]   ;;  %v18345_v10 = vld [vmem:[%s19197_s23 + $0x2a0c] ss:$16 sps:$4 sm:$0xff]  }
 0x69b   : > { %12919 = vmatpush1.bf16.msra.mxu0 %v18271_v0  ;;  %v18348_v0 = vld [vmem:[%s19197_s23 + $0x2c0c] ss:$16 sps:$4 sm:$0xff]  }
 0x69c   : > { %12960 = vmatpush1.bf16.msra.mxu1 %v18274_v45  ;;  %12920 = vmatprep.subr.bf16.mxu0 %v18279_v2  ;;  %v18343_v45 = vld [vmem:[%s19197_s23 + $0x2a08] ss:$16 sps:$4 sm:$0xff]  }
 0x69d   : > { %12961 = vmatprep.subr.bf16.mxu1 %v18282_v53  ;;  %v12616_v54 = vpop.f32.mrb[76].mxu0  ;;  %v18346_v2 = vld [vmem:[%s19197_s23 + $0x2c08] ss:$16 sps:$4 sm:$0xff]   ;;  %v18351_v53 = vld [vmem:[%s19197_s23 + $0x2a2c] ss:$16 sps:$4 sm:$0xff]  }
 0x69e   : > { %v12657_v3 = vpop.f32.mrb[76].mxu1  ;;  %v12617_v43 = vadd.f32 %v12616_v54, %v21142_v33  ;;  %v12618_v48 = vpop.f32.mrb[77].mxu0  ;;  %v18291_v33 = vld [vmem:[%s19197_s23 + $0x26ec] ss:$16 sps:$4 sm:$0xff]  }
 0x69f   : > { %v12659_v63 = vpop.f32.mrb[77].mxu1  ;;  %v12619_v38 = vadd.f32 %v12618_v48, %v21146_v27  ;;  %v12620_v25 = vpop.f32.mrb[78].mxu0  ;;  %12921 = vmatpush1.bf16.msra.mxu0 %v18277_v7  ;;  %v18294_v27 = vld [vmem:[%s19197_s23 + $0x28ec] ss:$16 sps:$4 sm:$0xff]  }
 0x6a0   : > { %v12661_v32 = vpop.f32.mrb[78].mxu1  ;;  %12962 = vmatpush1.bf16.msra.mxu1 %v18280_v18  ;;  %v21216_v16 = vadd.f32 %v12657_v3, %v12617_v43  ;;  %v12621_v22 = vpop.f32.mrb[79].mxu0  ;;  %12922 = vmatprep.subr.bf16.mxu0 %v18285_v11  ;;  %v18354_v7 = vld [vmem:[%s19197_s23 + $0x2c2c] ss:$16 sps:$4 sm:$0xff]   ;;  %v18349_v18 = vld [vmem:[%s19197_s23 + $0x2a28] ss:$16 sps:$4 sm:$0xff]  }
 0x6a1   : > { %v12662_v40 = vpop.f32.mrb[79].mxu1  ;;  %12963 = vmatprep.subr.bf16.mxu1 %v18288_v23  ;;  %v21220_v60 = vadd.f32 %v12659_v63, %v12619_v38  ;;  %v18352_v11 = vld [vmem:[%s19197_s23 + $0x2c28] ss:$16 sps:$4 sm:$0xff]   ;;  %v18357_v23 = vld [vmem:[%s19197_s23 + $0x2a4c] ss:$16 sps:$4 sm:$0xff]  }
 0x6a2   : > { %v18360_v54 = vld [vmem:[%s19197_s23 + $0x2c4c] ss:$16 sps:$4 sm:$0xff]   ;;  %v18361_v38 = vld [vmem:[%s19197_s23 + $0x2a68] ss:$16 sps:$4 sm:$0xff]  }
 0x6a3   : > { %12923 = vmatpush1.bf16.msra.mxu0 %v18283_v55  ;;  %v21578_v3 = vld [vmem:[#allocation17_spill] sm:$0xff]  ;;  %v21579_v43 = vld [vmem:[#allocation19_spill] sm:$0xff] }
 0x6a4   : > { %12964 = vmatpush1.bf16.msra.mxu1 %v18286_v34  ;;  %12924 = vmatprep.subr.bf16.mxu0 %v18291_v33  ;;  %v18363_v48 = vld [vmem:[%s19197_s23 + $0x2a6c] ss:$16 sps:$4 sm:$0xff]   ;;  %v18364_v25 = vld [vmem:[%s19197_s23 + $0x2c68] ss:$16 sps:$4 sm:$0xff]  }
 0x6a5   : > { %12965 = vmatprep.subr.bf16.mxu1 %v18294_v27  ;;  %v18366_v63 = vld [vmem:[%s19197_s23 + $0x2c6c] ss:$16 sps:$4 sm:$0xff]   ;;  %v18367_v34 = vld [vmem:[%s19197_s23 + $0x2a88] ss:$16 sps:$4 sm:$0xff]  }
 0x6a6   : > { %v18369_v32 = vld [vmem:[%s19197_s23 + $0x2a8c] ss:$16 sps:$4 sm:$0xff]   ;;  %v18370_v22 = vld [vmem:[%s19197_s23 + $0x2c88] ss:$16 sps:$4 sm:$0xff]  }
 0x6a7   : > { %12925 = vmatpush1.bf16.msra.mxu0 %v18289_v39  ;;  %v18372_v55 = vld [vmem:[%s19197_s23 + $0x2c8c] ss:$16 sps:$4 sm:$0xff]   ;;  %v18373_v27 = vld [vmem:[%s19197_s23 + $0x2aa8] ss:$16 sps:$4 sm:$0xff]  }
 0x6a8   : > { %12966 = vmatpush1.bf16.msra.mxu1 %v18292_v46  ;;  %12926 = vmatprep.subr.bf16.mxu0 %v18297_v1  ;;  %v18375_v40 = vld [vmem:[%s19197_s23 + $0x2aac] ss:$16 sps:$4 sm:$0xff]   ;;  %v18376_v39 = vld [vmem:[%s19197_s23 + $0x2ca8] ss:$16 sps:$4 sm:$0xff]  }
 0x6a9   : > { %12967 = vmatprep.subr.bf16.mxu1 %v18300_v26  ;;  %v18378_v33 = vld [vmem:[%s19197_s23 + $0x2cac] ss:$16 sps:$4 sm:$0xff]  }
 0x6aa   : > { %v18381_v46 = vld [vmem:[%s19197_s23 + $0x2acc] ss:$16 sps:$4 sm:$0xff]  }
 0x6ab   : > { %12927 = vmatpush1.bf16.msra.mxu0 %v18295_v31  ;;  %v18384_v1 = vld [vmem:[%s19197_s23 + $0x2ccc] ss:$16 sps:$4 sm:$0xff]  }
 0x6ac   : > { %12968 = vmatpush1.bf16.msra.mxu1 %v18298_v5  ;;  %12928 = vmatprep.subr.bf16.mxu0 %v18303_v28 }
 0x6ad   : > { %12969 = vmatprep.subr.bf16.mxu1 %v18306_v19 }
 0x6af   : > { %12929 = vmatpush1.bf16.msra.mxu0 %v18301_v51 }
 0x6b0   : > { %12970 = vmatpush1.bf16.msra.mxu1 %v18304_v24  ;;  %12930 = vmatprep.subr.bf16.mxu0 %v18309_v41 }
 0x6b1   : > { %12971 = vmatprep.subr.bf16.mxu1 %v18312_v4  ;;  %v18379_v4 = vld [vmem:[%s19197_s23 + $0x2ac8] ss:$16 sps:$4 sm:$0xff]  }
 0x6b3   : > { %12931 = vmatpush1.bf16.msra.mxu0 %v18307_v29  ;;  %v18382_v29 = vld [vmem:[%s19197_s23 + $0x2cc8] ss:$16 sps:$4 sm:$0xff]  }
 0x6b4   : > { %12972 = vmatpush1.bf16.msra.mxu1 %v18310_v17  ;;  %12932 = vmatprep.subr.bf16.mxu0 %v18315_v8 }
 0x6b5   : > { %12973 = vmatprep.subr.bf16.mxu1 %v18318_v12 }
 0x6b7   : > { %12933 = vmatpush1.bf16.msra.mxu0 %v18313_v36 }
 0x6b8   : > { %12974 = vmatpush1.bf16.msra.mxu1 %v18316_v49  ;;  %12934 = vmatprep.subr.bf16.mxu0 %v18321_v44  ;;  %v18385_v49 = vld [vmem:[%s19197_s23 + $0x2ae8] ss:$16 sps:$4 sm:$0xff]  }
 0x6b9   : > { %12975 = vmatprep.subr.bf16.mxu1 %v18324_v61  ;;  %v18388_v44 = vld [vmem:[%s19197_s23 + $0x2ce8] ss:$16 sps:$4 sm:$0xff]   ;;  %v18393_v61 = vld [vmem:[%s19197_s23 + $0x2b0c] ss:$16 sps:$4 sm:$0xff]  }
 0x6bb   : > { %12935 = vmatpush1.bf16.msra.mxu0 %v18319_v47  ;;  %v18396_v47 = vld [vmem:[%s19197_s23 + $0x2d0c] ss:$16 sps:$4 sm:$0xff]  }
 0x6bc   : > { %12976 = vmatpush1.bf16.msra.mxu1 %v18322_v13  ;;  %12936 = vmatprep.subr.bf16.mxu0 %v18327_v62  ;;  %v18391_v13 = vld [vmem:[%s19197_s23 + $0x2b08] ss:$16 sps:$4 sm:$0xff]  }
 0x6bd   : > { %12977 = vmatprep.subr.bf16.mxu1 %v18330_v50  ;;  %v18394_v62 = vld [vmem:[%s19197_s23 + $0x2d08] ss:$16 sps:$4 sm:$0xff]   ;;  %v18399_v50 = vld [vmem:[%s19197_s23 + $0x2b2c] ss:$16 sps:$4 sm:$0xff]  }
 0x6bf   : > { %12937 = vmatpush1.bf16.msra.mxu0 %v18325_v52  ;;  %v18402_v52 = vld [vmem:[%s19197_s23 + $0x2d2c] ss:$16 sps:$4 sm:$0xff]  }
 0x6c0   : > { %12978 = vmatpush1.bf16.msra.mxu1 %v18328_v37  ;;  %12938 = vmatprep.subr.bf16.mxu0 %v18333_v42  ;;  %v18397_v37 = vld [vmem:[%s19197_s23 + $0x2b28] ss:$16 sps:$4 sm:$0xff]  }
 0x6c1   : > { %12979 = vmatprep.subr.bf16.mxu1 %v18336_v20  ;;  %v18400_v42 = vld [vmem:[%s19197_s23 + $0x2d28] ss:$16 sps:$4 sm:$0xff]   ;;  %v18405_v20 = vld [vmem:[%s19197_s23 + $0x2b4c] ss:$16 sps:$4 sm:$0xff]  }
 0x6c3   : > { %12939 = vmatpush1.bf16.msra.mxu0 %v18331_v9  ;;  %v18408_v9 = vld [vmem:[%s19197_s23 + $0x2d4c] ss:$16 sps:$4 sm:$0xff]  }
 0x6c4   : > { %12980 = vmatpush1.bf16.msra.mxu1 %v18334_v59  ;;  %12940 = vmatprep.subr.bf16.mxu0 %v18339_v15  ;;  %v18403_v59 = vld [vmem:[%s19197_s23 + $0x2b48] ss:$16 sps:$4 sm:$0xff]  }
 0x6c5   : > { %12981 = vmatprep.subr.bf16.mxu1 %v18342_v14  ;;  %v18406_v15 = vld [vmem:[%s19197_s23 + $0x2d48] ss:$16 sps:$4 sm:$0xff]   ;;  %v18411_v14 = vld [vmem:[%s19197_s23 + $0x2b6c] ss:$16 sps:$4 sm:$0xff]  }
 0x6c7   : > { %12941 = vmatpush1.bf16.msra.mxu0 %v18337_v30  ;;  %v18414_v30 = vld [vmem:[%s19197_s23 + $0x2d6c] ss:$16 sps:$4 sm:$0xff]  }
 0x6c8   : > { %12982 = vmatpush1.bf16.msra.mxu1 %v18340_v21  ;;  %12992 = vmatprep.subr.bf16.mxu0 %v18345_v10  ;;  %v18409_v21 = vld [vmem:[%s19197_s23 + $0x2b68] ss:$16 sps:$4 sm:$0xff]  }
 0x6c9   : > { %13033 = vmatprep.subr.bf16.mxu1 %v18348_v0  ;;  %v18412_v10 = vld [vmem:[%s19197_s23 + $0x2d68] ss:$16 sps:$4 sm:$0xff]   ;;  %v18417_v0 = vld [vmem:[%s19197_s23 + $0x2b8c] ss:$16 sps:$4 sm:$0xff]  }
 0x6ca   : > { %12943 = vmatmul.mubr.bf16.vlgmr.msra.gmra.mrb[92].mxu0 %v20145_v58  ;;  %v18355_v58 = vld [vmem:[%s19197_s23 + $0x2a48] ss:$16 sps:$4 sm:$0xff]  }
 0x6cb   : > { %12984 = vmatmul.mubr.bf16.vlgmr.msra.gmra.mrb[92].mxu1 %v20237_v6  ;;  %12993 = vmatpush1.bf16.msra.mxu0 %v18343_v45  ;;  %v18358_v6 = vld [vmem:[%s19197_s23 + $0x2c48] ss:$16 sps:$4 sm:$0xff]   ;;  %v18420_v45 = vld [vmem:[%s19197_s23 + $0x2d8c] ss:$16 sps:$4 sm:$0xff]  }
 0x6cc   : > { %13034 = vmatpush1.bf16.msra.mxu1 %v18346_v2  ;;  %12994 = vmatprep.subr.bf16.mxu0 %v18351_v53  ;;  %v18415_v2 = vld [vmem:[%s19197_s23 + $0x2b88] ss:$16 sps:$4 sm:$0xff]  }
 0x6cd   : > { %13035 = vmatprep.subr.bf16.mxu1 %v18354_v7  ;;  %13024 = vmatprep.mubr.bf16.mxu0 %v21578_v3  ;;  %v18418_v53 = vld [vmem:[%s19197_s23 + $0x2d88] ss:$16 sps:$4 sm:$0xff]   ;;  %v18423_v7 = vld [vmem:[%s19197_s23 + $0x2bac] ss:$16 sps:$4 sm:$0xff]  }
 0x6ce   : > { %13065 = vmatprep.mubr.bf16.mxu1 %v21579_v43  ;;  %v18432_v3 = vld [vmem:[%s19197_s23 + $0x2dcc] ss:$16 sps:$4 sm:$0xff]   ;;  %v18427_v43 = vld [vmem:[%s19197_s23 + $0x2bc8] ss:$16 sps:$4 sm:$0xff]  }
 0x6cf   : > { %12995 = vmatpush1.bf16.msra.mxu0 %v18349_v18  ;;  %v18426_v18 = vld [vmem:[%s19197_s23 + $0x2dac] ss:$16 sps:$4 sm:$0xff]  }
 0x6d0   : > { %13036 = vmatpush1.bf16.msra.mxu1 %v18352_v11  ;;  %12996 = vmatprep.subr.bf16.mxu0 %v18357_v23  ;;  %v18421_v11 = vld [vmem:[%s19197_s23 + $0x2ba8] ss:$16 sps:$4 sm:$0xff]  }
 0x6d1   : > { %13037 = vmatprep.subr.bf16.mxu1 %v18360_v54  ;;  %v18424_v23 = vld [vmem:[%s19197_s23 + $0x2da8] ss:$16 sps:$4 sm:$0xff]   ;;  %v18429_v54 = vld [vmem:[%s19197_s23 + $0x2bcc] ss:$16 sps:$4 sm:$0xff]  }
 0x6d3   : > { %12997 = vmatpush1.bf16.msra.mxu0 %v18355_v58  ;;  %v18430_v58 = vld [vmem:[%s19197_s23 + $0x2dc8] ss:$16 sps:$4 sm:$0xff]  }
 0x6d4   : > { %13038 = vmatpush1.bf16.msra.mxu1 %v18358_v6  ;;  %12998 = vmatprep.subr.bf16.mxu0 %v18363_v48  ;;  %v18435_v6 = vld [vmem:[%s19197_s23 + $0x2bec] ss:$16 sps:$4 sm:$0xff]  }
 0x6d5   : > { %13039 = vmatprep.subr.bf16.mxu1 %v18366_v63  ;;  %v18438_v48 = vld [vmem:[%s19197_s23 + $0x2dec] ss:$16 sps:$4 sm:$0xff]   ;;  %v18433_v63 = vld [vmem:[%s19197_s23 + $0x2be8] ss:$16 sps:$4 sm:$0xff]  }
 0x6d7   : > { %12999 = vmatpush1.bf16.msra.mxu0 %v18361_v38  ;;  %v18436_v38 = vld [vmem:[%s19197_s23 + $0x2de8] ss:$16 sps:$4 sm:$0xff]  }
 0x6d8   : > { %13040 = vmatpush1.bf16.msra.mxu1 %v18364_v25  ;;  %13000 = vmatprep.subr.bf16.mxu0 %v18369_v32  ;;  %v18441_v25 = vld [vmem:[%s19197_s23 + $0x2e0c] ss:$16 sps:$4 sm:$0xff]  }
 0x6d9   : > { %13041 = vmatprep.subr.bf16.mxu1 %v18372_v55  ;;  %v18444_v32 = vld [vmem:[%s19197_s23 + $0x300c] ss:$16 sps:$4 sm:$0xff]   ;;  %v18439_v55 = vld [vmem:[%s19197_s23 + $0x2e08] ss:$16 sps:$4 sm:$0xff]  }
 0x6db   : > { %13001 = vmatpush1.bf16.msra.mxu0 %v18367_v34  ;;  %v18442_v34 = vld [vmem:[%s19197_s23 + $0x3008] ss:$16 sps:$4 sm:$0xff]  }
 0x6dc   : > { %13042 = vmatpush1.bf16.msra.mxu1 %v18370_v22  ;;  %13002 = vmatprep.subr.bf16.mxu0 %v18375_v40  ;;  %v18447_v22 = vld [vmem:[%s19197_s23 + $0x2e2c] ss:$16 sps:$4 sm:$0xff]  }
 0x6dd   : > { %13043 = vmatprep.subr.bf16.mxu1 %v18378_v33  ;;  %v12698_v26 = vpop.f32.mrb[80].mxu0  ;;  %v18450_v40 = vld [vmem:[%s19197_s23 + $0x302c] ss:$16 sps:$4 sm:$0xff]   ;;  %v21580_v33 = vld [vmem:[#allocation18_spill] sm:$0xff] }
 0x6de   : > { %v12739_v31 = vpop.f32.mrb[80].mxu1  ;;  %v12699_v5 = vadd.f32 %v12698_v26, %v21216_v16  ;;  %v12700_v28 = vpop.f32.mrb[81].mxu0  ;;  %v18387_v16 = vld [vmem:[%s19197_s23 + $0x2aec] ss:$16 sps:$4 sm:$0xff]  }
 0x6df   : > { %v12741_v19 = vpop.f32.mrb[81].mxu1  ;;  %v12701_v51 = vadd.f32 %v12700_v28, %v21220_v60  ;;  %v12702_v24 = vpop.f32.mrb[82].mxu0  ;;  %13003 = vmatpush1.bf16.msra.mxu0 %v18373_v27  ;;  %v18390_v60 = vld [vmem:[%s19197_s23 + $0x2cec] ss:$16 sps:$4 sm:$0xff]   ;;  %v18451_v28 = vld [vmem:[%s19197_s23 + $0x2e48] ss:$16 sps:$4 sm:$0xff]  }
 0x6e0   : > { %v12743_v41 = vpop.f32.mrb[82].mxu1  ;;  %13044 = vmatpush1.bf16.msra.mxu1 %v18376_v39  ;;  %v21290_v17 = vadd.f32 %v12739_v31, %v12699_v5  ;;  %v12703_v8 = vpop.f32.mrb[83].mxu0  ;;  %13004 = vmatprep.subr.bf16.mxu0 %v18381_v46  ;;  %v21581_v27 = vld [vmem:[#allocation21_spill] sm:$0xff]  ;;  %v21582_v31 = vld [vmem:[#allocation20_spill] sm:$0xff]  ;;  %v21583_v5 = vld [vmem:[#allocation23_spill] sm:$0xff] }
 0x6e1   : > { %v12744_v12 = vpop.f32.mrb[83].mxu1  ;;  %13045 = vmatprep.subr.bf16.mxu1 %v18384_v1  ;;  %v21294_v36 = vadd.f32 %v12741_v19, %v12701_v51  ;;  %v18445_v39 = vld [vmem:[%s19197_s23 + $0x2e28] ss:$16 sps:$4 sm:$0xff]   ;;  %v18453_v1 = vld [vmem:[%s19197_s23 + $0x2e4c] ss:$16 sps:$4 sm:$0xff]  }
 0x6e2   : > { %v18448_v46 = vld [vmem:[%s19197_s23 + $0x3028] ss:$16 sps:$4 sm:$0xff]   ;;  %v18456_v26 = vld [vmem:[%s19197_s23 + $0x304c] ss:$16 sps:$4 sm:$0xff]  }
 0x6e3   : > { %13005 = vmatpush1.bf16.msra.mxu0 %v18379_v4  ;;  %v18454_v19 = vld [vmem:[%s19197_s23 + $0x3048] ss:$16 sps:$4 sm:$0xff]   ;;  %v18459_v51 = vld [vmem:[%s19197_s23 + $0x2e6c] ss:$16 sps:$4 sm:$0xff]  }
 0x6e4   : > { %13046 = vmatpush1.bf16.msra.mxu1 %v18382_v29  ;;  %13006 = vmatprep.subr.bf16.mxu0 %v18387_v16  ;;  %v18462_v24 = vld [vmem:[%s19197_s23 + $0x306c] ss:$16 sps:$4 sm:$0xff]   ;;  %v18457_v41 = vld [vmem:[%s19197_s23 + $0x2e68] ss:$16 sps:$4 sm:$0xff]  }
 0x6e5   : > { %13047 = vmatprep.subr.bf16.mxu1 %v18390_v60  ;;  %v18460_v4 = vld [vmem:[%s19197_s23 + $0x3068] ss:$16 sps:$4 sm:$0xff]   ;;  %v18465_v29 = vld [vmem:[%s19197_s23 + $0x2e8c] ss:$16 sps:$4 sm:$0xff]  }
 0x6e6   : > { %v18468_v8 = vld [vmem:[%s19197_s23 + $0x308c] ss:$16 sps:$4 sm:$0xff]   ;;  %v18463_v12 = vld [vmem:[%s19197_s23 + $0x2e88] ss:$16 sps:$4 sm:$0xff]  }
 0x6e7   : > { %13007 = vmatpush1.bf16.msra.mxu0 %v18385_v49  ;;  %v18466_v16 = vld [vmem:[%s19197_s23 + $0x3088] ss:$16 sps:$4 sm:$0xff]   ;;  %v18471_v60 = vld [vmem:[%s19197_s23 + $0x2eac] ss:$16 sps:$4 sm:$0xff]  }
 0x6e8   : > { %13048 = vmatpush1.bf16.msra.mxu1 %v18388_v44  ;;  %13008 = vmatprep.subr.bf16.mxu0 %v18393_v61  ;;  %v18474_v49 = vld [vmem:[%s19197_s23 + $0x30ac] ss:$16 sps:$4 sm:$0xff]   ;;  %v18469_v44 = vld [vmem:[%s19197_s23 + $0x2ea8] ss:$16 sps:$4 sm:$0xff]  }
 0x6e9   : > { %13049 = vmatprep.subr.bf16.mxu1 %v18396_v47  ;;  %v18472_v61 = vld [vmem:[%s19197_s23 + $0x30a8] ss:$16 sps:$4 sm:$0xff]   ;;  %v18477_v47 = vld [vmem:[%s19197_s23 + $0x2ecc] ss:$16 sps:$4 sm:$0xff]  }
 0x6eb   : > { %13009 = vmatpush1.bf16.msra.mxu0 %v18391_v13  ;;  %v18480_v13 = vld [vmem:[%s19197_s23 + $0x30cc] ss:$16 sps:$4 sm:$0xff]  }
 0x6ec   : > { %13050 = vmatpush1.bf16.msra.mxu1 %v18394_v62  ;;  %13010 = vmatprep.subr.bf16.mxu0 %v18399_v50 }
 0x6ed   : > { %13051 = vmatprep.subr.bf16.mxu1 %v18402_v52 }
 0x6ef   : > { %13011 = vmatpush1.bf16.msra.mxu0 %v18397_v37 }
 0x6f0   : > { %13052 = vmatpush1.bf16.msra.mxu1 %v18400_v42  ;;  %13012 = vmatprep.subr.bf16.mxu0 %v18405_v20 }
 0x6f1   : > { %13053 = vmatprep.subr.bf16.mxu1 %v18408_v9 }
 0x6f3   : > { %13013 = vmatpush1.bf16.msra.mxu0 %v18403_v59 }
 0x6f4   : > { %13054 = vmatpush1.bf16.msra.mxu1 %v18406_v15  ;;  %13014 = vmatprep.subr.bf16.mxu0 %v18411_v14  ;;  %v18475_v15 = vld [vmem:[%s19197_s23 + $0x2ec8] ss:$16 sps:$4 sm:$0xff]  }
 0x6f5   : > { %13055 = vmatprep.subr.bf16.mxu1 %v18414_v30  ;;  %v18478_v14 = vld [vmem:[%s19197_s23 + $0x30c8] ss:$16 sps:$4 sm:$0xff]  }
 0x6f7   : > { %13015 = vmatpush1.bf16.msra.mxu0 %v18409_v21 }
 0x6f8   : > { %13056 = vmatpush1.bf16.msra.mxu1 %v18412_v10  ;;  %13016 = vmatprep.subr.bf16.mxu0 %v18417_v0 }
 0x6f9   : > { %13057 = vmatprep.subr.bf16.mxu1 %v18420_v45  ;;  %v18481_v45 = vld [vmem:[%s19197_s23 + $0x2ee8] ss:$16 sps:$4 sm:$0xff]  }
 0x6fb   : > { %13017 = vmatpush1.bf16.msra.mxu0 %v18415_v2  ;;  %v18484_v2 = vld [vmem:[%s19197_s23 + $0x30e8] ss:$16 sps:$4 sm:$0xff]  }
 0x6fc   : > { %13058 = vmatpush1.bf16.msra.mxu1 %v18418_v53  ;;  %13018 = vmatprep.subr.bf16.mxu0 %v18423_v7  ;;  %v18489_v53 = vld [vmem:[%s19197_s23 + $0x2f0c] ss:$16 sps:$4 sm:$0xff]  }
 0x6fd   : > { %13059 = vmatprep.subr.bf16.mxu1 %v18426_v18  ;;  %v18492_v7 = vld [vmem:[%s19197_s23 + $0x310c] ss:$16 sps:$4 sm:$0xff]   ;;  %v18487_v18 = vld [vmem:[%s19197_s23 + $0x2f08] ss:$16 sps:$4 sm:$0xff]  }
 0x6ff   : > { %13019 = vmatpush1.bf16.msra.mxu0 %v18421_v11  ;;  %v18490_v11 = vld [vmem:[%s19197_s23 + $0x3108] ss:$16 sps:$4 sm:$0xff]  }
 0x700   : > { %13060 = vmatpush1.bf16.msra.mxu1 %v18424_v23  ;;  %13020 = vmatprep.subr.bf16.mxu0 %v18429_v54  ;;  %v18495_v23 = vld [vmem:[%s19197_s23 + $0x2f2c] ss:$16 sps:$4 sm:$0xff]  }
 0x701   : > { %13061 = vmatprep.subr.bf16.mxu1 %v18432_v3  ;;  %v18498_v54 = vld [vmem:[%s19197_s23 + $0x312c] ss:$16 sps:$4 sm:$0xff]   ;;  %v18493_v3 = vld [vmem:[%s19197_s23 + $0x2f28] ss:$16 sps:$4 sm:$0xff]  }
 0x703   : > { %13021 = vmatpush1.bf16.msra.mxu0 %v18427_v43  ;;  %v18496_v43 = vld [vmem:[%s19197_s23 + $0x3128] ss:$16 sps:$4 sm:$0xff]  }
 0x704   : > { %13062 = vmatpush1.bf16.msra.mxu1 %v18430_v58  ;;  %13022 = vmatprep.subr.bf16.mxu0 %v18435_v6  ;;  %v18501_v58 = vld [vmem:[%s19197_s23 + $0x2f4c] ss:$16 sps:$4 sm:$0xff]  }
 0x705   : > { %13063 = vmatprep.subr.bf16.mxu1 %v18438_v48  ;;  %v18504_v6 = vld [vmem:[%s19197_s23 + $0x314c] ss:$16 sps:$4 sm:$0xff]   ;;  %v18499_v48 = vld [vmem:[%s19197_s23 + $0x2f48] ss:$16 sps:$4 sm:$0xff]  }
 0x707   : > { %13023 = vmatpush1.bf16.msra.mxu0 %v18433_v63  ;;  %v18502_v63 = vld [vmem:[%s19197_s23 + $0x3148] ss:$16 sps:$4 sm:$0xff]  }
 0x708   : > { %13064 = vmatpush1.bf16.msra.mxu1 %v18436_v38  ;;  %13074 = vmatprep.subr.bf16.mxu0 %v18441_v25  ;;  %v18507_v38 = vld [vmem:[%s19197_s23 + $0x2f6c] ss:$16 sps:$4 sm:$0xff]  }
 0x709   : > { %13115 = vmatprep.subr.bf16.mxu1 %v18444_v32  ;;  %v18510_v25 = vld [vmem:[%s19197_s23 + $0x316c] ss:$16 sps:$4 sm:$0xff]   ;;  %v18505_v32 = vld [vmem:[%s19197_s23 + $0x2f68] ss:$16 sps:$4 sm:$0xff]  }
 0x70a   : > { %13025 = vmatmul.mubr.bf16.vlgmr.msra.gmra.mrb[96].mxu0 %v21580_v33  ;;  %v18514_v33 = vld [vmem:[%s19197_s23 + $0x3188] ss:$16 sps:$4 sm:$0xff]  }
 0x70b   : > { %13066 = vmatmul.mubr.bf16.vlgmr.msra.gmra.mrb[96].mxu1 %v21581_v27  ;;  %13075 = vmatpush1.bf16.msra.mxu0 %v18439_v55  ;;  %v18508_v55 = vld [vmem:[%s19197_s23 + $0x3168] ss:$16 sps:$4 sm:$0xff]   ;;  %v18519_v27 = vld [vmem:[%s19197_s23 + $0x2fac] ss:$16 sps:$4 sm:$0xff]  }
 0x70c   : > { %13116 = vmatpush1.bf16.msra.mxu1 %v18442_v34  ;;  %13076 = vmatprep.subr.bf16.mxu0 %v18447_v22  ;;  %v18513_v34 = vld [vmem:[%s19197_s23 + $0x2f8c] ss:$16 sps:$4 sm:$0xff]  }
 0x70d   : > { %13117 = vmatprep.subr.bf16.mxu1 %v18450_v40  ;;  %13106 = vmatprep.mubr.bf16.mxu0 %v21582_v31  ;;  %v18516_v22 = vld [vmem:[%s19197_s23 + $0x318c] ss:$16 sps:$4 sm:$0xff]   ;;  %v18511_v40 = vld [vmem:[%s19197_s23 + $0x2f88] ss:$16 sps:$4 sm:$0xff]  }
 0x70e   : > { %13147 = vmatprep.mubr.bf16.mxu1 %v21583_v5  ;;  %v18528_v31 = vld [vmem:[%s19197_s23 + $0x31cc] ss:$16 sps:$4 sm:$0xff]   ;;  %v18523_v5 = vld [vmem:[%s19197_s23 + $0x2fc8] ss:$16 sps:$4 sm:$0xff]  }
 0x70f   : > { %13077 = vmatpush1.bf16.msra.mxu0 %v18445_v39  ;;  %v18522_v39 = vld [vmem:[%s19197_s23 + $0x31ac] ss:$16 sps:$4 sm:$0xff]  }
 0x710   : > { %13118 = vmatpush1.bf16.msra.mxu1 %v18448_v46  ;;  %13078 = vmatprep.subr.bf16.mxu0 %v18453_v1  ;;  %v18517_v46 = vld [vmem:[%s19197_s23 + $0x2fa8] ss:$16 sps:$4 sm:$0xff]  }
 0x711   : > { %13119 = vmatprep.subr.bf16.mxu1 %v18456_v26  ;;  %v18520_v1 = vld [vmem:[%s19197_s23 + $0x31a8] ss:$16 sps:$4 sm:$0xff]   ;;  %v18525_v26 = vld [vmem:[%s19197_s23 + $0x2fcc] ss:$16 sps:$4 sm:$0xff]  }
 0x713   : > { %13079 = vmatpush1.bf16.msra.mxu0 %v18451_v28  ;;  %v18526_v28 = vld [vmem:[%s19197_s23 + $0x31c8] ss:$16 sps:$4 sm:$0xff]  }
 0x714   : > { %13120 = vmatpush1.bf16.msra.mxu1 %v18454_v19  ;;  %13080 = vmatprep.subr.bf16.mxu0 %v18459_v51  ;;  %v18531_v19 = vld [vmem:[%s19197_s23 + $0x2fec] ss:$16 sps:$4 sm:$0xff]  }
 0x715   : > { %13121 = vmatprep.subr.bf16.mxu1 %v18462_v24  ;;  %v18534_v51 = vld [vmem:[%s19197_s23 + $0x31ec] ss:$16 sps:$4 sm:$0xff]   ;;  %v18529_v24 = vld [vmem:[%s19197_s23 + $0x2fe8] ss:$16 sps:$4 sm:$0xff]  }
 0x717   : > { %13081 = vmatpush1.bf16.msra.mxu0 %v18457_v41  ;;  %v18532_v41 = vld [vmem:[%s19197_s23 + $0x31e8] ss:$16 sps:$4 sm:$0xff]  }
 0x718   : > { %13122 = vmatpush1.bf16.msra.mxu1 %v18460_v4  ;;  %13082 = vmatprep.subr.bf16.mxu0 %v18465_v29  ;;  %v18537_v4 = vld [vmem:[%s19197_s23 + $0x320c] ss:$16 sps:$4 sm:$0xff]  }
 0x719   : > { %13123 = vmatprep.subr.bf16.mxu1 %v18468_v8  ;;  %v18540_v29 = vld [vmem:[%s19197_s23 + $0x340c] ss:$16 sps:$4 sm:$0xff]   ;;  %v18535_v8 = vld [vmem:[%s19197_s23 + $0x3208] ss:$16 sps:$4 sm:$0xff]  }
 0x71b   : > { %13083 = vmatpush1.bf16.msra.mxu0 %v18463_v12  ;;  %v18538_v12 = vld [vmem:[%s19197_s23 + $0x3408] ss:$16 sps:$4 sm:$0xff]  }
 0x71c   : > { %13124 = vmatpush1.bf16.msra.mxu1 %v18466_v16  ;;  %13084 = vmatprep.subr.bf16.mxu0 %v18471_v60  ;;  %v18543_v16 = vld [vmem:[%s19197_s23 + $0x322c] ss:$16 sps:$4 sm:$0xff]  }
 0x71d   : > { %13125 = vmatprep.subr.bf16.mxu1 %v18474_v49  ;;  %v12780_v62 = vpop.f32.mrb[84].mxu0  ;;  %v18546_v60 = vld [vmem:[%s19197_s23 + $0x342c] ss:$16 sps:$4 sm:$0xff]   ;;  %v21584_v49 = vld [vmem:[#allocation22_spill] sm:$0xff] }
 0x71e   : > { %v12821_v50 = vpop.f32.mrb[84].mxu1  ;;  %v12781_v52 = vadd.f32 %v12780_v62, %v21290_v17  ;;  %v12782_v37 = vpop.f32.mrb[85].mxu0  ;;  %v18483_v17 = vld [vmem:[%s19197_s23 + $0x2eec] ss:$16 sps:$4 sm:$0xff]   ;;  %v21585_v62 = vld [vmem:[#allocation24_spill] sm:$0xff] }
 0x71f   : > { %v12823_v42 = vpop.f32.mrb[85].mxu1  ;;  %v12783_v20 = vadd.f32 %v12782_v37, %v21294_v36  ;;  %v12784_v9 = vpop.f32.mrb[86].mxu0  ;;  %13085 = vmatpush1.bf16.msra.mxu0 %v18469_v44  ;;  %v18486_v36 = vld [vmem:[%s19197_s23 + $0x30ec] ss:$16 sps:$4 sm:$0xff]   ;;  %v18541_v44 = vld [vmem:[%s19197_s23 + $0x3228] ss:$16 sps:$4 sm:$0xff]  }
 0x720   : > { %v12825_v59 = vpop.f32.mrb[86].mxu1  ;;  %13126 = vmatpush1.bf16.msra.mxu1 %v18472_v61  ;;  %v21364_v30 = vadd.f32 %v12821_v50, %v12781_v52  ;;  %v12785_v21 = vpop.f32.mrb[87].mxu0  ;;  %13086 = vmatprep.subr.bf16.mxu0 %v18477_v47  ;;  %v18544_v61 = vld [vmem:[%s19197_s23 + $0x3428] ss:$16 sps:$4 sm:$0xff]   ;;  %v18549_v47 = vld [vmem:[%s19197_s23 + $0x324c] ss:$16 sps:$4 sm:$0xff]  }
 0x721   : > { %v12826_v10 = vpop.f32.mrb[87].mxu1  ;;  %13127 = vmatprep.subr.bf16.mxu1 %v18480_v13  ;;  %v21368_v0 = vadd.f32 %v12823_v42, %v12783_v20  ;;  %v18552_v13 = vld [vmem:[%s19197_s23 + $0x344c] ss:$16 sps:$4 sm:$0xff]   ;;  %v18550_v50 = vld [vmem:[%s19197_s23 + $0x3448] ss:$16 sps:$4 sm:$0xff]  }
 0x722   : > { %v18555_v52 = vld [vmem:[%s19197_s23 + $0x326c] ss:$16 sps:$4 sm:$0xff]   ;;  %v18553_v42 = vld [vmem:[%s19197_s23 + $0x3268] ss:$16 sps:$4 sm:$0xff]  }
 0x723   : > { %13087 = vmatpush1.bf16.msra.mxu0 %v18475_v15  ;;  %v18558_v37 = vld [vmem:[%s19197_s23 + $0x346c] ss:$16 sps:$4 sm:$0xff]   ;;  %v18556_v20 = vld [vmem:[%s19197_s23 + $0x3468] ss:$16 sps:$4 sm:$0xff]  }
 0x724   : > { %13128 = vmatpush1.bf16.msra.mxu1 %v18478_v14  ;;  %13088 = vmatprep.subr.bf16.mxu0 %v18483_v17  ;;  %v18564_v9 = vld [vmem:[%s19197_s23 + $0x348c] ss:$16 sps:$4 sm:$0xff]   ;;  %v18559_v59 = vld [vmem:[%s19197_s23 + $0x3288] ss:$16 sps:$4 sm:$0xff]  }
 0x725   : > { %13129 = vmatprep.subr.bf16.mxu1 %v18486_v36  ;;  %v18562_v15 = vld [vmem:[%s19197_s23 + $0x3488] ss:$16 sps:$4 sm:$0xff]   ;;  %v18567_v14 = vld [vmem:[%s19197_s23 + $0x32ac] ss:$16 sps:$4 sm:$0xff]  }
 0x726   : > { %v18570_v21 = vld [vmem:[%s19197_s23 + $0x34ac] ss:$16 sps:$4 sm:$0xff]   ;;  %v18565_v10 = vld [vmem:[%s19197_s23 + $0x32a8] ss:$16 sps:$4 sm:$0xff]  }
 0x727   : > { %13089 = vmatpush1.bf16.msra.mxu0 %v18481_v45  ;;  %v18568_v17 = vld [vmem:[%s19197_s23 + $0x34a8] ss:$16 sps:$4 sm:$0xff]   ;;  %v18573_v36 = vld [vmem:[%s19197_s23 + $0x32cc] ss:$16 sps:$4 sm:$0xff]  }
 0x728   : > { %13130 = vmatpush1.bf16.msra.mxu1 %v18484_v2  ;;  %13090 = vmatprep.subr.bf16.mxu0 %v18489_v53  ;;  %v18576_v45 = vld [vmem:[%s19197_s23 + $0x34cc] ss:$16 sps:$4 sm:$0xff]  }
 0x729   : > { %13131 = vmatprep.subr.bf16.mxu1 %v18492_v7 }
 0x72b   : > { %13091 = vmatpush1.bf16.msra.mxu0 %v18487_v18 }
 0x72c   : > { %13132 = vmatpush1.bf16.msra.mxu1 %v18490_v11  ;;  %13092 = vmatprep.subr.bf16.mxu0 %v18495_v23 }
 0x72d   : > { %13133 = vmatprep.subr.bf16.mxu1 %v18498_v54 }
 0x72f   : > { %13093 = vmatpush1.bf16.msra.mxu0 %v18493_v3 }
 0x730   : > { %13134 = vmatpush1.bf16.msra.mxu1 %v18496_v43  ;;  %13094 = vmatprep.subr.bf16.mxu0 %v18501_v58  ;;  %v18571_v43 = vld [vmem:[%s19197_s23 + $0x32c8] ss:$16 sps:$4 sm:$0xff]  }
 0x731   : > { %13135 = vmatprep.subr.bf16.mxu1 %v18504_v6  ;;  %v18574_v58 = vld [vmem:[%s19197_s23 + $0x34c8] ss:$16 sps:$4 sm:$0xff]  }
 0x733   : > { %13095 = vmatpush1.bf16.msra.mxu0 %v18499_v48 }
 0x734   : > { %13136 = vmatpush1.bf16.msra.mxu1 %v18502_v63  ;;  %13096 = vmatprep.subr.bf16.mxu0 %v18507_v38 }
 0x735   : > { %13137 = vmatprep.subr.bf16.mxu1 %v18510_v25  ;;  %v18577_v25 = vld [vmem:[%s19197_s23 + $0x32e8] ss:$16 sps:$4 sm:$0xff]  }
 0x737   : > { %13097 = vmatpush1.bf16.msra.mxu0 %v18505_v32  ;;  %v18580_v32 = vld [vmem:[%s19197_s23 + $0x34e8] ss:$16 sps:$4 sm:$0xff]  }
 0x738   : > { %13138 = vmatpush1.bf16.msra.mxu1 %v18508_v55  ;;  %13098 = vmatprep.subr.bf16.mxu0 %v18513_v34  ;;  %v18585_v55 = vld [vmem:[%s19197_s23 + $0x330c] ss:$16 sps:$4 sm:$0xff]  }
 0x739   : > { %13139 = vmatprep.subr.bf16.mxu1 %v18516_v22  ;;  %v18588_v34 = vld [vmem:[%s19197_s23 + $0x350c] ss:$16 sps:$4 sm:$0xff]   ;;  %v18583_v22 = vld [vmem:[%s19197_s23 + $0x3308] ss:$16 sps:$4 sm:$0xff]  }
 0x73b   : > { %13099 = vmatpush1.bf16.msra.mxu0 %v18511_v40  ;;  %v18586_v40 = vld [vmem:[%s19197_s23 + $0x3508] ss:$16 sps:$4 sm:$0xff]  }
 0x73c   : > { %13140 = vmatpush1.bf16.msra.mxu1 %v18514_v33  ;;  %13100 = vmatprep.subr.bf16.mxu0 %v18519_v27  ;;  %v18591_v33 = vld [vmem:[%s19197_s23 + $0x332c] ss:$16 sps:$4 sm:$0xff]  }
 0x73d   : > { %13141 = vmatprep.subr.bf16.mxu1 %v18522_v39  ;;  %v18594_v27 = vld [vmem:[%s19197_s23 + $0x352c] ss:$16 sps:$4 sm:$0xff]   ;;  %v18589_v39 = vld [vmem:[%s19197_s23 + $0x3328] ss:$16 sps:$4 sm:$0xff]  }
 0x73f   : > { %13101 = vmatpush1.bf16.msra.mxu0 %v18517_v46  ;;  %v18592_v46 = vld [vmem:[%s19197_s23 + $0x3528] ss:$16 sps:$4 sm:$0xff]  }
 0x740   : > { %13142 = vmatpush1.bf16.msra.mxu1 %v18520_v1  ;;  %13102 = vmatprep.subr.bf16.mxu0 %v18525_v26  ;;  %v18597_v1 = vld [vmem:[%s19197_s23 + $0x334c] ss:$16 sps:$4 sm:$0xff]  }
 0x741   : > { %13143 = vmatprep.subr.bf16.mxu1 %v18528_v31  ;;  %v18600_v26 = vld [vmem:[%s19197_s23 + $0x354c] ss:$16 sps:$4 sm:$0xff]   ;;  %v18595_v31 = vld [vmem:[%s19197_s23 + $0x3348] ss:$16 sps:$4 sm:$0xff]  }
 0x743   : > { %13103 = vmatpush1.bf16.msra.mxu0 %v18523_v5  ;;  %v18598_v5 = vld [vmem:[%s19197_s23 + $0x3548] ss:$16 sps:$4 sm:$0xff]  }
 0x744   : > { %13144 = vmatpush1.bf16.msra.mxu1 %v18526_v28  ;;  %13104 = vmatprep.subr.bf16.mxu0 %v18531_v19  ;;  %v18603_v28 = vld [vmem:[%s19197_s23 + $0x336c] ss:$16 sps:$4 sm:$0xff]  }
 0x745   : > { %13145 = vmatprep.subr.bf16.mxu1 %v18534_v51  ;;  %v18606_v19 = vld [vmem:[%s19197_s23 + $0x356c] ss:$16 sps:$4 sm:$0xff]   ;;  %v18601_v51 = vld [vmem:[%s19197_s23 + $0x3368] ss:$16 sps:$4 sm:$0xff]  }
 0x747   : > { %13105 = vmatpush1.bf16.msra.mxu0 %v18529_v24  ;;  %v18604_v24 = vld [vmem:[%s19197_s23 + $0x3568] ss:$16 sps:$4 sm:$0xff]  }
 0x748   : > { %13146 = vmatpush1.bf16.msra.mxu1 %v18532_v41  ;;  %13156 = vmatprep.subr.bf16.mxu0 %v18537_v4  ;;  %v18609_v41 = vld [vmem:[%s19197_s23 + $0x338c] ss:$16 sps:$4 sm:$0xff]  }
 0x749   : > { %13197 = vmatprep.subr.bf16.mxu1 %v18540_v29  ;;  %v18612_v4 = vld [vmem:[%s19197_s23 + $0x358c] ss:$16 sps:$4 sm:$0xff]   ;;  %v18607_v29 = vld [vmem:[%s19197_s23 + $0x3388] ss:$16 sps:$4 sm:$0xff]  }
 0x74a   : > { %13107 = vmatmul.mubr.bf16.vlgmr.msra.gmra.mrb[100].mxu0 %v21584_v49  ;;  %v18616_v49 = vld [vmem:[%s19197_s23 + $0x35a8] ss:$16 sps:$4 sm:$0xff]  }
 0x74b   : > { %13148 = vmatmul.mubr.bf16.vlgmr.msra.gmra.mrb[100].mxu1 %v20432_v56  ;;  %13157 = vmatpush1.bf16.msra.mxu0 %v18535_v8  ;;  %v18547_v56 = vld [vmem:[%s19197_s23 + $0x3248] ss:$16 sps:$4 sm:$0xff]  }
 0x74c   : > { %13198 = vmatpush1.bf16.msra.mxu1 %v18538_v12  ;;  %13158 = vmatprep.subr.bf16.mxu0 %v18543_v16  ;;  %v18610_v8 = vld [vmem:[%s19197_s23 + $0x3588] ss:$16 sps:$4 sm:$0xff]   ;;  %v18615_v12 = vld [vmem:[%s19197_s23 + $0x33ac] ss:$16 sps:$4 sm:$0xff]  }
 0x74d   : > { %13199 = vmatprep.subr.bf16.mxu1 %v18546_v60  ;;  %13188 = vmatprep.mubr.bf16.mxu0 %v21585_v62  ;;  %v18618_v16 = vld [vmem:[%s19197_s23 + $0x35ac] ss:$16 sps:$4 sm:$0xff]   ;;  %v18613_v60 = vld [vmem:[%s19197_s23 + $0x33a8] ss:$16 sps:$4 sm:$0xff]  }
 0x74e   : > { %13229 = vmatprep.mubr.bf16.mxu1 %v20442_v57  ;;  %v18561_v57 = vld [vmem:[%s19197_s23 + $0x328c] ss:$16 sps:$4 sm:$0xff]  }
 0x74f   : > { %13159 = vmatpush1.bf16.msra.mxu0 %v18541_v44  ;;  %v18621_v44 = vld [vmem:[%s19197_s23 + $0x33cc] ss:$16 sps:$4 sm:$0xff]  }
 0x750   : > { %13200 = vmatpush1.bf16.msra.mxu1 %v18544_v61  ;;  %13160 = vmatprep.subr.bf16.mxu0 %v18549_v47  ;;  %v18624_v61 = vld [vmem:[%s19197_s23 + $0x35cc] ss:$16 sps:$4 sm:$0xff]   ;;  %v18619_v47 = vld [vmem:[%s19197_s23 + $0x33c8] ss:$16 sps:$4 sm:$0xff]  }
 0x751   : > { %13201 = vmatprep.subr.bf16.mxu1 %v18552_v13  ;;  %v18622_v13 = vld [vmem:[%s19197_s23 + $0x35c8] ss:$16 sps:$4 sm:$0xff]   ;;  %v18627_v62 = vld [vmem:[%s19197_s23 + $0x33ec] ss:$16 sps:$4 sm:$0xff]  }
 0x753   : > { %13161 = vmatpush1.bf16.msra.mxu0 %v18547_v56  ;;  %v18630_v56 = vld [vmem:[%s19197_s23 + $0x35ec] ss:$16 sps:$4 sm:$0xff]  }
 0x754   : > { %13202 = vmatpush1.bf16.msra.mxu1 %v18550_v50  ;;  %13162 = vmatprep.subr.bf16.mxu0 %v18555_v52  ;;  %v18625_v50 = vld [vmem:[%s19197_s23 + $0x33e8] ss:$16 sps:$4 sm:$0xff]  }
 0x755   : > { %13203 = vmatprep.subr.bf16.mxu1 %v18558_v37  ;;  %v18628_v52 = vld [vmem:[%s19197_s23 + $0x35e8] ss:$16 sps:$4 sm:$0xff]  }
 0x756   : > { %v21586_v37 = vld [vmem:[#allocation25_spill] sm:$0xff] }
 0x757   : > { %13163 = vmatpush1.bf16.msra.mxu0 %v18553_v42 }
 0x758   : > { %13204 = vmatpush1.bf16.msra.mxu1 %v18556_v20  ;;  %13164 = vmatprep.subr.bf16.mxu0 %v18561_v57 }
 0x759   : > { %13205 = vmatprep.subr.bf16.mxu1 %v18564_v9 }
 0x75b   : > { %13165 = vmatpush1.bf16.msra.mxu0 %v18559_v59 }
 0x75c   : > { %13206 = vmatpush1.bf16.msra.mxu1 %v18562_v15  ;;  %13166 = vmatprep.subr.bf16.mxu0 %v18567_v14 }
 0x75d   : > { %13207 = vmatprep.subr.bf16.mxu1 %v18570_v21  ;;  %v12862_v2 = vpop.f32.mrb[88].mxu0 }
 0x75e   : > { %v12903_v53 = vpop.f32.mrb[88].mxu1  ;;  %v12863_v7 = vadd.f32 %v12862_v2, %v21364_v30  ;;  %v12864_v18 = vpop.f32.mrb[89].mxu0  ;;  %v18579_v30 = vld [vmem:[%s19197_s23 + $0x32ec] ss:$16 sps:$4 sm:$0xff]  }
 0x75f   : > { %v12905_v11 = vpop.f32.mrb[89].mxu1  ;;  %v12865_v23 = vadd.f32 %v12864_v18, %v21368_v0  ;;  %v12866_v54 = vpop.f32.mrb[90].mxu0  ;;  %13167 = vmatpush1.bf16.msra.mxu0 %v18565_v10  ;;  %v18582_v0 = vld [vmem:[%s19197_s23 + $0x34ec] ss:$16 sps:$4 sm:$0xff]  }
 0x760   : > { %v12907_v3 = vpop.f32.mrb[90].mxu1  ;;  %13208 = vmatpush1.bf16.msra.mxu1 %v18568_v17  ;;  %v21438_v6 = vadd.f32 %v12903_v53, %v12863_v7  ;;  %v12867_v48 = vpop.f32.mrb[91].mxu0  ;;  %13168 = vmatprep.subr.bf16.mxu0 %v18573_v36 }
 0x761   : > { %v12908_v63 = vpop.f32.mrb[91].mxu1  ;;  %13209 = vmatprep.subr.bf16.mxu1 %v18576_v45  ;;  %v21442_v38 = vadd.f32 %v12905_v11, %v12865_v23 }
 0x763   : > { %13169 = vmatpush1.bf16.msra.mxu0 %v18571_v43 }
 0x764   : > { %13210 = vmatpush1.bf16.msra.mxu1 %v18574_v58  ;;  %13170 = vmatprep.subr.bf16.mxu0 %v18579_v30 }
 0x765   : > { %13211 = vmatprep.subr.bf16.mxu1 %v18582_v0 }
 0x767   : > { %13171 = vmatpush1.bf16.msra.mxu0 %v18577_v25 }
 0x768   : > { %13212 = vmatpush1.bf16.msra.mxu1 %v18580_v32  ;;  %13172 = vmatprep.subr.bf16.mxu0 %v18585_v55 }
 0x769   : > { %13213 = vmatprep.subr.bf16.mxu1 %v18588_v34 }
 0x76b   : > { %13173 = vmatpush1.bf16.msra.mxu0 %v18583_v22 }
 0x76c   : > { %13214 = vmatpush1.bf16.msra.mxu1 %v18586_v40  ;;  %13174 = vmatprep.subr.bf16.mxu0 %v18591_v33 }
 0x76d   : > { %13215 = vmatprep.subr.bf16.mxu1 %v18594_v27 }
 0x76f   : > { %13175 = vmatpush1.bf16.msra.mxu0 %v18589_v39 }
 0x770   : > { %13216 = vmatpush1.bf16.msra.mxu1 %v18592_v46  ;;  %13176 = vmatprep.subr.bf16.mxu0 %v18597_v1 }
 0x771   : > { %13217 = vmatprep.subr.bf16.mxu1 %v18600_v26 }
 0x773   : > { %13177 = vmatpush1.bf16.msra.mxu0 %v18595_v31  ;;  %v438_v31 = vld [vmem:[#allocation2 + $0x10] sm:$0xff] }
 0x774   : > { %13218 = vmatpush1.bf16.msra.mxu1 %v18598_v5  ;;  %13178 = vmatprep.subr.bf16.mxu0 %v18603_v28 }
 0x775   : > { %13219 = vmatprep.subr.bf16.mxu1 %v18606_v19 }
 0x777   : > { %13179 = vmatpush1.bf16.msra.mxu0 %v18601_v51 }
 0x778   : > { %13220 = vmatpush1.bf16.msra.mxu1 %v18604_v24  ;;  %13180 = vmatprep.subr.bf16.mxu0 %v18609_v41  ;;  %v439_v24 = vld [vmem:[#allocation2 + $0x18] sm:$0xff] }
 0x779   : > { %13221 = vmatprep.subr.bf16.mxu1 %v18612_v4 }
 0x77b   : > { %13181 = vmatpush1.bf16.msra.mxu0 %v18607_v29 }
 0x77c   : > { %13222 = vmatpush1.bf16.msra.mxu1 %v18610_v8  ;;  %13182 = vmatprep.subr.bf16.mxu0 %v18615_v12 }
 0x77d   : > { %13223 = vmatprep.subr.bf16.mxu1 %v18618_v16  ;;  %v18631_v16 = vld [vmem:[#allocation7 + $0x40] sm:$0xff] (!%p15750_p12)  }
 0x77f   : > { %13183 = vmatpush1.bf16.msra.mxu0 %v18613_v60  ;;  %v18632_v60 = vld [vmem:[#allocation7 + $0xc0] sm:$0xff] (!%p15750_p12)  }
 0x780   : > { %13224 = vmatpush1.bf16.msra.mxu1 %v18616_v49  ;;  %13184 = vmatprep.subr.bf16.mxu0 %v18621_v44  ;;  %v18633_v49 = vld [vmem:[#allocation7] sm:$0xff] (!%p15750_p12)  }
 0x781   : > { %13225 = vmatprep.subr.bf16.mxu1 %v18624_v61  ;;  %v18634_v44 = vld [vmem:[#allocation7 + $0x80] sm:$0xff] (!%p15750_p12)   ;;  %v18635_v61 = vld [vmem:[#allocation7 + $0x48] sm:$0xff] (!%p15750_p12)  }
 0x783   : > { %13185 = vmatpush1.bf16.msra.mxu0 %v18619_v47  ;;  %v18636_v47 = vld [vmem:[#allocation7 + $0xc8] sm:$0xff] (!%p15750_p12)  }
 0x784   : > { %13226 = vmatpush1.bf16.msra.mxu1 %v18622_v13  ;;  %13186 = vmatprep.subr.bf16.mxu0 %v18627_v62  ;;  %v18637_v13 = vld [vmem:[#allocation7 + $0x8] sm:$0xff] (!%p15750_p12)  }
 0x785   : > { %13227 = vmatprep.subr.bf16.mxu1 %v18630_v56  ;;  %v18638_v62 = vld [vmem:[#allocation7 + $0x88] sm:$0xff] (!%p15750_p12)   ;;  %v18639_v56 = vld [vmem:[#allocation7 + $0x50] sm:$0xff] (!%p15750_p12)  }
 0x787   : > { %13187 = vmatpush1.bf16.msra.mxu0 %v18625_v50  ;;  %v18640_v50 = vld [vmem:[#allocation7 + $0xd0] sm:$0xff] (!%p15750_p12)  }
 0x788   : > { %13228 = vmatpush1.bf16.msra.mxu1 %v18628_v52  ;;  %15802 = vmatprep.subr.bf16.mxu0 (!%p15750_p12), %v18631_v16  ;;  %v18641_v52 = vld [vmem:[#allocation7 + $0x10] sm:$0xff] (!%p15750_p12)  }
 0x789   : > { %15824 = vmatprep.subr.bf16.mxu1 (!%p15750_p12), %v18632_v60 }
 0x78a   : > { %13189 = vmatmul.mubr.bf16.vlgmr.msra.gmra.mrb[104].mxu0 %v21586_v37  ;;  %v18642_v37 = vld [vmem:[#allocation7 + $0x90] sm:$0xff] (!%p15750_p12)  }
 0x78b   : > { %13230 = vmatmul.mubr.bf16.vlgmr.msra.gmra.mrb[104].mxu1 %v20518_v35  ;;  %15803 = vmatpush3.bf16.msra.mxu0 (!%p15750_p12), %v18633_v49 }
 0x78c   : > { %15825 = vmatpush3.bf16.msra.mxu1 (!%p15750_p12), %v18634_v44  ;;  %15804 = vmatprep.subr.bf16.mxu0 (!%p15750_p12), %v18635_v61 }
 0x78d   : > { %15826 = vmatprep.subr.bf16.mxu1 (!%p15750_p12), %v18636_v47 }
 0x78f   : > { %15805 = vmatpush3.bf16.msra.mxu0 (!%p15750_p12), %v18637_v13 }
 0x790   : > { %15827 = vmatpush3.bf16.msra.mxu1 (!%p15750_p12), %v18638_v62  ;;  %15806 = vmatprep.subr.bf16.mxu0 (!%p15750_p12), %v18639_v56 }
 0x791   : > { %15828 = vmatprep.subr.bf16.mxu1 (!%p15750_p12), %v18640_v50 }
 0x793   : > { %15807 = vmatpush3.bf16.msra.mxu0 (!%p15750_p12), %v18641_v52 }
 0x794   : > { %15829 = vmatpush3.bf16.msra.mxu1 (!%p15750_p12), %v18642_v37  ;;  %v18663_v37 = vld [vmem:[%s21534_s5] sm:$0xff] (!%p15750_p12)  }
 0x79d   : > { %v12944_v42 = vpop.f32.mrb[92].mxu0 }
 0x79e   : > { %v12985_v20 = vpop.f32.mrb[92].mxu1  ;;  %v12945_v57 = vadd.f32 %v12944_v42, %v21438_v6  ;;  %v12946_v9 = vpop.f32.mrb[93].mxu0  ;;  %v18643_v42 = vld [vmem:[#allocation7 + $0x58] sm:$0xff] (!%p15750_p12)  }
 0x79f   : > { %v12987_v59 = vpop.f32.mrb[93].mxu1  ;;  %v12947_v15 = vadd.f32 %v12946_v9, %v21442_v38  ;;  %v12948_v14 = vpop.f32.mrb[94].mxu0  ;;  %15808 = vmatprep.subr.bf16.mxu0 (!%p15750_p12), %v18643_v42  ;;  %v18646_v9 = vld [vmem:[#allocation7 + $0x98] sm:$0xff] (!%p15750_p12)   ;;  %v18930_v42 = vmov (!%p15750_p12), 0.0  }
 0x7a0   : > { %v12989_v21 = vpop.f32.mrb[94].mxu1  ;;  %v12986_v10 = vadd.f32 %v12985_v20, %v12945_v57  ;;  %v12949_v17 = vpop.f32.mrb[95].mxu0  ;;  %v18644_v20 = vld [vmem:[#allocation7 + $0xd8] sm:$0xff] (!%p15750_p12)   ;;  %v18649_v14 = vld [vmem:[#allocation7 + $0x20] sm:$0xff] (!%p15750_p12)  }
 0x7a1   : > { %v12990_v36 = vpop.f32.mrb[95].mxu1  ;;  %v12988_v45 = vadd.f32 %v12987_v59, %v12947_v15  ;;  %v18645_v57 = vld [vmem:[#allocation7 + $0x18] sm:$0xff] (!%p15750_p12)   ;;  %15830 = vmatprep.subr.bf16.mxu1 (!%p15750_p12), %v18644_v20  ;;  %v18647_v59 = vld [vmem:[#allocation7 + $0x60] sm:$0xff] (!%p15750_p12)   ;;  %v13256_v21 = vlaneseq (!%p15750_p12)  ;;  %v18651_v17 = vld [vmem:[#allocation7 + $0x68] sm:$0xff] (!%p15750_p12)  }
 0x7a2   : > { %15809 = vmatpush3.bf16.msra.mxu0 (!%p15750_p12), %v18645_v57  ;;  %15831 = vmatpush3.bf16.msra.mxu1 (!%p15750_p12), %v18646_v9  ;;  %v18648_v15 = vld [vmem:[#allocation7 + $0xe0] sm:$0xff] (!%p15750_p12)   ;;  %v18652_v36 = vld [vmem:[#allocation7 + $0xe8] sm:$0xff] (!%p15750_p12)   ;;  %v18666_v9 = vld [vmem:[%s21534_s5 + $0x18] sm:$0xff] (!%p15750_p12)  }
 0x7a3   : > { %15810 = vmatprep.subr.bf16.mxu0 (!%p15750_p12), %v18647_v59  ;;  %15832 = vmatprep.subr.bf16.mxu1 (!%p15750_p12), %v18648_v15  ;;  %v18664_v20 = vld [vmem:[%s21534_s5 + $0x8] sm:$0xff] (!%p15750_p12)   ;;  %v18665_v57 = vld [vmem:[%s21534_s5 + $0x10] sm:$0xff] (!%p15750_p12)   ;;  %v18667_v59 = vld [vmem:[%s21534_s5 + $0x20] sm:$0xff] (!%p15750_p12)  }
 0x7a4   : > { %v18668_v15 = vld [vmem:[%s21534_s5 + $0x28] sm:$0xff] (!%p15750_p12)  }
 0x7a6   : > { %15811 = vmatpush3.bf16.msra.mxu0 (!%p15750_p12), %v18649_v14  ;;  %v18669_v14 = vld [vmem:[%s21534_s5 + $0x30] sm:$0xff] (!%p15750_p12)  }
 0x7a7   : > { %15812 = vmatprep.subr.bf16.mxu0 (!%p15750_p12), %v18651_v17 }
 0x7dd   : > { %v13026_v2 = vpop.f32.mrb[96].mxu0 }
 0x7de   : > { %v13067_v53 = vpop.f32.mrb[96].mxu1  ;;  %v13027_v7 = vadd.f32 %v13026_v2, %v12986_v10  ;;  %v13028_v18 = vpop.f32.mrb[97].mxu0  ;;  %v18650_v10 = vld [vmem:[#allocation7 + $0xa0] sm:$0xff] (!%p15750_p12)   ;;  %v13257_v2 = vshrl.u32 (!%p15750_p12), %v13256_v21, 7  ;;  %v18670_v21 = vld [vmem:[%s21534_s5 + $0x38] sm:$0xff] (!%p15750_p12)  }
 0x7df   : > { %v13069_v11 = vpop.f32.mrb[97].mxu1  ;;  %v13029_v35 = vadd.f32 %v13028_v18, %v12988_v45  ;;  %v13030_v23 = vpop.f32.mrb[98].mxu0  ;;  %15833 = vmatpush3.bf16.msra.mxu1 (!%p15750_p12), %v18650_v10  ;;  %v18653_v45 = vld [vmem:[#allocation7 + $0x28] sm:$0xff] (!%p15750_p12)   ;;  %v18656_v18 = vld [vmem:[#allocation7 + $0xf0] sm:$0xff] (!%p15750_p12)  }
 0x7e0   : > { %v13071_v54 = vpop.f32.mrb[98].mxu1  ;;  %v13068_v3 = vadd.f32 %v13067_v53, %v13027_v7  ;;  %v13031_v43 = vpop.f32.mrb[99].mxu0  ;;  %15834 = vmatprep.subr.bf16.mxu1 (!%p15750_p12), %v18652_v36  ;;  %v18654_v53 = vld [vmem:[#allocation7 + $0xa8] sm:$0xff] (!%p15750_p12)   ;;  %15813 = vmatpush3.bf16.msra.mxu0 (!%p15750_p12), %v18653_v45  ;;  %v18655_v7 = vld [vmem:[#allocation7 + $0x70] sm:$0xff] (!%p15750_p12)   ;;  %v15751_v36 = vld [vmem:[#allocation8] ss:$0 sm:$0xff] (!%p15750_p12) }
 0x7e1   : > { %v13072_v58 = vpop.f32.mrb[99].mxu1  ;;  %v13070_v6 = vadd.f32 %v13069_v11, %v13029_v35  ;;  %15814 = vmatprep.subr.bf16.mxu0 (!%p15750_p12), %v18655_v7  ;;  %v18657_v11 = vld [vmem:[#allocation7 + $0x30] sm:$0xff] (!%p15750_p12)   ;;  %v13262_v35 = vsub.s32 (!%p15750_p12), 1, %v13257_v2  ;;  %v13270_v54 = vsub.s32 (!%p15750_p12), 3, %v13257_v2  ;;  %v13258_v43 = vsub.s32 (!%p15750_p12), 0, %v13257_v2 }
 0x7e2   : > { %v18658_v23 = vld [vmem:[#allocation7 + $0xb0] sm:$0xff] (!%p15750_p12)   ;;  %v18660_v58 = vld [vmem:[#allocation7 + $0xf8] sm:$0xff] (!%p15750_p12)  }
 0x7e3   : > { %15835 = vmatpush3.bf16.msra.mxu1 (!%p15750_p12), %v18654_v53 }
 0x7e4   : > { %15836 = vmatprep.subr.bf16.mxu1 (!%p15750_p12), %v18656_v18  ;;  %15815 = vmatpush3.bf16.msra.mxu0 (!%p15750_p12), %v18657_v11 }
 0x7e7   : > { %15837 = vmatpush3.bf16.msra.mxu1 (!%p15750_p12), %v18658_v23 }
 0x7e8   : > { %15838 = vmatprep.subr.bf16.mxu1 (!%p15750_p12), %v18660_v58 }
 0x81d   : > { %v13108_v48 = vpop.f32.mrb[100].mxu0 }
 0x81e   : > { %v13149_v63 = vpop.f32.mrb[100].mxu1  ;;  %v13109_v30 = vadd.f32 %v13108_v48, %v13068_v3  ;;  %v13110_v0 = vpop.f32.mrb[101].mxu0  ;;  %v18659_v3 = vld [vmem:[#allocation7 + $0x78] sm:$0xff] (!%p15750_p12)  }
 0x81f   : > { %v13151_v38 = vpop.f32.mrb[101].mxu1  ;;  %v13111_v25 = vadd.f32 %v13110_v0, %v13070_v6  ;;  %v13112_v32 = vpop.f32.mrb[102].mxu0  ;;  %v13266_v6 = vsub.s32 (!%p15750_p12), 2, %v13257_v2  ;;  %15816 = vmatprep.subr.bf16.mxu0 (!%p15750_p12), %v18659_v3  ;;  %v18661_v48 = vld [vmem:[#allocation7 + $0x38] sm:$0xff] (!%p15750_p12)  }
 0x820   : > { %v13153_v55 = vpop.f32.mrb[102].mxu1  ;;  %v13150_v34 = vadd.f32 %v13149_v63, %v13109_v30  ;;  %v13113_v22 = vpop.f32.mrb[103].mxu0  ;;  %v18662_v63 = vld [vmem:[#allocation7 + $0xb8] sm:$0xff] (!%p15750_p12)   ;;  %15817 = vmatpush3.bf16.msra.mxu0 (!%p15750_p12), %v18661_v48  ;;  %v13251_v30 = vld [vmem:[#allocation2 + $0x8] sm:$0xff] (!%p15750_p12) }
 0x821   : > { %v13154_v40 = vpop.f32.mrb[103].mxu1  ;;  %v13152_v33 = vadd.f32 %v13151_v38, %v13111_v25  ;;  %v13254_v0 = vld [vmem:[#allocation5] sm:$0xf] (!%p15750_p12)  ;;  %15839 = vmatpush3.bf16.msra.mxu1 (!%p15750_p12), %v18662_v63  ;;  %15858 = vmatprep.subr.bf16.mxu0 (!%p15750_p12), %v18930_v42 }
 0x822   : > { %v13263_v25 = vrot.slane (!%p15750_p12), %v13254_v0, %v13262_v35  ;;  %v13271_v32 = vrot.slane (!%p15750_p12), %v13254_v0, %v13270_v54  ;;  %v13250_v55 = vld [vmem:[#allocation2] sm:$0xff] (!%p15750_p12)  ;;  %v13267_v40 = vrot.slane (!%p15750_p12), %v13254_v0, %v13266_v6  ;;  %15878 = vmatprep.subr.bf16.mxu1 (!%p15750_p12), %v18930_v42 }
 0x85d   : > { %v13190_v27 = vpop.f32.mrb[104].mxu0 }
 0x85e   : > { %v13231_v39 = vpop.f32.mrb[104].mxu1  ;;  %v13191_v46 = vadd.f32 %v13190_v27, %v13150_v34  ;;  %v13192_v1 = vpop.f32.mrb[105].mxu0  ;;  %v13259_v34 = vrot.slane (!%p15750_p12), %v13254_v0, %v13258_v43  ;;  %v18671_v0 = vld [vmem:[%s21536_s7] sm:$0xff] (!%p15750_p12)  }
 0x85f   : > { %v13233_v26 = vpop.f32.mrb[105].mxu1  ;;  %v13193_v5 = vadd.f32 %v13192_v1, %v13152_v33  ;;  %v13194_v28 = vpop.f32.mrb[106].mxu0  ;;  %13249 = sbr.rel (%p15750_p12) target bundleno = 2926 (0xb6e), region = 88  ;;  %v13277_v33 = vadd.f32 (!%p15750_p12), %v13263_v25, %v13251_v30  ;;  %v15784_v25 = vld [vmem:[#allocation10] ss:$0 sm:$0xff] (!%p15750_p12) }
 0x860   : > { %v13235_v19 = vpop.f32.mrb[106].mxu1  ;;  %v13232_v51 = vadd.f32 %v13231_v39, %v13191_v46  ;;  %v13195_v41 = vpop.f32.mrb[107].mxu0  ;;  %v13276_v39 = vadd.f32 (!%p15750_p12), %v13259_v34, %v13250_v55 }
 0x861   : > { %v13236_v4 = vpop.f32.mrb[107].mxu1  ;;  %v13234_v29 = vadd.f32 %v13233_v26, %v13193_v5  ;;  %v13281_v1 = vsub.f32 (!%p15750_p12), 0.0, %v13277_v33 }
 0x862   : > { %v13240_v8 = vadd.f32 %v13232_v51, %v438_v31  ;;  %v13280_v31 = vsub.f32 (!%p15750_p12), 0.0, %v13276_v39 }
 0x863   : > { %v13241_v12 = vadd.f32 %v13234_v29, %v439_v24  ;;  %v13286_v28 = vmul.f32 (!%p15750_p12), 1.442695, %v13281_v1 }
 0x864   : > { %13244 = vst [vmem:[#allocation2 + $0x10] sm:$0xff] %v13240_v8  ;;  %v13284_v51 = vmul.f32 (!%p15750_p12), 1.442695, %v13280_v31  ;;  %v15793_v31 = vld [vmem:[#allocation11] ss:$0 sm:$0xff] (!%p15750_p12) }
 0x865   : > { %13245 = vst [vmem:[#allocation2 + $0x18] sm:$0xff] %v13241_v12  ;;  %18673 = vpow2.f32 (!%p15750_p12), %v13286_v28 }
 0x86b   : > { %v13252_v22 = vld [vmem:[#allocation2 + $0x10] sm:$0xff] }
 0x86c   : > { %v13253_v38 = vld [vmem:[#allocation2 + $0x18] sm:$0xff]  ;;  %v13278_v46 = vadd.f32 %v13267_v40, %v13252_v22 }
 0x86d   : > { %v13279_v27 = vadd.f32 %v13271_v32, %v13253_v38  ;;  %v18672_v38 = vld [vmem:[%s21536_s7 + $0x8] sm:$0xff]  }
 0x86e   : > { %v13282_v5 = vsub.f32 0.0, %v13278_v46 }
 0x86f   : > { %v13283_v26 = vsub.f32 0.0, %v13279_v27  ;;  %v18674_v41 = vpop.eup %18673 }
 0x870   : > { %v13288_v24 = vmul.f32 1.442695, %v13282_v5  ;;  %v13293_v29 = vadd.f32 1.0, %v18674_v41 }
 0x871   : > { %v13290_v19 = vmul.f32 1.442695, %v13283_v26 }
 0x873   : > { %18675 = vpow2.f32 %v13290_v19 }
 0x874   : > { %18677 = vpow2.f32 %v13284_v51 }
 0x875   : > { %18679 = vpow2.f32 %v13288_v24 }
 0x876   : > { %18681 = vrcp.f32 %v13293_v29 }
 0x87d   : > { %v18676_v4 = vpop.eup %18675 }
 0x87e   : > { %v18678_v8 = vpop.eup %18677  ;;  %v13295_v12 = vadd.f32 1.0, %v18676_v4 }
 0x87f   : > { %v18680_v16 = vpop.eup %18679  ;;  %v13292_v60 = vadd.f32 1.0, %v18678_v8 }
 0x880   : > { %18683 = vrcp.f32 %v13295_v12  ;;  %v13294_v49 = vadd.f32 1.0, %v18680_v16  ;;  %v18682_v44 = vpop.eup %18681 }
 0x881   : > { %18685 = vrcp.f32 %v13292_v60  ;;  %v13305_v47 = vpack.c.bf16 %v18682_v44, %v18682_v44 }
 0x882   : > { %18687 = vrcp.f32 %v13294_v49 }
 0x883   : > { %13603 = vmatprep.mubr.bf16.mxu0 %v13305_v47 }
 0x88a   : > { %v18684_v61 = vpop.eup %18683 }
 0x88b   : > { %v18686_v13 = vpop.eup %18685  ;;  %v13307_v62 = vpack.c.bf16 %v18684_v61, %v18684_v61 }
 0x88c   : > { %v18688_v56 = vpop.eup %18687  ;;  %v13304_v50 = vpack.c.bf16 %v18686_v13, %v18686_v13 }
 0x88d   : > { %13643 = vmatprep.mubr.bf16.mxu1 %v13307_v62  ;;  %v13306_v52 = vpack.c.bf16 %v18688_v56, %v18688_v56 }
 0x88e   : > { %13604 = vmatmul.mubr.bf16.vlgmr.msra.gmra.mrb[0].mxu0 %v13304_v50 }
 0x88f   : > { %13644 = vmatmul.mubr.bf16.vlgmr.msra.gmra.mrb[0].mxu1 %v13306_v52  ;;  %15859 = vmatpush3.bf16.msra.mxu0 %v18663_v37 }
 0x890   : > { %15860 = vmatprep.subr.bf16.mxu0 %v18930_v42  ;;  %15874 = vmatprep.mubr.msk.bf16.mxu0 %vm18931_vm0, %v18930_v42 }
 0x891   : > { %15882 = vmatprep.mubr.msk.bf16.mxu1 %vm18931_vm0, %v18930_v42  ;;  %15879 = vmatpush3.bf16.msra.mxu1 %v18671_v0 }
 0x892   : > { %15880 = vmatprep.subr.bf16.mxu1 %v18930_v42 }
 0x893   : > { %15861 = vmatpush3.bf16.msra.mxu0 %v18664_v20 }
 0x894   : > { %15862 = vmatprep.subr.bf16.mxu0 %v18930_v42 }
 0x895   : > { %15881 = vmatpush3.bf16.msra.mxu1 %v18672_v38 }
 0x897   : > { %15863 = vmatpush3.bf16.msra.mxu0 %v18665_v57 }
 0x898   : > { %15864 = vmatprep.subr.bf16.mxu0 %v18930_v42 }
 0x89b   : > { %15865 = vmatpush3.bf16.msra.mxu0 %v18666_v9 }
 0x89c   : > { %15866 = vmatprep.subr.bf16.mxu0 %v18930_v42 }
 0x89f   : > { %15867 = vmatpush3.bf16.msra.mxu0 %v18667_v59 }
 0x8a0   : > { %15868 = vmatprep.subr.bf16.mxu0 %v18930_v42 }
 0x8a3   : > { %15869 = vmatpush3.bf16.msra.mxu0 %v18668_v15 }
 0x8a4   : > { %15870 = vmatprep.subr.bf16.mxu0 %v18930_v42 }
 0x8a7   : > { %15871 = vmatpush3.bf16.msra.mxu0 %v18669_v14 }
 0x8a8   : > { %15872 = vmatprep.subr.bf16.mxu0 %v18930_v42 }
 0x8ab   : > { %15873 = vmatpush3.bf16.msra.mxu0 %v18670_v21 }
 0x961   : > { %v15818_v10 = vpop.f32.mrb[0].mxu0 }
 0x962   : > { %v15840_v17 = vpop.f32.mrb[0].mxu1  ;;  %v15819_v45 = vpop.f32.mrb[1].mxu0 }
 0x963   : > { %v15820_v2 = vadd.f32 %v15819_v45, %v15818_v10  ;;  %v15841_v53 = vpop.f32.mrb[1].mxu1  ;;  %v15821_v7 = vpop.f32.mrb[2].mxu0 }
 0x964   : > { %v15842_v18 = vadd.f32 %v15841_v53, %v15840_v17  ;;  %v15843_v11 = vpop.f32.mrb[2].mxu1  ;;  %v15822_v35 = vpop.f32.mrb[3].mxu0 }
 0x965   : > { %v13606_v23 = vadd.f32 %v15820_v2, %v15751_v36  ;;  %v15844_v54 = vpop.f32.mrb[3].mxu1 }
 0x967   : > { %v13646_v3 = vadd.f32 %v15842_v18, %v13606_v23 }
 0x969   : > { %v13651_v43 = vsub.f32 0.0, %v13646_v3 }
 0x96b   : > { %v13652_v58 = vmul.f32 1.442695, %v13651_v43 }
 0x96d   : > { %18689 = vpow2.f32 %v13652_v58 }
 0x977   : > { %v18690_v6 = vpop.eup %18689 }
 0x978   : > { %v13654_v48 = vadd.f32 1.0, %v18690_v6 }
 0x97a   : > { %18691 = vrcp.f32 %v13654_v48 }
 0x984   : > { %v18692_v63 = vpop.eup %18691 }
 0x985   : > { %v13657_v30 = vpack.c.bf16 %v18692_v63, %v18692_v63 }
 0x987   : > { %15875 = vmatmul.mubr.bf16.vlgmr.msra.gmra.mrb[4].mxu0 %v13657_v30 }
 0xa5a   : > { %v13763_v32 = vpop.f32.mrb[4].mxu0 }
 0xa5b   : > { %v13764_v55 = vadd.f32 %v15784_v25, %v13763_v32  ;;  %v15876_v34 = vpop.f32.mrb[5].mxu0 }
 0xa5c   : > { %v13766_v22 = vpop.f32.mrb[6].mxu0 }
 0xa5d   : > { %v13769_v40 = vsub.f32 0.0, %v13764_v55  ;;  %v15877_v33 = vpop.f32.mrb[7].mxu0 }
 0xa5f   : > { %v13770_v27 = vmul.f32 1.442695, %v13769_v40 }
 0xa61   : > { %18693 = vpow2.f32 %v13770_v27 }
 0xa6b   : > { %v18694_v39 = vpop.eup %18693 }
 0xa6c   : > { %v13772_v46 = vadd.f32 1.0, %v18694_v39 }
 0xa6e   : > { %18695 = vrcp.f32 %v13772_v46 }
 0xa78   : > { %v18696_v1 = vpop.eup %18695 }
 0xa79   : > { %v13775_v26 = vpack.c.bf16 %v18696_v1, %v18696_v1 }
 0xa7b   : > { %15883 = vmatmul.mubr.msk.bf16.vlgmr.msra.gmra.mrb[4].mxu1 %vm13799_vm1, %v13775_v26 }
 0xb4e   : > { %v13837_v5 = vpop.f32.mrb[4].mxu1 }
 0xb4f   : > { %v13838_v28 = vadd.f32 %v15793_v31, %v13837_v5  ;;  %v15884_v19 = vpop.f32.mrb[5].mxu1 }
 0xb50   : > { %v13840_v51 = vpop.f32.mrb[6].mxu1 }
 0xb51   : > { %v13843_v24 = vsub.f32 0.0, %v13838_v28  ;;  %v15885_v41 = vpop.f32.mrb[7].mxu1 }
 0xb53   : > { %v13844_v4 = vmul.f32 1.442695, %v13843_v24 }
 0xb55   : > { %18697 = vpow2.f32 %v13844_v4 }
 0xb5f   : > { %v18698_v29 = vpop.eup %18697 }
 0xb60   : > { %v13846_v8 = vadd.f32 1.0, %v18698_v29 }
 0xb62   : > { %18699 = vrcp.f32 %v13846_v8 }
 0xb6c   : > { %v18700_v12 = vpop.eup %18699 }
 0xb6d   : > { %13850 = vst.msk [vmem:[%s21587_s29] sm:$0xff] %vm13849_vm2, %v18700_v12 }
 0xb6e PF: > { %p22_p0 = scmp.ge.s32.totalorder %s19133_s27, 5   ;;  %s21588_s30 = smov %s18909_s10 }
 0xb6f   : > { %s21589_s10 = smov %s18913_s11  ;;  %s21590_s11 = smov %s19144_s14 }
 0xb70   : > { %s21591_s12 = smov %s19133_s27  ;;  %24 = sbr.rel (!%p22_p0) target bundleno = 10 (0xa), region = 123 }
 0xb77   :  { %13862 = vsyncpa [#allocation4], 1 }
 0xb78   :  { %13864 = vsyncpa [#allocation4 + $0x1], 1 }
 0xb79   :  { %13865 = vsyncpa [#allocation6], 1 }
 0xb7a   :  { %13866 = vsyncpa [#allocation9], 1 }
 0xb7b   :  { %13867 = vsyncpa [#allocation12], 1 }

</bundles_post_ra>
